<compile_context>
chip_gen: v6e
topology: v6e:2x2x1
jax: 0.10.0
libtpu: 0.0.40
codegen_flags: <defaults>
</compile_context>

<pallas_src>
import jax
import jax.numpy as jnp
from jax import lax
from jax.experimental import pallas as pl
from jax.experimental.pallas import tpu as pltpu

N_STEPS = 9                 # t_span = linspace(0, 1, 10) -> 9 RK4 steps
_H = 1.0 / N_STEPS
_H_THIRD = _H / 3.0
_H_EIGHTH = _H * 0.125


def _pick_chunk(rows, max_chunk=32):
    """Largest multiple-of-8 divisor of rows <= max_chunk (register-resident
    RK4 sub-tile).  Falls back to the full tile for small/odd row counts."""
    if rows <= max_chunk:
        return rows
    for cand in range(max_chunk - (max_chunk % 8), 7, -8):
        if rows % cand == 0:
            return cand
    return rows


def nmode_kernel(x_ref, w_enc_ref, b_enc_ref, w_cls_ref, b_cls_ref, out_ref):
    rows = x_ref.shape[0]
    width = w_enc_ref.shape[1]          # folded hidden width (usually 128)
    chunk = _pick_chunk(rows)           # register-resident sub-tile rows
    n_chunks = rows // chunk

    # Unroll RK4 only when the ~6-array per-chunk live set fits the vreg file.
    vregs_per_array = (-(-chunk // 8)) * (-(-width // 128))
    unroll_rk4 = bool(6 * vregs_per_array <= 48)

    def process_chunk(r0):
        # --- encoder: Linear + Tanh (MXU matmul + EUP tanh, lane-dense) ---
        x_c = x_ref[pl.ds(r0, chunk), :]
        gamma = jnp.tanh(
            jnp.dot(x_c, w_enc_ref[...], preferred_element_type=jnp.float32)
            + b_enc_ref[...]
        )

        # ODE rhs, VALU-reduced:  -y + s2 + e^{-y} s2  ==  s2*(1 + e^{-y}) - y
        # (sin -> VPU polynomial; exp -> EUP)
        def rhs(y):
            s = jnp.sin(y + gamma)
            s2 = s * s
            return s2 * (1.0 + jnp.exp(-y)) - y

        # torchdiffeq fixed-grid 'rk4' (3/8 rule) step; reuse (h/3)*k1.
        def rk4_step(_, y):
            k1 = rhs(y)
            hk1_3 = _H_THIRD * k1
            k2 = rhs(y + hk1_3)
            k3 = rhs(y + _H * k2 - hk1_3)
            k4 = rhs(y + _H * (k1 - k2 + k3))
            return y + _H_EIGHTH * (k1 + 3.0 * (k2 + k3) + k4)

        y = lax.fori_loop(0, N_STEPS, rk4_step, jnp.zeros_like(gamma),
                          unroll=unroll_rk4)

        # --- classifier: Linear (lane-dense padded output -> unmasked vst) ---
        out_ref[pl.ds(r0, chunk), :] = (
            jnp.dot(y, w_cls_ref[...], preferred_element_type=jnp.float32)
            + b_cls_ref[...]
        ).astype(out_ref.dtype)

    if n_chunks == 1:
        process_chunk(0)
    else:
        def chunk_body(c, carry):
            process_chunk(pl.multiple_of(c * chunk, chunk))
            return carry
        lax.fori_loop(0, n_chunks, chunk_body, 0, unroll=False)


def _pick_tile(n, max_tile=512):
    """Largest multiple-of-8 divisor of n, capped at max_tile rows and capped
    so the grid has >= 2 steps whenever n >= 16 (v7x megacore)."""
    if n <= 8:
        return n
    cap = min(max_tile, n)
    if n >= 16:
        half = (n // 2 // 8) * 8
        if half >= 8:
            cap = min(cap, half)
    best = None
    for cand in range(8, cap + 1, 8):
        if n % cand == 0:
            best = cand
    return best if best is not None else n   # full-dim fallback


def fold_nmode_params(w_enc, b_enc, w_cls, b_cls, batch_size):
    """One-time layout plumbing (call once per weight set, outside the per-call
    path): lane-fold factor F, block-diagonal (kron) weights, padded classifier.
    NOTE: if 128 % H != 0 or batch % (128//H) != 0 we fall back to F=1, which is
    numerically correct but drops lane utilization to H/128."""
    w_enc = jnp.asarray(w_enc, jnp.float32)
    b_enc = jnp.asarray(b_enc, jnp.float32)
    w_cls = jnp.asarray(w_cls, jnp.float32)
    b_cls = jnp.asarray(b_cls, jnp.float32)
    D_in, H = w_enc.shape
    O = w_cls.shape[1]

    if H < 128 and 128 % H == 0 and batch_size % (128 // H) == 0:
        F = 128 // H
    else:
        F = 1                                   # perf cliff, see docstring
    unit = 128 // F
    O_pad = unit * pl.cdiv(O, unit)             # F*O_pad is a multiple of 128

    eye = jnp.eye(F, dtype=jnp.float32)
    w_enc_f = jnp.kron(eye, w_enc)                              # (F*D_in, F*H)
    b_enc_f = jnp.tile(b_enc, F).reshape(1, F * H)
    w_cls_p = jnp.pad(w_cls, ((0, 0), (0, O_pad - O)))
    w_cls_f = jnp.kron(eye, w_cls_p)                            # (F*H, F*O_pad)
    b_cls_f = jnp.tile(jnp.pad(b_cls, (0, O_pad - O)), F).reshape(1, F * O_pad)

    folded = (w_enc_f, b_enc_f, w_cls_f, b_cls_f)
    static = dict(F=F, D_in=D_in, H=H, O=O, O_pad=O_pad)
    return folded, static


def nmode_forward(x, folded, static):
    """x: (B, D_in) f32 -> (B, out_dim) f32, using pre-folded weights."""
    F, D_in, H, O, O_pad = (static["F"], static["D_in"], static["H"],
                            static["O"], static["O_pad"])
    w_enc_f, b_enc_f, w_cls_f, b_cls_f = folded

    x = x.astype(jnp.float32)
    B = x.shape[0]
    assert B % F == 0, "batch must be divisible by the lane-fold factor F"
    B_f = B // F
    width = F * H
    owidth = F * O_pad

    tile_rows = _pick_tile(B_f)
    grid = (B_f // tile_rows,)

    x_f = x.reshape(B_f, F * D_in)               # row-major lane fold

    # Advisory cost hint: VALU-dominated (sin = VPU polynomial); only exp/tanh
    # are EUP transcendentals.
    n_rhs = 4 * N_STEPS
    cost = pl.CostEstimate(
        flops=int(2 * B_f * (F * D_in * width + width * owidth)
                  + B * H * N_STEPS * 90),
        transcendentals=int(B * H * (n_rhs + 1)),
        bytes_accessed=int(4 * (x_f.size + w_enc_f.size + b_enc_f.size
                                + w_cls_f.size + b_cls_f.size + B_f * owidth)),
    )

    out_f = pl.pallas_call(
        nmode_kernel,
        out_shape=jax.ShapeDtypeStruct((B_f, owidth), jnp.float32),
        grid_spec=pltpu.PrefetchScalarGridSpec(
            num_scalar_prefetch=0,
            grid=grid,
            in_specs=[
                pl.BlockSpec((tile_rows, F * D_in), lambda i: (i, 0)),
                pl.BlockSpec((F * D_in, width), lambda i: (0, 0)),
                pl.BlockSpec((1, width), lambda i: (0, 0)),
                pl.BlockSpec((width, owidth), lambda i: (0, 0)),
                pl.BlockSpec((1, owidth), lambda i: (0, 0)),
            ],
            out_specs=pl.BlockSpec((tile_rows, owidth), lambda i: (i, 0)),
        ),
        compiler_params=pltpu.CompilerParams(
            dimension_semantics=("parallel",)),
        cost_estimate=cost,
    )(x_f, w_enc_f, b_enc_f, w_cls_f, b_cls_f)

    # Un-fold and drop the lane padding.
    return out_f.reshape(B, O_pad)[:, :O]


def neural_memory_ode(x, w_enc, b_enc, w_cls, b_cls):
    """Convenience wrapper (folds weights per call; prefer fold_nmode_params
    + nmode_forward in a real deployment)."""
    folded, static = fold_nmode_params(w_enc, b_enc, w_cls, b_cls, x.shape[0])
    return nmode_forward(x, folded, static)


# ----------------------------- pure-JAX reference -----------------------------
def _ode_rhs_ref(y, gamma):
    s2 = jnp.sin(y + gamma) ** 2
    return -y + s2 + jnp.exp(-y) * s2


def neural_memory_ode_ref(x, w_enc, b_enc, w_cls, b_cls):
    gamma = jnp.tanh(x @ w_enc + b_enc)
    y = jnp.zeros_like(gamma)
    h = 1.0 / N_STEPS
    for _ in range(N_STEPS):
        k1 = _ode_rhs_ref(y, gamma)
        k2 = _ode_rhs_ref(y + h * k1 / 3.0, gamma)
        k3 = _ode_rhs_ref(y + h * (k2 - k1 / 3.0), gamma)
        k4 = _ode_rhs_ref(y + h * (k1 - k2 + k3), gamma)
        y = y + h * (k1 + 3.0 * (k2 + k3) + k4) * 0.125
    return y @ w_cls + b_cls


if __name__ == "__main__":
    # TODO(synk): backward/adjoint pass (NeuralODEFunc.backward) not implemented.
    D_IN, HIDDEN, OUT = 16, 32, 8
    key = jax.random.PRNGKey(0)
    kx, k1, k2, k3, k4, kx2 = jax.random.split(key, 6)

    # nn.Linear-style init: uniform(-1/sqrt(fan_in), 1/sqrt(fan_in))
    lim_e = 1.0 / jnp.sqrt(D_IN)
    lim_c = 1.0 / jnp.sqrt(HIDDEN)
    w_enc = jax.random.uniform(k1, (D_IN, HIDDEN), jnp.float32, -lim_e, lim_e)
    b_enc = jax.random.uniform(k2, (HIDDEN,), jnp.float32, -lim_e, lim_e)
    w_cls = jax.random.uniform(k3, (HIDDEN, OUT), jnp.float32, -lim_c, lim_c)
    b_cls = jax.random.uniform(k4, (OUT,), jnp.float32, -lim_c, lim_c)

    # --- small case: batch=32 (single grid step, single in-kernel chunk) ---
    B = 32
    x = jax.random.normal(kx, (B, D_IN), dtype=jnp.float32)
    folded, static = fold_nmode_params(w_enc, b_enc, w_cls, b_cls, B)
    out = jax.block_until_ready(nmode_forward(x, folded, static))
    ref = neural_memory_ode_ref(x, w_enc, b_enc, w_cls, b_cls)
    assert out.shape == (B, OUT)
    assert jnp.allclose(out, ref, atol=1e-4, rtol=1e-4), "mismatch (B=32)"

    # --- larger case: batch=512 (2 parallel grid steps, 2 in-kernel chunks) ---
    B2 = 512
    x2 = jax.random.normal(kx2, (B2, D_IN), dtype=jnp.float32)
    folded2, static2 = fold_nmode_params(w_enc, b_enc, w_cls, b_cls, B2)
    out2 = jax.block_until_ready(nmode_forward(x2, folded2, static2))
    ref2 = neural_memory_ode_ref(x2, w_enc, b_enc, w_cls, b_cls)
    assert out2.shape == (B2, OUT)
    assert jnp.allclose(out2, ref2, atol=1e-4, rtol=1e-4), "mismatch (B=512)"

    print("KERNEL_OK")
</pallas_src>

<mosaic_0001>
module attributes {stable_mosaic.version = 11 : i64} {
  func.func @nmode_kernel(%arg0: i32, %arg1: memref<8x64xf32, #tpu.memory_space<vmem>>, %arg2: memref<64x128xf32, #tpu.memory_space<vmem>>, %arg3: memref<1x128xf32, #tpu.memory_space<vmem>>, %arg4: memref<128x128xf32, #tpu.memory_space<vmem>>, %arg5: memref<1x128xf32, #tpu.memory_space<vmem>>, %arg6: memref<8x128xf32, #tpu.memory_space<vmem>>) attributes {dimension_semantics = [#tpu.dimension_semantics<parallel>], iteration_bounds = array<i64: 1>, scalar_prefetch = 0 : i64, scratch_operands = 0 : i64, tpu.core_type = #tpu.core_type<tc>, window_params = [{transform_indices = @transform_0, window_bounds = array<i64: 8, 64>}, {pipeline_mode = #tpu.pipeline_mode<synchronous>, transform_indices = @transform_1, window_bounds = array<i64: 64, 128>}, {pipeline_mode = #tpu.pipeline_mode<synchronous>, transform_indices = @transform_2, window_bounds = array<i64: 1, 128>}, {pipeline_mode = #tpu.pipeline_mode<synchronous>, transform_indices = @transform_3, window_bounds = array<i64: 128, 128>}, {pipeline_mode = #tpu.pipeline_mode<synchronous>, transform_indices = @transform_4, window_bounds = array<i64: 1, 128>}, {transform_indices = @transform_5, window_bounds = array<i64: 8, 128>}]} {
    %c0 = arith.constant 0 : index
    %c0_0 = arith.constant 0 : index
    %0 = vector.load %arg1[%c0, %c0_0] : memref<8x64xf32, #tpu.memory_space<vmem>>, vector<8x64xf32>
    %c0_1 = arith.constant 0 : index
    %c0_2 = arith.constant 0 : index
    %1 = vector.load %arg2[%c0_1, %c0_2] : memref<64x128xf32, #tpu.memory_space<vmem>>, vector<64x128xf32>
    %cst = arith.constant dense<0.000000e+00> : vector<8x128xf32>
    %2 = tpu.matmul %0, %1, %cst {dimension_numbers = #tpu.dot_dimension_numbers<[1], [0], [0], [1], [0, 0, 1, 1], [], []>} : vector<8x64xf32>, vector<64x128xf32>, vector<8x128xf32> -> vector<8x128xf32>
    %c0_3 = arith.constant 0 : index
    %c0_4 = arith.constant 0 : index
    %3 = vector.load %arg3[%c0_3, %c0_4] : memref<1x128xf32, #tpu.memory_space<vmem>>, vector<1x128xf32>
    %4 = vector.broadcast %3 : vector<1x128xf32> to vector<8x128xf32>
    %5 = arith.addf %2, %4 : vector<8x128xf32>
    %6 = math.tanh %5 : vector<8x128xf32>
    %cst_5 = arith.constant 0.000000e+00 : f32
    %7 = vector.broadcast %cst_5 : f32 to vector<8x128xf32>
    %c0_i32 = arith.constant 0 : i32
    %8 = arith.addf %7, %6 : vector<8x128xf32>
    %9 = math.sin %8 : vector<8x128xf32>
    %10 = arith.mulf %9, %9 : vector<8x128xf32>
    %cst_6 = arith.constant 0.000000e+00 : f32
    %11 = vector.broadcast %cst_6 : f32 to vector<8x128xf32>
    %12 = arith.subf %11, %7 : vector<8x128xf32>
    %13 = math.exp %12 : vector<8x128xf32>
    %cst_7 = arith.constant 1.000000e+00 : f32
    %14 = vector.broadcast %cst_7 : f32 to vector<8x128xf32>
    %15 = arith.addf %14, %13 : vector<8x128xf32>
    %16 = arith.mulf %10, %15 : vector<8x128xf32>
    %17 = arith.subf %16, %7 : vector<8x128xf32>
    %cst_8 = arith.constant 0.0370370373 : f32
    %18 = vector.broadcast %cst_8 : f32 to vector<8x128xf32>
    %19 = arith.mulf %18, %17 : vector<8x128xf32>
    %20 = arith.addf %7, %19 : vector<8x128xf32>
    %21 = arith.addf %20, %6 : vector<8x128xf32>
    %22 = math.sin %21 : vector<8x128xf32>
    %23 = arith.mulf %22, %22 : vector<8x128xf32>
    %cst_9 = arith.constant 0.000000e+00 : f32
    %24 = vector.broadcast %cst_9 : f32 to vector<8x128xf32>
    %25 = arith.subf %24, %20 : vector<8x128xf32>
    %26 = math.exp %25 : vector<8x128xf32>
    %cst_10 = arith.constant 1.000000e+00 : f32
    %27 = vector.broadcast %cst_10 : f32 to vector<8x128xf32>
    %28 = arith.addf %27, %26 : vector<8x128xf32>
    %29 = arith.mulf %23, %28 : vector<8x128xf32>
    %30 = arith.subf %29, %20 : vector<8x128xf32>
    %cst_11 = arith.constant 0.111111112 : f32
    %31 = vector.broadcast %cst_11 : f32 to vector<8x128xf32>
    %32 = arith.mulf %31, %30 : vector<8x128xf32>
    %33 = arith.addf %7, %32 : vector<8x128xf32>
    %34 = arith.subf %33, %19 : vector<8x128xf32>
    %35 = arith.addf %34, %6 : vector<8x128xf32>
    %36 = math.sin %35 : vector<8x128xf32>
    %37 = arith.mulf %36, %36 : vector<8x128xf32>
    %cst_12 = arith.constant 0.000000e+00 : f32
    %38 = vector.broadcast %cst_12 : f32 to vector<8x128xf32>
    %39 = arith.subf %38, %34 : vector<8x128xf32>
    %40 = math.exp %39 : vector<8x128xf32>
    %cst_13 = arith.constant 1.000000e+00 : f32
    %41 = vector.broadcast %cst_13 : f32 to vector<8x128xf32>
    %42 = arith.addf %41, %40 : vector<8x128xf32>
    %43 = arith.mulf %37, %42 : vector<8x128xf32>
    %44 = arith.subf %43, %34 : vector<8x128xf32>
    %45 = arith.subf %17, %30 : vector<8x128xf32>
    %46 = arith.addf %45, %44 : vector<8x128xf32>
    %cst_14 = arith.constant 0.111111112 : f32
    %47 = vector.broadcast %cst_14 : f32 to vector<8x128xf32>
    %48 = arith.mulf %47, %46 : vector<8x128xf32>
    %49 = arith.addf %7, %48 : vector<8x128xf32>
    %50 = arith.addf %49, %6 : vector<8x128xf32>
    %51 = math.sin %50 : vector<8x128xf32>
    %52 = arith.mulf %51, %51 : vector<8x128xf32>
    %cst_15 = arith.constant 0.000000e+00 : f32
    %53 = vector.broadcast %cst_15 : f32 to vector<8x128xf32>
    %54 = arith.subf %53, %49 : vector<8x128xf32>
    %55 = math.exp %54 : vector<8x128xf32>
    %cst_16 = arith.constant 1.000000e+00 : f32
    %56 = vector.broadcast %cst_16 : f32 to vector<8x128xf32>
    %57 = arith.addf %56, %55 : vector<8x128xf32>
    %58 = arith.mulf %52, %57 : vector<8x128xf32>
    %59 = arith.subf %58, %49 : vector<8x128xf32>
    %60 = arith.addf %30, %44 : vector<8x128xf32>
    %cst_17 = arith.constant 3.000000e+00 : f32
    %61 = vector.broadcast %cst_17 : f32 to vector<8x128xf32>
    %62 = arith.mulf %61, %60 : vector<8x128xf32>
    %63 = arith.addf %17, %62 : vector<8x128xf32>
    %64 = arith.addf %63, %59 : vector<8x128xf32>
    %cst_18 = arith.constant 0.013888889 : f32
    %65 = vector.broadcast %cst_18 : f32 to vector<8x128xf32>
    %66 = arith.mulf %65, %64 : vector<8x128xf32>
    %67 = arith.addf %7, %66 : vector<8x128xf32>
    %c1_i32 = arith.constant 1 : i32
    %68 = arith.addf %67, %6 : vector<8x128xf32>
    %69 = math.sin %68 : vector<8x128xf32>
    %70 = arith.mulf %69, %69 : vector<8x128xf32>
    %cst_19 = arith.constant 0.000000e+00 : f32
    %71 = vector.broadcast %cst_19 : f32 to vector<8x128xf32>
    %72 = arith.subf %71, %67 : vector<8x128xf32>
    %73 = math.exp %72 : vector<8x128xf32>
    %cst_20 = arith.constant 1.000000e+00 : f32
    %74 = vector.broadcast %cst_20 : f32 to vector<8x128xf32>
    %75 = arith.addf %74, %73 : vector<8x128xf32>
    %76 = arith.mulf %70, %75 : vector<8x128xf32>
    %77 = arith.subf %76, %67 : vector<8x128xf32>
    %cst_21 = arith.constant 0.0370370373 : f32
    %78 = vector.broadcast %cst_21 : f32 to vector<8x128xf32>
    %79 = arith.mulf %78, %77 : vector<8x128xf32>
    %80 = arith.addf %67, %79 : vector<8x128xf32>
    %81 = arith.addf %80, %6 : vector<8x128xf32>
    %82 = math.sin %81 : vector<8x128xf32>
    %83 = arith.mulf %82, %82 : vector<8x128xf32>
    %cst_22 = arith.constant 0.000000e+00 : f32
    %84 = vector.broadcast %cst_22 : f32 to vector<8x128xf32>
    %85 = arith.subf %84, %80 : vector<8x128xf32>
    %86 = math.exp %85 : vector<8x128xf32>
    %cst_23 = arith.constant 1.000000e+00 : f32
    %87 = vector.broadcast %cst_23 : f32 to vector<8x128xf32>
    %88 = arith.addf %87, %86 : vector<8x128xf32>
    %89 = arith.mulf %83, %88 : vector<8x128xf32>
    %90 = arith.subf %89, %80 : vector<8x128xf32>
    %cst_24 = arith.constant 0.111111112 : f32
    %91 = vector.broadcast %cst_24 : f32 to vector<8x128xf32>
    %92 = arith.mulf %91, %90 : vector<8x128xf32>
    %93 = arith.addf %67, %92 : vector<8x128xf32>
    %94 = arith.subf %93, %79 : vector<8x128xf32>
    %95 = arith.addf %94, %6 : vector<8x128xf32>
    %96 = math.sin %95 : vector<8x128xf32>
    %97 = arith.mulf %96, %96 : vector<8x128xf32>
    %cst_25 = arith.constant 0.000000e+00 : f32
    %98 = vector.broadcast %cst_25 : f32 to vector<8x128xf32>
    %99 = arith.subf %98, %94 : vector<8x128xf32>
    %100 = math.exp %99 : vector<8x128xf32>
    %cst_26 = arith.constant 1.000000e+00 : f32
    %101 = vector.broadcast %cst_26 : f32 to vector<8x128xf32>
    %102 = arith.addf %101, %100 : vector<8x128xf32>
    %103 = arith.mulf %97, %102 : vector<8x128xf32>
    %104 = arith.subf %103, %94 : vector<8x128xf32>
    %105 = arith.subf %77, %90 : vector<8x128xf32>
    %106 = arith.addf %105, %104 : vector<8x128xf32>
    %cst_27 = arith.constant 0.111111112 : f32
    %107 = vector.broadcast %cst_27 : f32 to vector<8x128xf32>
    %108 = arith.mulf %107, %106 : vector<8x128xf32>
    %109 = arith.addf %67, %108 : vector<8x128xf32>
    %110 = arith.addf %109, %6 : vector<8x128xf32>
    %111 = math.sin %110 : vector<8x128xf32>
    %112 = arith.mulf %111, %111 : vector<8x128xf32>
    %cst_28 = arith.constant 0.000000e+00 : f32
    %113 = vector.broadcast %cst_28 : f32 to vector<8x128xf32>
    %114 = arith.subf %113, %109 : vector<8x128xf32>
    %115 = math.exp %114 : vector<8x128xf32>
    %cst_29 = arith.constant 1.000000e+00 : f32
    %116 = vector.broadcast %cst_29 : f32 to vector<8x128xf32>
    %117 = arith.addf %116, %115 : vector<8x128xf32>
    %118 = arith.mulf %112, %117 : vector<8x128xf32>
    %119 = arith.subf %118, %109 : vector<8x128xf32>
    %120 = arith.addf %90, %104 : vector<8x128xf32>
    %cst_30 = arith.constant 3.000000e+00 : f32
    %121 = vector.broadcast %cst_30 : f32 to vector<8x128xf32>
    %122 = arith.mulf %121, %120 : vector<8x128xf32>
    %123 = arith.addf %77, %122 : vector<8x128xf32>
    %124 = arith.addf %123, %119 : vector<8x128xf32>
    %cst_31 = arith.constant 0.013888889 : f32
    %125 = vector.broadcast %cst_31 : f32 to vector<8x128xf32>
    %126 = arith.mulf %125, %124 : vector<8x128xf32>
    %127 = arith.addf %67, %126 : vector<8x128xf32>
    %c2_i32 = arith.constant 2 : i32
    %128 = arith.addf %127, %6 : vector<8x128xf32>
    %129 = math.sin %128 : vector<8x128xf32>
    %130 = arith.mulf %129, %129 : vector<8x128xf32>
    %cst_32 = arith.constant 0.000000e+00 : f32
    %131 = vector.broadcast %cst_32 : f32 to vector<8x128xf32>
    %132 = arith.subf %131, %127 : vector<8x128xf32>
    %133 = math.exp %132 : vector<8x128xf32>
    %cst_33 = arith.constant 1.000000e+00 : f32
    %134 = vector.broadcast %cst_33 : f32 to vector<8x128xf32>
    %135 = arith.addf %134, %133 : vector<8x128xf32>
    %136 = arith.mulf %130, %135 : vector<8x128xf32>
    %137 = arith.subf %136, %127 : vector<8x128xf32>
    %cst_34 = arith.constant 0.0370370373 : f32
    %138 = vector.broadcast %cst_34 : f32 to vector<8x128xf32>
    %139 = arith.mulf %138, %137 : vector<8x128xf32>
    %140 = arith.addf %127, %139 : vector<8x128xf32>
    %141 = arith.addf %140, %6 : vector<8x128xf32>
    %142 = math.sin %141 : vector<8x128xf32>
    %143 = arith.mulf %142, %142 : vector<8x128xf32>
    %cst_35 = arith.constant 0.000000e+00 : f32
    %144 = vector.broadcast %cst_35 : f32 to vector<8x128xf32>
    %145 = arith.subf %144, %140 : vector<8x128xf32>
    %146 = math.exp %145 : vector<8x128xf32>
    %cst_36 = arith.constant 1.000000e+00 : f32
    %147 = vector.broadcast %cst_36 : f32 to vector<8x128xf32>
    %148 = arith.addf %147, %146 : vector<8x128xf32>
    %149 = arith.mulf %143, %148 : vector<8x128xf32>
    %150 = arith.subf %149, %140 : vector<8x128xf32>
    %cst_37 = arith.constant 0.111111112 : f32
    %151 = vector.broadcast %cst_37 : f32 to vector<8x128xf32>
    %152 = arith.mulf %151, %150 : vector<8x128xf32>
    %153 = arith.addf %127, %152 : vector<8x128xf32>
    %154 = arith.subf %153, %139 : vector<8x128xf32>
    %155 = arith.addf %154, %6 : vector<8x128xf32>
    %156 = math.sin %155 : vector<8x128xf32>
    %157 = arith.mulf %156, %156 : vector<8x128xf32>
    %cst_38 = arith.constant 0.000000e+00 : f32
    %158 = vector.broadcast %cst_38 : f32 to vector<8x128xf32>
    %159 = arith.subf %158, %154 : vector<8x128xf32>
    %160 = math.exp %159 : vector<8x128xf32>
    %cst_39 = arith.constant 1.000000e+00 : f32
    %161 = vector.broadcast %cst_39 : f32 to vector<8x128xf32>
    %162 = arith.addf %161, %160 : vector<8x128xf32>
    %163 = arith.mulf %157, %162 : vector<8x128xf32>
    %164 = arith.subf %163, %154 : vector<8x128xf32>
    %165 = arith.subf %137, %150 : vector<8x128xf32>
    %166 = arith.addf %165, %164 : vector<8x128xf32>
    %cst_40 = arith.constant 0.111111112 : f32
    %167 = vector.broadcast %cst_40 : f32 to vector<8x128xf32>
    %168 = arith.mulf %167, %166 : vector<8x128xf32>
    %169 = arith.addf %127, %168 : vector<8x128xf32>
    %170 = arith.addf %169, %6 : vector<8x128xf32>
    %171 = math.sin %170 : vector<8x128xf32>
    %172 = arith.mulf %171, %171 : vector<8x128xf32>
    %cst_41 = arith.constant 0.000000e+00 : f32
    %173 = vector.broadcast %cst_41 : f32 to vector<8x128xf32>
    %174 = arith.subf %173, %169 : vector<8x128xf32>
    %175 = math.exp %174 : vector<8x128xf32>
    %cst_42 = arith.constant 1.000000e+00 : f32
    %176 = vector.broadcast %cst_42 : f32 to vector<8x128xf32>
    %177 = arith.addf %176, %175 : vector<8x128xf32>
    %178 = arith.mulf %172, %177 : vector<8x128xf32>
    %179 = arith.subf %178, %169 : vector<8x128xf32>
    %180 = arith.addf %150, %164 : vector<8x128xf32>
    %cst_43 = arith.constant 3.000000e+00 : f32
    %181 = vector.broadcast %cst_43 : f32 to vector<8x128xf32>
    %182 = arith.mulf %181, %180 : vector<8x128xf32>
    %183 = arith.addf %137, %182 : vector<8x128xf32>
    %184 = arith.addf %183, %179 : vector<8x128xf32>
    %cst_44 = arith.constant 0.013888889 : f32
    %185 = vector.broadcast %cst_44 : f32 to vector<8x128xf32>
    %186 = arith.mulf %185, %184 : vector<8x128xf32>
    %187 = arith.addf %127, %186 : vector<8x128xf32>
    %c3_i32 = arith.constant 3 : i32
    %188 = arith.addf %187, %6 : vector<8x128xf32>
    %189 = math.sin %188 : vector<8x128xf32>
    %190 = arith.mulf %189, %189 : vector<8x128xf32>
    %cst_45 = arith.constant 0.000000e+00 : f32
    %191 = vector.broadcast %cst_45 : f32 to vector<8x128xf32>
    %192 = arith.subf %191, %187 : vector<8x128xf32>
    %193 = math.exp %192 : vector<8x128xf32>
    %cst_46 = arith.constant 1.000000e+00 : f32
    %194 = vector.broadcast %cst_46 : f32 to vector<8x128xf32>
    %195 = arith.addf %194, %193 : vector<8x128xf32>
    %196 = arith.mulf %190, %195 : vector<8x128xf32>
    %197 = arith.subf %196, %187 : vector<8x128xf32>
    %cst_47 = arith.constant 0.0370370373 : f32
    %198 = vector.broadcast %cst_47 : f32 to vector<8x128xf32>
    %199 = arith.mulf %198, %197 : vector<8x128xf32>
    %200 = arith.addf %187, %199 : vector<8x128xf32>
    %201 = arith.addf %200, %6 : vector<8x128xf32>
    %202 = math.sin %201 : vector<8x128xf32>
    %203 = arith.mulf %202, %202 : vector<8x128xf32>
    %cst_48 = arith.constant 0.000000e+00 : f32
    %204 = vector.broadcast %cst_48 : f32 to vector<8x128xf32>
    %205 = arith.subf %204, %200 : vector<8x128xf32>
    %206 = math.exp %205 : vector<8x128xf32>
    %cst_49 = arith.constant 1.000000e+00 : f32
    %207 = vector.broadcast %cst_49 : f32 to vector<8x128xf32>
    %208 = arith.addf %207, %206 : vector<8x128xf32>
    %209 = arith.mulf %203, %208 : vector<8x128xf32>
    %210 = arith.subf %209, %200 : vector<8x128xf32>
    %cst_50 = arith.constant 0.111111112 : f32
    %211 = vector.broadcast %cst_50 : f32 to vector<8x128xf32>
    %212 = arith.mulf %211, %210 : vector<8x128xf32>
    %213 = arith.addf %187, %212 : vector<8x128xf32>
    %214 = arith.subf %213, %199 : vector<8x128xf32>
    %215 = arith.addf %214, %6 : vector<8x128xf32>
    %216 = math.sin %215 : vector<8x128xf32>
    %217 = arith.mulf %216, %216 : vector<8x128xf32>
    %cst_51 = arith.constant 0.000000e+00 : f32
    %218 = vector.broadcast %cst_51 : f32 to vector<8x128xf32>
    %219 = arith.subf %218, %214 : vector<8x128xf32>
    %220 = math.exp %219 : vector<8x128xf32>
    %cst_52 = arith.constant 1.000000e+00 : f32
    %221 = vector.broadcast %cst_52 : f32 to vector<8x128xf32>
    %222 = arith.addf %221, %220 : vector<8x128xf32>
    %223 = arith.mulf %217, %222 : vector<8x128xf32>
    %224 = arith.subf %223, %214 : vector<8x128xf32>
    %225 = arith.subf %197, %210 : vector<8x128xf32>
    %226 = arith.addf %225, %224 : vector<8x128xf32>
    %cst_53 = arith.constant 0.111111112 : f32
    %227 = vector.broadcast %cst_53 : f32 to vector<8x128xf32>
    %228 = arith.mulf %227, %226 : vector<8x128xf32>
    %229 = arith.addf %187, %228 : vector<8x128xf32>
    %230 = arith.addf %229, %6 : vector<8x128xf32>
    %231 = math.sin %230 : vector<8x128xf32>
    %232 = arith.mulf %231, %231 : vector<8x128xf32>
    %cst_54 = arith.constant 0.000000e+00 : f32
    %233 = vector.broadcast %cst_54 : f32 to vector<8x128xf32>
    %234 = arith.subf %233, %229 : vector<8x128xf32>
    %235 = math.exp %234 : vector<8x128xf32>
    %cst_55 = arith.constant 1.000000e+00 : f32
    %236 = vector.broadcast %cst_55 : f32 to vector<8x128xf32>
    %237 = arith.addf %236, %235 : vector<8x128xf32>
    %238 = arith.mulf %232, %237 : vector<8x128xf32>
    %239 = arith.subf %238, %229 : vector<8x128xf32>
    %240 = arith.addf %210, %224 : vector<8x128xf32>
    %cst_56 = arith.constant 3.000000e+00 : f32
    %241 = vector.broadcast %cst_56 : f32 to vector<8x128xf32>
    %242 = arith.mulf %241, %240 : vector<8x128xf32>
    %243 = arith.addf %197, %242 : vector<8x128xf32>
    %244 = arith.addf %243, %239 : vector<8x128xf32>
    %cst_57 = arith.constant 0.013888889 : f32
    %245 = vector.broadcast %cst_57 : f32 to vector<8x128xf32>
    %246 = arith.mulf %245, %244 : vector<8x128xf32>
    %247 = arith.addf %187, %246 : vector<8x128xf32>
    %c4_i32 = arith.constant 4 : i32
    %248 = arith.addf %247, %6 : vector<8x128xf32>
    %249 = math.sin %248 : vector<8x128xf32>
    %250 = arith.mulf %249, %249 : vector<8x128xf32>
    %cst_58 = arith.constant 0.000000e+00 : f32
    %251 = vector.broadcast %cst_58 : f32 to vector<8x128xf32>
    %252 = arith.subf %251, %247 : vector<8x128xf32>
    %253 = math.exp %252 : vector<8x128xf32>
    %cst_59 = arith.constant 1.000000e+00 : f32
    %254 = vector.broadcast %cst_59 : f32 to vector<8x128xf32>
    %255 = arith.addf %254, %253 : vector<8x128xf32>
    %256 = arith.mulf %250, %255 : vector<8x128xf32>
    %257 = arith.subf %256, %247 : vector<8x128xf32>
    %cst_60 = arith.constant 0.0370370373 : f32
    %258 = vector.broadcast %cst_60 : f32 to vector<8x128xf32>
    %259 = arith.mulf %258, %257 : vector<8x128xf32>
    %260 = arith.addf %247, %259 : vector<8x128xf32>
    %261 = arith.addf %260, %6 : vector<8x128xf32>
    %262 = math.sin %261 : vector<8x128xf32>
    %263 = arith.mulf %262, %262 : vector<8x128xf32>
    %cst_61 = arith.constant 0.000000e+00 : f32
    %264 = vector.broadcast %cst_61 : f32 to vector<8x128xf32>
    %265 = arith.subf %264, %260 : vector<8x128xf32>
    %266 = math.exp %265 : vector<8x128xf32>
    %cst_62 = arith.constant 1.000000e+00 : f32
    %267 = vector.broadcast %cst_62 : f32 to vector<8x128xf32>
    %268 = arith.addf %267, %266 : vector<8x128xf32>
    %269 = arith.mulf %263, %268 : vector<8x128xf32>
    %270 = arith.subf %269, %260 : vector<8x128xf32>
    %cst_63 = arith.constant 0.111111112 : f32
    %271 = vector.broadcast %cst_63 : f32 to vector<8x128xf32>
    %272 = arith.mulf %271, %270 : vector<8x128xf32>
    %273 = arith.addf %247, %272 : vector<8x128xf32>
    %274 = arith.subf %273, %259 : vector<8x128xf32>
    %275 = arith.addf %274, %6 : vector<8x128xf32>
    %276 = math.sin %275 : vector<8x128xf32>
    %277 = arith.mulf %276, %276 : vector<8x128xf32>
    %cst_64 = arith.constant 0.000000e+00 : f32
    %278 = vector.broadcast %cst_64 : f32 to vector<8x128xf32>
    %279 = arith.subf %278, %274 : vector<8x128xf32>
    %280 = math.exp %279 : vector<8x128xf32>
    %cst_65 = arith.constant 1.000000e+00 : f32
    %281 = vector.broadcast %cst_65 : f32 to vector<8x128xf32>
    %282 = arith.addf %281, %280 : vector<8x128xf32>
    %283 = arith.mulf %277, %282 : vector<8x128xf32>
    %284 = arith.subf %283, %274 : vector<8x128xf32>
    %285 = arith.subf %257, %270 : vector<8x128xf32>
    %286 = arith.addf %285, %284 : vector<8x128xf32>
    %cst_66 = arith.constant 0.111111112 : f32
    %287 = vector.broadcast %cst_66 : f32 to vector<8x128xf32>
    %288 = arith.mulf %287, %286 : vector<8x128xf32>
    %289 = arith.addf %247, %288 : vector<8x128xf32>
    %290 = arith.addf %289, %6 : vector<8x128xf32>
    %291 = math.sin %290 : vector<8x128xf32>
    %292 = arith.mulf %291, %291 : vector<8x128xf32>
    %cst_67 = arith.constant 0.000000e+00 : f32
    %293 = vector.broadcast %cst_67 : f32 to vector<8x128xf32>
    %294 = arith.subf %293, %289 : vector<8x128xf32>
    %295 = math.exp %294 : vector<8x128xf32>
    %cst_68 = arith.constant 1.000000e+00 : f32
    %296 = vector.broadcast %cst_68 : f32 to vector<8x128xf32>
    %297 = arith.addf %296, %295 : vector<8x128xf32>
    %298 = arith.mulf %292, %297 : vector<8x128xf32>
    %299 = arith.subf %298, %289 : vector<8x128xf32>
    %300 = arith.addf %270, %284 : vector<8x128xf32>
    %cst_69 = arith.constant 3.000000e+00 : f32
    %301 = vector.broadcast %cst_69 : f32 to vector<8x128xf32>
    %302 = arith.mulf %301, %300 : vector<8x128xf32>
    %303 = arith.addf %257, %302 : vector<8x128xf32>
    %304 = arith.addf %303, %299 : vector<8x128xf32>
    %cst_70 = arith.constant 0.013888889 : f32
    %305 = vector.broadcast %cst_70 : f32 to vector<8x128xf32>
    %306 = arith.mulf %305, %304 : vector<8x128xf32>
    %307 = arith.addf %247, %306 : vector<8x128xf32>
    %c5_i32 = arith.constant 5 : i32
    %308 = arith.addf %307, %6 : vector<8x128xf32>
    %309 = math.sin %308 : vector<8x128xf32>
    %310 = arith.mulf %309, %309 : vector<8x128xf32>
    %cst_71 = arith.constant 0.000000e+00 : f32
    %311 = vector.broadcast %cst_71 : f32 to vector<8x128xf32>
    %312 = arith.subf %311, %307 : vector<8x128xf32>
    %313 = math.exp %312 : vector<8x128xf32>
    %cst_72 = arith.constant 1.000000e+00 : f32
    %314 = vector.broadcast %cst_72 : f32 to vector<8x128xf32>
    %315 = arith.addf %314, %313 : vector<8x128xf32>
    %316 = arith.mulf %310, %315 : vector<8x128xf32>
    %317 = arith.subf %316, %307 : vector<8x128xf32>
    %cst_73 = arith.constant 0.0370370373 : f32
    %318 = vector.broadcast %cst_73 : f32 to vector<8x128xf32>
    %319 = arith.mulf %318, %317 : vector<8x128xf32>
    %320 = arith.addf %307, %319 : vector<8x128xf32>
    %321 = arith.addf %320, %6 : vector<8x128xf32>
    %322 = math.sin %321 : vector<8x128xf32>
    %323 = arith.mulf %322, %322 : vector<8x128xf32>
    %cst_74 = arith.constant 0.000000e+00 : f32
    %324 = vector.broadcast %cst_74 : f32 to vector<8x128xf32>
    %325 = arith.subf %324, %320 : vector<8x128xf32>
    %326 = math.exp %325 : vector<8x128xf32>
    %cst_75 = arith.constant 1.000000e+00 : f32
    %327 = vector.broadcast %cst_75 : f32 to vector<8x128xf32>
    %328 = arith.addf %327, %326 : vector<8x128xf32>
    %329 = arith.mulf %323, %328 : vector<8x128xf32>
    %330 = arith.subf %329, %320 : vector<8x128xf32>
    %cst_76 = arith.constant 0.111111112 : f32
    %331 = vector.broadcast %cst_76 : f32 to vector<8x128xf32>
    %332 = arith.mulf %331, %330 : vector<8x128xf32>
    %333 = arith.addf %307, %332 : vector<8x128xf32>
    %334 = arith.subf %333, %319 : vector<8x128xf32>
    %335 = arith.addf %334, %6 : vector<8x128xf32>
    %336 = math.sin %335 : vector<8x128xf32>
    %337 = arith.mulf %336, %336 : vector<8x128xf32>
    %cst_77 = arith.constant 0.000000e+00 : f32
    %338 = vector.broadcast %cst_77 : f32 to vector<8x128xf32>
    %339 = arith.subf %338, %334 : vector<8x128xf32>
    %340 = math.exp %339 : vector<8x128xf32>
    %cst_78 = arith.constant 1.000000e+00 : f32
    %341 = vector.broadcast %cst_78 : f32 to vector<8x128xf32>
    %342 = arith.addf %341, %340 : vector<8x128xf32>
    %343 = arith.mulf %337, %342 : vector<8x128xf32>
    %344 = arith.subf %343, %334 : vector<8x128xf32>
    %345 = arith.subf %317, %330 : vector<8x128xf32>
    %346 = arith.addf %345, %344 : vector<8x128xf32>
    %cst_79 = arith.constant 0.111111112 : f32
    %347 = vector.broadcast %cst_79 : f32 to vector<8x128xf32>
    %348 = arith.mulf %347, %346 : vector<8x128xf32>
    %349 = arith.addf %307, %348 : vector<8x128xf32>
    %350 = arith.addf %349, %6 : vector<8x128xf32>
    %351 = math.sin %350 : vector<8x128xf32>
    %352 = arith.mulf %351, %351 : vector<8x128xf32>
    %cst_80 = arith.constant 0.000000e+00 : f32
    %353 = vector.broadcast %cst_80 : f32 to vector<8x128xf32>
    %354 = arith.subf %353, %349 : vector<8x128xf32>
    %355 = math.exp %354 : vector<8x128xf32>
    %cst_81 = arith.constant 1.000000e+00 : f32
    %356 = vector.broadcast %cst_81 : f32 to vector<8x128xf32>
    %357 = arith.addf %356, %355 : vector<8x128xf32>
    %358 = arith.mulf %352, %357 : vector<8x128xf32>
    %359 = arith.subf %358, %349 : vector<8x128xf32>
    %360 = arith.addf %330, %344 : vector<8x128xf32>
    %cst_82 = arith.constant 3.000000e+00 : f32
    %361 = vector.broadcast %cst_82 : f32 to vector<8x128xf32>
    %362 = arith.mulf %361, %360 : vector<8x128xf32>
    %363 = arith.addf %317, %362 : vector<8x128xf32>
    %364 = arith.addf %363, %359 : vector<8x128xf32>
    %cst_83 = arith.constant 0.013888889 : f32
    %365 = vector.broadcast %cst_83 : f32 to vector<8x128xf32>
    %366 = arith.mulf %365, %364 : vector<8x128xf32>
    %367 = arith.addf %307, %366 : vector<8x128xf32>
    %c6_i32 = arith.constant 6 : i32
    %368 = arith.addf %367, %6 : vector<8x128xf32>
    %369 = math.sin %368 : vector<8x128xf32>
    %370 = arith.mulf %369, %369 : vector<8x128xf32>
    %cst_84 = arith.constant 0.000000e+00 : f32
    %371 = vector.broadcast %cst_84 : f32 to vector<8x128xf32>
    %372 = arith.subf %371, %367 : vector<8x128xf32>
    %373 = math.exp %372 : vector<8x128xf32>
    %cst_85 = arith.constant 1.000000e+00 : f32
    %374 = vector.broadcast %cst_85 : f32 to vector<8x128xf32>
    %375 = arith.addf %374, %373 : vector<8x128xf32>
    %376 = arith.mulf %370, %375 : vector<8x128xf32>
    %377 = arith.subf %376, %367 : vector<8x128xf32>
    %cst_86 = arith.constant 0.0370370373 : f32
    %378 = vector.broadcast %cst_86 : f32 to vector<8x128xf32>
    %379 = arith.mulf %378, %377 : vector<8x128xf32>
    %380 = arith.addf %367, %379 : vector<8x128xf32>
    %381 = arith.addf %380, %6 : vector<8x128xf32>
    %382 = math.sin %381 : vector<8x128xf32>
    %383 = arith.mulf %382, %382 : vector<8x128xf32>
    %cst_87 = arith.constant 0.000000e+00 : f32
    %384 = vector.broadcast %cst_87 : f32 to vector<8x128xf32>
    %385 = arith.subf %384, %380 : vector<8x128xf32>
    %386 = math.exp %385 : vector<8x128xf32>
    %cst_88 = arith.constant 1.000000e+00 : f32
    %387 = vector.broadcast %cst_88 : f32 to vector<8x128xf32>
    %388 = arith.addf %387, %386 : vector<8x128xf32>
    %389 = arith.mulf %383, %388 : vector<8x128xf32>
    %390 = arith.subf %389, %380 : vector<8x128xf32>
    %cst_89 = arith.constant 0.111111112 : f32
    %391 = vector.broadcast %cst_89 : f32 to vector<8x128xf32>
    %392 = arith.mulf %391, %390 : vector<8x128xf32>
    %393 = arith.addf %367, %392 : vector<8x128xf32>
    %394 = arith.subf %393, %379 : vector<8x128xf32>
    %395 = arith.addf %394, %6 : vector<8x128xf32>
    %396 = math.sin %395 : vector<8x128xf32>
    %397 = arith.mulf %396, %396 : vector<8x128xf32>
    %cst_90 = arith.constant 0.000000e+00 : f32
    %398 = vector.broadcast %cst_90 : f32 to vector<8x128xf32>
    %399 = arith.subf %398, %394 : vector<8x128xf32>
    %400 = math.exp %399 : vector<8x128xf32>
    %cst_91 = arith.constant 1.000000e+00 : f32
    %401 = vector.broadcast %cst_91 : f32 to vector<8x128xf32>
    %402 = arith.addf %401, %400 : vector<8x128xf32>
    %403 = arith.mulf %397, %402 : vector<8x128xf32>
    %404 = arith.subf %403, %394 : vector<8x128xf32>
    %405 = arith.subf %377, %390 : vector<8x128xf32>
    %406 = arith.addf %405, %404 : vector<8x128xf32>
    %cst_92 = arith.constant 0.111111112 : f32
    %407 = vector.broadcast %cst_92 : f32 to vector<8x128xf32>
    %408 = arith.mulf %407, %406 : vector<8x128xf32>
    %409 = arith.addf %367, %408 : vector<8x128xf32>
    %410 = arith.addf %409, %6 : vector<8x128xf32>
    %411 = math.sin %410 : vector<8x128xf32>
    %412 = arith.mulf %411, %411 : vector<8x128xf32>
    %cst_93 = arith.constant 0.000000e+00 : f32
    %413 = vector.broadcast %cst_93 : f32 to vector<8x128xf32>
    %414 = arith.subf %413, %409 : vector<8x128xf32>
    %415 = math.exp %414 : vector<8x128xf32>
    %cst_94 = arith.constant 1.000000e+00 : f32
    %416 = vector.broadcast %cst_94 : f32 to vector<8x128xf32>
    %417 = arith.addf %416, %415 : vector<8x128xf32>
    %418 = arith.mulf %412, %417 : vector<8x128xf32>
    %419 = arith.subf %418, %409 : vector<8x128xf32>
    %420 = arith.addf %390, %404 : vector<8x128xf32>
    %cst_95 = arith.constant 3.000000e+00 : f32
    %421 = vector.broadcast %cst_95 : f32 to vector<8x128xf32>
    %422 = arith.mulf %421, %420 : vector<8x128xf32>
    %423 = arith.addf %377, %422 : vector<8x128xf32>
    %424 = arith.addf %423, %419 : vector<8x128xf32>
    %cst_96 = arith.constant 0.013888889 : f32
    %425 = vector.broadcast %cst_96 : f32 to vector<8x128xf32>
    %426 = arith.mulf %425, %424 : vector<8x128xf32>
    %427 = arith.addf %367, %426 : vector<8x128xf32>
    %c7_i32 = arith.constant 7 : i32
    %428 = arith.addf %427, %6 : vector<8x128xf32>
    %429 = math.sin %428 : vector<8x128xf32>
    %430 = arith.mulf %429, %429 : vector<8x128xf32>
    %cst_97 = arith.constant 0.000000e+00 : f32
    %431 = vector.broadcast %cst_97 : f32 to vector<8x128xf32>
    %432 = arith.subf %431, %427 : vector<8x128xf32>
    %433 = math.exp %432 : vector<8x128xf32>
    %cst_98 = arith.constant 1.000000e+00 : f32
    %434 = vector.broadcast %cst_98 : f32 to vector<8x128xf32>
    %435 = arith.addf %434, %433 : vector<8x128xf32>
    %436 = arith.mulf %430, %435 : vector<8x128xf32>
    %437 = arith.subf %436, %427 : vector<8x128xf32>
    %cst_99 = arith.constant 0.0370370373 : f32
    %438 = vector.broadcast %cst_99 : f32 to vector<8x128xf32>
    %439 = arith.mulf %438, %437 : vector<8x128xf32>
    %440 = arith.addf %427, %439 : vector<8x128xf32>
    %441 = arith.addf %440, %6 : vector<8x128xf32>
    %442 = math.sin %441 : vector<8x128xf32>
    %443 = arith.mulf %442, %442 : vector<8x128xf32>
    %cst_100 = arith.constant 0.000000e+00 : f32
    %444 = vector.broadcast %cst_100 : f32 to vector<8x128xf32>
    %445 = arith.subf %444, %440 : vector<8x128xf32>
    %446 = math.exp %445 : vector<8x128xf32>
    %cst_101 = arith.constant 1.000000e+00 : f32
    %447 = vector.broadcast %cst_101 : f32 to vector<8x128xf32>
    %448 = arith.addf %447, %446 : vector<8x128xf32>
    %449 = arith.mulf %443, %448 : vector<8x128xf32>
    %450 = arith.subf %449, %440 : vector<8x128xf32>
    %cst_102 = arith.constant 0.111111112 : f32
    %451 = vector.broadcast %cst_102 : f32 to vector<8x128xf32>
    %452 = arith.mulf %451, %450 : vector<8x128xf32>
    %453 = arith.addf %427, %452 : vector<8x128xf32>
    %454 = arith.subf %453, %439 : vector<8x128xf32>
    %455 = arith.addf %454, %6 : vector<8x128xf32>
    %456 = math.sin %455 : vector<8x128xf32>
    %457 = arith.mulf %456, %456 : vector<8x128xf32>
    %cst_103 = arith.constant 0.000000e+00 : f32
    %458 = vector.broadcast %cst_103 : f32 to vector<8x128xf32>
    %459 = arith.subf %458, %454 : vector<8x128xf32>
    %460 = math.exp %459 : vector<8x128xf32>
    %cst_104 = arith.constant 1.000000e+00 : f32
    %461 = vector.broadcast %cst_104 : f32 to vector<8x128xf32>
    %462 = arith.addf %461, %460 : vector<8x128xf32>
    %463 = arith.mulf %457, %462 : vector<8x128xf32>
    %464 = arith.subf %463, %454 : vector<8x128xf32>
    %465 = arith.subf %437, %450 : vector<8x128xf32>
    %466 = arith.addf %465, %464 : vector<8x128xf32>
    %cst_105 = arith.constant 0.111111112 : f32
    %467 = vector.broadcast %cst_105 : f32 to vector<8x128xf32>
    %468 = arith.mulf %467, %466 : vector<8x128xf32>
    %469 = arith.addf %427, %468 : vector<8x128xf32>
    %470 = arith.addf %469, %6 : vector<8x128xf32>
    %471 = math.sin %470 : vector<8x128xf32>
    %472 = arith.mulf %471, %471 : vector<8x128xf32>
    %cst_106 = arith.constant 0.000000e+00 : f32
    %473 = vector.broadcast %cst_106 : f32 to vector<8x128xf32>
    %474 = arith.subf %473, %469 : vector<8x128xf32>
    %475 = math.exp %474 : vector<8x128xf32>
    %cst_107 = arith.constant 1.000000e+00 : f32
    %476 = vector.broadcast %cst_107 : f32 to vector<8x128xf32>
    %477 = arith.addf %476, %475 : vector<8x128xf32>
    %478 = arith.mulf %472, %477 : vector<8x128xf32>
    %479 = arith.subf %478, %469 : vector<8x128xf32>
    %480 = arith.addf %450, %464 : vector<8x128xf32>
    %cst_108 = arith.constant 3.000000e+00 : f32
    %481 = vector.broadcast %cst_108 : f32 to vector<8x128xf32>
    %482 = arith.mulf %481, %480 : vector<8x128xf32>
    %483 = arith.addf %437, %482 : vector<8x128xf32>
    %484 = arith.addf %483, %479 : vector<8x128xf32>
    %cst_109 = arith.constant 0.013888889 : f32
    %485 = vector.broadcast %cst_109 : f32 to vector<8x128xf32>
    %486 = arith.mulf %485, %484 : vector<8x128xf32>
    %487 = arith.addf %427, %486 : vector<8x128xf32>
    %c8_i32 = arith.constant 8 : i32
    %488 = arith.addf %487, %6 : vector<8x128xf32>
    %489 = math.sin %488 : vector<8x128xf32>
    %490 = arith.mulf %489, %489 : vector<8x128xf32>
    %cst_110 = arith.constant 0.000000e+00 : f32
    %491 = vector.broadcast %cst_110 : f32 to vector<8x128xf32>
    %492 = arith.subf %491, %487 : vector<8x128xf32>
    %493 = math.exp %492 : vector<8x128xf32>
    %cst_111 = arith.constant 1.000000e+00 : f32
    %494 = vector.broadcast %cst_111 : f32 to vector<8x128xf32>
    %495 = arith.addf %494, %493 : vector<8x128xf32>
    %496 = arith.mulf %490, %495 : vector<8x128xf32>
    %497 = arith.subf %496, %487 : vector<8x128xf32>
    %cst_112 = arith.constant 0.0370370373 : f32
    %498 = vector.broadcast %cst_112 : f32 to vector<8x128xf32>
    %499 = arith.mulf %498, %497 : vector<8x128xf32>
    %500 = arith.addf %487, %499 : vector<8x128xf32>
    %501 = arith.addf %500, %6 : vector<8x128xf32>
    %502 = math.sin %501 : vector<8x128xf32>
    %503 = arith.mulf %502, %502 : vector<8x128xf32>
    %cst_113 = arith.constant 0.000000e+00 : f32
    %504 = vector.broadcast %cst_113 : f32 to vector<8x128xf32>
    %505 = arith.subf %504, %500 : vector<8x128xf32>
    %506 = math.exp %505 : vector<8x128xf32>
    %cst_114 = arith.constant 1.000000e+00 : f32
    %507 = vector.broadcast %cst_114 : f32 to vector<8x128xf32>
    %508 = arith.addf %507, %506 : vector<8x128xf32>
    %509 = arith.mulf %503, %508 : vector<8x128xf32>
    %510 = arith.subf %509, %500 : vector<8x128xf32>
    %cst_115 = arith.constant 0.111111112 : f32
    %511 = vector.broadcast %cst_115 : f32 to vector<8x128xf32>
    %512 = arith.mulf %511, %510 : vector<8x128xf32>
    %513 = arith.addf %487, %512 : vector<8x128xf32>
    %514 = arith.subf %513, %499 : vector<8x128xf32>
    %515 = arith.addf %514, %6 : vector<8x128xf32>
    %516 = math.sin %515 : vector<8x128xf32>
    %517 = arith.mulf %516, %516 : vector<8x128xf32>
    %cst_116 = arith.constant 0.000000e+00 : f32
    %518 = vector.broadcast %cst_116 : f32 to vector<8x128xf32>
    %519 = arith.subf %518, %514 : vector<8x128xf32>
    %520 = math.exp %519 : vector<8x128xf32>
    %cst_117 = arith.constant 1.000000e+00 : f32
    %521 = vector.broadcast %cst_117 : f32 to vector<8x128xf32>
    %522 = arith.addf %521, %520 : vector<8x128xf32>
    %523 = arith.mulf %517, %522 : vector<8x128xf32>
    %524 = arith.subf %523, %514 : vector<8x128xf32>
    %525 = arith.subf %497, %510 : vector<8x128xf32>
    %526 = arith.addf %525, %524 : vector<8x128xf32>
    %cst_118 = arith.constant 0.111111112 : f32
    %527 = vector.broadcast %cst_118 : f32 to vector<8x128xf32>
    %528 = arith.mulf %527, %526 : vector<8x128xf32>
    %529 = arith.addf %487, %528 : vector<8x128xf32>
    %530 = arith.addf %529, %6 : vector<8x128xf32>
    %531 = math.sin %530 : vector<8x128xf32>
    %532 = arith.mulf %531, %531 : vector<8x128xf32>
    %cst_119 = arith.constant 0.000000e+00 : f32
    %533 = vector.broadcast %cst_119 : f32 to vector<8x128xf32>
    %534 = arith.subf %533, %529 : vector<8x128xf32>
    %535 = math.exp %534 : vector<8x128xf32>
    %cst_120 = arith.constant 1.000000e+00 : f32
    %536 = vector.broadcast %cst_120 : f32 to vector<8x128xf32>
    %537 = arith.addf %536, %535 : vector<8x128xf32>
    %538 = arith.mulf %532, %537 : vector<8x128xf32>
    %539 = arith.subf %538, %529 : vector<8x128xf32>
    %540 = arith.addf %510, %524 : vector<8x128xf32>
    %cst_121 = arith.constant 3.000000e+00 : f32
    %541 = vector.broadcast %cst_121 : f32 to vector<8x128xf32>
    %542 = arith.mulf %541, %540 : vector<8x128xf32>
    %543 = arith.addf %497, %542 : vector<8x128xf32>
    %544 = arith.addf %543, %539 : vector<8x128xf32>
    %cst_122 = arith.constant 0.013888889 : f32
    %545 = vector.broadcast %cst_122 : f32 to vector<8x128xf32>
    %546 = arith.mulf %545, %544 : vector<8x128xf32>
    %547 = arith.addf %487, %546 : vector<8x128xf32>
    %c0_123 = arith.constant 0 : index
    %c0_124 = arith.constant 0 : index
    %548 = vector.load %arg4[%c0_123, %c0_124] : memref<128x128xf32, #tpu.memory_space<vmem>>, vector<128x128xf32>
    %cst_125 = arith.constant dense<0.000000e+00> : vector<8x128xf32>
    %549 = tpu.matmul %547, %548, %cst_125 {dimension_numbers = #tpu.dot_dimension_numbers<[1], [0], [0], [1], [0, 0, 1, 1], [], []>} : vector<8x128xf32>, vector<128x128xf32>, vector<8x128xf32> -> vector<8x128xf32>
    %c0_126 = arith.constant 0 : index
    %c0_127 = arith.constant 0 : index
    %550 = vector.load %arg5[%c0_126, %c0_127] : memref<1x128xf32, #tpu.memory_space<vmem>>, vector<1x128xf32>
    %551 = vector.broadcast %550 : vector<1x128xf32> to vector<8x128xf32>
    %552 = arith.addf %549, %551 : vector<8x128xf32>
    %c0_128 = arith.constant 0 : index
    %c0_129 = arith.constant 0 : index
    %553 = vector.load %arg6[%c0_128, %c0_129] : memref<8x128xf32, #tpu.memory_space<vmem>>, vector<8x128xf32>
    tpu.vector_store %arg6[%c0_128, %c0_129], %552 {strides = array<i32>} : memref<8x128xf32, #tpu.memory_space<vmem>>, vector<8x128xf32>,
    return
  }
  func.func @transform_0(%arg0: i32) -> (i32, i32) {
    %c0_i32 = arith.constant 0 : i32
    %c0_i32_0 = arith.constant 0 : i32
    return %arg0, %c0_i32 : i32, i32
  }
  func.func @transform_1(%arg0: i32) -> (i32, i32) {
    %c0_i32 = arith.constant 0 : i32
    %c0_i32_0 = arith.constant 0 : i32
    %c0_i32_1 = arith.constant 0 : i32
    return %c0_i32, %c0_i32_0 : i32, i32
  }
  func.func @transform_2(%arg0: i32) -> (i32, i32) {
    %c0_i32 = arith.constant 0 : i32
    %c0_i32_0 = arith.constant 0 : i32
    %c0_i32_1 = arith.constant 0 : i32
    return %c0_i32, %c0_i32_0 : i32, i32
  }
  func.func @transform_3(%arg0: i32) -> (i32, i32) {
    %c0_i32 = arith.constant 0 : i32
    %c0_i32_0 = arith.constant 0 : i32
    %c0_i32_1 = arith.constant 0 : i32
    return %c0_i32, %c0_i32_0 : i32, i32
  }
  func.func @transform_4(%arg0: i32) -> (i32, i32) {
    %c0_i32 = arith.constant 0 : i32
    %c0_i32_0 = arith.constant 0 : i32
    %c0_i32_1 = arith.constant 0 : i32
    return %c0_i32, %c0_i32_0 : i32, i32
  }
  func.func @transform_5(%arg0: i32) -> (i32, i32) {
    %c0_i32 = arith.constant 0 : i32
    %c0_i32_0 = arith.constant 0 : i32
    return %arg0, %c0_i32 : i32, i32
  }
}

</mosaic_0001>

<bundles_post_ra>
// kernel: tpu_custom_call.1
= control target key start
LH: loop header
LB: loop body
LE: loop exit
PB: predicated region body
PF: predicated region fallthrough
CT: control target
= control target key end

     0   :  { %10 = vsyncpa [#allocation3], 0  ;;  %s6764_s0 = inlined_call_operand.hbm [shape: f32[8,64], index: 0, kind: input, shape index: {}]   ;;  %s6765_s1 = inlined_call_operand.hbm [shape: f32[64,128], index: 1, kind: input, shape index: {}]   ;;  %s6766_s2 = inlined_call_operand.vmem [shape: f32[1,128], index: 2, kind: input, shape index: {}]   ;;  %s6767_s3 = inlined_call_operand.hbm [shape: f32[128,128], index: 3, kind: input, shape index: {}]   ;;  %s6768_s4 = inlined_call_operand.vmem [shape: f32[1,128], index: 4, kind: input, shape index: {}]   ;;  %s6769_s5 = inlined_call_operand.hbm [shape: f32[8,128], index: 5, kind: output, shape index: {}]  }
   0x1   :  { %11 = vsyncpa [#allocation6], 0 }
   0x2   :  { %12 = vsyncpa [#allocation4], 0  ;;  %s5110_s18 = smov [#allocation5]  }
   0x3   :  { %s28_s19 = sshll.u32 %s5110_s18, 4  ;;  %s29_s19 = int_to_ptr.vmem [resolvable:$true] %s28_s19 }
   0x4   :  { %s5032_s20 = scalar_lea.vmem %s29_s19, 1024  ;;  %p5037_p1 = scmp.lt.s32.totalorder %s29_s19, %s29_s19 }
   0x5   :  { %p5033_p0 = scmp.ne.s32.totalorder %s29_s19, %s5032_s20  ;;  %p5038_p2 = scmp.lt.s32.totalorder %s5032_s20, %s5032_s20 }
   0x7   :  { %p5039_p3 = por %p5038_p2, %p5037_p1 }
   0x9   :  { %p5040_p4 = pnand %p5039_p3, %p5033_p0 }
   0xb   :  { %5043 = shalt.err (!%p5040_p4)
}
   0xc   :  { %s5111_s21 = smov 128   ;;  %s5112_s22 = smov 8  }
   0xd   :  { %34 = dma.hbm_to_vmem [thread:$0]  %s6765_s1, 1024, %s29_s19, [#allocation6], %s5111_s21, %s5111_s21, %s5112_s22  }
   0xe   :  { %s5113_s25 = smov [#allocation2]   ;;  %s5114_s27 = smov [#allocation7]  }
   0xf   :  { %s19_s26 = sshll.u32 %s5113_s25, 4  ;;  %s42_s28 = sshll.u32 %s5114_s27, 4  ;;  %s20_s26 = int_to_ptr.vmem [resolvable:$true] %s19_s26  ;;  %s43_s28 = int_to_ptr.vmem [resolvable:$true] %s42_s28 }
  0x10   :  { %s5052_s29 = scalar_lea.vmem %s20_s26, 128  ;;  %p5057_p6 = scmp.lt.s32.totalorder %s20_s26, %s20_s26 }
  0x11   :  { %p5053_p5 = scmp.ne.s32.totalorder %s20_s26, %s5052_s29  ;;  %p5058_p7 = scmp.lt.s32.totalorder %s5052_s29, %s5052_s29 }
  0x13   :  { %p5059_p8 = por %p5058_p7, %p5057_p6 }
  0x15   :  { %p5060_p9 = pnand %p5059_p8, %p5053_p5 }
  0x17   :  { %5063 = shalt.err (!%p5060_p9)
}
  0x18   :  { %22 = dma.hbm_to_vmem [thread:$0]  %s6764_s0, 128, %s20_s26, [#allocation3]  }
  0x19   :  { %s5072_s7 = scalar_lea.vmem %s43_s28, 2048  ;;  %p5077_p11 = scmp.lt.s32.totalorder %s43_s28, %s43_s28 }
  0x1a   :  { %p5073_p10 = scmp.ne.s32.totalorder %s43_s28, %s5072_s7  ;;  %p5078_p12 = scmp.lt.s32.totalorder %s5072_s7, %s5072_s7 }
  0x1c   :  { %p5079_p13 = por %p5078_p12, %p5077_p11 }
  0x1e   :  { %p5080_p0 = pnand %p5079_p13, %p5073_p10 }
  0x20   :  { %5083 = shalt.err (!%p5080_p0)
}
  0x21   :  { %48 = dma.hbm_to_vmem [thread:$0]  %s6767_s3, 2048, %s43_s28, [#allocation6], %s5111_s21, %s5111_s21, %s5112_s22  }
  0x22   :  { %5104 = dma.done.wait [#allocation3], 128  }
  0x23   :  { %5105 = vsyncadd [#allocation3], 4294967168 }
  0x24   :  { %5106 = dma.done.wait [#allocation6], 3072  }
  0x25   :  { %5107 = vsyncadd [#allocation6], 4294964224  ;;  %v5115_v0 = vmov 0.0   ;;  %vm5116_vm0 = vmmov 0   ;;  %v67_v1 = vld [vmem:[#allocation5 + $0x30] sm:$0xff]  ;;  %v68_v2 = vld [vmem:[#allocation5 + $0x38] sm:$0xff] }
  0x26   :  { %4596 = vmatprep.subr.mxu0 %v5115_v0  ;;  %4612 = vmatprep.mubr.msk.f32.mxu0 %vm5116_vm0, %v5115_v0  ;;  %v66_v3 = vld [vmem:[#allocation5 + $0x28] sm:$0xff]  ;;  %v65_v4 = vld [vmem:[#allocation5 + $0x20] sm:$0xff]  ;;  %v64_v5 = vld [vmem:[#allocation5 + $0x18] sm:$0xff]  ;;  %vm76_vm1 = vcmask 523264   ;;  %v5117_v25 = vmov 683565275  }
  0x27   :  { %4615 = vmatprep.subr.mxu1 %v5115_v0  ;;  %4647 = vmatprep.mubr.msk.f32.mxu1 %vm5116_vm0, %v5115_v0  ;;  %v63_v6 = vld [vmem:[#allocation5 + $0x10] sm:$0xff]  ;;  %v62_v7 = vld [vmem:[#allocation5 + $0x8] sm:$0xff]  ;;  %v61_v8 = vld [vmem:[#allocation5] sm:$0xff]  ;;  %v5118_v27 = vmov 2475754826   ;;  %s5123_s10 = smov [#allocation8]  }
  0x28   :  { %4597 = vmatpush3.msra.mxu0 %v68_v2  ;;  %v60_v9 = vld [vmem:[#allocation2] sm:$0xff]  ;;  %v5119_v30 = vmov 2131351028   ;;  %v5120_v33 = vmov 2102212464   ;;  %s4413_s11 = sshll.u32 %s5123_s10, 4  ;;  %s4414_s11 = int_to_ptr.vmem [resolvable:$true] %s4413_s11 }
  0x29   :  { %4598 = vmatprep.subr.mxu0 %v5115_v0  ;;  %v4423_v10 = vld [vmem:[%s6766_s2] ss:$0 sm:$0xff]  ;;  %v5121_v36 = vmov 920167782   ;;  %v5122_v39 = vmov 1326507024   ;;  %p5089_p2 = scmp.lt.s32.totalorder %s4414_s11, %s4414_s11 }
  0x2a   :  { %4599 = vmatpush3.msra.mxu0 %v67_v1  ;;  %s5084_s12 = scalar_lea.vmem %s4414_s11, 128 }
  0x2b   :  { %4600 = vmatprep.subr.mxu0 %v5115_v0  ;;  %p5085_p1 = scmp.ne.s32.totalorder %s4414_s11, %s5084_s12  ;;  %p5090_p3 = scmp.lt.s32.totalorder %s5084_s12, %s5084_s12 }
  0x2c   :  { %4601 = vmatpush3.msra.mxu0 %v66_v3 }
  0x2d   :  { %4602 = vmatprep.subr.mxu0 %v5115_v0  ;;  %p5091_p4 = por %p5090_p3, %p5089_p2 }
  0x2e   :  { %4603 = vmatpush3.msra.mxu0 %v65_v4 }
  0x2f   :  { %4604 = vmatprep.subr.mxu0 %v5115_v0  ;;  %p5092_p5 = pnand %p5091_p4, %p5085_p1 }
  0x30   :  { %4605 = vmatpush3.msra.mxu0 %v64_v5 }
  0x31   :  { %4606 = vmatprep.subr.mxu0 %v5115_v0 }
  0x32   :  { %4607 = vmatpush3.msra.mxu0 %v63_v6 }
  0x33   :  { %4608 = vmatprep.subr.mxu0 %v5115_v0 }
  0x34   :  { %4609 = vmatpush3.msra.mxu0 %v62_v7 }
  0x35   :  { %4610 = vmatprep.subr.mxu0 %v5115_v0 }
  0x36   :  { %4611 = vmatpush3.msra.mxu0 %v61_v8 }
  0x37   :  { %4613 = vmatmul.mubr.msk.f32.vlgmr.msra.gmra.mxu0 %vm76_vm1, %v60_v9 }
  0xf7   :  { %v146_v11 = vpop.f32.mrf.mxu0 }
  0xf8   :  { %v147_v12 = vadd.f32 %v4423_v10, %v146_v11 }
  0xf9   :  { %v4614_v13 = vpop.f32.mrf.mxu0 }
  0xfa   :  { %4808 = vtanh.f32 %v147_v12 }
 0x107   :  { %v5177_v14 = vpop.eup %4808 }
 0x108   :  { %v155_v15 = vand.u32 2139095040, %v5177_v14  ;;  %v152_v19 = vand.u32 2147483647, %v5177_v14  ;;  %vm154_vm9 = vcmp.lt.s32.totalorder %v5177_v14, 0  ;;  %vm244_vm14 = vweird.f32 %v5177_v14 }
 0x10a   :  { %v156_v16 = vshrl.u32 %v155_v15, 23  ;;  %v159_v22 = vand.u32 8388607, %v152_v19  ;;  %vm153_vm10 = vcmp.le.f32.partialorder %v152_v19, 0.7853982 }
 0x10c   :  { %v4425_v17 = vadd.s32 4294967169, %v156_v16  ;;  %v160_v41 = vor.u32 8388608, %v159_v22 }
 0x10e   :  { %v162_v18 = vadd.s32 1, %v4425_v17  ;;  %v200_v55 = vshll.u32 %v160_v41, 8 }
 0x110   :  { %vm163_vm2 = vcmp.gt.s32.totalorder %v162_v18, 0 }
 0x111   :  { %v164_v20 = vsel %vm163_vm2, %v162_v18, 0 }
 0x112   :  { %v166_v21 = vand.u32 31, %v164_v20  ;;  %v165_v24 = vshrl.u32 %v164_v20, 5 }
 0x114   :  { %v167_v23 = vsub.s32 32, %v166_v21  ;;  %v169_v26 = vshll.u32 %v5117_v25, %v166_v21  ;;  %v172_v28 = vshll.u32 %v5118_v27, %v166_v21  ;;  %v175_v32 = vshll.u32 %v5119_v30, %v166_v21 }
 0x115   :  { %v178_v35 = vshll.u32 %v5120_v33, %v166_v21  ;;  %v181_v38 = vshll.u32 %v5121_v36, %v166_v21  ;;  %vm184_vm3 = vcmp.lt.s32.totalorder %v165_v24, 1  ;;  %vm187_vm4 = vcmp.lt.s32.totalorder %v165_v24, 4 }
 0x116   :  { %v170_v29 = vshrl.u32 %v5118_v27, %v167_v23  ;;  %v173_v31 = vshrl.u32 %v5119_v30, %v167_v23  ;;  %v176_v34 = vshrl.u32 %v5120_v33, %v167_v23  ;;  %v179_v37 = vshrl.u32 %v5121_v36, %v167_v23 }
 0x117   :  { %v182_v40 = vshrl.u32 %v5122_v39, %v167_v23  ;;  %v168_v50 = vshrl.u32 %v5117_v25, %v167_v23  ;;  %vm186_vm5 = vcmp.lt.s32.totalorder %v165_v24, 3  ;;  %vm185_vm6 = vcmp.lt.s32.totalorder %v165_v24, 2 }
 0x118   :  { %v171_v42 = vor.u32 %v170_v29, %v169_v26  ;;  %v174_v43 = vor.u32 %v173_v31, %v172_v28  ;;  %v177_v44 = vor.u32 %v176_v34, %v175_v32  ;;  %v180_v45 = vor.u32 %v179_v37, %v178_v35 }
 0x119   :  { %v183_v46 = vor.u32 %v182_v40, %v181_v38 }
 0x11a   :  { %v189_v47 = vsel %vm187_vm4, %v177_v44, 2102212464  ;;  %v192_v48 = vsel %vm184_vm3, %v171_v42, %v174_v43  ;;  %v196_v49 = vsel %vm184_vm3, %v174_v43, %v177_v44  ;;  %v193_v51 = vsel %vm187_vm4, %v180_v45, 920167782 }
 0x11b   :  { %v197_v52 = vsel %vm187_vm4, %v183_v46, 1326507024  ;;  %v194_v53 = vsel %vm186_vm5, %v177_v44, %v193_v51  ;;  %v188_v56 = vsel %vm184_vm3, %v168_v50, %v171_v42  ;;  %v190_v57 = vsel %vm186_vm5, %v174_v43, %v189_v47 }
 0x11c   :  { %v198_v54 = vsel %vm186_vm5, %v180_v45, %v197_v52  ;;  %v195_v58 = vsel %vm185_vm6, %v192_v48, %v194_v53  ;;  %v191_v1 = vsel %vm185_vm6, %v188_v56, %v190_v57 }
 0x11d   :  { %v199_v59 = vsel %vm185_vm6, %v196_v49, %v198_v54  ;;  %v5197_v62 = vmul.u32.u64.low %v200_v55, %v195_v58  ;;  %v5198_v63 = vmul.u32.u64.high %v200_v55, %v195_v58, %v5197_v62  ;;  %v207_v3 = vmul.u32 %v200_v55, %v191_v1 }
 0x11e   :  { %v5194_v60 = vmul.u32.u64.low %v200_v55, %v199_v59  ;;  %v5195_v61 = vmul.u32.u64.high %v200_v55, %v199_v59, %v5194_v60 }
 0x11f   :  { %v210_v2 = vadd.s32 1, %v5198_v63 }
 0x120   :  { %vm209_vm7 = vc.u32 %v5195_v61, %v5197_v62  ;;  %v208_v16 = vadd.s32 %v5197_v62, %v5195_v61 }
 0x121   :  { %v211_v4 = vsel %vm209_vm7, %v210_v2, %v5198_v63 }
 0x122   :  { %v212_v5 = vadd.s32 %v211_v4, %v207_v3 }
 0x124   :  { %v213_v6 = vadd.s32 536870912, %v212_v5 }
 0x126   :  { %v214_v7 = vshrl.u32 %v213_v6, 30 }
 0x128   :  { %v215_v8 = vshll.u32 %v214_v7, 30  ;;  %v238_v34 = vsub.s32 4, %v214_v7 }
 0x12a   :  { %v216_v9 = vsub.s32 %v212_v5, %v215_v8  ;;  %v239_v38 = vsel %vm154_vm9, %v238_v34, %v214_v7 }
 0x12b   :  { %v241_v40 = vsel %vm153_vm10, 0, %v239_v38 }
 0x12c   :  { %v218_v10 = vsub.s32 0, %v216_v9  ;;  %v245_v41 = vadd.s32 3, %v241_v40 }
 0x12e   :  { %v4426_v11 = vmin.u32 %v218_v10, %v216_v9  ;;  %v246_v42 = vand.u32 3, %v245_v41 }
 0x130   :  { %v220_v12 = vclz %v4426_v11  ;;  %vm251_vm11 = vcmp.eq.s32.totalorder %v246_v42, 2  ;;  %vm248_vm12 = vcmp.eq.s32.totalorder %v246_v42, 0  ;;  %vm247_vm13 = vcmp.lt.s32.totalorder %v246_v42, 2 }
 0x132   :  { %v4427_v13 = vadd.s32 4294967294, %v220_v12 }
 0x134   :  { %vm4428_vm8 = vcmp.lt.s32.totalorder %v4427_v13, 0 }
 0x135   :  { %v223_v15 = vsel %vm4428_vm8, 0, %v4427_v13 }
 0x136   :  { %v224_v17 = vsub.s32 32, %v223_v15  ;;  %v228_v18 = vsub.s32 4294967266, %v223_v15  ;;  %v225_v20 = vshll.u32 %v216_v9, %v223_v15 }
 0x138   :  { %v226_v21 = vshrl.u32 %v208_v16, %v224_v17  ;;  %v229_v22 = vadd.s32 127, %v228_v18 }
 0x13a   :  { %v227_v23 = vor.u32 %v226_v21, %v225_v20  ;;  %v230_v24 = vshll.u32 %v229_v22, 23 }
 0x13c   :  { %v231_v26 = vor.u32 4788187, %v230_v24  ;;  %v234_v29 = vcvt.s32.f32 %v227_v23 }
 0x13e   :  { %v232_v28 = vand.u32 2147483647, %v231_v26 }
 0x140   :  { %v235_v31 = vmul.f32 %v234_v29, %v232_v28 }
 0x142   :  { %v236_v32 = vxor.u32 2147483648, %v235_v31 }
 0x144   :  { %v237_v35 = vsel %vm154_vm9, %v236_v32, %v235_v31 }
 0x145   :  { %v240_v37 = vsel %vm153_vm10, %v5177_v14, %v237_v35 }
 0x146   :  { %4810 = vcosq.f32 %v240_v37 }
 0x147   :  { %4812 = vsinq.f32 %v240_v37 }
 0x153   :  { %v4811_v43 = vpop.eup %4810 }
 0x154   :  { %v4813_v44 = vpop.eup %4812  ;;  %v252_v45 = vxor.u32 2147483648, %v4811_v43 }
 0x155   :  { %v249_v46 = vxor.u32 2147483648, %v4813_v44 }
 0x156   :  { %v253_v47 = vsel %vm251_vm11, %v252_v45, %v4813_v44 }
 0x157   :  { %v250_v48 = vsel %vm248_vm12, %v4811_v43, %v249_v46 }
 0x158   :  { %v254_v19 = vsel %vm247_vm13, %v250_v48, %v253_v47 }
 0x159   :  { %v255_v49 = vsel %vm244_vm14, nan, %v254_v19 }
 0x15a   :  { %v256_v50 = vmul.f32 %v255_v49, %v255_v49 }
 0x15c   :  { %v5209_v51 = vmul.f32 2.0, %v256_v50 }
 0x15e   :  { %v5212_v52 = vmul.f32 0.037037037, %v5209_v51 }
 0x160   :  { %v5216_v53 = vadd.f32 %v5177_v14, %v5212_v52 }
 0x162   :  { %v264_v54 = vand.u32 2139095040, %v5216_v53  ;;  %v261_v58 = vand.u32 2147483647, %v5216_v53  ;;  %vm263_vm6 = vcmp.lt.s32.totalorder %v5216_v53, 0  ;;  %vm353_vm11 = vweird.f32 %v5216_v53 }
 0x164   :  { %v265_v55 = vshrl.u32 %v264_v54, 23  ;;  %v268_v61 = vand.u32 8388607, %v261_v58  ;;  %vm262_vm7 = vcmp.le.f32.partialorder %v261_v58, 0.7853982 }
 0x166   :  { %v4429_v56 = vadd.s32 4294967169, %v265_v55  ;;  %v269_v11 = vor.u32 8388608, %v268_v61 }
 0x168   :  { %v271_v57 = vadd.s32 1, %v4429_v56  ;;  %v309_v29 = vshll.u32 %v269_v11, 8 }
 0x16a   :  { %vm272_vm15 = vcmp.gt.s32.totalorder %v271_v57, 0 }
 0x16b   :  { %v273_v59 = vsel %vm272_vm15, %v271_v57, 0 }
 0x16c   :  { %v275_v60 = vand.u32 31, %v273_v59  ;;  %v274_v63 = vshrl.u32 %v273_v59, 5 }
 0x16e   :  { %v276_v62 = vsub.s32 32, %v275_v60  ;;  %v278_v1 = vshll.u32 %v5117_v25, %v275_v60  ;;  %v281_v2 = vshll.u32 %v5118_v27, %v275_v60  ;;  %v284_v5 = vshll.u32 %v5119_v30, %v275_v60 }
 0x16f   :  { %v287_v7 = vshll.u32 %v5120_v33, %v275_v60  ;;  %v290_v9 = vshll.u32 %v5121_v36, %v275_v60  ;;  %vm293_vm0 = vcmp.lt.s32.totalorder %v274_v63, 1  ;;  %vm296_vm1 = vcmp.lt.s32.totalorder %v274_v63, 4 }
 0x170   :  { %v279_v3 = vshrl.u32 %v5118_v27, %v276_v62  ;;  %v282_v4 = vshrl.u32 %v5119_v30, %v276_v62  ;;  %v285_v6 = vshrl.u32 %v5120_v33, %v276_v62  ;;  %v288_v8 = vshrl.u32 %v5121_v36, %v276_v62 }
 0x171   :  { %v291_v10 = vshrl.u32 %v5122_v39, %v276_v62  ;;  %v277_v22 = vshrl.u32 %v5117_v25, %v276_v62  ;;  %vm295_vm2 = vcmp.lt.s32.totalorder %v274_v63, 3  ;;  %vm294_vm3 = vcmp.lt.s32.totalorder %v274_v63, 2 }
 0x172   :  { %v280_v12 = vor.u32 %v279_v3, %v278_v1  ;;  %v283_v13 = vor.u32 %v282_v4, %v281_v2  ;;  %v286_v15 = vor.u32 %v285_v6, %v284_v5  ;;  %v289_v16 = vor.u32 %v288_v8, %v287_v7 }
 0x173   :  { %v292_v17 = vor.u32 %v291_v10, %v290_v9  ;;  %v366_v9 = vsub.f32 0.0, %v5212_v52 }
 0x174   :  { %v298_v18 = vsel %vm296_vm1, %v286_v15, 2102212464  ;;  %v301_v20 = vsel %vm293_vm0, %v280_v12, %v283_v13  ;;  %v305_v21 = vsel %vm293_vm0, %v283_v13, %v286_v15  ;;  %v302_v23 = vsel %vm296_vm1, %v289_v16, 920167782 }
 0x175   :  { %v306_v24 = vsel %vm296_vm1, %v292_v17, 1326507024  ;;  %v303_v26 = vsel %vm295_vm2, %v286_v15, %v302_v23  ;;  %v297_v31 = vsel %vm293_vm0, %v277_v22, %v280_v12  ;;  %v299_v32 = vsel %vm295_vm2, %v283_v13, %v298_v18 }
 0x176   :  { %v307_v28 = vsel %vm295_vm2, %v289_v16, %v306_v24  ;;  %v304_v34 = vsel %vm294_vm3, %v301_v20, %v303_v26  ;;  %v300_v42 = vsel %vm294_vm3, %v297_v31, %v299_v32  ;;  %v367_v13 = vmul.f32 1.442695, %v366_v9 }
 0x177   :  { %v308_v35 = vsel %vm294_vm3, %v305_v21, %v307_v28  ;;  %v5236_v40 = vmul.u32.u64.low %v309_v29, %v304_v34  ;;  %v5237_v41 = vmul.u32.u64.high %v309_v29, %v304_v34, %v5236_v40  ;;  %v316_v44 = vmul.u32 %v309_v29, %v300_v42 }
 0x178   :  { %v5233_v37 = vmul.u32.u64.low %v309_v29, %v308_v35  ;;  %v5234_v38 = vmul.u32.u64.high %v309_v29, %v308_v35, %v5233_v37 }
 0x179   :  { %v319_v43 = vadd.s32 1, %v5237_v41 }
 0x17a   :  { %vm318_vm4 = vc.u32 %v5234_v38, %v5236_v40  ;;  %v317_v59 = vadd.s32 %v5236_v40, %v5234_v38 }
 0x17b   :  { %v320_v45 = vsel %vm318_vm4, %v319_v43, %v5237_v41 }
 0x17c   :  { %v321_v46 = vadd.s32 %v320_v45, %v316_v44 }
 0x17e   :  { %v322_v47 = vadd.s32 536870912, %v321_v46 }
 0x180   :  { %v323_v48 = vshrl.u32 %v322_v47, 30 }
 0x182   :  { %v324_v19 = vshll.u32 %v323_v48, 30  ;;  %v347_v10 = vsub.s32 4, %v323_v48 }
 0x184   :  { %v325_v49 = vsub.s32 %v321_v46, %v324_v19  ;;  %v348_v15 = vsel %vm263_vm6, %v347_v10, %v323_v48 }
 0x185   :  { %v350_v16 = vsel %vm262_vm7, 0, %v348_v15 }
 0x186   :  { %v327_v50 = vsub.s32 0, %v325_v49  ;;  %v354_v17 = vadd.s32 3, %v350_v16 }
 0x188   :  { %v4430_v54 = vmin.u32 %v327_v50, %v325_v49  ;;  %v355_v18 = vand.u32 3, %v354_v17 }
 0x18a   :  { %v329_v55 = vclz %v4430_v54  ;;  %vm360_vm8 = vcmp.eq.s32.totalorder %v355_v18, 2  ;;  %vm357_vm9 = vcmp.eq.s32.totalorder %v355_v18, 0  ;;  %vm356_vm10 = vcmp.lt.s32.totalorder %v355_v18, 2 }
 0x18c   :  { %v4431_v56 = vadd.s32 4294967294, %v329_v55 }
 0x18e   :  { %vm4432_vm5 = vcmp.lt.s32.totalorder %v4431_v56, 0 }
 0x18f   :  { %v332_v57 = vsel %vm4432_vm5, 0, %v4431_v56 }
 0x190   :  { %v333_v60 = vsub.s32 32, %v332_v57  ;;  %v337_v61 = vsub.s32 4294967266, %v332_v57  ;;  %v334_v62 = vshll.u32 %v325_v49, %v332_v57 }
 0x192   :  { %v335_v63 = vshrl.u32 %v317_v59, %v333_v60  ;;  %v338_v1 = vadd.s32 127, %v337_v61 }
 0x194   :  { %v336_v2 = vor.u32 %v335_v63, %v334_v62  ;;  %v339_v3 = vshll.u32 %v338_v1, 23 }
 0x196   :  { %v340_v4 = vor.u32 4788187, %v339_v3  ;;  %v343_v6 = vcvt.s32.f32 %v336_v2 }
 0x198   :  { %v341_v5 = vand.u32 2147483647, %v340_v4 }
 0x19a   :  { %v344_v7 = vmul.f32 %v343_v6, %v341_v5 }
 0x19c   :  { %v345_v8 = vxor.u32 2147483648, %v344_v7 }
 0x19e   :  { %v346_v11 = vsel %vm263_vm6, %v345_v8, %v344_v7 }
 0x19f   :  { %v349_v12 = vsel %vm262_vm7, %v5216_v53, %v346_v11 }
 0x1a0   :  { %4814 = vcosq.f32 %v349_v12 }
 0x1a1   :  { %4816 = vsinq.f32 %v349_v12 }
 0x1a2   :  { %4818 = vpow2.f32 %v367_v13 }
 0x1ad   :  { %v4815_v20 = vpop.eup %4814 }
 0x1ae   :  { %v4817_v21 = vpop.eup %4816  ;;  %v361_v22 = vxor.u32 2147483648, %v4815_v20 }
 0x1af   :  { %v358_v23 = vxor.u32 2147483648, %v4817_v21  ;;  %v4819_v26 = vpop.eup %4818 }
 0x1b0   :  { %v362_v24 = vsel %vm360_vm8, %v361_v22, %v4817_v21  ;;  %v369_v32 = vadd.f32 1.0, %v4819_v26 }
 0x1b1   :  { %v359_v58 = vsel %vm357_vm9, %v4815_v20, %v358_v23 }
 0x1b2   :  { %v363_v28 = vsel %vm356_vm10, %v359_v58, %v362_v24 }
 0x1b3   :  { %v364_v29 = vsel %vm353_vm11, nan, %v363_v28 }
 0x1b4   :  { %v365_v31 = vmul.f32 %v364_v29, %v364_v29 }
 0x1b6   :  { %v370_v34 = vmul.f32 %v369_v32, %v365_v31 }
 0x1b8   :  { %v5250_v35 = vsub.f32 %v370_v34, %v5212_v52 }
 0x1ba   :  { %v372_v37 = vmul.f32 0.11111111, %v5250_v35 }
 0x1bc   :  { %v5254_v38 = vsub.f32 %v372_v37, %v5212_v52 }
 0x1be   :  { %v5258_v40 = vadd.f32 %v5177_v14, %v5254_v38 }
 0x1c0   :  { %v379_v41 = vand.u32 2139095040, %v5258_v40  ;;  %v376_v44 = vand.u32 2147483647, %v5258_v40  ;;  %vm378_vm3 = vcmp.lt.s32.totalorder %v5258_v40, 0  ;;  %vm468_vm8 = vweird.f32 %v5258_v40 }
 0x1c2   :  { %v380_v53 = vshrl.u32 %v379_v41, 23  ;;  %v383_v47 = vand.u32 8388607, %v376_v44  ;;  %vm377_vm4 = vcmp.le.f32.partialorder %v376_v44, 0.7853982 }
 0x1c4   :  { %v4433_v42 = vadd.s32 4294967169, %v380_v53  ;;  %v384_v62 = vor.u32 8388608, %v383_v47 }
 0x1c6   :  { %v386_v43 = vadd.s32 1, %v4433_v42  ;;  %v424_v13 = vshll.u32 %v384_v62, 8 }
 0x1c8   :  { %vm387_vm12 = vcmp.gt.s32.totalorder %v386_v43, 0 }
 0x1c9   :  { %v388_v45 = vsel %vm387_vm12, %v386_v43, 0 }
 0x1ca   :  { %v390_v46 = vand.u32 31, %v388_v45  ;;  %v389_v52 = vshrl.u32 %v388_v45, 5 }
 0x1cc   :  { %v391_v48 = vsub.s32 32, %v390_v46  ;;  %v393_v19 = vshll.u32 %v5117_v25, %v390_v46  ;;  %v396_v49 = vshll.u32 %v5118_v27, %v390_v46  ;;  %v399_v55 = vshll.u32 %v5119_v30, %v390_v46 }
 0x1cd   :  { %v402_v57 = vshll.u32 %v5120_v33, %v390_v46  ;;  %v405_v60 = vshll.u32 %v5121_v36, %v390_v46  ;;  %vm408_vm13 = vcmp.lt.s32.totalorder %v389_v52, 1  ;;  %vm411_vm14 = vcmp.lt.s32.totalorder %v389_v52, 4 }
 0x1ce   :  { %v394_v50 = vshrl.u32 %v5118_v27, %v391_v48  ;;  %v397_v54 = vshrl.u32 %v5119_v30, %v391_v48  ;;  %v400_v56 = vshrl.u32 %v5120_v33, %v391_v48  ;;  %v403_v59 = vshrl.u32 %v5121_v36, %v391_v48 }
 0x1cf   :  { %v406_v61 = vshrl.u32 %v5122_v39, %v391_v48  ;;  %v392_v8 = vshrl.u32 %v5117_v25, %v391_v48  ;;  %vm410_vm15 = vcmp.lt.s32.totalorder %v389_v52, 3  ;;  %vm409_vm0 = vcmp.lt.s32.totalorder %v389_v52, 2 }
 0x1d0   :  { %v395_v63 = vor.u32 %v394_v50, %v393_v19  ;;  %v398_v1 = vor.u32 %v397_v54, %v396_v49  ;;  %v401_v2 = vor.u32 %v400_v56, %v399_v55  ;;  %v404_v3 = vor.u32 %v403_v59, %v402_v57 }
 0x1d1   :  { %v407_v4 = vor.u32 %v406_v61, %v405_v60  ;;  %v481_v61 = vsub.f32 0.0, %v5254_v38 }
 0x1d2   :  { %v413_v5 = vsel %vm411_vm14, %v401_v2, 2102212464  ;;  %v416_v6 = vsel %vm408_vm13, %v395_v63, %v398_v1  ;;  %v420_v7 = vsel %vm408_vm13, %v398_v1, %v401_v2  ;;  %v417_v9 = vsel %vm411_vm14, %v404_v3, 920167782 }
 0x1d3   :  { %v421_v10 = vsel %vm411_vm14, %v407_v4, 1326507024  ;;  %v418_v11 = vsel %vm410_vm15, %v401_v2, %v417_v9  ;;  %v412_v15 = vsel %vm408_vm13, %v392_v8, %v395_v63  ;;  %v414_v16 = vsel %vm410_vm15, %v398_v1, %v413_v5 }
 0x1d4   :  { %v422_v12 = vsel %vm410_vm15, %v404_v3, %v421_v10  ;;  %v419_v17 = vsel %vm409_vm0, %v416_v6, %v418_v11  ;;  %v415_v24 = vsel %vm409_vm0, %v412_v15, %v414_v16  ;;  %v482_v2 = vmul.f32 1.442695, %v481_v61 }
 0x1d5   :  { %v423_v18 = vsel %vm409_vm0, %v420_v7, %v422_v12  ;;  %v5278_v22 = vmul.u32.u64.low %v424_v13, %v419_v17  ;;  %v5279_v23 = vmul.u32.u64.high %v424_v13, %v419_v17, %v5278_v22  ;;  %v431_v58 = vmul.u32 %v424_v13, %v415_v24 }
 0x1d6   :  { %v5275_v20 = vmul.u32.u64.low %v424_v13, %v423_v18  ;;  %v5276_v21 = vmul.u32.u64.high %v424_v13, %v423_v18, %v5275_v20 }
 0x1d7   :  { %v434_v26 = vadd.s32 1, %v5279_v23 }
 0x1d8   :  { %vm433_vm1 = vc.u32 %v5276_v21, %v5278_v22  ;;  %v432_v46 = vadd.s32 %v5278_v22, %v5276_v21  ;;  %v487_v21 = vsub.f32 %v5209_v51, %v5250_v35 }
 0x1d9   :  { %v435_v28 = vsel %vm433_vm1, %v434_v26, %v5279_v23 }
 0x1da   :  { %v436_v29 = vadd.s32 %v435_v28, %v431_v58 }
 0x1dc   :  { %v437_v31 = vadd.s32 536870912, %v436_v29 }
 0x1de   :  { %v438_v32 = vshrl.u32 %v437_v31, 30 }
 0x1e0   :  { %v439_v34 = vshll.u32 %v438_v32, 30  ;;  %v462_v62 = vsub.s32 4, %v438_v32 }
 0x1e2   :  { %v440_v37 = vsub.s32 %v436_v29, %v439_v34  ;;  %v463_v3 = vsel %vm378_vm3, %v462_v62, %v438_v32 }
 0x1e3   :  { %v465_v4 = vsel %vm377_vm4, 0, %v463_v3 }
 0x1e4   :  { %v442_v41 = vsub.s32 0, %v440_v37  ;;  %v469_v5 = vadd.s32 3, %v465_v4 }
 0x1e6   :  { %v4434_v53 = vmin.u32 %v442_v41, %v440_v37  ;;  %v470_v6 = vand.u32 3, %v469_v5 }
 0x1e8   :  { %v444_v42 = vclz %v4434_v53  ;;  %vm475_vm5 = vcmp.eq.s32.totalorder %v470_v6, 2  ;;  %vm472_vm6 = vcmp.eq.s32.totalorder %v470_v6, 0  ;;  %vm471_vm7 = vcmp.lt.s32.totalorder %v470_v6, 2 }
 0x1ea   :  { %v4435_v43 = vadd.s32 4294967294, %v444_v42 }
 0x1ec   :  { %vm4436_vm2 = vcmp.lt.s32.totalorder %v4435_v43, 0 }
 0x1ed   :  { %v447_v45 = vsel %vm4436_vm2, 0, %v4435_v43 }
 0x1ee   :  { %v448_v47 = vsub.s32 32, %v447_v45  ;;  %v452_v48 = vsub.s32 4294967266, %v447_v45  ;;  %v449_v52 = vshll.u32 %v440_v37, %v447_v45 }
 0x1f0   :  { %v450_v19 = vshrl.u32 %v432_v46, %v448_v47  ;;  %v453_v49 = vadd.s32 127, %v452_v48 }
 0x1f2   :  { %v451_v50 = vor.u32 %v450_v19, %v449_v52  ;;  %v454_v54 = vshll.u32 %v453_v49, 23 }
 0x1f4   :  { %v455_v55 = vor.u32 4788187, %v454_v54  ;;  %v458_v57 = vcvt.s32.f32 %v451_v50 }
 0x1f6   :  { %v456_v56 = vand.u32 2147483647, %v455_v55 }
 0x1f8   :  { %v459_v59 = vmul.f32 %v458_v57, %v456_v56 }
 0x1fa   :  { %v460_v60 = vxor.u32 2147483648, %v459_v59 }
 0x1fc   :  { %v461_v63 = vsel %vm378_vm3, %v460_v60, %v459_v59 }
 0x1fd   :  { %v464_v1 = vsel %vm377_vm4, %v5258_v40, %v461_v63 }
 0x1fe   :  { %4820 = vcosq.f32 %v464_v1 }
 0x1ff   :  { %4822 = vsinq.f32 %v464_v1 }
 0x200   :  { %4824 = vpow2.f32 %v482_v2 }
 0x20b   :  { %v4821_v7 = vpop.eup %4820 }
 0x20c   :  { %v4823_v8 = vpop.eup %4822  ;;  %v476_v9 = vxor.u32 2147483648, %v4821_v7 }
 0x20d   :  { %v473_v10 = vxor.u32 2147483648, %v4823_v8  ;;  %v4825_v12 = vpop.eup %4824 }
 0x20e   :  { %v477_v11 = vsel %vm475_vm5, %v476_v9, %v4823_v8  ;;  %v484_v17 = vadd.f32 1.0, %v4825_v12 }
 0x20f   :  { %v474_v44 = vsel %vm472_vm6, %v4821_v7, %v473_v10 }
 0x210   :  { %v478_v13 = vsel %vm471_vm7, %v474_v44, %v477_v11 }
 0x211   :  { %v479_v15 = vsel %vm468_vm8, nan, %v478_v13 }
 0x212   :  { %v480_v16 = vmul.f32 %v479_v15, %v479_v15 }
 0x214   :  { %v485_v18 = vmul.f32 %v484_v17, %v480_v16 }
 0x216   :  { %v5292_v20 = vsub.f32 %v485_v18, %v5254_v38 }
 0x218   :  { %v488_v22 = vadd.f32 %v487_v21, %v5292_v20 }
 0x21a   :  { %v5297_v23 = vmul.f32 0.11111111, %v488_v22 }
 0x21c   :  { %v5301_v24 = vadd.f32 %v5177_v14, %v5297_v23 }
 0x21e   :  { %v495_v40 = vand.u32 2139095040, %v5301_v24  ;;  %v492_v29 = vand.u32 2147483647, %v5301_v24  ;;  %vm494_vm0 = vcmp.lt.s32.totalorder %v5301_v24, 0  ;;  %vm584_vm5 = vweird.f32 %v5301_v24 }
 0x220   :  { %v496_v26 = vshrl.u32 %v495_v40, 23  ;;  %v499_v32 = vand.u32 8388607, %v492_v29  ;;  %vm493_vm1 = vcmp.le.f32.partialorder %v492_v29, 0.7853982  ;;  %v603_v29 = vadd.f32 %v5292_v20, %v5250_v35 }
 0x222   :  { %v4437_v58 = vadd.s32 4294967169, %v496_v26  ;;  %v500_v49 = vor.u32 8388608, %v499_v32 }
 0x224   :  { %v502_v28 = vadd.s32 1, %v4437_v58  ;;  %v540_v4 = vshll.u32 %v500_v49, 8  ;;  %v597_v49 = vsub.f32 0.0, %v5297_v23 }
 0x226   :  { %vm503_vm9 = vcmp.gt.s32.totalorder %v502_v28, 0 }
 0x227   :  { %v504_v38 = vsel %vm503_vm9, %v502_v28, 0 }
 0x228   :  { %v506_v31 = vand.u32 31, %v504_v38  ;;  %v505_v37 = vshrl.u32 %v504_v38, 5 }
 0x22a   :  { %v507_v34 = vsub.s32 32, %v506_v31  ;;  %v509_v41 = vshll.u32 %v5117_v25, %v506_v31  ;;  %v512_v53 = vshll.u32 %v5118_v27, %v506_v31  ;;  %v515_v45 = vshll.u32 %v5119_v30, %v506_v31 }
 0x22b   :  { %v518_v47 = vshll.u32 %v5120_v33, %v506_v31  ;;  %v521_v52 = vshll.u32 %v5121_v36, %v506_v31  ;;  %vm524_vm10 = vcmp.lt.s32.totalorder %v505_v37, 1  ;;  %vm527_vm11 = vcmp.lt.s32.totalorder %v505_v37, 4 }
 0x22c   :  { %v510_v42 = vshrl.u32 %v5118_v27, %v507_v34  ;;  %v513_v43 = vshrl.u32 %v5119_v30, %v507_v34  ;;  %v516_v46 = vshrl.u32 %v5120_v33, %v507_v34  ;;  %v519_v48 = vshrl.u32 %v5121_v36, %v507_v34 }
 0x22d   :  { %v522_v19 = vshrl.u32 %v5122_v39, %v507_v34  ;;  %v508_v62 = vshrl.u32 %v5117_v25, %v507_v34  ;;  %vm526_vm12 = vcmp.lt.s32.totalorder %v505_v37, 3  ;;  %vm525_vm13 = vcmp.lt.s32.totalorder %v505_v37, 2 }
 0x22e   :  { %v511_v50 = vor.u32 %v510_v42, %v509_v41  ;;  %v514_v54 = vor.u32 %v513_v43, %v512_v53  ;;  %v517_v55 = vor.u32 %v516_v46, %v515_v45  ;;  %v520_v56 = vor.u32 %v519_v48, %v518_v47 }
 0x22f   :  { %v523_v57 = vor.u32 %v522_v19, %v521_v52 }
 0x230   :  { %v529_v59 = vsel %vm527_vm11, %v517_v55, 2102212464  ;;  %v532_v60 = vsel %vm524_vm10, %v511_v50, %v514_v54  ;;  %v536_v61 = vsel %vm524_vm10, %v514_v54, %v517_v55  ;;  %v533_v63 = vsel %vm527_vm11, %v520_v56, 920167782 }
 0x231   :  { %v537_v1 = vsel %vm527_vm11, %v523_v57, 1326507024  ;;  %v534_v2 = vsel %vm526_vm12, %v517_v55, %v533_v63  ;;  %v528_v5 = vsel %vm524_vm10, %v508_v62, %v511_v50  ;;  %v530_v6 = vsel %vm526_vm12, %v514_v54, %v529_v59 }
 0x232   :  { %v538_v3 = vsel %vm526_vm12, %v520_v56, %v537_v1  ;;  %v535_v7 = vsel %vm525_vm13, %v532_v60, %v534_v2  ;;  %v531_v44 = vsel %vm525_vm13, %v528_v5, %v530_v6  ;;  %v598_v56 = vmul.f32 1.442695, %v597_v49 }
 0x233   :  { %v539_v8 = vsel %vm525_vm13, %v536_v61, %v538_v3  ;;  %v5321_v11 = vmul.u32.u64.low %v540_v4, %v535_v7  ;;  %v5322_v12 = vmul.u32.u64.high %v540_v4, %v535_v7, %v5321_v11  ;;  %v547_v15 = vmul.u32 %v540_v4, %v531_v44 }
 0x234   :  { %v5318_v9 = vmul.u32.u64.low %v540_v4, %v539_v8  ;;  %v5319_v10 = vmul.u32.u64.high %v540_v4, %v539_v8, %v5318_v9 }
 0x235   :  { %v550_v13 = vadd.s32 1, %v5322_v12 }
 0x236   :  { %vm549_vm14 = vc.u32 %v5319_v10, %v5321_v11  ;;  %v548_v32 = vadd.s32 %v5321_v11, %v5319_v10  ;;  %v604_v10 = vmul.f32 3.0, %v603_v29 }
 0x237   :  { %v551_v16 = vsel %vm549_vm14, %v550_v13, %v5322_v12 }
 0x238   :  { %v552_v17 = vadd.s32 %v551_v16, %v547_v15  ;;  %v605_v44 = vadd.f32 %v604_v10, %v5209_v51 }
 0x23a   :  { %v553_v18 = vadd.s32 536870912, %v552_v17 }
 0x23c   :  { %v554_v21 = vshrl.u32 %v553_v18, 30 }
 0x23e   :  { %v555_v22 = vshll.u32 %v554_v21, 30  ;;  %v578_v50 = vsub.s32 4, %v554_v21 }
 0x240   :  { %v556_v40 = vsub.s32 %v552_v17, %v555_v22  ;;  %v579_v57 = vsel %vm494_vm0, %v578_v50, %v554_v21 }
 0x241   :  { %v581_v59 = vsel %vm493_vm1, 0, %v579_v57 }
 0x242   :  { %v558_v26 = vsub.s32 0, %v556_v40  ;;  %v585_v60 = vadd.s32 3, %v581_v59 }
 0x244   :  { %v4438_v58 = vmin.u32 %v558_v26, %v556_v40  ;;  %v586_v61 = vand.u32 3, %v585_v60 }
 0x246   :  { %v560_v28 = vclz %v4438_v58  ;;  %vm591_vm2 = vcmp.eq.s32.totalorder %v586_v61, 2  ;;  %vm588_vm3 = vcmp.eq.s32.totalorder %v586_v61, 0  ;;  %vm587_vm4 = vcmp.lt.s32.totalorder %v586_v61, 2 }
 0x248   :  { %v4439_v38 = vadd.s32 4294967294, %v560_v28 }
 0x24a   :  { %vm4440_vm15 = vcmp.lt.s32.totalorder %v4439_v38, 0 }
 0x24b   :  { %v563_v31 = vsel %vm4440_vm15, 0, %v4439_v38 }
 0x24c   :  { %v564_v34 = vsub.s32 32, %v563_v31  ;;  %v568_v37 = vsub.s32 4294967266, %v563_v31  ;;  %v565_v41 = vshll.u32 %v556_v40, %v563_v31 }
 0x24e   :  { %v566_v53 = vshrl.u32 %v548_v32, %v564_v34  ;;  %v569_v42 = vadd.s32 127, %v568_v37 }
 0x250   :  { %v567_v43 = vor.u32 %v566_v53, %v565_v41  ;;  %v570_v45 = vshll.u32 %v569_v42, 23 }
 0x252   :  { %v571_v46 = vor.u32 4788187, %v570_v45  ;;  %v574_v48 = vcvt.s32.f32 %v567_v43 }
 0x254   :  { %v572_v47 = vand.u32 2147483647, %v571_v46 }
 0x256   :  { %v575_v52 = vmul.f32 %v574_v48, %v572_v47 }
 0x258   :  { %v576_v19 = vxor.u32 2147483648, %v575_v52 }
 0x25a   :  { %v577_v54 = vsel %vm494_vm0, %v576_v19, %v575_v52 }
 0x25b   :  { %v580_v55 = vsel %vm493_vm1, %v5301_v24, %v577_v54 }
 0x25c   :  { %4826 = vcosq.f32 %v580_v55 }
 0x25d   :  { %4828 = vsinq.f32 %v580_v55 }
 0x25e   :  { %4830 = vpow2.f32 %v598_v56 }
 0x269   :  { %v4827_v62 = vpop.eup %4826 }
 0x26a   :  { %v4829_v63 = vpop.eup %4828  ;;  %v592_v1 = vxor.u32 2147483648, %v4827_v62 }
 0x26b   :  { %v589_v2 = vxor.u32 2147483648, %v4829_v63  ;;  %v4831_v4 = vpop.eup %4830 }
 0x26c   :  { %v593_v3 = vsel %vm591_vm2, %v592_v1, %v4829_v63  ;;  %v600_v9 = vadd.f32 1.0, %v4831_v4 }
 0x26d   :  { %v590_v5 = vsel %vm588_vm3, %v4827_v62, %v589_v2 }
 0x26e   :  { %v594_v6 = vsel %vm587_vm4, %v590_v5, %v593_v3 }
 0x26f   :  { %v595_v7 = vsel %vm584_vm5, nan, %v594_v6 }
 0x270   :  { %v596_v8 = vmul.f32 %v595_v7, %v595_v7 }
 0x272   :  { %v601_v11 = vmul.f32 %v600_v9, %v596_v8 }
 0x274   :  { %v602_v12 = vsub.f32 %v601_v11, %v5297_v23 }
 0x276   :  { %v606_v13 = vadd.f32 %v605_v44, %v602_v12 }
 0x278   :  { %v5338_v15 = vmul.f32 0.013888889, %v606_v13 }
 0x27a   :  { %v5342_v35 = vadd.f32 %v5177_v14, %v5338_v15 }
 0x27c   :  { %v613_v20 = vand.u32 2139095040, %v5342_v35  ;;  %v610_v18 = vand.u32 2147483647, %v5342_v35  ;;  %vm612_vm13 = vcmp.lt.s32.totalorder %v5342_v35, 0  ;;  %vm702_vm2 = vweird.f32 %v5342_v35 }
 0x27e   :  { %v614_v24 = vshrl.u32 %v613_v20, 23  ;;  %v617_v51 = vand.u32 8388607, %v610_v18  ;;  %vm611_vm14 = vcmp.le.f32.partialorder %v610_v18, 0.7853982 }
 0x280   :  { %v4441_v16 = vadd.s32 4294967169, %v614_v24  ;;  %v618_v42 = vor.u32 8388608, %v617_v51 }
 0x282   :  { %v620_v17 = vadd.s32 1, %v4441_v16  ;;  %v658_v59 = vshll.u32 %v618_v42, 8 }
 0x284   :  { %vm621_vm6 = vcmp.gt.s32.totalorder %v620_v17, 0 }
 0x285   :  { %v622_v21 = vsel %vm621_vm6, %v620_v17, 0 }
 0x286   :  { %v624_v22 = vand.u32 31, %v622_v21  ;;  %v623_v40 = vshrl.u32 %v622_v21, 5 }
 0x288   :  { %v625_v23 = vsub.s32 32, %v624_v22  ;;  %v627_v26 = vshll.u32 %v5117_v25, %v624_v22  ;;  %v630_v58 = vshll.u32 %v5118_v27, %v624_v22  ;;  %v633_v31 = vshll.u32 %v5119_v30, %v624_v22 }
 0x289   :  { %v636_v34 = vshll.u32 %v5120_v33, %v624_v22  ;;  %v639_v41 = vshll.u32 %v5121_v36, %v624_v22  ;;  %vm642_vm7 = vcmp.lt.s32.totalorder %v623_v40, 1  ;;  %vm645_vm8 = vcmp.lt.s32.totalorder %v623_v40, 4 }
 0x28a   :  { %v628_v28 = vshrl.u32 %v5118_v27, %v625_v23  ;;  %v631_v38 = vshrl.u32 %v5119_v30, %v625_v23  ;;  %v634_v32 = vshrl.u32 %v5120_v33, %v625_v23  ;;  %v637_v37 = vshrl.u32 %v5121_v36, %v625_v23 }
 0x28b   :  { %v640_v53 = vshrl.u32 %v5122_v39, %v625_v23  ;;  %v626_v50 = vshrl.u32 %v5117_v25, %v625_v23  ;;  %vm644_vm9 = vcmp.lt.s32.totalorder %v623_v40, 3  ;;  %vm643_vm10 = vcmp.lt.s32.totalorder %v623_v40, 2 }
 0x28c   :  { %v629_v43 = vor.u32 %v628_v28, %v627_v26  ;;  %v632_v45 = vor.u32 %v631_v38, %v630_v58  ;;  %v635_v46 = vor.u32 %v634_v32, %v633_v31  ;;  %v638_v47 = vor.u32 %v637_v37, %v636_v34 }
 0x28d   :  { %v641_v48 = vor.u32 %v640_v53, %v639_v41  ;;  %v715_v37 = vsub.f32 0.0, %v5338_v15 }
 0x28e   :  { %v647_v52 = vsel %vm645_vm8, %v635_v46, 2102212464  ;;  %v650_v19 = vsel %vm642_vm7, %v629_v43, %v632_v45  ;;  %v654_v49 = vsel %vm642_vm7, %v632_v45, %v635_v46  ;;  %v651_v54 = vsel %vm645_vm8, %v638_v47, 920167782 }
 0x28f   :  { %v655_v55 = vsel %vm645_vm8, %v641_v48, 1326507024  ;;  %v652_v56 = vsel %vm644_vm9, %v635_v46, %v651_v54  ;;  %v646_v60 = vsel %vm642_vm7, %v626_v50, %v629_v43  ;;  %v648_v61 = vsel %vm644_vm9, %v632_v45, %v647_v52 }
 0x290   :  { %v656_v57 = vsel %vm644_vm9, %v638_v47, %v655_v55  ;;  %v653_v62 = vsel %vm643_vm10, %v650_v19, %v652_v56  ;;  %v649_v4 = vsel %vm643_vm10, %v646_v60, %v648_v61  ;;  %v716_v43 = vmul.f32 1.442695, %v715_v37 }
 0x291   :  { %v657_v63 = vsel %vm643_vm10, %v654_v49, %v656_v57  ;;  %v5362_v3 = vmul.u32.u64.low %v658_v59, %v653_v62  ;;  %v5363_v29 = vmul.u32.u64.high %v658_v59, %v653_v62, %v5362_v3  ;;  %v665_v6 = vmul.u32 %v658_v59, %v649_v4 }
 0x292   :  { %v5359_v1 = vmul.u32.u64.low %v658_v59, %v657_v63  ;;  %v5360_v2 = vmul.u32.u64.high %v658_v59, %v657_v63, %v5359_v1 }
 0x293   :  { %v668_v5 = vadd.s32 1, %v5363_v29 }
 0x294   :  { %vm667_vm11 = vc.u32 %v5360_v2, %v5362_v3  ;;  %v666_v17 = vadd.s32 %v5362_v3, %v5360_v2 }
 0x295   :  { %v669_v7 = vsel %vm667_vm11, %v668_v5, %v5363_v29 }
 0x296   :  { %v670_v8 = vadd.s32 %v669_v7, %v665_v6 }
 0x298   :  { %v671_v9 = vadd.s32 536870912, %v670_v8 }
 0x29a   :  { %v672_v10 = vshrl.u32 %v671_v9, 30 }
 0x29c   :  { %v673_v11 = vshll.u32 %v672_v10, 30  ;;  %v696_v41 = vsub.s32 4, %v672_v10 }
 0x29e   :  { %v674_v12 = vsub.s32 %v670_v8, %v673_v11  ;;  %v697_v45 = vsel %vm612_vm13, %v696_v41, %v672_v10 }
 0x29f   :  { %v699_v46 = vsel %vm611_vm14, 0, %v697_v45 }
 0x2a0   :  { %v676_v44 = vsub.s32 0, %v674_v12  ;;  %v703_v47 = vadd.s32 3, %v699_v46 }
 0x2a2   :  { %v4442_v13 = vmin.u32 %v676_v44, %v674_v12  ;;  %v704_v48 = vand.u32 3, %v703_v47 }
 0x2a4   :  { %v678_v20 = vclz %v4442_v13  ;;  %vm709_vm15 = vcmp.eq.s32.totalorder %v704_v48, 2  ;;  %vm706_vm0 = vcmp.eq.s32.totalorder %v704_v48, 0  ;;  %vm705_vm1 = vcmp.lt.s32.totalorder %v704_v48, 2 }
 0x2a6   :  { %v4443_v24 = vadd.s32 4294967294, %v678_v20 }
 0x2a8   :  { %vm4444_vm12 = vcmp.lt.s32.totalorder %v4443_v24, 0 }
 0x2a9   :  { %v681_v16 = vsel %vm4444_vm12, 0, %v4443_v24 }
 0x2aa   :  { %v682_v21 = vsub.s32 32, %v681_v16  ;;  %v686_v22 = vsub.s32 4294967266, %v681_v16  ;;  %v683_v51 = vshll.u32 %v674_v12, %v681_v16 }
 0x2ac   :  { %v684_v23 = vshrl.u32 %v666_v17, %v682_v21  ;;  %v687_v40 = vadd.s32 127, %v686_v22 }
 0x2ae   :  { %v685_v26 = vor.u32 %v684_v23, %v683_v51  ;;  %v688_v58 = vshll.u32 %v687_v40, 23 }
 0x2b0   :  { %v689_v28 = vor.u32 4788187, %v688_v58  ;;  %v692_v31 = vcvt.s32.f32 %v685_v26 }
 0x2b2   :  { %v690_v38 = vand.u32 2147483647, %v689_v28 }
 0x2b4   :  { %v693_v32 = vmul.f32 %v692_v31, %v690_v38 }
 0x2b6   :  { %v694_v34 = vxor.u32 2147483648, %v693_v32 }
 0x2b8   :  { %v695_v53 = vsel %vm612_vm13, %v694_v34, %v693_v32 }
 0x2b9   :  { %v698_v42 = vsel %vm611_vm14, %v5342_v35, %v695_v53 }
 0x2ba   :  { %4832 = vcosq.f32 %v698_v42 }
 0x2bb   :  { %4834 = vsinq.f32 %v698_v42 }
 0x2bc   :  { %4836 = vpow2.f32 %v716_v43 }
 0x2c7   :  { %v4833_v52 = vpop.eup %4832 }
 0x2c8   :  { %v4835_v19 = vpop.eup %4834  ;;  %v710_v49 = vxor.u32 2147483648, %v4833_v52 }
 0x2c9   :  { %v707_v50 = vxor.u32 2147483648, %v4835_v19  ;;  %v4837_v55 = vpop.eup %4836 }
 0x2ca   :  { %v711_v54 = vsel %vm709_vm15, %v710_v49, %v4835_v19  ;;  %v718_v60 = vadd.f32 1.0, %v4837_v55 }
 0x2cb   :  { %v708_v18 = vsel %vm706_vm0, %v4833_v52, %v707_v50 }
 0x2cc   :  { %v712_v56 = vsel %vm705_vm1, %v708_v18, %v711_v54 }
 0x2cd   :  { %v713_v57 = vsel %vm702_vm2, nan, %v712_v56 }
 0x2ce   :  { %v714_v59 = vmul.f32 %v713_v57, %v713_v57 }
 0x2d0   :  { %v719_v61 = vmul.f32 %v718_v60, %v714_v59 }
 0x2d2   :  { %v5376_v62 = vsub.f32 %v719_v61, %v5338_v15 }
 0x2d4   :  { %v5379_v63 = vmul.f32 0.037037037, %v5376_v62 }
 0x2d6   :  { %v5383_v1 = vadd.f32 %v5379_v63, %v5338_v15 }
 0x2d8   :  { %v5387_v2 = vadd.f32 %v5177_v14, %v5383_v1 }
 0x2da   :  { %v727_v35 = vand.u32 2139095040, %v5387_v2  ;;  %v724_v5 = vand.u32 2147483647, %v5387_v2  ;;  %vm726_vm10 = vcmp.lt.s32.totalorder %v5387_v2, 0  ;;  %vm816_vm15 = vweird.f32 %v5387_v2 }
 0x2dc   :  { %v728_v3 = vshrl.u32 %v727_v35, 23  ;;  %v731_v8 = vand.u32 8388607, %v724_v5  ;;  %vm725_vm11 = vcmp.le.f32.partialorder %v724_v5, 0.7853982 }
 0x2de   :  { %v4445_v29 = vadd.s32 4294967169, %v728_v3  ;;  %v732_v51 = vor.u32 8388608, %v731_v8 }
 0x2e0   :  { %v734_v4 = vadd.s32 1, %v4445_v29  ;;  %v772_v43 = vshll.u32 %v732_v51, 8  ;;  %v829_v51 = vsub.f32 0.0, %v5383_v1 }
 0x2e2   :  { %vm735_vm3 = vcmp.gt.s32.totalorder %v734_v4, 0 }
 0x2e3   :  { %v736_v6 = vsel %vm735_vm3, %v734_v4, 0 }
 0x2e4   :  { %v738_v7 = vand.u32 31, %v736_v6  ;;  %v737_v10 = vshrl.u32 %v736_v6, 5 }
 0x2e6   :  { %v739_v9 = vsub.s32 32, %v738_v7  ;;  %v741_v11 = vshll.u32 %v5117_v25, %v738_v7  ;;  %v744_v12 = vshll.u32 %v5118_v27, %v738_v7  ;;  %v747_v20 = vshll.u32 %v5119_v30, %v738_v7 }
 0x2e7   :  { %v750_v16 = vshll.u32 %v5120_v33, %v738_v7  ;;  %v753_v21 = vshll.u32 %v5121_v36, %v738_v7  ;;  %vm756_vm4 = vcmp.lt.s32.totalorder %v737_v10, 1  ;;  %vm759_vm5 = vcmp.lt.s32.totalorder %v737_v10, 4 }
 0x2e8   :  { %v742_v44 = vshrl.u32 %v5118_v27, %v739_v9  ;;  %v745_v13 = vshrl.u32 %v5119_v30, %v739_v9  ;;  %v748_v24 = vshrl.u32 %v5120_v33, %v739_v9  ;;  %v751_v17 = vshrl.u32 %v5121_v36, %v739_v9 }
 0x2e9   :  { %v754_v22 = vshrl.u32 %v5122_v39, %v739_v9  ;;  %v740_v34 = vshrl.u32 %v5117_v25, %v739_v9  ;;  %vm758_vm6 = vcmp.lt.s32.totalorder %v737_v10, 3  ;;  %vm757_vm7 = vcmp.lt.s32.totalorder %v737_v10, 2 }
 0x2ea   :  { %v743_v23 = vor.u32 %v742_v44, %v741_v11  ;;  %v746_v40 = vor.u32 %v745_v13, %v744_v12  ;;  %v749_v26 = vor.u32 %v748_v24, %v747_v20  ;;  %v752_v58 = vor.u32 %v751_v17, %v750_v16 }
 0x2eb   :  { %v755_v28 = vor.u32 %v754_v22, %v753_v21 }
 0x2ec   :  { %v761_v38 = vsel %vm759_vm5, %v749_v26, 2102212464  ;;  %v764_v31 = vsel %vm756_vm4, %v743_v23, %v746_v40  ;;  %v768_v32 = vsel %vm756_vm4, %v746_v40, %v749_v26  ;;  %v765_v37 = vsel %vm759_vm5, %v752_v58, 920167782 }
 0x2ed   :  { %v769_v41 = vsel %vm759_vm5, %v755_v28, 1326507024  ;;  %v766_v53 = vsel %vm758_vm6, %v749_v26, %v765_v37  ;;  %v760_v45 = vsel %vm756_vm4, %v740_v34, %v743_v23  ;;  %v762_v46 = vsel %vm758_vm6, %v746_v40, %v761_v38 }
 0x2ee   :  { %v770_v42 = vsel %vm758_vm6, %v752_v58, %v769_v41  ;;  %v767_v47 = vsel %vm757_vm7, %v764_v31, %v766_v53  ;;  %v763_v54 = vsel %vm757_vm7, %v760_v45, %v762_v46  ;;  %v830_v58 = vmul.f32 1.442695, %v829_v51 }
 0x2ef   :  { %v771_v48 = vsel %vm757_vm7, %v768_v32, %v770_v42  ;;  %v5407_v49 = vmul.u32.u64.low %v772_v43, %v767_v47  ;;  %v5408_v50 = vmul.u32.u64.high %v772_v43, %v767_v47, %v5407_v49  ;;  %v779_v18 = vmul.u32 %v772_v43, %v763_v54 }
 0x2f0   :  { %v5404_v52 = vmul.u32.u64.low %v772_v43, %v771_v48  ;;  %v5405_v19 = vmul.u32.u64.high %v772_v43, %v771_v48, %v5404_v52 }
 0x2f1   :  { %v782_v55 = vadd.s32 1, %v5408_v50 }
 0x2f2   :  { %vm781_vm8 = vc.u32 %v5405_v19, %v5407_v49  ;;  %v780_v8 = vadd.s32 %v5407_v49, %v5405_v19 }
 0x2f3   :  { %v783_v56 = vsel %vm781_vm8, %v782_v55, %v5408_v50 }
 0x2f4   :  { %v784_v57 = vadd.s32 %v783_v56, %v779_v18 }
 0x2f6   :  { %v785_v59 = vadd.s32 536870912, %v784_v57 }
 0x2f8   :  { %v786_v60 = vshrl.u32 %v785_v59, 30 }
 0x2fa   :  { %v787_v61 = vshll.u32 %v786_v60, 30  ;;  %v810_v23 = vsub.s32 4, %v786_v60 }
 0x2fc   :  { %v788_v35 = vsub.s32 %v784_v57, %v787_v61  ;;  %v811_v28 = vsel %vm726_vm10, %v810_v23, %v786_v60 }
 0x2fd   :  { %v813_v38 = vsel %vm725_vm11, 0, %v811_v28 }
 0x2fe   :  { %v790_v3 = vsub.s32 0, %v788_v35  ;;  %v817_v31 = vadd.s32 3, %v813_v38 }
 0x300   :  { %v4446_v29 = vmin.u32 %v790_v3, %v788_v35  ;;  %v818_v32 = vand.u32 3, %v817_v31 }
 0x302   :  { %v792_v4 = vclz %v4446_v29  ;;  %vm823_vm12 = vcmp.eq.s32.totalorder %v818_v32, 2  ;;  %vm820_vm13 = vcmp.eq.s32.totalorder %v818_v32, 0  ;;  %vm819_vm14 = vcmp.lt.s32.totalorder %v818_v32, 2 }
 0x304   :  { %v4447_v6 = vadd.s32 4294967294, %v792_v4 }
 0x306   :  { %vm4448_vm9 = vcmp.lt.s32.totalorder %v4447_v6, 0 }
 0x307   :  { %v795_v7 = vsel %vm4448_vm9, 0, %v4447_v6 }
 0x308   :  { %v796_v9 = vsub.s32 32, %v795_v7  ;;  %v800_v10 = vsub.s32 4294967266, %v795_v7  ;;  %v797_v11 = vshll.u32 %v788_v35, %v795_v7 }
 0x30a   :  { %v798_v12 = vshrl.u32 %v780_v8, %v796_v9  ;;  %v801_v44 = vadd.s32 127, %v800_v10 }
 0x30c   :  { %v799_v13 = vor.u32 %v798_v12, %v797_v11  ;;  %v802_v20 = vshll.u32 %v801_v44, 23 }
 0x30e   :  { %v803_v24 = vor.u32 4788187, %v802_v20  ;;  %v806_v17 = vcvt.s32.f32 %v799_v13 }
 0x310   :  { %v804_v16 = vand.u32 2147483647, %v803_v24 }
 0x312   :  { %v807_v21 = vmul.f32 %v806_v17, %v804_v16 }
 0x314   :  { %v808_v22 = vxor.u32 2147483648, %v807_v21 }
 0x316   :  { %v809_v40 = vsel %vm726_vm10, %v808_v22, %v807_v21 }
 0x317   :  { %v812_v26 = vsel %vm725_vm11, %v5387_v2, %v809_v40 }
 0x318   :  { %4838 = vcosq.f32 %v812_v26 }
 0x319   :  { %4840 = vsinq.f32 %v812_v26 }
 0x31a   :  { %4842 = vpow2.f32 %v830_v58 }
 0x325   :  { %v4839_v34 = vpop.eup %4838 }
 0x326   :  { %v4841_v37 = vpop.eup %4840  ;;  %v824_v41 = vxor.u32 2147483648, %v4839_v34 }
 0x327   :  { %v821_v53 = vxor.u32 2147483648, %v4841_v37  ;;  %v4843_v43 = vpop.eup %4842 }
 0x328   :  { %v825_v42 = vsel %vm823_vm12, %v824_v41, %v4841_v37  ;;  %v832_v48 = vadd.f32 1.0, %v4843_v43 }
 0x329   :  { %v822_v5 = vsel %vm820_vm13, %v4839_v34, %v821_v53 }
 0x32a   :  { %v826_v45 = vsel %vm819_vm14, %v822_v5, %v825_v42 }
 0x32b   :  { %v827_v46 = vsel %vm816_vm15, nan, %v826_v45 }
 0x32c   :  { %v828_v47 = vmul.f32 %v827_v46, %v827_v46 }
 0x32e   :  { %v833_v52 = vmul.f32 %v832_v48, %v828_v47 }
 0x330   :  { %v5421_v19 = vsub.f32 %v833_v52, %v5383_v1 }
 0x332   :  { %v835_v49 = vmul.f32 0.11111111, %v5421_v19 }
 0x334   :  { %v836_v50 = vadd.f32 %v835_v49, %v5338_v15 }
 0x336   :  { %v5426_v54 = vsub.f32 %v836_v50, %v5379_v63 }
 0x338   :  { %v5430_v55 = vadd.f32 %v5177_v14, %v5426_v54 }
 0x33a   :  { %v842_v2 = vand.u32 2139095040, %v5430_v55  ;;  %v839_v59 = vand.u32 2147483647, %v5430_v55  ;;  %vm841_vm7 = vcmp.lt.s32.totalorder %v5430_v55, 0  ;;  %vm931_vm12 = vweird.f32 %v5430_v55 }
 0x33c   :  { %v843_v18 = vshrl.u32 %v842_v2, 23  ;;  %v846_v61 = vand.u32 8388607, %v839_v59  ;;  %vm840_vm8 = vcmp.le.f32.partialorder %v839_v59, 0.7853982 }
 0x33e   :  { %v4449_v56 = vadd.s32 4294967169, %v843_v18  ;;  %v847_v44 = vor.u32 8388608, %v846_v61 }
 0x340   :  { %v849_v57 = vadd.s32 1, %v4449_v56  ;;  %v887_v38 = vshll.u32 %v847_v44, 8  ;;  %v944_v44 = vsub.f32 0.0, %v5426_v54 }
 0x342   :  { %vm850_vm0 = vcmp.gt.s32.totalorder %v849_v57, 0 }
 0x343   :  { %v851_v1 = vsel %vm850_vm0, %v849_v57, 0 }
 0x344   :  { %v853_v60 = vand.u32 31, %v851_v1  ;;  %v852_v63 = vshrl.u32 %v851_v1, 5 }
 0x346   :  { %v854_v35 = vsub.s32 32, %v853_v60  ;;  %v856_v3 = vshll.u32 %v5117_v25, %v853_v60  ;;  %v859_v29 = vshll.u32 %v5118_v27, %v853_v60  ;;  %v862_v7 = vshll.u32 %v5119_v30, %v853_v60 }
 0x347   :  { %v865_v9 = vshll.u32 %v5120_v33, %v853_v60  ;;  %v868_v11 = vshll.u32 %v5121_v36, %v853_v60  ;;  %vm871_vm1 = vcmp.lt.s32.totalorder %v852_v63, 1  ;;  %vm874_vm2 = vcmp.lt.s32.totalorder %v852_v63, 4 }
 0x348   :  { %v857_v4 = vshrl.u32 %v5118_v27, %v854_v35  ;;  %v860_v6 = vshrl.u32 %v5119_v30, %v854_v35  ;;  %v863_v8 = vshrl.u32 %v5120_v33, %v854_v35  ;;  %v866_v10 = vshrl.u32 %v5121_v36, %v854_v35 }
 0x349   :  { %v869_v12 = vshrl.u32 %v5122_v39, %v854_v35  ;;  %v855_v23 = vshrl.u32 %v5117_v25, %v854_v35  ;;  %vm873_vm3 = vcmp.lt.s32.totalorder %v852_v63, 3  ;;  %vm872_vm4 = vcmp.lt.s32.totalorder %v852_v63, 2 }
 0x34a   :  { %v858_v13 = vor.u32 %v857_v4, %v856_v3  ;;  %v861_v20 = vor.u32 %v860_v6, %v859_v29  ;;  %v864_v24 = vor.u32 %v863_v8, %v862_v7  ;;  %v867_v16 = vor.u32 %v866_v10, %v865_v9 }
 0x34b   :  { %v870_v17 = vor.u32 %v869_v12, %v868_v11 }
 0x34c   :  { %v876_v21 = vsel %vm874_vm2, %v864_v24, 2102212464  ;;  %v879_v22 = vsel %vm871_vm1, %v858_v13, %v861_v20  ;;  %v883_v51 = vsel %vm871_vm1, %v861_v20, %v864_v24  ;;  %v880_v40 = vsel %vm874_vm2, %v867_v16, 920167782 }
 0x34d   :  { %v884_v26 = vsel %vm874_vm2, %v870_v17, 1326507024  ;;  %v881_v58 = vsel %vm873_vm3, %v864_v24, %v880_v40  ;;  %v875_v31 = vsel %vm871_vm1, %v855_v23, %v858_v13  ;;  %v877_v32 = vsel %vm873_vm3, %v861_v20, %v876_v21 }
 0x34e   :  { %v885_v28 = vsel %vm873_vm3, %v867_v16, %v884_v26  ;;  %v882_v34 = vsel %vm872_vm4, %v879_v22, %v881_v58  ;;  %v878_v5 = vsel %vm872_vm4, %v875_v31, %v877_v32  ;;  %v945_v16 = vmul.f32 1.442695, %v944_v44 }
 0x34f   :  { %v886_v37 = vsel %vm872_vm4, %v883_v51, %v885_v28  ;;  %v5450_v42 = vmul.u32.u64.low %v887_v38, %v882_v34  ;;  %v5451_v43 = vmul.u32.u64.high %v887_v38, %v882_v34, %v5450_v42  ;;  %v894_v46 = vmul.u32 %v887_v38, %v878_v5 }
 0x350   :  { %v5447_v41 = vmul.u32.u64.low %v887_v38, %v886_v37  ;;  %v5448_v53 = vmul.u32.u64.high %v887_v38, %v886_v37, %v5447_v41 }
 0x351   :  { %v897_v45 = vadd.s32 1, %v5451_v43 }
 0x352   :  { %vm896_vm5 = vc.u32 %v5448_v53, %v5450_v42  ;;  %v895_v61 = vadd.s32 %v5450_v42, %v5448_v53  ;;  %v950_v42 = vsub.f32 %v5376_v62, %v5421_v19 }
 0x353   :  { %v898_v47 = vsel %vm896_vm5, %v897_v45, %v5451_v43 }
 0x354   :  { %v899_v48 = vadd.s32 %v898_v47, %v894_v46 }
 0x356   :  { %v900_v52 = vadd.s32 536870912, %v899_v48 }
 0x358   :  { %v901_v49 = vshrl.u32 %v900_v52, 30 }
 0x35a   :  { %v902_v50 = vshll.u32 %v901_v49, 30  ;;  %v925_v13 = vsub.s32 4, %v901_v49 }
 0x35c   :  { %v903_v2 = vsub.s32 %v899_v48, %v902_v50  ;;  %v926_v17 = vsel %vm841_vm7, %v925_v13, %v901_v49 }
 0x35d   :  { %v928_v21 = vsel %vm840_vm8, 0, %v926_v17 }
 0x35e   :  { %v905_v18 = vsub.s32 0, %v903_v2  ;;  %v932_v22 = vadd.s32 3, %v928_v21 }
 0x360   :  { %v4450_v56 = vmin.u32 %v905_v18, %v903_v2  ;;  %v933_v51 = vand.u32 3, %v932_v22 }
 0x362   :  { %v907_v57 = vclz %v4450_v56  ;;  %vm938_vm9 = vcmp.eq.s32.totalorder %v933_v51, 2  ;;  %vm935_vm10 = vcmp.eq.s32.totalorder %v933_v51, 0  ;;  %vm934_vm11 = vcmp.lt.s32.totalorder %v933_v51, 2 }
 0x364   :  { %v4451_v1 = vadd.s32 4294967294, %v907_v57 }
 0x366   :  { %vm4452_vm6 = vcmp.lt.s32.totalorder %v4451_v1, 0 }
 0x367   :  { %v910_v60 = vsel %vm4452_vm6, 0, %v4451_v1 }
 0x368   :  { %v911_v35 = vsub.s32 32, %v910_v60  ;;  %v915_v63 = vsub.s32 4294967266, %v910_v60  ;;  %v912_v3 = vshll.u32 %v903_v2, %v910_v60 }
 0x36a   :  { %v913_v29 = vshrl.u32 %v895_v61, %v911_v35  ;;  %v916_v4 = vadd.s32 127, %v915_v63 }
 0x36c   :  { %v914_v6 = vor.u32 %v913_v29, %v912_v3  ;;  %v917_v7 = vshll.u32 %v916_v4, 23 }
 0x36e   :  { %v918_v8 = vor.u32 4788187, %v917_v7  ;;  %v921_v10 = vcvt.s32.f32 %v914_v6 }
 0x370   :  { %v919_v9 = vand.u32 2147483647, %v918_v8 }
 0x372   :  { %v922_v11 = vmul.f32 %v921_v10, %v919_v9 }
 0x374   :  { %v923_v12 = vxor.u32 2147483648, %v922_v11 }
 0x376   :  { %v924_v20 = vsel %vm841_vm7, %v923_v12, %v922_v11 }
 0x377   :  { %v927_v24 = vsel %vm840_vm8, %v5430_v55, %v924_v20 }
 0x378   :  { %4844 = vcosq.f32 %v927_v24 }
 0x379   :  { %4846 = vsinq.f32 %v927_v24 }
 0x37a   :  { %4848 = vpow2.f32 %v945_v16 }
 0x385   :  { %v4845_v23 = vpop.eup %4844 }
 0x386   :  { %v4847_v40 = vpop.eup %4846  ;;  %v939_v26 = vxor.u32 2147483648, %v4845_v23 }
 0x387   :  { %v936_v58 = vxor.u32 2147483648, %v4847_v40  ;;  %v4849_v38 = vpop.eup %4848 }
 0x388   :  { %v940_v28 = vsel %vm938_vm9, %v939_v26, %v4847_v40  ;;  %v947_v37 = vadd.f32 1.0, %v4849_v38 }
 0x389   :  { %v937_v59 = vsel %vm935_vm10, %v4845_v23, %v936_v58 }
 0x38a   :  { %v941_v31 = vsel %vm934_vm11, %v937_v59, %v940_v28 }
 0x38b   :  { %v942_v32 = vsel %vm931_vm12, nan, %v941_v31 }
 0x38c   :  { %v943_v34 = vmul.f32 %v942_v32, %v942_v32 }
 0x38e   :  { %v948_v41 = vmul.f32 %v947_v37, %v943_v34 }
 0x390   :  { %v5464_v53 = vsub.f32 %v948_v41, %v5426_v54 }
 0x392   :  { %v951_v43 = vadd.f32 %v950_v42, %v5464_v53 }
 0x394   :  { %v952_v5 = vmul.f32 0.11111111, %v951_v43 }
 0x396   :  { %v5470_v45 = vadd.f32 %v952_v5, %v5338_v15 }
 0x398   :  { %v5474_v55 = vadd.f32 %v5177_v14, %v5470_v45 }
 0x39a   :  { %v958_v46 = vand.u32 2139095040, %v5474_v55  ;;  %v955_v54 = vand.u32 2147483647, %v5474_v55  ;;  %vm957_vm4 = vcmp.lt.s32.totalorder %v5474_v55, 0  ;;  %vm1047_vm9 = vweird.f32 %v5474_v55 }
 0x39c   :  { %v959_v47 = vshrl.u32 %v958_v46, 23  ;;  %v962_v2 = vand.u32 8388607, %v955_v54  ;;  %vm956_vm5 = vcmp.le.f32.partialorder %v955_v54, 0.7853982  ;;  %v1066_v54 = vadd.f32 %v5464_v53, %v5421_v19 }
 0x39e   :  { %v4453_v48 = vadd.s32 4294967169, %v959_v47  ;;  %v963_v7 = vor.u32 8388608, %v962_v2 }
 0x3a0   :  { %v965_v52 = vadd.s32 1, %v4453_v48  ;;  %v1003_v51 = vshll.u32 %v963_v7, 8 }
 0x3a2   :  { %vm966_vm13 = vcmp.gt.s32.totalorder %v965_v52, 0 }
 0x3a3   :  { %v967_v49 = vsel %vm966_vm13, %v965_v52, 0 }
 0x3a4   :  { %v969_v50 = vand.u32 31, %v967_v49  ;;  %v968_v56 = vshrl.u32 %v967_v49, 5 }
 0x3a6   :  { %v970_v18 = vsub.s32 32, %v969_v50  ;;  %v972_v57 = vshll.u32 %v5117_v25, %v969_v50  ;;  %v975_v1 = vshll.u32 %v5118_v27, %v969_v50  ;;  %v978_v35 = vshll.u32 %v5119_v30, %v969_v50 }
 0x3a7   :  { %v981_v3 = vshll.u32 %v5120_v33, %v969_v50  ;;  %v984_v4 = vshll.u32 %v5121_v36, %v969_v50  ;;  %vm987_vm14 = vcmp.lt.s32.totalorder %v968_v56, 1  ;;  %vm990_vm15 = vcmp.lt.s32.totalorder %v968_v56, 4 }
 0x3a8   :  { %v973_v60 = vshrl.u32 %v5118_v27, %v970_v18  ;;  %v976_v61 = vshrl.u32 %v5119_v30, %v970_v18  ;;  %v979_v63 = vshrl.u32 %v5120_v33, %v970_v18  ;;  %v982_v29 = vshrl.u32 %v5121_v36, %v970_v18 }
 0x3a9   :  { %v985_v6 = vshrl.u32 %v5122_v39, %v970_v18  ;;  %v971_v24 = vshrl.u32 %v5117_v25, %v970_v18  ;;  %vm989_vm0 = vcmp.lt.s32.totalorder %v968_v56, 3  ;;  %vm988_vm1 = vcmp.lt.s32.totalorder %v968_v56, 2 }
 0x3aa   :  { %v974_v8 = vor.u32 %v973_v60, %v972_v57  ;;  %v977_v9 = vor.u32 %v976_v61, %v975_v1  ;;  %v980_v10 = vor.u32 %v979_v63, %v978_v35  ;;  %v983_v11 = vor.u32 %v982_v29, %v981_v3 }
 0x3ab   :  { %v986_v12 = vor.u32 %v985_v6, %v984_v4 }
 0x3ac   :  { %v992_v44 = vsel %vm990_vm15, %v980_v10, 2102212464  ;;  %v995_v13 = vsel %vm987_vm14, %v974_v8, %v977_v9  ;;  %v999_v20 = vsel %vm987_vm14, %v977_v9, %v980_v10  ;;  %v996_v16 = vsel %vm990_vm15, %v983_v11, 920167782 }
 0x3ad   :  { %v1000_v17 = vsel %vm990_vm15, %v986_v12, 1326507024  ;;  %v997_v21 = vsel %vm989_vm0, %v980_v10, %v996_v16  ;;  %v991_v23 = vsel %vm987_vm14, %v971_v24, %v974_v8  ;;  %v993_v40 = vsel %vm989_vm0, %v977_v9, %v992_v44 }
 0x3ae   :  { %v1001_v22 = vsel %vm989_vm0, %v983_v11, %v1000_v17  ;;  %v998_v26 = vsel %vm988_vm1, %v995_v13, %v997_v21  ;;  %v994_v32 = vsel %vm988_vm1, %v991_v23, %v993_v40  ;;  %v1060_v8 = vsub.f32 0.0, %v5470_v45 }
 0x3af   :  { %v1002_v58 = vsel %vm988_vm1, %v999_v20, %v1001_v22  ;;  %v5494_v59 = vmul.u32.u64.low %v1003_v51, %v998_v26  ;;  %v5495_v31 = vmul.u32.u64.high %v1003_v51, %v998_v26, %v5494_v59  ;;  %v1010_v37 = vmul.u32 %v1003_v51, %v994_v32 }
 0x3b0   :  { %v5491_v28 = vmul.u32.u64.low %v1003_v51, %v1002_v58  ;;  %v5492_v38 = vmul.u32.u64.high %v1003_v51, %v1002_v58, %v5491_v28  ;;  %v1061_v12 = vmul.f32 1.442695, %v1060_v8 }
 0x3b1   :  { %v1013_v34 = vadd.s32 1, %v5495_v31 }
 0x3b2   :  { %vm1012_vm2 = vc.u32 %v5492_v38, %v5494_v59  ;;  %v1011_v18 = vadd.s32 %v5494_v59, %v5492_v38  ;;  %v1067_v59 = vmul.f32 3.0, %v1066_v54 }
 0x3b3   :  { %v1014_v41 = vsel %vm1012_vm2, %v1013_v34, %v5495_v31 }
 0x3b4   :  { %v1015_v42 = vadd.s32 %v1014_v41, %v1010_v37  ;;  %v1068_v34 = vadd.f32 %v1067_v59, %v5376_v62 }
 0x3b6   :  { %v1016_v43 = vadd.s32 536870912, %v1015_v42 }
 0x3b8   :  { %v1017_v5 = vshrl.u32 %v1016_v43, 30 }
 0x3ba   :  { %v1018_v46 = vshll.u32 %v1017_v5, 30  ;;  %v1041_v9 = vsub.s32 4, %v1017_v5 }
 0x3bc   :  { %v1019_v47 = vsub.s32 %v1015_v42, %v1018_v46  ;;  %v1042_v44 = vsel %vm957_vm4, %v1041_v9, %v1017_v5 }
 0x3bd   :  { %v1044_v13 = vsel %vm956_vm5, 0, %v1042_v44 }
 0x3be   :  { %v1021_v48 = vsub.s32 0, %v1019_v47  ;;  %v1048_v20 = vadd.s32 3, %v1044_v13 }
 0x3c0   :  { %v4454_v52 = vmin.u32 %v1021_v48, %v1019_v47  ;;  %v1049_v24 = vand.u32 3, %v1048_v20 }
 0x3c2   :  { %v1023_v49 = vclz %v4454_v52  ;;  %vm1054_vm6 = vcmp.eq.s32.totalorder %v1049_v24, 2  ;;  %vm1051_vm7 = vcmp.eq.s32.totalorder %v1049_v24, 0  ;;  %vm1050_vm8 = vcmp.lt.s32.totalorder %v1049_v24, 2 }
 0x3c4   :  { %v4455_v50 = vadd.s32 4294967294, %v1023_v49 }
 0x3c6   :  { %vm4456_vm3 = vcmp.lt.s32.totalorder %v4455_v50, 0 }
 0x3c7   :  { %v1026_v2 = vsel %vm4456_vm3, 0, %v4455_v50 }
 0x3c8   :  { %v1027_v56 = vsub.s32 32, %v1026_v2  ;;  %v1031_v57 = vsub.s32 4294967266, %v1026_v2  ;;  %v1028_v1 = vshll.u32 %v1019_v47, %v1026_v2 }
 0x3ca   :  { %v1029_v60 = vshrl.u32 %v1011_v18, %v1027_v56  ;;  %v1032_v61 = vadd.s32 127, %v1031_v57 }
 0x3cc   :  { %v1030_v35 = vor.u32 %v1029_v60, %v1028_v1  ;;  %v1033_v63 = vshll.u32 %v1032_v61, 23 }
 0x3ce   :  { %v1034_v3 = vor.u32 4788187, %v1033_v63  ;;  %v1037_v4 = vcvt.s32.f32 %v1030_v35 }
 0x3d0   :  { %v1035_v29 = vand.u32 2147483647, %v1034_v3 }
 0x3d2   :  { %v1038_v6 = vmul.f32 %v1037_v4, %v1035_v29 }
 0x3d4   :  { %v1039_v7 = vxor.u32 2147483648, %v1038_v6 }
 0x3d6   :  { %v1040_v10 = vsel %vm957_vm4, %v1039_v7, %v1038_v6 }
 0x3d7   :  { %v1043_v11 = vsel %vm956_vm5, %v5474_v55, %v1040_v10 }
 0x3d8   :  { %4850 = vcosq.f32 %v1043_v11 }
 0x3d9   :  { %4852 = vsinq.f32 %v1043_v11 }
 0x3da   :  { %4854 = vpow2.f32 %v1061_v12 }
 0x3e5   :  { %v4851_v16 = vpop.eup %4850 }
 0x3e6   :  { %v4853_v17 = vpop.eup %4852  ;;  %v1055_v21 = vxor.u32 2147483648, %v4851_v16 }
 0x3e7   :  { %v1052_v22 = vxor.u32 2147483648, %v4853_v17  ;;  %v4855_v23 = vpop.eup %4854 }
 0x3e8   :  { %v1056_v51 = vsel %vm1054_vm6, %v1055_v21, %v4853_v17  ;;  %v1063_v38 = vadd.f32 1.0, %v4855_v23 }
 0x3e9   :  { %v1053_v40 = vsel %vm1051_vm7, %v4851_v16, %v1052_v22 }
 0x3ea   :  { %v1057_v26 = vsel %vm1050_vm8, %v1053_v40, %v1056_v51 }
 0x3eb   :  { %v1058_v58 = vsel %vm1047_vm9, nan, %v1057_v26 }
 0x3ec   :  { %v1059_v28 = vmul.f32 %v1058_v58, %v1058_v58 }
 0x3ee   :  { %v1064_v31 = vmul.f32 %v1063_v38, %v1059_v28 }
 0x3f0   :  { %v1065_v32 = vsub.f32 %v1064_v31, %v5470_v45 }
 0x3f2   :  { %v1069_v37 = vadd.f32 %v1068_v34, %v1065_v32 }
 0x3f4   :  { %v1070_v41 = vmul.f32 0.013888889, %v1069_v37 }
 0x3f6   :  { %v5512_v42 = vadd.f32 %v1070_v41, %v5338_v15 }
 0x3f8   :  { %v5516_v19 = vadd.f32 %v5177_v14, %v5512_v42 }
 0x3fa   :  { %v1076_v53 = vand.u32 2139095040, %v5516_v19  ;;  %v1073_v46 = vand.u32 2147483647, %v5516_v19  ;;  %vm1075_vm1 = vcmp.lt.s32.totalorder %v5516_v19, 0  ;;  %vm1165_vm6 = vweird.f32 %v5516_v19 }
 0x3fc   :  { %v1077_v55 = vshrl.u32 %v1076_v53, 23  ;;  %v1080_v62 = vand.u32 8388607, %v1073_v46  ;;  %vm1074_vm2 = vcmp.le.f32.partialorder %v1073_v46, 0.7853982 }
 0x3fe   :  { %v4457_v43 = vadd.s32 4294967169, %v1077_v55  ;;  %v1081_v35 = vor.u32 8388608, %v1080_v62 }
 0x400   :  { %v1083_v5 = vadd.s32 1, %v4457_v43  ;;  %v1121_v20 = vshll.u32 %v1081_v35, 8 }
 0x402   :  { %vm1084_vm10 = vcmp.gt.s32.totalorder %v1083_v5, 0 }
 0x403   :  { %v1085_v45 = vsel %vm1084_vm10, %v1083_v5, 0 }
 0x404   :  { %v1087_v47 = vand.u32 31, %v1085_v45  ;;  %v1086_v15 = vshrl.u32 %v1085_v45, 5 }
 0x406   :  { %v1088_v48 = vsub.s32 32, %v1087_v47  ;;  %v1090_v52 = vshll.u32 %v5117_v25, %v1087_v47  ;;  %v1093_v49 = vshll.u32 %v5118_v27, %v1087_v47  ;;  %v1096_v18 = vshll.u32 %v5119_v30, %v1087_v47 }
 0x407   :  { %v1099_v57 = vshll.u32 %v5120_v33, %v1087_v47  ;;  %v1102_v60 = vshll.u32 %v5121_v36, %v1087_v47  ;;  %vm1105_vm11 = vcmp.lt.s32.totalorder %v1086_v15, 1  ;;  %vm1108_vm12 = vcmp.lt.s32.totalorder %v1086_v15, 4 }
 0x408   :  { %v1091_v50 = vshrl.u32 %v5118_v27, %v1088_v48  ;;  %v1094_v2 = vshrl.u32 %v5119_v30, %v1088_v48  ;;  %v1097_v56 = vshrl.u32 %v5120_v33, %v1088_v48  ;;  %v1100_v1 = vshrl.u32 %v5121_v36, %v1088_v48 }
 0x409   :  { %v1103_v61 = vshrl.u32 %v5122_v39, %v1088_v48  ;;  %v1089_v10 = vshrl.u32 %v5117_v25, %v1088_v48  ;;  %vm1107_vm13 = vcmp.lt.s32.totalorder %v1086_v15, 3  ;;  %vm1106_vm14 = vcmp.lt.s32.totalorder %v1086_v15, 2 }
 0x40a   :  { %v1092_v63 = vor.u32 %v1091_v50, %v1090_v52  ;;  %v1095_v3 = vor.u32 %v1094_v2, %v1093_v49  ;;  %v1098_v29 = vor.u32 %v1097_v56, %v1096_v18  ;;  %v1101_v4 = vor.u32 %v1100_v1, %v1099_v57 }
 0x40b   :  { %v1104_v6 = vor.u32 %v1103_v61, %v1102_v60  ;;  %v1178_v1 = vsub.f32 0.0, %v5512_v42 }
 0x40c   :  { %v1110_v7 = vsel %vm1108_vm12, %v1098_v29, 2102212464  ;;  %v1113_v8 = vsel %vm1105_vm11, %v1092_v63, %v1095_v3  ;;  %v1117_v9 = vsel %vm1105_vm11, %v1095_v3, %v1098_v29  ;;  %v1114_v11 = vsel %vm1108_vm12, %v1101_v4, 920167782 }
 0x40d   :  { %v1118_v12 = vsel %vm1108_vm12, %v1104_v6, 1326507024  ;;  %v1115_v44 = vsel %vm1107_vm13, %v1098_v29, %v1114_v11  ;;  %v1109_v24 = vsel %vm1105_vm11, %v1089_v10, %v1092_v63  ;;  %v1111_v16 = vsel %vm1107_vm13, %v1095_v3, %v1110_v7 }
 0x40e   :  { %v1119_v13 = vsel %vm1107_vm13, %v1101_v4, %v1118_v12  ;;  %v1116_v17 = vsel %vm1106_vm14, %v1113_v8, %v1115_v44  ;;  %v1112_v40 = vsel %vm1106_vm14, %v1109_v24, %v1111_v16  ;;  %v1179_v63 = vmul.f32 1.442695, %v1178_v1 }
 0x40f   :  { %v1120_v21 = vsel %vm1106_vm14, %v1117_v9, %v1119_v13  ;;  %v5536_v54 = vmul.u32.u64.low %v1121_v20, %v1116_v17  ;;  %v5537_v23 = vmul.u32.u64.high %v1121_v20, %v1116_v17, %v5536_v54  ;;  %v1128_v58 = vmul.u32 %v1121_v20, %v1112_v40 }
 0x410   :  { %v5533_v22 = vmul.u32.u64.low %v1121_v20, %v1120_v21  ;;  %v5534_v51 = vmul.u32.u64.high %v1121_v20, %v1120_v21, %v5533_v22 }
 0x411   :  { %v1131_v26 = vadd.s32 1, %v5537_v23 }
 0x412   :  { %vm1130_vm15 = vc.u32 %v5534_v51, %v5536_v54  ;;  %v1129_v5 = vadd.s32 %v5536_v54, %v5534_v51 }
 0x413   :  { %v1132_v28 = vsel %vm1130_vm15, %v1131_v26, %v5537_v23 }
 0x414   :  { %v1133_v38 = vadd.s32 %v1132_v28, %v1128_v58 }
 0x416   :  { %v1134_v59 = vadd.s32 536870912, %v1133_v38 }
 0x418   :  { %v1135_v31 = vshrl.u32 %v1134_v59, 30 }
 0x41a   :  { %v1136_v32 = vshll.u32 %v1135_v31, 30  ;;  %v1159_v60 = vsub.s32 4, %v1135_v31 }
 0x41c   :  { %v1137_v34 = vsub.s32 %v1133_v38, %v1136_v32  ;;  %v1160_v3 = vsel %vm1075_vm1, %v1159_v60, %v1135_v31 }
 0x41d   :  { %v1162_v29 = vsel %vm1074_vm2, 0, %v1160_v3 }
 0x41e   :  { %v1139_v37 = vsub.s32 0, %v1137_v34  ;;  %v1166_v4 = vadd.s32 3, %v1162_v29 }
 0x420   :  { %v4458_v41 = vmin.u32 %v1139_v37, %v1137_v34  ;;  %v1167_v6 = vand.u32 3, %v1166_v4 }
 0x422   :  { %v1141_v53 = vclz %v4458_v41  ;;  %vm1172_vm3 = vcmp.eq.s32.totalorder %v1167_v6, 2  ;;  %vm1169_vm4 = vcmp.eq.s32.totalorder %v1167_v6, 0  ;;  %vm1168_vm5 = vcmp.lt.s32.totalorder %v1167_v6, 2 }
 0x424   :  { %v4459_v55 = vadd.s32 4294967294, %v1141_v53 }
 0x426   :  { %vm4460_vm0 = vcmp.lt.s32.totalorder %v4459_v55, 0 }
 0x427   :  { %v1144_v43 = vsel %vm4460_vm0, 0, %v4459_v55 }
 0x428   :  { %v1145_v45 = vsub.s32 32, %v1144_v43  ;;  %v1149_v47 = vsub.s32 4294967266, %v1144_v43  ;;  %v1146_v62 = vshll.u32 %v1137_v34, %v1144_v43 }
 0x42a   :  { %v1147_v48 = vshrl.u32 %v1129_v5, %v1145_v45  ;;  %v1150_v15 = vadd.s32 127, %v1149_v47 }
 0x42c   :  { %v1148_v52 = vor.u32 %v1147_v48, %v1146_v62  ;;  %v1151_v49 = vshll.u32 %v1150_v15, 23 }
 0x42e   :  { %v1152_v50 = vor.u32 4788187, %v1151_v49  ;;  %v1155_v18 = vcvt.s32.f32 %v1148_v52 }
 0x430   :  { %v1153_v2 = vand.u32 2147483647, %v1152_v50 }
 0x432   :  { %v1156_v56 = vmul.f32 %v1155_v18, %v1153_v2 }
 0x434   :  { %v1157_v57 = vxor.u32 2147483648, %v1156_v56 }
 0x436   :  { %v1158_v61 = vsel %vm1075_vm1, %v1157_v57, %v1156_v56 }
 0x437   :  { %v1161_v35 = vsel %vm1074_vm2, %v5516_v19, %v1158_v61 }
 0x438   :  { %4856 = vcosq.f32 %v1161_v35 }
 0x439   :  { %4858 = vsinq.f32 %v1161_v35 }
 0x43a   :  { %4860 = vpow2.f32 %v1179_v63 }
 0x445   :  { %v4857_v7 = vpop.eup %4856 }
 0x446   :  { %v4859_v8 = vpop.eup %4858  ;;  %v1173_v9 = vxor.u32 2147483648, %v4857_v7 }
 0x447   :  { %v1170_v10 = vxor.u32 2147483648, %v4859_v8  ;;  %v4861_v12 = vpop.eup %4860 }
 0x448   :  { %v1174_v11 = vsel %vm1172_vm3, %v1173_v9, %v4859_v8  ;;  %v1181_v24 = vadd.f32 1.0, %v4861_v12 }
 0x449   :  { %v1171_v46 = vsel %vm1169_vm4, %v4857_v7, %v1170_v10 }
 0x44a   :  { %v1175_v44 = vsel %vm1168_vm5, %v1171_v46, %v1174_v11 }
 0x44b   :  { %v1176_v13 = vsel %vm1165_vm6, nan, %v1175_v44 }
 0x44c   :  { %v1177_v20 = vmul.f32 %v1176_v13, %v1176_v13 }
 0x44e   :  { %v1182_v16 = vmul.f32 %v1181_v24, %v1177_v20 }
 0x450   :  { %v5550_v17 = vsub.f32 %v1182_v16, %v5512_v42 }
 0x452   :  { %v5553_v21 = vmul.f32 0.037037037, %v5550_v17 }
 0x454   :  { %v5557_v22 = vadd.f32 %v5553_v21, %v5512_v42 }
 0x456   :  { %v5561_v51 = vadd.f32 %v5177_v14, %v5557_v22 }
 0x458   :  { %v1190_v19 = vand.u32 2139095040, %v5561_v51  ;;  %v1187_v26 = vand.u32 2147483647, %v5561_v51  ;;  %vm1189_vm14 = vcmp.lt.s32.totalorder %v5561_v51, 0  ;;  %vm1279_vm3 = vweird.f32 %v5561_v51 }
 0x45a   :  { %v1191_v54 = vshrl.u32 %v1190_v19, 23  ;;  %v1194_v38 = vand.u32 8388607, %v1187_v26  ;;  %vm1188_vm15 = vcmp.le.f32.partialorder %v1187_v26, 0.7853982 }
 0x45c   :  { %v4461_v23 = vadd.s32 4294967169, %v1191_v54  ;;  %v1195_v62 = vor.u32 8388608, %v1194_v38 }
 0x45e   :  { %v1197_v40 = vadd.s32 1, %v4461_v23  ;;  %v1235_v63 = vshll.u32 %v1195_v62, 8  ;;  %v1292_v62 = vsub.f32 0.0, %v5557_v22 }
 0x460   :  { %vm1198_vm7 = vcmp.gt.s32.totalorder %v1197_v40, 0 }
 0x461   :  { %v1199_v58 = vsel %vm1198_vm7, %v1197_v40, 0 }
 0x462   :  { %v1201_v28 = vand.u32 31, %v1199_v58  ;;  %v1200_v31 = vshrl.u32 %v1199_v58, 5 }
 0x464   :  { %v1202_v59 = vsub.s32 32, %v1201_v28  ;;  %v1204_v32 = vshll.u32 %v5117_v25, %v1201_v28  ;;  %v1207_v34 = vshll.u32 %v5118_v27, %v1201_v28  ;;  %v1210_v53 = vshll.u32 %v5119_v30, %v1201_v28 }
 0x465   :  { %v1213_v43 = vshll.u32 %v5120_v33, %v1201_v28  ;;  %v1216_v45 = vshll.u32 %v5121_v36, %v1201_v28  ;;  %vm1219_vm8 = vcmp.lt.s32.totalorder %v1200_v31, 1  ;;  %vm1222_vm9 = vcmp.lt.s32.totalorder %v1200_v31, 4 }
 0x466   :  { %v1205_v37 = vshrl.u32 %v5118_v27, %v1202_v59  ;;  %v1208_v41 = vshrl.u32 %v5119_v30, %v1202_v59  ;;  %v1211_v55 = vshrl.u32 %v5120_v33, %v1202_v59  ;;  %v1214_v5 = vshrl.u32 %v5121_v36, %v1202_v59 }
 0x467   :  { %v1217_v47 = vshrl.u32 %v5122_v39, %v1202_v59  ;;  %v1203_v57 = vshrl.u32 %v5117_v25, %v1202_v59  ;;  %vm1221_vm10 = vcmp.lt.s32.totalorder %v1200_v31, 3  ;;  %vm1220_vm11 = vcmp.lt.s32.totalorder %v1200_v31, 2 }
 0x468   :  { %v1206_v48 = vor.u32 %v1205_v37, %v1204_v32  ;;  %v1209_v15 = vor.u32 %v1208_v41, %v1207_v34  ;;  %v1212_v52 = vor.u32 %v1211_v55, %v1210_v53  ;;  %v1215_v49 = vor.u32 %v1214_v5, %v1213_v43 }
 0x469   :  { %v1218_v50 = vor.u32 %v1217_v47, %v1216_v45 }
 0x46a   :  { %v1224_v2 = vsel %vm1222_vm9, %v1212_v52, 2102212464  ;;  %v1227_v18 = vsel %vm1219_vm8, %v1206_v48, %v1209_v15  ;;  %v1231_v56 = vsel %vm1219_vm8, %v1209_v15, %v1212_v52  ;;  %v1228_v1 = vsel %vm1222_vm9, %v1215_v49, 920167782 }
 0x46b   :  { %v1232_v60 = vsel %vm1222_vm9, %v1218_v50, 1326507024  ;;  %v1229_v61 = vsel %vm1221_vm10, %v1212_v52, %v1228_v1  ;;  %v1223_v3 = vsel %vm1219_vm8, %v1203_v57, %v1206_v48  ;;  %v1225_v29 = vsel %vm1221_vm10, %v1209_v15, %v1224_v2 }
 0x46c   :  { %v1233_v35 = vsel %vm1221_vm10, %v1215_v49, %v1232_v60  ;;  %v1230_v4 = vsel %vm1220_vm11, %v1227_v18, %v1229_v61  ;;  %v1226_v11 = vsel %vm1220_vm11, %v1223_v3, %v1225_v29  ;;  %v1293_v49 = vmul.f32 1.442695, %v1292_v62 }
 0x46d   :  { %v1234_v6 = vsel %vm1220_vm11, %v1231_v56, %v1233_v35  ;;  %v5581_v9 = vmul.u32.u64.low %v1235_v63, %v1230_v4  ;;  %v5582_v10 = vmul.u32.u64.high %v1235_v63, %v1230_v4, %v5581_v9  ;;  %v1242_v46 = vmul.u32 %v1235_v63, %v1226_v11 }
 0x46e   :  { %v5578_v7 = vmul.u32.u64.low %v1235_v63, %v1234_v6  ;;  %v5579_v8 = vmul.u32.u64.high %v1235_v63, %v1234_v6, %v5578_v7 }
 0x46f   :  { %v1245_v12 = vadd.s32 1, %v5582_v10 }
 0x470   :  { %vm1244_vm12 = vc.u32 %v5579_v8, %v5581_v9  ;;  %v1243_v38 = vadd.s32 %v5581_v9, %v5579_v8 }
 0x471   :  { %v1246_v44 = vsel %vm1244_vm12, %v1245_v12, %v5582_v10 }
 0x472   :  { %v1247_v13 = vadd.s32 %v1246_v44, %v1242_v46 }
 0x474   :  { %v1248_v20 = vadd.s32 536870912, %v1247_v13 }
 0x476   :  { %v1249_v24 = vshrl.u32 %v1248_v20, 30 }
 0x478   :  { %v1250_v16 = vshll.u32 %v1249_v24, 30  ;;  %v1273_v48 = vsub.s32 4, %v1249_v24 }
 0x47a   :  { %v1251_v19 = vsub.s32 %v1247_v13, %v1250_v16  ;;  %v1274_v50 = vsel %vm1189_vm14, %v1273_v48, %v1249_v24 }
 0x47b   :  { %v1276_v2 = vsel %vm1188_vm15, 0, %v1274_v50 }
 0x47c   :  { %v1253_v54 = vsub.s32 0, %v1251_v19  ;;  %v1280_v18 = vadd.s32 3, %v1276_v2 }
 0x47e   :  { %v4462_v23 = vmin.u32 %v1253_v54, %v1251_v19  ;;  %v1281_v56 = vand.u32 3, %v1280_v18 }
 0x480   :  { %v1255_v40 = vclz %v4462_v23  ;;  %vm1286_vm0 = vcmp.eq.s32.totalorder %v1281_v56, 2  ;;  %vm1283_vm1 = vcmp.eq.s32.totalorder %v1281_v56, 0  ;;  %vm1282_vm2 = vcmp.lt.s32.totalorder %v1281_v56, 2 }
 0x482   :  { %v4463_v58 = vadd.s32 4294967294, %v1255_v40 }
 0x484   :  { %vm4464_vm13 = vcmp.lt.s32.totalorder %v4463_v58, 0 }
 0x485   :  { %v1258_v28 = vsel %vm4464_vm13, 0, %v4463_v58 }
 0x486   :  { %v1259_v59 = vsub.s32 32, %v1258_v28  ;;  %v1263_v31 = vsub.s32 4294967266, %v1258_v28  ;;  %v1260_v32 = vshll.u32 %v1251_v19, %v1258_v28 }
 0x488   :  { %v1261_v34 = vshrl.u32 %v1243_v38, %v1259_v59  ;;  %v1264_v37 = vadd.s32 127, %v1263_v31 }
 0x48a   :  { %v1262_v41 = vor.u32 %v1261_v34, %v1260_v32  ;;  %v1265_v53 = vshll.u32 %v1264_v37, 23 }
 0x48c   :  { %v1266_v55 = vor.u32 4788187, %v1265_v53  ;;  %v1269_v5 = vcvt.s32.f32 %v1262_v41 }
 0x48e   :  { %v1267_v43 = vand.u32 2147483647, %v1266_v55 }
 0x490   :  { %v1270_v45 = vmul.f32 %v1269_v5, %v1267_v43 }
 0x492   :  { %v1271_v47 = vxor.u32 2147483648, %v1270_v45 }
 0x494   :  { %v1272_v15 = vsel %vm1189_vm14, %v1271_v47, %v1270_v45 }
 0x495   :  { %v1275_v52 = vsel %vm1188_vm15, %v5561_v51, %v1272_v15 }
 0x496   :  { %4862 = vcosq.f32 %v1275_v52 }
 0x497   :  { %4864 = vsinq.f32 %v1275_v52 }
 0x498   :  { %4866 = vpow2.f32 %v1293_v49 }
 0x4a3   :  { %v4863_v57 = vpop.eup %4862 }
 0x4a4   :  { %v4865_v1 = vpop.eup %4864  ;;  %v1287_v60 = vxor.u32 2147483648, %v4863_v57 }
 0x4a5   :  { %v1284_v61 = vxor.u32 2147483648, %v4865_v1  ;;  %v4867_v63 = vpop.eup %4866 }
 0x4a6   :  { %v1288_v35 = vsel %vm1286_vm0, %v1287_v60, %v4865_v1  ;;  %v1295_v6 = vadd.f32 1.0, %v4867_v63 }
 0x4a7   :  { %v1285_v26 = vsel %vm1283_vm1, %v4863_v57, %v1284_v61 }
 0x4a8   :  { %v1289_v3 = vsel %vm1282_vm2, %v1285_v26, %v1288_v35 }
 0x4a9   :  { %v1290_v29 = vsel %vm1279_vm3, nan, %v1289_v3 }
 0x4aa   :  { %v1291_v4 = vmul.f32 %v1290_v29, %v1290_v29 }
 0x4ac   :  { %v1296_v7 = vmul.f32 %v1295_v6, %v1291_v4 }
 0x4ae   :  { %v5595_v8 = vsub.f32 %v1296_v7, %v5557_v22 }
 0x4b0   :  { %v1298_v9 = vmul.f32 0.11111111, %v5595_v8 }
 0x4b2   :  { %v1299_v10 = vadd.f32 %v1298_v9, %v5512_v42 }
 0x4b4   :  { %v5600_v11 = vsub.f32 %v1299_v10, %v5553_v21 }
 0x4b6   :  { %v5604_v12 = vadd.f32 %v5177_v14, %v5600_v11 }
 0x4b8   :  { %v1305_v51 = vand.u32 2139095040, %v5604_v12  ;;  %v1302_v20 = vand.u32 2147483647, %v5604_v12  ;;  %vm1304_vm11 = vcmp.lt.s32.totalorder %v5604_v12, 0  ;;  %vm1394_vm0 = vweird.f32 %v5604_v12 }
 0x4ba   :  { %v1306_v46 = vshrl.u32 %v1305_v51, 23  ;;  %v1309_v16 = vand.u32 8388607, %v1302_v20  ;;  %vm1303_vm12 = vcmp.le.f32.partialorder %v1302_v20, 0.7853982 }
 0x4bc   :  { %v4465_v44 = vadd.s32 4294967169, %v1306_v46  ;;  %v1310_v37 = vor.u32 8388608, %v1309_v16 }
 0x4be   :  { %v1312_v13 = vadd.s32 1, %v4465_v44  ;;  %v1350_v2 = vshll.u32 %v1310_v37, 8  ;;  %v1407_v37 = vsub.f32 0.0, %v5600_v11 }
 0x4c0   :  { %vm1313_vm4 = vcmp.gt.s32.totalorder %v1312_v13, 0 }
 0x4c1   :  { %v1314_v22 = vsel %vm1313_vm4, %v1312_v13, 0 }
 0x4c2   :  { %v1316_v24 = vand.u32 31, %v1314_v22  ;;  %v1315_v21 = vshrl.u32 %v1314_v22, 5 }
 0x4c4   :  { %v1317_v19 = vsub.s32 32, %v1316_v24  ;;  %v1319_v54 = vshll.u32 %v5117_v25, %v1316_v24  ;;  %v1322_v23 = vshll.u32 %v5118_v27, %v1316_v24  ;;  %v1325_v28 = vshll.u32 %v5119_v30, %v1316_v24 }
 0x4c5   :  { %v1328_v59 = vshll.u32 %v5120_v33, %v1316_v24  ;;  %v1331_v32 = vshll.u32 %v5121_v36, %v1316_v24  ;;  %vm1334_vm5 = vcmp.lt.s32.totalorder %v1315_v21, 1  ;;  %vm1337_vm6 = vcmp.lt.s32.totalorder %v1315_v21, 4 }
 0x4c6   :  { %v1320_v40 = vshrl.u32 %v5118_v27, %v1317_v19  ;;  %v1323_v58 = vshrl.u32 %v5119_v30, %v1317_v19  ;;  %v1326_v38 = vshrl.u32 %v5120_v33, %v1317_v19  ;;  %v1329_v31 = vshrl.u32 %v5121_v36, %v1317_v19 }
 0x4c7   :  { %v1332_v34 = vshrl.u32 %v5122_v39, %v1317_v19  ;;  %v1318_v48 = vshrl.u32 %v5117_v25, %v1317_v19  ;;  %vm1336_vm7 = vcmp.lt.s32.totalorder %v1315_v21, 3  ;;  %vm1335_vm8 = vcmp.lt.s32.totalorder %v1315_v21, 2 }
 0x4c8   :  { %v1321_v41 = vor.u32 %v1320_v40, %v1319_v54  ;;  %v1324_v53 = vor.u32 %v1323_v58, %v1322_v23  ;;  %v1327_v55 = vor.u32 %v1326_v38, %v1325_v28  ;;  %v1330_v43 = vor.u32 %v1329_v31, %v1328_v59 }
 0x4c9   :  { %v1333_v5 = vor.u32 %v1332_v34, %v1331_v32 }
 0x4ca   :  { %v1339_v45 = vsel %vm1337_vm6, %v1327_v55, 2102212464  ;;  %v1342_v47 = vsel %vm1334_vm5, %v1321_v41, %v1324_v53  ;;  %v1346_v62 = vsel %vm1334_vm5, %v1324_v53, %v1327_v55  ;;  %v1343_v15 = vsel %vm1337_vm6, %v1330_v43, 920167782 }
 0x4cb   :  { %v1347_v52 = vsel %vm1337_vm6, %v1333_v5, 1326507024  ;;  %v1344_v49 = vsel %vm1336_vm7, %v1327_v55, %v1343_v15  ;;  %v1338_v18 = vsel %vm1334_vm5, %v1318_v48, %v1321_v41  ;;  %v1340_v56 = vsel %vm1336_vm7, %v1324_v53, %v1339_v45 }
 0x4cc   :  { %v1348_v50 = vsel %vm1336_vm7, %v1330_v43, %v1347_v52  ;;  %v1345_v57 = vsel %vm1335_vm8, %v1342_v47, %v1344_v49  ;;  %v1341_v26 = vsel %vm1335_vm8, %v1338_v18, %v1340_v56  ;;  %v1408_v43 = vmul.f32 1.442695, %v1407_v37 }
 0x4cd   :  { %v1349_v1 = vsel %vm1335_vm8, %v1346_v62, %v1348_v50  ;;  %v5624_v35 = vmul.u32.u64.low %v1350_v2, %v1345_v57  ;;  %v5625_v63 = vmul.u32.u64.high %v1350_v2, %v1345_v57, %v5624_v35  ;;  %v1357_v29 = vmul.u32 %v1350_v2, %v1341_v26 }
 0x4ce   :  { %v5621_v60 = vmul.u32.u64.low %v1350_v2, %v1349_v1  ;;  %v5622_v61 = vmul.u32.u64.high %v1350_v2, %v1349_v1, %v5621_v60 }
 0x4cf   :  { %v1360_v3 = vadd.s32 1, %v5625_v63 }
 0x4d0   :  { %vm1359_vm9 = vc.u32 %v5622_v61, %v5624_v35  ;;  %v1358_v16 = vadd.s32 %v5624_v35, %v5622_v61  ;;  %v1413_v35 = vsub.f32 %v5550_v17, %v5595_v8 }
 0x4d1   :  { %v1361_v4 = vsel %vm1359_vm9, %v1360_v3, %v5625_v63 }
 0x4d2   :  { %v1362_v6 = vadd.s32 %v1361_v4, %v1357_v29 }
 0x4d4   :  { %v1363_v7 = vadd.s32 536870912, %v1362_v6 }
 0x4d6   :  { %v1364_v9 = vshrl.u32 %v1363_v7, 30 }
 0x4d8   :  { %v1365_v10 = vshll.u32 %v1364_v9, 30  ;;  %v1388_v41 = vsub.s32 4, %v1364_v9 }
 0x4da   :  { %v1366_v51 = vsub.s32 %v1362_v6, %v1365_v10  ;;  %v1389_v5 = vsel %vm1304_vm11, %v1388_v41, %v1364_v9 }
 0x4db   :  { %v1391_v45 = vsel %vm1303_vm12, 0, %v1389_v5 }
 0x4dc   :  { %v1368_v46 = vsub.s32 0, %v1366_v51  ;;  %v1395_v47 = vadd.s32 3, %v1391_v45 }
 0x4de   :  { %v4466_v44 = vmin.u32 %v1368_v46, %v1366_v51  ;;  %v1396_v62 = vand.u32 3, %v1395_v47 }
 0x4e0   :  { %v1370_v13 = vclz %v4466_v44  ;;  %vm1401_vm13 = vcmp.eq.s32.totalorder %v1396_v62, 2  ;;  %vm1398_vm14 = vcmp.eq.s32.totalorder %v1396_v62, 0  ;;  %vm1397_vm15 = vcmp.lt.s32.totalorder %v1396_v62, 2 }
 0x4e2   :  { %v4467_v22 = vadd.s32 4294967294, %v1370_v13 }
 0x4e4   :  { %vm4468_vm10 = vcmp.lt.s32.totalorder %v4467_v22, 0 }
 0x4e5   :  { %v1373_v24 = vsel %vm4468_vm10, 0, %v4467_v22 }
 0x4e6   :  { %v1374_v19 = vsub.s32 32, %v1373_v24  ;;  %v1378_v21 = vsub.s32 4294967266, %v1373_v24  ;;  %v1375_v54 = vshll.u32 %v1366_v51, %v1373_v24 }
 0x4e8   :  { %v1376_v23 = vshrl.u32 %v1358_v16, %v1374_v19  ;;  %v1379_v40 = vadd.s32 127, %v1378_v21 }
 0x4ea   :  { %v1377_v58 = vor.u32 %v1376_v23, %v1375_v54  ;;  %v1380_v28 = vshll.u32 %v1379_v40, 23 }
 0x4ec   :  { %v1381_v38 = vor.u32 4788187, %v1380_v28  ;;  %v1384_v31 = vcvt.s32.f32 %v1377_v58 }
 0x4ee   :  { %v1382_v59 = vand.u32 2147483647, %v1381_v38 }
 0x4f0   :  { %v1385_v32 = vmul.f32 %v1384_v31, %v1382_v59 }
 0x4f2   :  { %v1386_v34 = vxor.u32 2147483648, %v1385_v32 }
 0x4f4   :  { %v1387_v53 = vsel %vm1304_vm11, %v1386_v34, %v1385_v32 }
 0x4f5   :  { %v1390_v55 = vsel %vm1303_vm12, %v5604_v12, %v1387_v53 }
 0x4f6   :  { %4868 = vcosq.f32 %v1390_v55 }
 0x4f7   :  { %4870 = vsinq.f32 %v1390_v55 }
 0x4f8   :  { %4872 = vpow2.f32 %v1408_v43 }
 0x503   :  { %v4869_v48 = vpop.eup %4868 }
 0x504   :  { %v4871_v15 = vpop.eup %4870  ;;  %v1402_v52 = vxor.u32 2147483648, %v4869_v48 }
 0x505   :  { %v1399_v49 = vxor.u32 2147483648, %v4871_v15  ;;  %v4873_v2 = vpop.eup %4872 }
 0x506   :  { %v1403_v50 = vsel %vm1401_vm13, %v1402_v52, %v4871_v15  ;;  %v1410_v1 = vadd.f32 1.0, %v4873_v2 }
 0x507   :  { %v1400_v20 = vsel %vm1398_vm14, %v4869_v48, %v1399_v49 }
 0x508   :  { %v1404_v18 = vsel %vm1397_vm15, %v1400_v20, %v1403_v50 }
 0x509   :  { %v1405_v56 = vsel %vm1394_vm0, nan, %v1404_v18 }
 0x50a   :  { %v1406_v57 = vmul.f32 %v1405_v56, %v1405_v56 }
 0x50c   :  { %v1411_v60 = vmul.f32 %v1410_v1, %v1406_v57 }
 0x50e   :  { %v5638_v61 = vsub.f32 %v1411_v60, %v5600_v11 }
 0x510   :  { %v1414_v63 = vadd.f32 %v1413_v35, %v5638_v61 }
 0x512   :  { %v1415_v26 = vmul.f32 0.11111111, %v1414_v63 }
 0x514   :  { %v5644_v3 = vadd.f32 %v1415_v26, %v5512_v42 }
 0x516   :  { %v5648_v12 = vadd.f32 %v5177_v14, %v5644_v3 }
 0x518   :  { %v1421_v29 = vand.u32 2139095040, %v5648_v12  ;;  %v1418_v11 = vand.u32 2147483647, %v5648_v12  ;;  %vm1420_vm8 = vcmp.lt.s32.totalorder %v5648_v12, 0  ;;  %vm1510_vm13 = vweird.f32 %v5648_v12 }
 0x51a   :  { %v1422_v4 = vshrl.u32 %v1421_v29, 23  ;;  %v1425_v51 = vand.u32 8388607, %v1418_v11  ;;  %vm1419_vm9 = vcmp.le.f32.partialorder %v1418_v11, 0.7853982  ;;  %v1529_v11 = vadd.f32 %v5638_v61, %v5595_v8 }
 0x51c   :  { %v4469_v6 = vadd.s32 4294967169, %v1422_v4  ;;  %v1426_v28 = vor.u32 8388608, %v1425_v51 }
 0x51e   :  { %v1428_v7 = vadd.s32 1, %v4469_v6  ;;  %v1466_v62 = vshll.u32 %v1426_v28, 8 }
 0x520   :  { %vm1429_vm1 = vcmp.gt.s32.totalorder %v1428_v7, 0 }
 0x521   :  { %v1430_v9 = vsel %vm1429_vm1, %v1428_v7, 0 }
 0x522   :  { %v1432_v10 = vand.u32 31, %v1430_v9  ;;  %v1431_v44 = vshrl.u32 %v1430_v9, 5 }
 0x524   :  { %v1433_v46 = vsub.s32 32, %v1432_v10  ;;  %v1435_v13 = vshll.u32 %v5117_v25, %v1432_v10  ;;  %v1438_v22 = vshll.u32 %v5118_v27, %v1432_v10  ;;  %v1441_v19 = vshll.u32 %v5119_v30, %v1432_v10 }
 0x525   :  { %v1444_v54 = vshll.u32 %v5120_v33, %v1432_v10  ;;  %v1447_v40 = vshll.u32 %v5121_v36, %v1432_v10  ;;  %vm1450_vm2 = vcmp.lt.s32.totalorder %v1431_v44, 1  ;;  %vm1453_vm3 = vcmp.lt.s32.totalorder %v1431_v44, 4 }
 0x526   :  { %v1436_v24 = vshrl.u32 %v5118_v27, %v1433_v46  ;;  %v1439_v16 = vshrl.u32 %v5119_v30, %v1433_v46  ;;  %v1442_v21 = vshrl.u32 %v5120_v33, %v1433_v46  ;;  %v1445_v23 = vshrl.u32 %v5121_v36, %v1433_v46 }
 0x527   :  { %v1448_v58 = vshrl.u32 %v5122_v39, %v1433_v46  ;;  %v1434_v55 = vshrl.u32 %v5117_v25, %v1433_v46  ;;  %vm1452_vm4 = vcmp.lt.s32.totalorder %v1431_v44, 3  ;;  %vm1451_vm5 = vcmp.lt.s32.totalorder %v1431_v44, 2 }
 0x528   :  { %v1437_v38 = vor.u32 %v1436_v24, %v1435_v13  ;;  %v1440_v59 = vor.u32 %v1439_v16, %v1438_v22  ;;  %v1443_v31 = vor.u32 %v1442_v21, %v1441_v19  ;;  %v1446_v32 = vor.u32 %v1445_v23, %v1444_v54 }
 0x529   :  { %v1449_v34 = vor.u32 %v1448_v58, %v1447_v40 }
 0x52a   :  { %v1455_v37 = vsel %vm1453_vm3, %v1443_v31, 2102212464  ;;  %v1458_v41 = vsel %vm1450_vm2, %v1437_v38, %v1440_v59  ;;  %v1462_v53 = vsel %vm1450_vm2, %v1440_v59, %v1443_v31  ;;  %v1459_v43 = vsel %vm1453_vm3, %v1446_v32, 920167782 }
 0x52b   :  { %v1463_v5 = vsel %vm1453_vm3, %v1449_v34, 1326507024  ;;  %v1460_v45 = vsel %vm1452_vm4, %v1443_v31, %v1459_v43  ;;  %v1454_v48 = vsel %vm1450_vm2, %v1434_v55, %v1437_v38  ;;  %v1456_v15 = vsel %vm1452_vm4, %v1440_v59, %v1455_v37 }
 0x52c   :  { %v1464_v47 = vsel %vm1452_vm4, %v1446_v32, %v1463_v5  ;;  %v1461_v52 = vsel %vm1451_vm5, %v1458_v41, %v1460_v45  ;;  %v1457_v56 = vsel %vm1451_vm5, %v1454_v48, %v1456_v15  ;;  %v1523_v38 = vsub.f32 0.0, %v5644_v3 }
 0x52d   :  { %v1465_v49 = vsel %vm1451_vm5, %v1462_v53, %v1464_v47  ;;  %v5668_v20 = vmul.u32.u64.low %v1466_v62, %v1461_v52  ;;  %v5669_v18 = vmul.u32.u64.high %v1466_v62, %v1461_v52, %v5668_v20  ;;  %v1473_v1 = vmul.u32 %v1466_v62, %v1457_v56 }
 0x52e   :  { %v5665_v50 = vmul.u32.u64.low %v1466_v62, %v1465_v49  ;;  %v5666_v2 = vmul.u32.u64.high %v1466_v62, %v1465_v49, %v5665_v50  ;;  %v1524_v34 = vmul.f32 1.442695, %v1523_v38 }
 0x52f   :  { %v1476_v57 = vadd.s32 1, %v5669_v18 }
 0x530   :  { %vm1475_vm6 = vc.u32 %v5666_v2, %v5668_v20  ;;  %v1474_v46 = vadd.s32 %v5668_v20, %v5666_v2  ;;  %v1530_v20 = vmul.f32 3.0, %v1529_v11 }
 0x531   :  { %v1477_v60 = vsel %vm1475_vm6, %v1476_v57, %v5669_v18 }
 0x532   :  { %v1478_v35 = vadd.s32 %v1477_v60, %v1473_v1  ;;  %v1531_v57 = vadd.f32 %v1530_v20, %v5550_v17 }
 0x534   :  { %v1479_v63 = vadd.s32 536870912, %v1478_v35 }
 0x536   :  { %v1480_v26 = vshrl.u32 %v1479_v63, 30 }
 0x538   :  { %v1481_v29 = vshll.u32 %v1480_v26, 30  ;;  %v1504_v59 = vsub.s32 4, %v1480_v26 }
 0x53a   :  { %v1482_v4 = vsub.s32 %v1478_v35, %v1481_v29  ;;  %v1505_v37 = vsel %vm1420_vm8, %v1504_v59, %v1480_v26 }
 0x53b   :  { %v1507_v41 = vsel %vm1419_vm9, 0, %v1505_v37 }
 0x53c   :  { %v1484_v6 = vsub.s32 0, %v1482_v4  ;;  %v1511_v53 = vadd.s32 3, %v1507_v41 }
 0x53e   :  { %v4470_v7 = vmin.u32 %v1484_v6, %v1482_v4  ;;  %v1512_v55 = vand.u32 3, %v1511_v53 }
 0x540   :  { %v1486_v9 = vclz %v4470_v7  ;;  %vm1517_vm10 = vcmp.eq.s32.totalorder %v1512_v55, 2  ;;  %vm1514_vm11 = vcmp.eq.s32.totalorder %v1512_v55, 0  ;;  %vm1513_vm12 = vcmp.lt.s32.totalorder %v1512_v55, 2 }
 0x542   :  { %v4471_v10 = vadd.s32 4294967294, %v1486_v9 }
 0x544   :  { %vm4472_vm7 = vcmp.lt.s32.totalorder %v4471_v10, 0 }
 0x545   :  { %v1489_v51 = vsel %vm4472_vm7, 0, %v4471_v10 }
 0x546   :  { %v1490_v44 = vsub.s32 32, %v1489_v51  ;;  %v1494_v13 = vsub.s32 4294967266, %v1489_v51  ;;  %v1491_v22 = vshll.u32 %v1482_v4, %v1489_v51 }
 0x548   :  { %v1492_v24 = vshrl.u32 %v1474_v46, %v1490_v44  ;;  %v1495_v16 = vadd.s32 127, %v1494_v13 }
 0x54a   :  { %v1493_v19 = vor.u32 %v1492_v24, %v1491_v22  ;;  %v1496_v21 = vshll.u32 %v1495_v16, 23 }
 0x54c   :  { %v1497_v54 = vor.u32 4788187, %v1496_v21  ;;  %v1500_v40 = vcvt.s32.f32 %v1493_v19 }
 0x54e   :  { %v1498_v23 = vand.u32 2147483647, %v1497_v54 }
 0x550   :  { %v1501_v58 = vmul.f32 %v1500_v40, %v1498_v23 }
 0x552   :  { %v1502_v28 = vxor.u32 2147483648, %v1501_v58 }
 0x554   :  { %v1503_v31 = vsel %vm1420_vm8, %v1502_v28, %v1501_v58 }
 0x555   :  { %v1506_v32 = vsel %vm1419_vm9, %v5648_v12, %v1503_v31 }
 0x556   :  { %4874 = vcosq.f32 %v1506_v32 }
 0x557   :  { %4876 = vsinq.f32 %v1506_v32 }
 0x558   :  { %4878 = vpow2.f32 %v1524_v34 }
 0x563   :  { %v4875_v43 = vpop.eup %4874 }
 0x564   :  { %v4877_v5 = vpop.eup %4876  ;;  %v1518_v45 = vxor.u32 2147483648, %v4875_v43 }
 0x565   :  { %v1515_v47 = vxor.u32 2147483648, %v4877_v5  ;;  %v4879_v48 = vpop.eup %4878 }
 0x566   :  { %v1519_v62 = vsel %vm1517_vm10, %v1518_v45, %v4877_v5  ;;  %v1526_v2 = vadd.f32 1.0, %v4879_v48 }
 0x567   :  { %v1516_v15 = vsel %vm1514_vm11, %v4875_v43, %v1515_v47 }
 0x568   :  { %v1520_v52 = vsel %vm1513_vm12, %v1516_v15, %v1519_v62 }
 0x569   :  { %v1521_v49 = vsel %vm1510_vm13, nan, %v1520_v52 }
 0x56a   :  { %v1522_v50 = vmul.f32 %v1521_v49, %v1521_v49 }
 0x56c   :  { %v1527_v18 = vmul.f32 %v1526_v2, %v1522_v50 }
 0x56e   :  { %v1528_v56 = vsub.f32 %v1527_v18, %v5644_v3 }
 0x570   :  { %v1532_v1 = vadd.f32 %v1531_v57, %v1528_v56 }
 0x572   :  { %v1533_v60 = vmul.f32 0.013888889, %v1532_v1 }
 0x574   :  { %v5686_v35 = vadd.f32 %v1533_v60, %v5512_v42 }
 0x576   :  { %v5690_v8 = vadd.f32 %v5177_v14, %v5686_v35 }
 0x578   :  { %v1539_v61 = vand.u32 2139095040, %v5690_v8  ;;  %v1536_v29 = vand.u32 2147483647, %v5690_v8  ;;  %vm1538_vm5 = vcmp.lt.s32.totalorder %v5690_v8, 0  ;;  %vm1628_vm10 = vweird.f32 %v5690_v8 }
 0x57a   :  { %v1540_v12 = vshrl.u32 %v1539_v61, 23  ;;  %v1543_v17 = vand.u32 8388607, %v1536_v29  ;;  %vm1537_vm6 = vcmp.le.f32.partialorder %v1536_v29, 0.7853982 }
 0x57c   :  { %v4473_v63 = vadd.s32 4294967169, %v1540_v12  ;;  %v1544_v19 = vor.u32 8388608, %v1543_v17 }
 0x57e   :  { %v1546_v26 = vadd.s32 1, %v4473_v63  ;;  %v1584_v53 = vshll.u32 %v1544_v19, 8 }
 0x580   :  { %vm1547_vm14 = vcmp.gt.s32.totalorder %v1546_v26, 0 }
 0x581   :  { %v1548_v3 = vsel %vm1547_vm14, %v1546_v26, 0 }
 0x582   :  { %v1550_v4 = vand.u32 31, %v1548_v3  ;;  %v1549_v42 = vshrl.u32 %v1548_v3, 5 }
 0x584   :  { %v1551_v6 = vsub.s32 32, %v1550_v4  ;;  %v1553_v7 = vshll.u32 %v5117_v25, %v1550_v4  ;;  %v1556_v9 = vshll.u32 %v5118_v27, %v1550_v4  ;;  %v1559_v46 = vshll.u32 %v5119_v30, %v1550_v4 }
 0x585   :  { %v1562_v13 = vshll.u32 %v5120_v33, %v1550_v4  ;;  %v1565_v24 = vshll.u32 %v5121_v36, %v1550_v4  ;;  %vm1568_vm15 = vcmp.lt.s32.totalorder %v1549_v42, 1  ;;  %vm1571_vm0 = vcmp.lt.s32.totalorder %v1549_v42, 4 }
 0x586   :  { %v1554_v10 = vshrl.u32 %v5118_v27, %v1551_v6  ;;  %v1557_v51 = vshrl.u32 %v5119_v30, %v1551_v6  ;;  %v1560_v44 = vshrl.u32 %v5120_v33, %v1551_v6  ;;  %v1563_v22 = vshrl.u32 %v5121_v36, %v1551_v6 }
 0x587   :  { %v1566_v16 = vshrl.u32 %v5122_v39, %v1551_v6  ;;  %v1552_v31 = vshrl.u32 %v5117_v25, %v1551_v6  ;;  %vm1570_vm1 = vcmp.lt.s32.totalorder %v1549_v42, 3  ;;  %vm1569_vm2 = vcmp.lt.s32.totalorder %v1549_v42, 2 }
 0x588   :  { %v1555_v21 = vor.u32 %v1554_v10, %v1553_v7  ;;  %v1558_v54 = vor.u32 %v1557_v51, %v1556_v9  ;;  %v1561_v23 = vor.u32 %v1560_v44, %v1559_v46  ;;  %v1564_v40 = vor.u32 %v1563_v22, %v1562_v13 }
 0x589   :  { %v1567_v58 = vor.u32 %v1566_v16, %v1565_v24  ;;  %v1641_v22 = vsub.f32 0.0, %v5686_v35 }
 0x58a   :  { %v1573_v28 = vsel %vm1571_vm0, %v1561_v23, 2102212464  ;;  %v1576_v38 = vsel %vm1568_vm15, %v1555_v21, %v1558_v54  ;;  %v1580_v59 = vsel %vm1568_vm15, %v1558_v54, %v1561_v23  ;;  %v1577_v32 = vsel %vm1571_vm0, %v1564_v40, 920167782 }
 0x58b   :  { %v1581_v34 = vsel %vm1571_vm0, %v1567_v58, 1326507024  ;;  %v1578_v37 = vsel %vm1570_vm1, %v1561_v23, %v1577_v32  ;;  %v1572_v55 = vsel %vm1568_vm15, %v1552_v31, %v1555_v21  ;;  %v1574_v43 = vsel %vm1570_vm1, %v1558_v54, %v1573_v28 }
 0x58c   :  { %v1582_v41 = vsel %vm1570_vm1, %v1564_v40, %v1581_v34  ;;  %v1579_v5 = vsel %vm1569_vm2, %v1576_v38, %v1578_v37  ;;  %v1575_v15 = vsel %vm1569_vm2, %v1572_v55, %v1574_v43  ;;  %v1642_v21 = vmul.f32 1.442695, %v1641_v22 }
 0x58d   :  { %v1583_v45 = vsel %vm1569_vm2, %v1580_v59, %v1582_v41  ;;  %v5710_v11 = vmul.u32.u64.low %v1584_v53, %v1579_v5  ;;  %v5711_v48 = vmul.u32.u64.high %v1584_v53, %v1579_v5, %v5710_v11  ;;  %v1591_v49 = vmul.u32 %v1584_v53, %v1575_v15 }
 0x58e   :  { %v5707_v47 = vmul.u32.u64.low %v1584_v53, %v1583_v45  ;;  %v5708_v62 = vmul.u32.u64.high %v1584_v53, %v1583_v45, %v5707_v47 }
 0x58f   :  { %v1594_v52 = vadd.s32 1, %v5711_v48 }
 0x590   :  { %vm1593_vm3 = vc.u32 %v5708_v62, %v5710_v11  ;;  %v1592_v26 = vadd.s32 %v5710_v11, %v5708_v62 }
 0x591   :  { %v1595_v50 = vsel %vm1593_vm3, %v1594_v52, %v5711_v48 }
 0x592   :  { %v1596_v2 = vadd.s32 %v1595_v50, %v1591_v49 }
 0x594   :  { %v1597_v20 = vadd.s32 536870912, %v1596_v2 }
 0x596   :  { %v1598_v18 = vshrl.u32 %v1597_v20, 30 }
 0x598   :  { %v1599_v56 = vshll.u32 %v1598_v18, 30  ;;  %v1622_v24 = vsub.s32 4, %v1598_v18 }
 0x59a   :  { %v1600_v57 = vsub.s32 %v1596_v2, %v1599_v56  ;;  %v1623_v54 = vsel %vm1538_vm5, %v1622_v24, %v1598_v18 }
 0x59b   :  { %v1625_v23 = vsel %vm1537_vm6, 0, %v1623_v54 }
 0x59c   :  { %v1602_v1 = vsub.s32 0, %v1600_v57  ;;  %v1629_v40 = vadd.s32 3, %v1625_v23 }
 0x59e   :  { %v4474_v60 = vmin.u32 %v1602_v1, %v1600_v57  ;;  %v1630_v58 = vand.u32 3, %v1629_v40 }
 0x5a0   :  { %v1604_v61 = vclz %v4474_v60  ;;  %vm1635_vm7 = vcmp.eq.s32.totalorder %v1630_v58, 2  ;;  %vm1632_vm8 = vcmp.eq.s32.totalorder %v1630_v58, 0  ;;  %vm1631_vm9 = vcmp.lt.s32.totalorder %v1630_v58, 2 }
 0x5a2   :  { %v4475_v12 = vadd.s32 4294967294, %v1604_v61 }
 0x5a4   :  { %vm4476_vm4 = vcmp.lt.s32.totalorder %v4475_v12, 0 }
 0x5a5   :  { %v1607_v63 = vsel %vm4476_vm4, 0, %v4475_v12 }
 0x5a6   :  { %v1608_v3 = vsub.s32 32, %v1607_v63  ;;  %v1612_v4 = vsub.s32 4294967266, %v1607_v63  ;;  %v1609_v17 = vshll.u32 %v1600_v57, %v1607_v63 }
 0x5a8   :  { %v1610_v6 = vshrl.u32 %v1592_v26, %v1608_v3  ;;  %v1613_v42 = vadd.s32 127, %v1612_v4 }
 0x5aa   :  { %v1611_v7 = vor.u32 %v1610_v6, %v1609_v17  ;;  %v1614_v9 = vshll.u32 %v1613_v42, 23 }
 0x5ac   :  { %v1615_v10 = vor.u32 4788187, %v1614_v9  ;;  %v1618_v46 = vcvt.s32.f32 %v1611_v7 }
 0x5ae   :  { %v1616_v51 = vand.u32 2147483647, %v1615_v10 }
 0x5b0   :  { %v1619_v44 = vmul.f32 %v1618_v46, %v1616_v51 }
 0x5b2   :  { %v1620_v13 = vxor.u32 2147483648, %v1619_v44 }
 0x5b4   :  { %v1621_v16 = vsel %vm1538_vm5, %v1620_v13, %v1619_v44 }
 0x5b5   :  { %v1624_v19 = vsel %vm1537_vm6, %v5690_v8, %v1621_v16 }
 0x5b6   :  { %4880 = vcosq.f32 %v1624_v19 }
 0x5b7   :  { %4882 = vsinq.f32 %v1624_v19 }
 0x5b8   :  { %4884 = vpow2.f32 %v1642_v21 }
 0x5c3   :  { %v4881_v28 = vpop.eup %4880 }
 0x5c4   :  { %v4883_v38 = vpop.eup %4882  ;;  %v1636_v59 = vxor.u32 2147483648, %v4881_v28 }
 0x5c5   :  { %v1633_v31 = vxor.u32 2147483648, %v4883_v38  ;;  %v4885_v34 = vpop.eup %4884 }
 0x5c6   :  { %v1637_v32 = vsel %vm1635_vm7, %v1636_v59, %v4883_v38  ;;  %v1644_v55 = vadd.f32 1.0, %v4885_v34 }
 0x5c7   :  { %v1634_v29 = vsel %vm1632_vm8, %v4881_v28, %v1633_v31 }
 0x5c8   :  { %v1638_v37 = vsel %vm1631_vm9, %v1634_v29, %v1637_v32 }
 0x5c9   :  { %v1639_v41 = vsel %vm1628_vm10, nan, %v1638_v37 }
 0x5ca   :  { %v1640_v53 = vmul.f32 %v1639_v41, %v1639_v41 }
 0x5cc   :  { %v1645_v43 = vmul.f32 %v1644_v55, %v1640_v53 }
 0x5ce   :  { %v5724_v5 = vsub.f32 %v1645_v43, %v5686_v35 }
 0x5d0   :  { %v5727_v45 = vmul.f32 0.037037037, %v5724_v5 }
 0x5d2   :  { %v5731_v47 = vadd.f32 %v5727_v45, %v5686_v35 }
 0x5d4   :  { %v5735_v62 = vadd.f32 %v5177_v14, %v5731_v47 }
 0x5d6   :  { %v1653_v8 = vand.u32 2139095040, %v5735_v62  ;;  %v1650_v52 = vand.u32 2147483647, %v5735_v62  ;;  %vm1652_vm2 = vcmp.lt.s32.totalorder %v5735_v62, 0  ;;  %vm1742_vm7 = vweird.f32 %v5735_v62 }
 0x5d8   :  { %v1654_v11 = vshrl.u32 %v1653_v8, 23  ;;  %v1657_v2 = vand.u32 8388607, %v1650_v52  ;;  %vm1651_vm3 = vcmp.le.f32.partialorder %v1650_v52, 0.7853982 }
 0x5da   :  { %v4477_v48 = vadd.s32 4294967169, %v1654_v11  ;;  %v1658_v17 = vor.u32 8388608, %v1657_v2 }
 0x5dc   :  { %v1660_v15 = vadd.s32 1, %v4477_v48  ;;  %v1698_v21 = vshll.u32 %v1658_v17, 8  ;;  %v1755_v17 = vsub.f32 0.0, %v5731_v47 }
 0x5de   :  { %vm1661_vm11 = vcmp.gt.s32.totalorder %v1660_v15, 0 }
 0x5df   :  { %v1662_v49 = vsel %vm1661_vm11, %v1660_v15, 0 }
 0x5e0   :  { %v1664_v50 = vand.u32 31, %v1662_v49  ;;  %v1663_v18 = vshrl.u32 %v1662_v49, 5 }
 0x5e2   :  { %v1665_v20 = vsub.s32 32, %v1664_v50  ;;  %v1667_v56 = vshll.u32 %v5117_v25, %v1664_v50  ;;  %v1670_v57 = vshll.u32 %v5118_v27, %v1664_v50  ;;  %v1673_v61 = vshll.u32 %v5119_v30, %v1664_v50 }
 0x5e3   :  { %v1676_v63 = vshll.u32 %v5120_v33, %v1664_v50  ;;  %v1679_v3 = vshll.u32 %v5121_v36, %v1664_v50  ;;  %vm1682_vm12 = vcmp.lt.s32.totalorder %v1663_v18, 1  ;;  %vm1685_vm13 = vcmp.lt.s32.totalorder %v1663_v18, 4 }
 0x5e4   :  { %v1668_v1 = vshrl.u32 %v5118_v27, %v1665_v20  ;;  %v1671_v60 = vshrl.u32 %v5119_v30, %v1665_v20  ;;  %v1674_v12 = vshrl.u32 %v5120_v33, %v1665_v20  ;;  %v1677_v26 = vshrl.u32 %v5121_v36, %v1665_v20 }
 0x5e5   :  { %v1680_v4 = vshrl.u32 %v5122_v39, %v1665_v20  ;;  %v1666_v13 = vshrl.u32 %v5117_v25, %v1665_v20  ;;  %vm1684_vm14 = vcmp.lt.s32.totalorder %v1663_v18, 3  ;;  %vm1683_vm15 = vcmp.lt.s32.totalorder %v1663_v18, 2 }
 0x5e6   :  { %v1669_v6 = vor.u32 %v1668_v1, %v1667_v56  ;;  %v1672_v42 = vor.u32 %v1671_v60, %v1670_v57  ;;  %v1675_v7 = vor.u32 %v1674_v12, %v1673_v61  ;;  %v1678_v9 = vor.u32 %v1677_v26, %v1676_v63 }
 0x5e7   :  { %v1681_v10 = vor.u32 %v1680_v4, %v1679_v3 }
 0x5e8   :  { %v1687_v51 = vsel %vm1685_vm13, %v1675_v7, 2102212464  ;;  %v1690_v46 = vsel %vm1682_vm12, %v1669_v6, %v1672_v42  ;;  %v1694_v44 = vsel %vm1682_vm12, %v1672_v42, %v1675_v7  ;;  %v1691_v22 = vsel %vm1685_vm13, %v1678_v9, 920167782 }
 0x5e9   :  { %v1695_v24 = vsel %vm1685_vm13, %v1681_v10, 1326507024  ;;  %v1692_v16 = vsel %vm1684_vm14, %v1675_v7, %v1691_v22  ;;  %v1686_v54 = vsel %vm1682_vm12, %v1666_v13, %v1669_v6  ;;  %v1688_v23 = vsel %vm1684_vm14, %v1672_v42, %v1687_v51 }
 0x5ea   :  { %v1696_v19 = vsel %vm1684_vm14, %v1678_v9, %v1695_v24  ;;  %v1693_v40 = vsel %vm1683_vm15, %v1690_v46, %v1692_v16  ;;  %v1689_v32 = vsel %vm1683_vm15, %v1686_v54, %v1688_v23  ;;  %v1756_v9 = vmul.f32 1.442695, %v1755_v17 }
 0x5eb   :  { %v1697_v58 = vsel %vm1683_vm15, %v1694_v44, %v1696_v19  ;;  %v5755_v59 = vmul.u32.u64.low %v1698_v21, %v1693_v40  ;;  %v5756_v31 = vmul.u32.u64.high %v1698_v21, %v1693_v40, %v5755_v59  ;;  %v1705_v29 = vmul.u32 %v1698_v21, %v1689_v32 }
 0x5ec   :  { %v5752_v28 = vmul.u32.u64.low %v1698_v21, %v1697_v58  ;;  %v5753_v38 = vmul.u32.u64.high %v1698_v21, %v1697_v58, %v5752_v28 }
 0x5ed   :  { %v1708_v34 = vadd.s32 1, %v5756_v31 }
 0x5ee   :  { %vm1707_vm0 = vc.u32 %v5753_v38, %v5755_v59  ;;  %v1706_v2 = vadd.s32 %v5755_v59, %v5753_v38 }
 0x5ef   :  { %v1709_v37 = vsel %vm1707_vm0, %v1708_v34, %v5756_v31 }
 0x5f0   :  { %v1710_v41 = vadd.s32 %v1709_v37, %v1705_v29 }
 0x5f2   :  { %v1711_v53 = vadd.s32 536870912, %v1710_v41 }
 0x5f4   :  { %v1712_v55 = vshrl.u32 %v1711_v53, 30 }
 0x5f6   :  { %v1713_v43 = vshll.u32 %v1712_v55, 30  ;;  %v1736_v6 = vsub.s32 4, %v1712_v55 }
 0x5f8   :  { %v1714_v8 = vsub.s32 %v1710_v41, %v1713_v43  ;;  %v1737_v10 = vsel %vm1652_vm2, %v1736_v6, %v1712_v55 }
 0x5f9   :  { %v1739_v51 = vsel %vm1651_vm3, 0, %v1737_v10 }
 0x5fa   :  { %v1716_v11 = vsub.s32 0, %v1714_v8  ;;  %v1743_v46 = vadd.s32 3, %v1739_v51 }
 0x5fc   :  { %v4478_v48 = vmin.u32 %v1716_v11, %v1714_v8  ;;  %v1744_v44 = vand.u32 3, %v1743_v46 }
 0x5fe   :  { %v1718_v15 = vclz %v4478_v48  ;;  %vm1749_vm4 = vcmp.eq.s32.totalorder %v1744_v44, 2  ;;  %vm1746_vm5 = vcmp.eq.s32.totalorder %v1744_v44, 0  ;;  %vm1745_vm6 = vcmp.lt.s32.totalorder %v1744_v44, 2 }
 0x600   :  { %v4479_v49 = vadd.s32 4294967294, %v1718_v15 }
 0x602   :  { %vm4480_vm1 = vcmp.lt.s32.totalorder %v4479_v49, 0 }
 0x603   :  { %v1721_v50 = vsel %vm4480_vm1, 0, %v4479_v49 }
 0x604   :  { %v1722_v20 = vsub.s32 32, %v1721_v50  ;;  %v1726_v18 = vsub.s32 4294967266, %v1721_v50  ;;  %v1723_v56 = vshll.u32 %v1714_v8, %v1721_v50 }
 0x606   :  { %v1724_v57 = vshrl.u32 %v1706_v2, %v1722_v20  ;;  %v1727_v1 = vadd.s32 127, %v1726_v18 }
 0x608   :  { %v1725_v60 = vor.u32 %v1724_v57, %v1723_v56  ;;  %v1728_v61 = vshll.u32 %v1727_v1, 23 }
 0x60a   :  { %v1729_v12 = vor.u32 4788187, %v1728_v61  ;;  %v1732_v26 = vcvt.s32.f32 %v1725_v60 }
 0x60c   :  { %v1730_v63 = vand.u32 2147483647, %v1729_v12 }
 0x60e   :  { %v1733_v3 = vmul.f32 %v1732_v26, %v1730_v63 }
 0x610   :  { %v1734_v4 = vxor.u32 2147483648, %v1733_v3 }
 0x612   :  { %v1735_v42 = vsel %vm1652_vm2, %v1734_v4, %v1733_v3 }
 0x613   :  { %v1738_v7 = vsel %vm1651_vm3, %v5735_v62, %v1735_v42 }
 0x614   :  { %4886 = vcosq.f32 %v1738_v7 }
 0x615   :  { %4888 = vsinq.f32 %v1738_v7 }
 0x616   :  { %4890 = vpow2.f32 %v1756_v9 }
 0x621   :  { %v4887_v13 = vpop.eup %4886 }
 0x622   :  { %v4889_v22 = vpop.eup %4888  ;;  %v1750_v24 = vxor.u32 2147483648, %v4887_v13 }
 0x623   :  { %v1747_v16 = vxor.u32 2147483648, %v4889_v22  ;;  %v4891_v21 = vpop.eup %4890 }
 0x624   :  { %v1751_v19 = vsel %vm1749_vm4, %v1750_v24, %v4889_v22  ;;  %v1758_v58 = vadd.f32 1.0, %v4891_v21 }
 0x625   :  { %v1748_v52 = vsel %vm1746_vm5, %v4887_v13, %v1747_v16 }
 0x626   :  { %v1752_v54 = vsel %vm1745_vm6, %v1748_v52, %v1751_v19 }
 0x627   :  { %v1753_v23 = vsel %vm1742_vm7, nan, %v1752_v54 }
 0x628   :  { %v1754_v40 = vmul.f32 %v1753_v23, %v1753_v23 }
 0x62a   :  { %v1759_v28 = vmul.f32 %v1758_v58, %v1754_v40 }
 0x62c   :  { %v5769_v38 = vsub.f32 %v1759_v28, %v5731_v47 }
 0x62e   :  { %v1761_v59 = vmul.f32 0.11111111, %v5769_v38 }
 0x630   :  { %v1762_v31 = vadd.f32 %v1761_v59, %v5686_v35 }
 0x632   :  { %v5774_v32 = vsub.f32 %v1762_v31, %v5727_v45 }
 0x634   :  { %v5778_v34 = vadd.f32 %v5177_v14, %v5774_v32 }
 0x636   :  { %v1768_v62 = vand.u32 2139095040, %v5778_v34  ;;  %v1765_v53 = vand.u32 2147483647, %v5778_v34  ;;  %vm1767_vm15 = vcmp.lt.s32.totalorder %v5778_v34, 0  ;;  %vm1857_vm4 = vweird.f32 %v5778_v34 }
 0x638   :  { %v1769_v29 = vshrl.u32 %v1768_v62, 23  ;;  %v1772_v43 = vand.u32 8388607, %v1765_v53  ;;  %vm1766_vm0 = vcmp.le.f32.partialorder %v1765_v53, 0.7853982 }
 0x63a   :  { %v4481_v37 = vadd.s32 4294967169, %v1769_v29  ;;  %v1773_v1 = vor.u32 8388608, %v1772_v43 }
 0x63c   :  { %v1775_v41 = vadd.s32 1, %v4481_v37  ;;  %v1813_v51 = vshll.u32 %v1773_v1, 8  ;;  %v1870_v1 = vsub.f32 0.0, %v5774_v32 }
 0x63e   :  { %vm1776_vm8 = vcmp.gt.s32.totalorder %v1775_v41, 0 }
 0x63f   :  { %v1777_v47 = vsel %vm1776_vm8, %v1775_v41, 0 }
 0x640   :  { %v1779_v55 = vand.u32 31, %v1777_v47  ;;  %v1778_v45 = vshrl.u32 %v1777_v47, 5 }
 0x642   :  { %v1780_v8 = vsub.s32 32, %v1779_v55  ;;  %v1782_v11 = vshll.u32 %v5117_v25, %v1779_v55  ;;  %v1785_v48 = vshll.u32 %v5118_v27, %v1779_v55  ;;  %v1788_v50 = vshll.u32 %v5119_v30, %v1779_v55 }
 0x643   :  { %v1791_v20 = vshll.u32 %v5120_v33, %v1779_v55  ;;  %v1794_v56 = vshll.u32 %v5121_v36, %v1779_v55  ;;  %vm1797_vm9 = vcmp.lt.s32.totalorder %v1778_v45, 1  ;;  %vm1800_vm10 = vcmp.lt.s32.totalorder %v1778_v45, 4 }
 0x644   :  { %v1783_v15 = vshrl.u32 %v5118_v27, %v1780_v8  ;;  %v1786_v49 = vshrl.u32 %v5119_v30, %v1780_v8  ;;  %v1789_v2 = vshrl.u32 %v5120_v33, %v1780_v8  ;;  %v1792_v18 = vshrl.u32 %v5121_v36, %v1780_v8 }
 0x645   :  { %v1795_v57 = vshrl.u32 %v5122_v39, %v1780_v8  ;;  %v1781_v6 = vshrl.u32 %v5117_v25, %v1780_v8  ;;  %vm1799_vm11 = vcmp.lt.s32.totalorder %v1778_v45, 3  ;;  %vm1798_vm12 = vcmp.lt.s32.totalorder %v1778_v45, 2 }
 0x646   :  { %v1784_v60 = vor.u32 %v1783_v15, %v1782_v11  ;;  %v1787_v61 = vor.u32 %v1786_v49, %v1785_v48  ;;  %v1790_v12 = vor.u32 %v1789_v2, %v1788_v50  ;;  %v1793_v63 = vor.u32 %v1792_v18, %v1791_v20 }
 0x647   :  { %v1796_v26 = vor.u32 %v1795_v57, %v1794_v56 }
 0x648   :  { %v1802_v3 = vsel %vm1800_vm10, %v1790_v12, 2102212464  ;;  %v1805_v4 = vsel %vm1797_vm9, %v1784_v60, %v1787_v61  ;;  %v1809_v17 = vsel %vm1797_vm9, %v1787_v61, %v1790_v12  ;;  %v1806_v42 = vsel %vm1800_vm10, %v1793_v63, 920167782 }
 0x649   :  { %v1810_v7 = vsel %vm1800_vm10, %v1796_v26, 1326507024  ;;  %v1807_v9 = vsel %vm1799_vm11, %v1790_v12, %v1806_v42  ;;  %v1801_v46 = vsel %vm1797_vm9, %v1781_v6, %v1784_v60  ;;  %v1803_v44 = vsel %vm1799_vm11, %v1787_v61, %v1802_v3 }
 0x64a   :  { %v1811_v10 = vsel %vm1799_vm11, %v1793_v63, %v1810_v7  ;;  %v1808_v13 = vsel %vm1798_vm12, %v1805_v4, %v1807_v9  ;;  %v1804_v52 = vsel %vm1798_vm12, %v1801_v46, %v1803_v44  ;;  %v1871_v63 = vmul.f32 1.442695, %v1870_v1 }
 0x64b   :  { %v1812_v22 = vsel %vm1798_vm12, %v1809_v17, %v1811_v10  ;;  %v5798_v19 = vmul.u32.u64.low %v1813_v51, %v1808_v13  ;;  %v5799_v21 = vmul.u32.u64.high %v1813_v51, %v1808_v13, %v5798_v19  ;;  %v1820_v23 = vmul.u32 %v1813_v51, %v1804_v52 }
 0x64c   :  { %v5795_v24 = vmul.u32.u64.low %v1813_v51, %v1812_v22  ;;  %v5796_v16 = vmul.u32.u64.high %v1813_v51, %v1812_v22, %v5795_v24 }
 0x64d   :  { %v1823_v54 = vadd.s32 1, %v5799_v21 }
 0x64e   :  { %vm1822_vm13 = vc.u32 %v5796_v16, %v5798_v19  ;;  %v1821_v43 = vadd.s32 %v5798_v19, %v5796_v16  ;;  %v1876_v19 = vsub.f32 %v5724_v5, %v5769_v38 }
 0x64f   :  { %v1824_v40 = vsel %vm1822_vm13, %v1823_v54, %v5799_v21 }
 0x650   :  { %v1825_v58 = vadd.s32 %v1824_v40, %v1820_v23 }
 0x652   :  { %v1826_v28 = vadd.s32 536870912, %v1825_v58 }
 0x654   :  { %v1827_v59 = vshrl.u32 %v1826_v28, 30 }
 0x656   :  { %v1828_v31 = vshll.u32 %v1827_v59, 30  ;;  %v1851_v60 = vsub.s32 4, %v1827_v59 }
 0x658   :  { %v1829_v62 = vsub.s32 %v1825_v58, %v1828_v31  ;;  %v1852_v26 = vsel %vm1767_vm15, %v1851_v60, %v1827_v59 }
 0x659   :  { %v1854_v3 = vsel %vm1766_vm0, 0, %v1852_v26 }
 0x65a   :  { %v1831_v29 = vsub.s32 0, %v1829_v62  ;;  %v1858_v4 = vadd.s32 3, %v1854_v3 }
 0x65c   :  { %v4482_v37 = vmin.u32 %v1831_v29, %v1829_v62  ;;  %v1859_v17 = vand.u32 3, %v1858_v4 }
 0x65e   :  { %v1833_v41 = vclz %v4482_v37  ;;  %vm1864_vm1 = vcmp.eq.s32.totalorder %v1859_v17, 2  ;;  %vm1861_vm2 = vcmp.eq.s32.totalorder %v1859_v17, 0  ;;  %vm1860_vm3 = vcmp.lt.s32.totalorder %v1859_v17, 2 }
 0x660   :  { %v4483_v47 = vadd.s32 4294967294, %v1833_v41 }
 0x662   :  { %vm4484_vm14 = vcmp.lt.s32.totalorder %v4483_v47, 0 }
 0x663   :  { %v1836_v55 = vsel %vm4484_vm14, 0, %v4483_v47 }
 0x664   :  { %v1837_v8 = vsub.s32 32, %v1836_v55  ;;  %v1841_v45 = vsub.s32 4294967266, %v1836_v55  ;;  %v1838_v11 = vshll.u32 %v1829_v62, %v1836_v55 }
 0x666   :  { %v1839_v48 = vshrl.u32 %v1821_v43, %v1837_v8  ;;  %v1842_v15 = vadd.s32 127, %v1841_v45 }
 0x668   :  { %v1840_v49 = vor.u32 %v1839_v48, %v1838_v11  ;;  %v1843_v50 = vshll.u32 %v1842_v15, 23 }
 0x66a   :  { %v1844_v2 = vor.u32 4788187, %v1843_v50  ;;  %v1847_v18 = vcvt.s32.f32 %v1840_v49 }
 0x66c   :  { %v1845_v20 = vand.u32 2147483647, %v1844_v2 }
 0x66e   :  { %v1848_v56 = vmul.f32 %v1847_v18, %v1845_v20 }
 0x670   :  { %v1849_v57 = vxor.u32 2147483648, %v1848_v56 }
 0x672   :  { %v1850_v61 = vsel %vm1767_vm15, %v1849_v57, %v1848_v56 }
 0x673   :  { %v1853_v12 = vsel %vm1766_vm0, %v5778_v34, %v1850_v61 }
 0x674   :  { %4892 = vcosq.f32 %v1853_v12 }
 0x675   :  { %4894 = vsinq.f32 %v1853_v12 }
 0x676   :  { %4896 = vpow2.f32 %v1871_v63 }
 0x681   :  { %v4893_v6 = vpop.eup %4892 }
 0x682   :  { %v4895_v42 = vpop.eup %4894  ;;  %v1865_v7 = vxor.u32 2147483648, %v4893_v6 }
 0x683   :  { %v1862_v9 = vxor.u32 2147483648, %v4895_v42  ;;  %v4897_v51 = vpop.eup %4896 }
 0x684   :  { %v1866_v10 = vsel %vm1864_vm1, %v1865_v7, %v4895_v42  ;;  %v1873_v22 = vadd.f32 1.0, %v4897_v51 }
 0x685   :  { %v1863_v53 = vsel %vm1861_vm2, %v4893_v6, %v1862_v9 }
 0x686   :  { %v1867_v46 = vsel %vm1860_vm3, %v1863_v53, %v1866_v10 }
 0x687   :  { %v1868_v44 = vsel %vm1857_vm4, nan, %v1867_v46 }
 0x688   :  { %v1869_v13 = vmul.f32 %v1868_v44, %v1868_v44 }
 0x68a   :  { %v1874_v24 = vmul.f32 %v1873_v22, %v1869_v13 }
 0x68c   :  { %v5812_v16 = vsub.f32 %v1874_v24, %v5774_v32 }
 0x68e   :  { %v1877_v21 = vadd.f32 %v1876_v19, %v5812_v16 }
 0x690   :  { %v1878_v52 = vmul.f32 0.11111111, %v1877_v21 }
 0x692   :  { %v5818_v54 = vadd.f32 %v1878_v52, %v5686_v35 }
 0x694   :  { %v5822_v34 = vadd.f32 %v5177_v14, %v5818_v54 }
 0x696   :  { %v1884_v23 = vand.u32 2139095040, %v5822_v34  ;;  %v1881_v32 = vand.u32 2147483647, %v5822_v34  ;;  %vm1883_vm12 = vcmp.lt.s32.totalorder %v5822_v34, 0  ;;  %vm1973_vm1 = vweird.f32 %v5822_v34 }
 0x698   :  { %v1885_v40 = vshrl.u32 %v1884_v23, 23  ;;  %v1888_v62 = vand.u32 8388607, %v1881_v32  ;;  %vm1882_vm13 = vcmp.le.f32.partialorder %v1881_v32, 0.7853982  ;;  %v1992_v32 = vadd.f32 %v5812_v16, %v5769_v38 }
 0x69a   :  { %v4485_v58 = vadd.s32 4294967169, %v1885_v40  ;;  %v1889_v50 = vor.u32 8388608, %v1888_v62 }
 0x69c   :  { %v1891_v28 = vadd.s32 1, %v4485_v58  ;;  %v1929_v17 = vshll.u32 %v1889_v50, 8 }
 0x69e   :  { %vm1892_vm5 = vcmp.gt.s32.totalorder %v1891_v28, 0 }
 0x69f   :  { %v1893_v59 = vsel %vm1892_vm5, %v1891_v28, 0 }
 0x6a0   :  { %v1895_v31 = vand.u32 31, %v1893_v59  ;;  %v1894_v37 = vshrl.u32 %v1893_v59, 5 }
 0x6a2   :  { %v1896_v29 = vsub.s32 32, %v1895_v31  ;;  %v1898_v41 = vshll.u32 %v5117_v25, %v1895_v31  ;;  %v1901_v47 = vshll.u32 %v5118_v27, %v1895_v31  ;;  %v1904_v8 = vshll.u32 %v5119_v30, %v1895_v31 }
 0x6a3   :  { %v1907_v11 = vshll.u32 %v5120_v33, %v1895_v31  ;;  %v1910_v15 = vshll.u32 %v5121_v36, %v1895_v31  ;;  %vm1913_vm6 = vcmp.lt.s32.totalorder %v1894_v37, 1  ;;  %vm1916_vm7 = vcmp.lt.s32.totalorder %v1894_v37, 4 }
 0x6a4   :  { %v1899_v55 = vshrl.u32 %v5118_v27, %v1896_v29  ;;  %v1902_v43 = vshrl.u32 %v5119_v30, %v1896_v29  ;;  %v1905_v45 = vshrl.u32 %v5120_v33, %v1896_v29  ;;  %v1908_v48 = vshrl.u32 %v5121_v36, %v1896_v29 }
 0x6a5   :  { %v1911_v49 = vshrl.u32 %v5122_v39, %v1896_v29  ;;  %v1897_v12 = vshrl.u32 %v5117_v25, %v1896_v29  ;;  %vm1915_vm8 = vcmp.lt.s32.totalorder %v1894_v37, 3  ;;  %vm1914_vm9 = vcmp.lt.s32.totalorder %v1894_v37, 2 }
 0x6a6   :  { %v1900_v2 = vor.u32 %v1899_v55, %v1898_v41  ;;  %v1903_v20 = vor.u32 %v1902_v43, %v1901_v47  ;;  %v1906_v18 = vor.u32 %v1905_v45, %v1904_v8  ;;  %v1909_v56 = vor.u32 %v1908_v48, %v1907_v11 }
 0x6a7   :  { %v1912_v57 = vor.u32 %v1911_v49, %v1910_v15 }
 0x6a8   :  { %v1918_v1 = vsel %vm1916_vm7, %v1906_v18, 2102212464  ;;  %v1921_v60 = vsel %vm1913_vm6, %v1900_v2, %v1903_v20  ;;  %v1925_v61 = vsel %vm1913_vm6, %v1903_v20, %v1906_v18  ;;  %v1922_v63 = vsel %vm1916_vm7, %v1909_v56, 920167782 }
 0x6a9   :  { %v1926_v26 = vsel %vm1916_vm7, %v1912_v57, 1326507024  ;;  %v1923_v3 = vsel %vm1915_vm8, %v1906_v18, %v1922_v63  ;;  %v1917_v6 = vsel %vm1913_vm6, %v1897_v12, %v1900_v2  ;;  %v1919_v42 = vsel %vm1915_vm8, %v1903_v20, %v1918_v1 }
 0x6aa   :  { %v1927_v4 = vsel %vm1915_vm8, %v1909_v56, %v1926_v26  ;;  %v1924_v7 = vsel %vm1914_vm9, %v1921_v60, %v1923_v3  ;;  %v1920_v44 = vsel %vm1914_vm9, %v1917_v6, %v1919_v42  ;;  %v1986_v2 = vsub.f32 0.0, %v5818_v54 }
 0x6ab   :  { %v1928_v9 = vsel %vm1914_vm9, %v1925_v61, %v1927_v4  ;;  %v5842_v53 = vmul.u32.u64.low %v1929_v17, %v1924_v7  ;;  %v5843_v46 = vmul.u32.u64.high %v1929_v17, %v1924_v7, %v5842_v53  ;;  %v1936_v22 = vmul.u32 %v1929_v17, %v1920_v44 }
 0x6ac   :  { %v5839_v10 = vmul.u32.u64.low %v1929_v17, %v1928_v9  ;;  %v5840_v51 = vmul.u32.u64.high %v1929_v17, %v1928_v9, %v5839_v10  ;;  %v1987_v57 = vmul.f32 1.442695, %v1986_v2 }
 0x6ad   :  { %v1939_v13 = vadd.s32 1, %v5843_v46 }
 0x6ae   :  { %vm1938_vm10 = vc.u32 %v5840_v51, %v5842_v53  ;;  %v1937_v29 = vadd.s32 %v5842_v53, %v5840_v51  ;;  %v1993_v53 = vmul.f32 3.0, %v1992_v32 }
 0x6af   :  { %v1940_v24 = vsel %vm1938_vm10, %v1939_v13, %v5843_v46 }
 0x6b0   :  { %v1941_v19 = vadd.s32 %v1940_v24, %v1936_v22  ;;  %v1994_v13 = vadd.f32 %v1993_v53, %v5724_v5 }
 0x6b2   :  { %v1942_v21 = vadd.s32 536870912, %v1941_v19 }
 0x6b4   :  { %v1943_v52 = vshrl.u32 %v1942_v21, 30 }
 0x6b6   :  { %v1944_v23 = vshll.u32 %v1943_v52, 30  ;;  %v1967_v20 = vsub.s32 4, %v1943_v52 }
 0x6b8   :  { %v1945_v40 = vsub.s32 %v1941_v19, %v1944_v23  ;;  %v1968_v1 = vsel %vm1883_vm12, %v1967_v20, %v1943_v52 }
 0x6b9   :  { %v1970_v60 = vsel %vm1882_vm13, 0, %v1968_v1 }
 0x6ba   :  { %v1947_v58 = vsub.s32 0, %v1945_v40  ;;  %v1974_v61 = vadd.s32 3, %v1970_v60 }
 0x6bc   :  { %v4486_v28 = vmin.u32 %v1947_v58, %v1945_v40  ;;  %v1975_v12 = vand.u32 3, %v1974_v61 }
 0x6be   :  { %v1949_v59 = vclz %v4486_v28  ;;  %vm1980_vm14 = vcmp.eq.s32.totalorder %v1975_v12, 2  ;;  %vm1977_vm15 = vcmp.eq.s32.totalorder %v1975_v12, 0  ;;  %vm1976_vm0 = vcmp.lt.s32.totalorder %v1975_v12, 2 }
 0x6c0   :  { %v4487_v31 = vadd.s32 4294967294, %v1949_v59 }
 0x6c2   :  { %vm4488_vm11 = vcmp.lt.s32.totalorder %v4487_v31, 0 }
 0x6c3   :  { %v1952_v62 = vsel %vm4488_vm11, 0, %v4487_v31 }
 0x6c4   :  { %v1953_v37 = vsub.s32 32, %v1952_v62  ;;  %v1957_v41 = vsub.s32 4294967266, %v1952_v62  ;;  %v1954_v47 = vshll.u32 %v1945_v40, %v1952_v62 }
 0x6c6   :  { %v1955_v55 = vshrl.u32 %v1937_v29, %v1953_v37  ;;  %v1958_v43 = vadd.s32 127, %v1957_v41 }
 0x6c8   :  { %v1956_v8 = vor.u32 %v1955_v55, %v1954_v47  ;;  %v1959_v45 = vshll.u32 %v1958_v43, 23 }
 0x6ca   :  { %v1960_v11 = vor.u32 4788187, %v1959_v45  ;;  %v1963_v15 = vcvt.s32.f32 %v1956_v8 }
 0x6cc   :  { %v1961_v48 = vand.u32 2147483647, %v1960_v11 }
 0x6ce   :  { %v1964_v49 = vmul.f32 %v1963_v15, %v1961_v48 }
 0x6d0   :  { %v1965_v50 = vxor.u32 2147483648, %v1964_v49 }
 0x6d2   :  { %v1966_v18 = vsel %vm1883_vm12, %v1965_v50, %v1964_v49 }
 0x6d3   :  { %v1969_v56 = vsel %vm1882_vm13, %v5822_v34, %v1966_v18 }
 0x6d4   :  { %4898 = vcosq.f32 %v1969_v56 }
 0x6d5   :  { %4900 = vsinq.f32 %v1969_v56 }
 0x6d6   :  { %4902 = vpow2.f32 %v1987_v57 }
 0x6e1   :  { %v4899_v63 = vpop.eup %4898 }
 0x6e2   :  { %v4901_v26 = vpop.eup %4900  ;;  %v1981_v3 = vxor.u32 2147483648, %v4899_v63 }
 0x6e3   :  { %v1978_v4 = vxor.u32 2147483648, %v4901_v26  ;;  %v4903_v6 = vpop.eup %4902 }
 0x6e4   :  { %v1982_v17 = vsel %vm1980_vm14, %v1981_v3, %v4901_v26  ;;  %v1989_v51 = vadd.f32 1.0, %v4903_v6 }
 0x6e5   :  { %v1979_v42 = vsel %vm1977_vm15, %v4899_v63, %v1978_v4 }
 0x6e6   :  { %v1983_v7 = vsel %vm1976_vm0, %v1979_v42, %v1982_v17 }
 0x6e7   :  { %v1984_v9 = vsel %vm1973_vm1, nan, %v1983_v7 }
 0x6e8   :  { %v1985_v10 = vmul.f32 %v1984_v9, %v1984_v9 }
 0x6ea   :  { %v1990_v46 = vmul.f32 %v1989_v51, %v1985_v10 }
 0x6ec   :  { %v1991_v44 = vsub.f32 %v1990_v46, %v5818_v54 }
 0x6ee   :  { %v1995_v22 = vadd.f32 %v1994_v13, %v1991_v44 }
 0x6f0   :  { %v1996_v24 = vmul.f32 0.013888889, %v1995_v22 }
 0x6f2   :  { %v5860_v19 = vadd.f32 %v1996_v24, %v5686_v35 }
 0x6f4   :  { %v5864_v38 = vadd.f32 %v5177_v14, %v5860_v19 }
 0x6f6   :  { %v2002_v16 = vand.u32 2139095040, %v5864_v38  ;;  %v1999_v23 = vand.u32 2147483647, %v5864_v38  ;;  %vm2001_vm9 = vcmp.lt.s32.totalorder %v5864_v38, 0  ;;  %vm2091_vm14 = vweird.f32 %v5864_v38 }
 0x6f8   :  { %v2003_v34 = vshrl.u32 %v2002_v16, 23  ;;  %v2006_v5 = vand.u32 8388607, %v1999_v23  ;;  %vm2000_vm10 = vcmp.le.f32.partialorder %v1999_v23, 0.7853982 }
 0x6fa   :  { %v4489_v21 = vadd.s32 4294967169, %v2003_v34  ;;  %v2007_v8 = vor.u32 8388608, %v2006_v5 }
 0x6fc   :  { %v2009_v52 = vadd.s32 1, %v4489_v21  ;;  %v2047_v61 = vshll.u32 %v2007_v8, 8 }
 0x6fe   :  { %vm2010_vm2 = vcmp.gt.s32.totalorder %v2009_v52, 0 }
 0x6ff   :  { %v2011_v54 = vsel %vm2010_vm2, %v2009_v52, 0 }
 0x700   :  { %v2013_v40 = vand.u32 31, %v2011_v54  ;;  %v2012_v35 = vshrl.u32 %v2011_v54, 5 }
 0x702   :  { %v2014_v58 = vsub.s32 32, %v2013_v40  ;;  %v2016_v28 = vshll.u32 %v5117_v25, %v2013_v40  ;;  %v2019_v59 = vshll.u32 %v5118_v27, %v2013_v40  ;;  %v2022_v29 = vshll.u32 %v5119_v30, %v2013_v40 }
 0x703   :  { %v2025_v41 = vshll.u32 %v5120_v33, %v2013_v40  ;;  %v2028_v55 = vshll.u32 %v5121_v36, %v2013_v40  ;;  %vm2031_vm3 = vcmp.lt.s32.totalorder %v2012_v35, 1  ;;  %vm2034_vm4 = vcmp.lt.s32.totalorder %v2012_v35, 4 }
 0x704   :  { %v2017_v31 = vshrl.u32 %v5118_v27, %v2014_v58  ;;  %v2020_v62 = vshrl.u32 %v5119_v30, %v2014_v58  ;;  %v2023_v37 = vshrl.u32 %v5120_v33, %v2014_v58  ;;  %v2026_v47 = vshrl.u32 %v5121_v36, %v2014_v58 }
 0x705   :  { %v2029_v43 = vshrl.u32 %v5122_v39, %v2014_v58  ;;  %v2015_v18 = vshrl.u32 %v5117_v25, %v2014_v58  ;;  %vm2033_vm5 = vcmp.lt.s32.totalorder %v2012_v35, 3  ;;  %vm2032_vm6 = vcmp.lt.s32.totalorder %v2012_v35, 2 }
 0x706   :  { %v2018_v45 = vor.u32 %v2017_v31, %v2016_v28  ;;  %v2021_v11 = vor.u32 %v2020_v62, %v2019_v59  ;;  %v2024_v48 = vor.u32 %v2023_v37, %v2022_v29  ;;  %v2027_v15 = vor.u32 %v2026_v47, %v2025_v41 }
 0x707   :  { %v2030_v49 = vor.u32 %v2029_v43, %v2028_v55  ;;  %v2104_v47 = vsub.f32 0.0, %v5860_v19 }
 0x708   :  { %v2036_v50 = vsel %vm2034_vm4, %v2024_v48, 2102212464  ;;  %v2039_v2 = vsel %vm2031_vm3, %v2018_v45, %v2021_v11  ;;  %v2043_v20 = vsel %vm2031_vm3, %v2021_v11, %v2024_v48  ;;  %v2040_v56 = vsel %vm2034_vm4, %v2027_v15, 920167782 }
 0x709   :  { %v2044_v57 = vsel %vm2034_vm4, %v2030_v49, 1326507024  ;;  %v2041_v1 = vsel %vm2033_vm5, %v2024_v48, %v2040_v56  ;;  %v2035_v12 = vsel %vm2031_vm3, %v2015_v18, %v2018_v45  ;;  %v2037_v63 = vsel %vm2033_vm5, %v2021_v11, %v2036_v50 }
 0x70a   :  { %v2045_v60 = vsel %vm2033_vm5, %v2027_v15, %v2044_v57  ;;  %v2042_v26 = vsel %vm2032_vm6, %v2039_v2, %v2041_v1  ;;  %v2038_v42 = vsel %vm2032_vm6, %v2035_v12, %v2037_v63  ;;  %v2105_v45 = vmul.f32 1.442695, %v2104_v47 }
 0x70b   :  { %v2046_v3 = vsel %vm2032_vm6, %v2043_v20, %v2045_v60  ;;  %v5884_v32 = vmul.u32.u64.low %v2047_v61, %v2042_v26  ;;  %v5885_v6 = vmul.u32.u64.high %v2047_v61, %v2042_v26, %v5884_v32  ;;  %v2054_v9 = vmul.u32 %v2047_v61, %v2038_v42 }
 0x70c   :  { %v5881_v4 = vmul.u32.u64.low %v2047_v61, %v2046_v3  ;;  %v5882_v17 = vmul.u32.u64.high %v2047_v61, %v2046_v3, %v5881_v4 }
 0x70d   :  { %v2057_v7 = vadd.s32 1, %v5885_v6 }
 0x70e   :  { %vm2056_vm7 = vc.u32 %v5882_v17, %v5884_v32  ;;  %v2055_v52 = vadd.s32 %v5884_v32, %v5882_v17 }
 0x70f   :  { %v2058_v10 = vsel %vm2056_vm7, %v2057_v7, %v5885_v6 }
 0x710   :  { %v2059_v51 = vadd.s32 %v2058_v10, %v2054_v9 }
 0x712   :  { %v2060_v53 = vadd.s32 536870912, %v2059_v51 }
 0x714   :  { %v2061_v46 = vshrl.u32 %v2060_v53, 30 }
 0x716   :  { %v2062_v44 = vshll.u32 %v2061_v46, 30  ;;  %v2085_v55 = vsub.s32 4, %v2061_v46 }
 0x718   :  { %v2063_v13 = vsub.s32 %v2059_v51, %v2062_v44  ;;  %v2086_v11 = vsel %vm2001_vm9, %v2085_v55, %v2061_v46 }
 0x719   :  { %v2088_v48 = vsel %vm2000_vm10, 0, %v2086_v11 }
 0x71a   :  { %v2065_v22 = vsub.s32 0, %v2063_v13  ;;  %v2092_v15 = vadd.s32 3, %v2088_v48 }
 0x71c   :  { %v4490_v24 = vmin.u32 %v2065_v22, %v2063_v13  ;;  %v2093_v49 = vand.u32 3, %v2092_v15 }
 0x71e   :  { %v2067_v16 = vclz %v4490_v24  ;;  %vm2098_vm11 = vcmp.eq.s32.totalorder %v2093_v49, 2  ;;  %vm2095_vm12 = vcmp.eq.s32.totalorder %v2093_v49, 0  ;;  %vm2094_vm13 = vcmp.lt.s32.totalorder %v2093_v49, 2 }
 0x720   :  { %v4491_v34 = vadd.s32 4294967294, %v2067_v16 }
 0x722   :  { %vm4492_vm8 = vcmp.lt.s32.totalorder %v4491_v34, 0 }
 0x723   :  { %v2070_v21 = vsel %vm4492_vm8, 0, %v4491_v34 }
 0x724   :  { %v2071_v54 = vsub.s32 32, %v2070_v21  ;;  %v2075_v40 = vsub.s32 4294967266, %v2070_v21  ;;  %v2072_v5 = vshll.u32 %v2063_v13, %v2070_v21 }
 0x726   :  { %v2073_v58 = vshrl.u32 %v2055_v52, %v2071_v54  ;;  %v2076_v35 = vadd.s32 127, %v2075_v40 }
 0x728   :  { %v2074_v28 = vor.u32 %v2073_v58, %v2072_v5  ;;  %v2077_v59 = vshll.u32 %v2076_v35, 23 }
 0x72a   :  { %v2078_v31 = vor.u32 4788187, %v2077_v59  ;;  %v2081_v29 = vcvt.s32.f32 %v2074_v28 }
 0x72c   :  { %v2079_v62 = vand.u32 2147483647, %v2078_v31 }
 0x72e   :  { %v2082_v37 = vmul.f32 %v2081_v29, %v2079_v62 }
 0x730   :  { %v2083_v41 = vxor.u32 2147483648, %v2082_v37 }
 0x732   :  { %v2084_v43 = vsel %vm2001_vm9, %v2083_v41, %v2082_v37 }
 0x733   :  { %v2087_v8 = vsel %vm2000_vm10, %v5864_v38, %v2084_v43 }
 0x734   :  { %4904 = vcosq.f32 %v2087_v8 }
 0x735   :  { %4906 = vsinq.f32 %v2087_v8 }
 0x736   :  { %4908 = vpow2.f32 %v2105_v45 }
 0x741   :  { %v4905_v50 = vpop.eup %4904 }
 0x742   :  { %v4907_v2 = vpop.eup %4906  ;;  %v2099_v20 = vxor.u32 2147483648, %v4905_v50 }
 0x743   :  { %v2096_v18 = vxor.u32 2147483648, %v4907_v2  ;;  %v4909_v57 = vpop.eup %4908 }
 0x744   :  { %v2100_v56 = vsel %vm2098_vm11, %v2099_v20, %v4907_v2  ;;  %v2107_v12 = vadd.f32 1.0, %v4909_v57 }
 0x745   :  { %v2097_v23 = vsel %vm2095_vm12, %v4905_v50, %v2096_v18 }
 0x746   :  { %v2101_v1 = vsel %vm2094_vm13, %v2097_v23, %v2100_v56 }
 0x747   :  { %v2102_v60 = vsel %vm2091_vm14, nan, %v2101_v1 }
 0x748   :  { %v2103_v61 = vmul.f32 %v2102_v60, %v2102_v60 }
 0x74a   :  { %v2108_v63 = vmul.f32 %v2107_v12, %v2103_v61 }
 0x74c   :  { %v5898_v26 = vsub.f32 %v2108_v63, %v5860_v19 }
 0x74e   :  { %v5901_v3 = vmul.f32 0.037037037, %v5898_v26 }
 0x750   :  { %v5905_v4 = vadd.f32 %v5901_v3, %v5860_v19 }
 0x752   :  { %v5909_v17 = vadd.f32 %v5177_v14, %v5905_v4 }
 0x754   :  { %v2116_v38 = vand.u32 2139095040, %v5909_v17  ;;  %v2113_v7 = vand.u32 2147483647, %v5909_v17  ;;  %vm2115_vm6 = vcmp.lt.s32.totalorder %v5909_v17, 0  ;;  %vm2205_vm11 = vweird.f32 %v5909_v17 }
 0x756   :  { %v2117_v32 = vshrl.u32 %v2116_v38, 23  ;;  %v2120_v51 = vand.u32 8388607, %v2113_v7  ;;  %vm2114_vm7 = vcmp.le.f32.partialorder %v2113_v7, 0.7853982 }
 0x758   :  { %v4493_v6 = vadd.s32 4294967169, %v2117_v32  ;;  %v2121_v5 = vor.u32 8388608, %v2120_v51 }
 0x75a   :  { %v2123_v42 = vadd.s32 1, %v4493_v6  ;;  %v2161_v45 = vshll.u32 %v2121_v5, 8  ;;  %v2218_v5 = vsub.f32 0.0, %v5905_v4 }
 0x75c   :  { %vm2124_vm15 = vcmp.gt.s32.totalorder %v2123_v42, 0 }
 0x75d   :  { %v2125_v9 = vsel %vm2124_vm15, %v2123_v42, 0 }
 0x75e   :  { %v2127_v10 = vand.u32 31, %v2125_v9  ;;  %v2126_v46 = vshrl.u32 %v2125_v9, 5 }
 0x760   :  { %v2128_v53 = vsub.s32 32, %v2127_v10  ;;  %v2130_v44 = vshll.u32 %v5117_v25, %v2127_v10  ;;  %v2133_v13 = vshll.u32 %v5118_v27, %v2127_v10  ;;  %v2136_v16 = vshll.u32 %v5119_v30, %v2127_v10 }
 0x761   :  { %v2139_v21 = vshll.u32 %v5120_v33, %v2127_v10  ;;  %v2142_v54 = vshll.u32 %v5121_v36, %v2127_v10  ;;  %vm2145_vm0 = vcmp.lt.s32.totalorder %v2126_v46, 1  ;;  %vm2148_vm1 = vcmp.lt.s32.totalorder %v2126_v46, 4 }
 0x762   :  { %v2131_v22 = vshrl.u32 %v5118_v27, %v2128_v53  ;;  %v2134_v24 = vshrl.u32 %v5119_v30, %v2128_v53  ;;  %v2137_v34 = vshrl.u32 %v5120_v33, %v2128_v53  ;;  %v2140_v52 = vshrl.u32 %v5121_v36, %v2128_v53 }
 0x763   :  { %v2143_v40 = vshrl.u32 %v5122_v39, %v2128_v53  ;;  %v2129_v41 = vshrl.u32 %v5117_v25, %v2128_v53  ;;  %vm2147_vm2 = vcmp.lt.s32.totalorder %v2126_v46, 3  ;;  %vm2146_vm3 = vcmp.lt.s32.totalorder %v2126_v46, 2 }
 0x764   :  { %v2132_v58 = vor.u32 %v2131_v22, %v2130_v44  ;;  %v2135_v35 = vor.u32 %v2134_v24, %v2133_v13  ;;  %v2138_v28 = vor.u32 %v2137_v34, %v2136_v16  ;;  %v2141_v59 = vor.u32 %v2140_v52, %v2139_v21 }
 0x765   :  { %v2144_v31 = vor.u32 %v2143_v40, %v2142_v54 }
 0x766   :  { %v2150_v62 = vsel %vm2148_vm1, %v2138_v28, 2102212464  ;;  %v2153_v29 = vsel %vm2145_vm0, %v2132_v58, %v2135_v35  ;;  %v2157_v37 = vsel %vm2145_vm0, %v2135_v35, %v2138_v28  ;;  %v2154_v47 = vsel %vm2148_vm1, %v2141_v59, 920167782 }
 0x767   :  { %v2158_v55 = vsel %vm2148_vm1, %v2144_v31, 1326507024  ;;  %v2155_v43 = vsel %vm2147_vm2, %v2138_v28, %v2154_v47  ;;  %v2149_v11 = vsel %vm2145_vm0, %v2129_v41, %v2132_v58  ;;  %v2151_v48 = vsel %vm2147_vm2, %v2135_v35, %v2150_v62 }
 0x768   :  { %v2159_v8 = vsel %vm2147_vm2, %v2141_v59, %v2158_v55  ;;  %v2156_v15 = vsel %vm2146_vm3, %v2153_v29, %v2155_v43  ;;  %v2152_v56 = vsel %vm2146_vm3, %v2149_v11, %v2151_v48  ;;  %v2219_v59 = vmul.f32 1.442695, %v2218_v5 }
 0x769   :  { %v2160_v49 = vsel %vm2146_vm3, %v2157_v37, %v2159_v8  ;;  %v5929_v20 = vmul.u32.u64.low %v2161_v45, %v2156_v15  ;;  %v5930_v18 = vmul.u32.u64.high %v2161_v45, %v2156_v15, %v5929_v20  ;;  %v2168_v23 = vmul.u32 %v2161_v45, %v2152_v56 }
 0x76a   :  { %v5926_v50 = vmul.u32.u64.low %v2161_v45, %v2160_v49  ;;  %v5927_v2 = vmul.u32.u64.high %v2161_v45, %v2160_v49, %v5926_v50 }
 0x76b   :  { %v2171_v57 = vadd.s32 1, %v5930_v18 }
 0x76c   :  { %vm2170_vm4 = vc.u32 %v5927_v2, %v5929_v20  ;;  %v2169_v51 = vadd.s32 %v5929_v20, %v5927_v2 }
 0x76d   :  { %v2172_v1 = vsel %vm2170_vm4, %v2171_v57, %v5930_v18 }
 0x76e   :  { %v2173_v60 = vadd.s32 %v2172_v1, %v2168_v23 }
 0x770   :  { %v2174_v61 = vadd.s32 536870912, %v2173_v60 }
 0x772   :  { %v2175_v12 = vshrl.u32 %v2174_v61, 30 }
 0x774   :  { %v2176_v63 = vshll.u32 %v2175_v12, 30  ;;  %v2199_v58 = vsub.s32 4, %v2175_v12 }
 0x776   :  { %v2177_v38 = vsub.s32 %v2173_v60, %v2176_v63  ;;  %v2200_v31 = vsel %vm2115_vm6, %v2199_v58, %v2175_v12 }
 0x777   :  { %v2202_v62 = vsel %vm2114_vm7, 0, %v2200_v31 }
 0x778   :  { %v2179_v32 = vsub.s32 0, %v2177_v38  ;;  %v2206_v29 = vadd.s32 3, %v2202_v62 }
 0x77a   :  { %v4494_v6 = vmin.u32 %v2179_v32, %v2177_v38  ;;  %v2207_v37 = vand.u32 3, %v2206_v29 }
 0x77c   :  { %v2181_v42 = vclz %v4494_v6  ;;  %vm2212_vm8 = vcmp.eq.s32.totalorder %v2207_v37, 2  ;;  %vm2209_vm9 = vcmp.eq.s32.totalorder %v2207_v37, 0  ;;  %vm2208_vm10 = vcmp.lt.s32.totalorder %v2207_v37, 2 }
 0x77e   :  { %v4495_v9 = vadd.s32 4294967294, %v2181_v42 }
 0x780   :  { %vm4496_vm5 = vcmp.lt.s32.totalorder %v4495_v9, 0 }
 0x781   :  { %v2184_v10 = vsel %vm4496_vm5, 0, %v4495_v9 }
 0x782   :  { %v2185_v53 = vsub.s32 32, %v2184_v10  ;;  %v2189_v46 = vsub.s32 4294967266, %v2184_v10  ;;  %v2186_v44 = vshll.u32 %v2177_v38, %v2184_v10 }
 0x784   :  { %v2187_v13 = vshrl.u32 %v2169_v51, %v2185_v53  ;;  %v2190_v22 = vadd.s32 127, %v2189_v46 }
 0x786   :  { %v2188_v24 = vor.u32 %v2187_v13, %v2186_v44  ;;  %v2191_v16 = vshll.u32 %v2190_v22, 23 }
 0x788   :  { %v2192_v34 = vor.u32 4788187, %v2191_v16  ;;  %v2195_v52 = vcvt.s32.f32 %v2188_v24 }
 0x78a   :  { %v2193_v21 = vand.u32 2147483647, %v2192_v34 }
 0x78c   :  { %v2196_v54 = vmul.f32 %v2195_v52, %v2193_v21 }
 0x78e   :  { %v2197_v40 = vxor.u32 2147483648, %v2196_v54 }
 0x790   :  { %v2198_v35 = vsel %vm2115_vm6, %v2197_v40, %v2196_v54 }
 0x791   :  { %v2201_v28 = vsel %vm2114_vm7, %v5909_v17, %v2198_v35 }
 0x792   :  { %4910 = vcosq.f32 %v2201_v28 }
 0x793   :  { %4912 = vsinq.f32 %v2201_v28 }
 0x794   :  { %4914 = vpow2.f32 %v2219_v59 }
 0x79f   :  { %v4911_v41 = vpop.eup %4910 }
 0x7a0   :  { %v4913_v47 = vpop.eup %4912  ;;  %v2213_v55 = vxor.u32 2147483648, %v4911_v41 }
 0x7a1   :  { %v2210_v43 = vxor.u32 2147483648, %v4913_v47  ;;  %v4915_v45 = vpop.eup %4914 }
 0x7a2   :  { %v2214_v8 = vsel %vm2212_vm8, %v2213_v55, %v4913_v47  ;;  %v2221_v49 = vadd.f32 1.0, %v4915_v45 }
 0x7a3   :  { %v2211_v7 = vsel %vm2209_vm9, %v4911_v41, %v2210_v43 }
 0x7a4   :  { %v2215_v11 = vsel %vm2208_vm10, %v2211_v7, %v2214_v8 }
 0x7a5   :  { %v2216_v48 = vsel %vm2205_vm11, nan, %v2215_v11 }
 0x7a6   :  { %v2217_v15 = vmul.f32 %v2216_v48, %v2216_v48 }
 0x7a8   :  { %v2222_v50 = vmul.f32 %v2221_v49, %v2217_v15 }
 0x7aa   :  { %v5943_v2 = vsub.f32 %v2222_v50, %v5905_v4 }
 0x7ac   :  { %v2224_v20 = vmul.f32 0.11111111, %v5943_v2 }
 0x7ae   :  { %v2225_v18 = vadd.f32 %v2224_v20, %v5860_v19 }
 0x7b0   :  { %v5948_v56 = vsub.f32 %v2225_v18, %v5901_v3 }
 0x7b2   :  { %v5952_v57 = vadd.f32 %v5177_v14, %v5948_v56 }
 0x7b4   :  { %v2231_v17 = vand.u32 2139095040, %v5952_v57  ;;  %v2228_v61 = vand.u32 2147483647, %v5952_v57  ;;  %vm2230_vm3 = vcmp.lt.s32.totalorder %v5952_v57, 0  ;;  %vm2320_vm8 = vweird.f32 %v5952_v57 }
 0x7b6   :  { %v2232_v23 = vshrl.u32 %v2231_v17, 23  ;;  %v2235_v63 = vand.u32 8388607, %v2228_v61  ;;  %vm2229_vm4 = vcmp.le.f32.partialorder %v2228_v61, 0.7853982 }
 0x7b8   :  { %v4497_v1 = vadd.s32 4294967169, %v2232_v23  ;;  %v2236_v22 = vor.u32 8388608, %v2235_v63 }
 0x7ba   :  { %v2238_v60 = vadd.s32 1, %v4497_v1  ;;  %v2276_v62 = vshll.u32 %v2236_v22, 8  ;;  %v2333_v22 = vsub.f32 0.0, %v5948_v56 }
 0x7bc   :  { %vm2239_vm12 = vcmp.gt.s32.totalorder %v2238_v60, 0 }
 0x7bd   :  { %v2240_v4 = vsel %vm2239_vm12, %v2238_v60, 0 }
 0x7be   :  { %v2242_v12 = vand.u32 31, %v2240_v4  ;;  %v2241_v3 = vshrl.u32 %v2240_v4, 5 }
 0x7c0   :  { %v2243_v38 = vsub.s32 32, %v2242_v12  ;;  %v2245_v32 = vshll.u32 %v5117_v25, %v2242_v12  ;;  %v2248_v6 = vshll.u32 %v5118_v27, %v2242_v12  ;;  %v2251_v10 = vshll.u32 %v5119_v30, %v2242_v12 }
 0x7c1   :  { %v2254_v53 = vshll.u32 %v5120_v33, %v2242_v12  ;;  %v2257_v44 = vshll.u32 %v5121_v36, %v2242_v12  ;;  %vm2260_vm13 = vcmp.lt.s32.totalorder %v2241_v3, 1  ;;  %vm2263_vm14 = vcmp.lt.s32.totalorder %v2241_v3, 4 }
 0x7c2   :  { %v2246_v42 = vshrl.u32 %v5118_v27, %v2243_v38  ;;  %v2249_v9 = vshrl.u32 %v5119_v30, %v2243_v38  ;;  %v2252_v51 = vshrl.u32 %v5120_v33, %v2243_v38  ;;  %v2255_v46 = vshrl.u32 %v5121_v36, %v2243_v38 }
 0x7c3   :  { %v2258_v13 = vshrl.u32 %v5122_v39, %v2243_v38  ;;  %v2244_v58 = vshrl.u32 %v5117_v25, %v2243_v38  ;;  %vm2262_vm15 = vcmp.lt.s32.totalorder %v2241_v3, 3  ;;  %vm2261_vm0 = vcmp.lt.s32.totalorder %v2241_v3, 2 }
 0x7c4   :  { %v2247_v24 = vor.u32 %v2246_v42, %v2245_v32  ;;  %v2250_v16 = vor.u32 %v2249_v9, %v2248_v6  ;;  %v2253_v34 = vor.u32 %v2252_v51, %v2251_v10  ;;  %v2256_v21 = vor.u32 %v2255_v46, %v2254_v53 }
 0x7c5   :  { %v2259_v52 = vor.u32 %v2258_v13, %v2257_v44 }
 0x7c6   :  { %v2265_v54 = vsel %vm2263_vm14, %v2253_v34, 2102212464  ;;  %v2268_v40 = vsel %vm2260_vm13, %v2247_v24, %v2250_v16  ;;  %v2272_v5 = vsel %vm2260_vm13, %v2250_v16, %v2253_v34  ;;  %v2269_v35 = vsel %vm2263_vm14, %v2256_v21, 920167782 }
 0x7c7   :  { %v2273_v28 = vsel %vm2263_vm14, %v2259_v52, 1326507024  ;;  %v2270_v59 = vsel %vm2262_vm15, %v2253_v34, %v2269_v35  ;;  %v2264_v29 = vsel %vm2260_vm13, %v2244_v58, %v2247_v24  ;;  %v2266_v37 = vsel %vm2262_vm15, %v2250_v16, %v2265_v54 }
 0x7c8   :  { %v2274_v31 = vsel %vm2262_vm15, %v2256_v21, %v2273_v28  ;;  %v2271_v41 = vsel %vm2261_vm0, %v2268_v40, %v2270_v59  ;;  %v2267_v7 = vsel %vm2261_vm0, %v2264_v29, %v2266_v37  ;;  %v2334_v21 = vmul.f32 1.442695, %v2333_v22 }
 0x7c9   :  { %v2275_v47 = vsel %vm2261_vm0, %v2272_v5, %v2274_v31  ;;  %v5972_v8 = vmul.u32.u64.low %v2276_v62, %v2271_v41  ;;  %v5973_v45 = vmul.u32.u64.high %v2276_v62, %v2271_v41, %v5972_v8  ;;  %v2283_v48 = vmul.u32 %v2276_v62, %v2267_v7 }
 0x7ca   :  { %v5969_v55 = vmul.u32.u64.low %v2276_v62, %v2275_v47  ;;  %v5970_v43 = vmul.u32.u64.high %v2276_v62, %v2275_v47, %v5969_v55 }
 0x7cb   :  { %v2286_v11 = vadd.s32 1, %v5973_v45 }
 0x7cc   :  { %vm2285_vm1 = vc.u32 %v5970_v43, %v5972_v8  ;;  %v2284_v63 = vadd.s32 %v5972_v8, %v5970_v43  ;;  %v2339_v8 = vsub.f32 %v5898_v26, %v5943_v2 }
 0x7cd   :  { %v2287_v15 = vsel %vm2285_vm1, %v2286_v11, %v5973_v45 }
 0x7ce   :  { %v2288_v49 = vadd.s32 %v2287_v15, %v2283_v48 }
 0x7d0   :  { %v2289_v50 = vadd.s32 536870912, %v2288_v49 }
 0x7d2   :  { %v2290_v20 = vshrl.u32 %v2289_v50, 30 }
 0x7d4   :  { %v2291_v18 = vshll.u32 %v2290_v20, 30  ;;  %v2314_v24 = vsub.s32 4, %v2290_v20 }
 0x7d6   :  { %v2292_v17 = vsub.s32 %v2288_v49, %v2291_v18  ;;  %v2315_v52 = vsel %vm2230_vm3, %v2314_v24, %v2290_v20 }
 0x7d7   :  { %v2317_v54 = vsel %vm2229_vm4, 0, %v2315_v52 }
 0x7d8   :  { %v2294_v23 = vsub.s32 0, %v2292_v17  ;;  %v2321_v40 = vadd.s32 3, %v2317_v54 }
 0x7da   :  { %v4498_v1 = vmin.u32 %v2294_v23, %v2292_v17  ;;  %v2322_v5 = vand.u32 3, %v2321_v40 }
 0x7dc   :  { %v2296_v60 = vclz %v4498_v1  ;;  %vm2327_vm5 = vcmp.eq.s32.totalorder %v2322_v5, 2  ;;  %vm2324_vm6 = vcmp.eq.s32.totalorder %v2322_v5, 0  ;;  %vm2323_vm7 = vcmp.lt.s32.totalorder %v2322_v5, 2 }
 0x7de   :  { %v4499_v4 = vadd.s32 4294967294, %v2296_v60 }
 0x7e0   :  { %vm4500_vm2 = vcmp.lt.s32.totalorder %v4499_v4, 0 }
 0x7e1   :  { %v2299_v12 = vsel %vm4500_vm2, 0, %v4499_v4 }
 0x7e2   :  { %v2300_v38 = vsub.s32 32, %v2299_v12  ;;  %v2304_v3 = vsub.s32 4294967266, %v2299_v12  ;;  %v2301_v32 = vshll.u32 %v2292_v17, %v2299_v12 }
 0x7e4   :  { %v2302_v6 = vshrl.u32 %v2284_v63, %v2300_v38  ;;  %v2305_v42 = vadd.s32 127, %v2304_v3 }
 0x7e6   :  { %v2303_v9 = vor.u32 %v2302_v6, %v2301_v32  ;;  %v2306_v10 = vshll.u32 %v2305_v42, 23 }
 0x7e8   :  { %v2307_v51 = vor.u32 4788187, %v2306_v10  ;;  %v2310_v46 = vcvt.s32.f32 %v2303_v9 }
 0x7ea   :  { %v2308_v53 = vand.u32 2147483647, %v2307_v51 }
 0x7ec   :  { %v2311_v44 = vmul.f32 %v2310_v46, %v2308_v53 }
 0x7ee   :  { %v2312_v13 = vxor.u32 2147483648, %v2311_v44 }
 0x7f0   :  { %v2313_v16 = vsel %vm2230_vm3, %v2312_v13, %v2311_v44 }
 0x7f1   :  { %v2316_v34 = vsel %vm2229_vm4, %v5952_v57, %v2313_v16 }
 0x7f2   :  { %4916 = vcosq.f32 %v2316_v34 }
 0x7f3   :  { %4918 = vsinq.f32 %v2316_v34 }
 0x7f4   :  { %4920 = vpow2.f32 %v2334_v21 }
 0x7ff   :  { %v4917_v58 = vpop.eup %4916 }
 0x800   :  { %v4919_v35 = vpop.eup %4918  ;;  %v2328_v28 = vxor.u32 2147483648, %v4917_v58 }
 0x801   :  { %v2325_v59 = vxor.u32 2147483648, %v4919_v35  ;;  %v4921_v62 = vpop.eup %4920 }
 0x802   :  { %v2329_v31 = vsel %vm2327_vm5, %v2328_v28, %v4919_v35  ;;  %v2336_v47 = vadd.f32 1.0, %v4921_v62 }
 0x803   :  { %v2326_v61 = vsel %vm2324_vm6, %v4917_v58, %v2325_v59 }
 0x804   :  { %v2330_v29 = vsel %vm2323_vm7, %v2326_v61, %v2329_v31 }
 0x805   :  { %v2331_v37 = vsel %vm2320_vm8, nan, %v2330_v29 }
 0x806   :  { %v2332_v41 = vmul.f32 %v2331_v37, %v2331_v37 }
 0x808   :  { %v2337_v55 = vmul.f32 %v2336_v47, %v2332_v41 }
 0x80a   :  { %v5986_v43 = vsub.f32 %v2337_v55, %v5948_v56 }
 0x80c   :  { %v2340_v45 = vadd.f32 %v2339_v8, %v5986_v43 }
 0x80e   :  { %v2341_v7 = vmul.f32 0.11111111, %v2340_v45 }
 0x810   :  { %v5992_v11 = vadd.f32 %v2341_v7, %v5860_v19 }
 0x812   :  { %v5996_v57 = vadd.f32 %v5177_v14, %v5992_v11 }
 0x814   :  { %v2347_v48 = vand.u32 2139095040, %v5996_v57  ;;  %v2344_v56 = vand.u32 2147483647, %v5996_v57  ;;  %vm2346_vm0 = vcmp.lt.s32.totalorder %v5996_v57, 0  ;;  %vm2436_vm5 = vweird.f32 %v5996_v57 }
 0x816   :  { %v2348_v15 = vshrl.u32 %v2347_v48, 23  ;;  %v2351_v17 = vand.u32 8388607, %v2344_v56  ;;  %vm2345_vm1 = vcmp.le.f32.partialorder %v2344_v56, 0.7853982  ;;  %v2455_v56 = vadd.f32 %v5986_v43, %v5943_v2 }
 0x818   :  { %v4501_v49 = vadd.s32 4294967169, %v2348_v15  ;;  %v2352_v10 = vor.u32 8388608, %v2351_v17 }
 0x81a   :  { %v2354_v50 = vadd.s32 1, %v4501_v49  ;;  %v2392_v5 = vshll.u32 %v2352_v10, 8 }
 0x81c   :  { %vm2355_vm9 = vcmp.gt.s32.totalorder %v2354_v50, 0 }
 0x81d   :  { %v2356_v20 = vsel %vm2355_vm9, %v2354_v50, 0 }
 0x81e   :  { %v2358_v18 = vand.u32 31, %v2356_v20  ;;  %v2357_v1 = vshrl.u32 %v2356_v20, 5 }
 0x820   :  { %v2359_v23 = vsub.s32 32, %v2358_v18  ;;  %v2361_v60 = vshll.u32 %v5117_v25, %v2358_v18  ;;  %v2364_v4 = vshll.u32 %v5118_v27, %v2358_v18  ;;  %v2367_v38 = vshll.u32 %v5119_v30, %v2358_v18 }
 0x821   :  { %v2370_v32 = vshll.u32 %v5120_v33, %v2358_v18  ;;  %v2373_v42 = vshll.u32 %v5121_v36, %v2358_v18  ;;  %vm2376_vm10 = vcmp.lt.s32.totalorder %v2357_v1, 1  ;;  %vm2379_vm11 = vcmp.lt.s32.totalorder %v2357_v1, 4 }
 0x822   :  { %v2362_v12 = vshrl.u32 %v5118_v27, %v2359_v23  ;;  %v2365_v63 = vshrl.u32 %v5119_v30, %v2359_v23  ;;  %v2368_v3 = vshrl.u32 %v5120_v33, %v2359_v23  ;;  %v2371_v6 = vshrl.u32 %v5121_v36, %v2359_v23 }
 0x823   :  { %v2374_v9 = vshrl.u32 %v5122_v39, %v2359_v23  ;;  %v2360_v34 = vshrl.u32 %v5117_v25, %v2359_v23  ;;  %vm2378_vm12 = vcmp.lt.s32.totalorder %v2357_v1, 3  ;;  %vm2377_vm13 = vcmp.lt.s32.totalorder %v2357_v1, 2 }
 0x824   :  { %v2363_v51 = vor.u32 %v2362_v12, %v2361_v60  ;;  %v2366_v53 = vor.u32 %v2365_v63, %v2364_v4  ;;  %v2369_v46 = vor.u32 %v2368_v3, %v2367_v38  ;;  %v2372_v44 = vor.u32 %v2371_v6, %v2370_v32 }
 0x825   :  { %v2375_v13 = vor.u32 %v2374_v9, %v2373_v42 }
 0x826   :  { %v2381_v22 = vsel %vm2379_vm11, %v2369_v46, 2102212464  ;;  %v2384_v24 = vsel %vm2376_vm10, %v2363_v51, %v2366_v53  ;;  %v2388_v16 = vsel %vm2376_vm10, %v2366_v53, %v2369_v46  ;;  %v2385_v21 = vsel %vm2379_vm11, %v2372_v44, 920167782 }
 0x827   :  { %v2389_v52 = vsel %vm2379_vm11, %v2375_v13, 1326507024  ;;  %v2386_v54 = vsel %vm2378_vm12, %v2369_v46, %v2385_v21  ;;  %v2380_v58 = vsel %vm2376_vm10, %v2360_v34, %v2363_v51  ;;  %v2382_v35 = vsel %vm2378_vm12, %v2366_v53, %v2381_v22 }
 0x828   :  { %v2390_v40 = vsel %vm2378_vm12, %v2372_v44, %v2389_v52  ;;  %v2387_v28 = vsel %vm2377_vm13, %v2384_v24, %v2386_v54  ;;  %v2383_v37 = vsel %vm2377_vm13, %v2380_v58, %v2382_v35  ;;  %v2449_v51 = vsub.f32 0.0, %v5992_v11 }
 0x829   :  { %v2391_v59 = vsel %vm2377_vm13, %v2388_v16, %v2390_v40  ;;  %v6016_v61 = vmul.u32.u64.low %v2392_v5, %v2387_v28  ;;  %v6017_v29 = vmul.u32.u64.high %v2392_v5, %v2387_v28, %v6016_v61  ;;  %v2399_v47 = vmul.u32 %v2392_v5, %v2383_v37 }
 0x82a   :  { %v6013_v31 = vmul.u32.u64.low %v2392_v5, %v2391_v59  ;;  %v6014_v62 = vmul.u32.u64.high %v2392_v5, %v2391_v59, %v6013_v31  ;;  %v2450_v13 = vmul.f32 1.442695, %v2449_v51 }
 0x82b   :  { %v2402_v41 = vadd.s32 1, %v6017_v29 }
 0x82c   :  { %vm2401_vm14 = vc.u32 %v6014_v62, %v6016_v61  ;;  %v2400_v23 = vadd.s32 %v6016_v61, %v6014_v62  ;;  %v2456_v61 = vmul.f32 3.0, %v2455_v56 }
 0x82d   :  { %v2403_v55 = vsel %vm2401_vm14, %v2402_v41, %v6017_v29 }
 0x82e   :  { %v2404_v8 = vadd.s32 %v2403_v55, %v2399_v47  ;;  %v2457_v41 = vadd.f32 %v2456_v61, %v5898_v26 }
 0x830   :  { %v2405_v45 = vadd.s32 536870912, %v2404_v8 }
 0x832   :  { %v2406_v7 = vshrl.u32 %v2405_v45, 30 }
 0x834   :  { %v2407_v48 = vshll.u32 %v2406_v7, 30  ;;  %v2430_v53 = vsub.s32 4, %v2406_v7 }
 0x836   :  { %v2408_v15 = vsub.s32 %v2404_v8, %v2407_v48  ;;  %v2431_v22 = vsel %vm2346_vm0, %v2430_v53, %v2406_v7 }
 0x837   :  { %v2433_v24 = vsel %vm2345_vm1, 0, %v2431_v22 }
 0x838   :  { %v2410_v49 = vsub.s32 0, %v2408_v15  ;;  %v2437_v16 = vadd.s32 3, %v2433_v24 }
 0x83a   :  { %v4502_v50 = vmin.u32 %v2410_v49, %v2408_v15  ;;  %v2438_v34 = vand.u32 3, %v2437_v16 }
 0x83c   :  { %v2412_v20 = vclz %v4502_v50  ;;  %vm2443_vm2 = vcmp.eq.s32.totalorder %v2438_v34, 2  ;;  %vm2440_vm3 = vcmp.eq.s32.totalorder %v2438_v34, 0  ;;  %vm2439_vm4 = vcmp.lt.s32.totalorder %v2438_v34, 2 }
 0x83e   :  { %v4503_v18 = vadd.s32 4294967294, %v2412_v20 }
 0x840   :  { %vm4504_vm15 = vcmp.lt.s32.totalorder %v4503_v18, 0 }
 0x841   :  { %v2415_v17 = vsel %vm4504_vm15, 0, %v4503_v18 }
 0x842   :  { %v2416_v1 = vsub.s32 32, %v2415_v17  ;;  %v2420_v60 = vsub.s32 4294967266, %v2415_v17  ;;  %v2417_v4 = vshll.u32 %v2408_v15, %v2415_v17 }
 0x844   :  { %v2418_v12 = vshrl.u32 %v2400_v23, %v2416_v1  ;;  %v2421_v63 = vadd.s32 127, %v2420_v60 }
 0x846   :  { %v2419_v38 = vor.u32 %v2418_v12, %v2417_v4  ;;  %v2422_v3 = vshll.u32 %v2421_v63, 23 }
 0x848   :  { %v2423_v32 = vor.u32 4788187, %v2422_v3  ;;  %v2426_v42 = vcvt.s32.f32 %v2419_v38 }
 0x84a   :  { %v2424_v6 = vand.u32 2147483647, %v2423_v32 }
 0x84c   :  { %v2427_v9 = vmul.f32 %v2426_v42, %v2424_v6 }
 0x84e   :  { %v2428_v10 = vxor.u32 2147483648, %v2427_v9 }
 0x850   :  { %v2429_v46 = vsel %vm2346_vm0, %v2428_v10, %v2427_v9 }
 0x851   :  { %v2432_v44 = vsel %vm2345_vm1, %v5996_v57, %v2429_v46 }
 0x852   :  { %4922 = vcosq.f32 %v2432_v44 }
 0x853   :  { %4924 = vsinq.f32 %v2432_v44 }
 0x854   :  { %4926 = vpow2.f32 %v2450_v13 }
 0x85f   :  { %v4923_v21 = vpop.eup %4922 }
 0x860   :  { %v4925_v52 = vpop.eup %4924  ;;  %v2444_v54 = vxor.u32 2147483648, %v4923_v21 }
 0x861   :  { %v2441_v40 = vxor.u32 2147483648, %v4925_v52  ;;  %v4927_v58 = vpop.eup %4926 }
 0x862   :  { %v2445_v5 = vsel %vm2443_vm2, %v2444_v54, %v4925_v52  ;;  %v2452_v62 = vadd.f32 1.0, %v4927_v58 }
 0x863   :  { %v2442_v35 = vsel %vm2440_vm3, %v4923_v21, %v2441_v40 }
 0x864   :  { %v2446_v28 = vsel %vm2439_vm4, %v2442_v35, %v2445_v5 }
 0x865   :  { %v2447_v59 = vsel %vm2436_vm5, nan, %v2446_v28 }
 0x866   :  { %v2448_v31 = vmul.f32 %v2447_v59, %v2447_v59 }
 0x868   :  { %v2453_v29 = vmul.f32 %v2452_v62, %v2448_v31 }
 0x86a   :  { %v2454_v37 = vsub.f32 %v2453_v29, %v5992_v11 }
 0x86c   :  { %v2458_v47 = vadd.f32 %v2457_v41, %v2454_v37 }
 0x86e   :  { %v2459_v55 = vmul.f32 0.013888889, %v2458_v47 }
 0x870   :  { %v6034_v8 = vadd.f32 %v2459_v55, %v5860_v19 }
 0x872   :  { %v6038_v2 = vadd.f32 %v5177_v14, %v6034_v8 }
 0x874   :  { %v2465_v43 = vand.u32 2139095040, %v6038_v2  ;;  %v2462_v48 = vand.u32 2147483647, %v6038_v2  ;;  %vm2464_vm13 = vcmp.lt.s32.totalorder %v6038_v2, 0  ;;  %vm2554_vm2 = vweird.f32 %v6038_v2 }
 0x876   :  { %v2466_v57 = vshrl.u32 %v2465_v43, 23  ;;  %v2469_v26 = vand.u32 8388607, %v2462_v48  ;;  %vm2463_vm14 = vcmp.le.f32.partialorder %v2462_v48, 0.7853982 }
 0x878   :  { %v4505_v45 = vadd.s32 4294967169, %v2466_v57  ;;  %v2470_v38 = vor.u32 8388608, %v2469_v26 }
 0x87a   :  { %v2472_v7 = vadd.s32 1, %v4505_v45  ;;  %v2510_v16 = vshll.u32 %v2470_v38, 8 }
 0x87c   :  { %vm2473_vm6 = vcmp.gt.s32.totalorder %v2472_v7, 0 }
 0x87d   :  { %v2474_v11 = vsel %vm2473_vm6, %v2472_v7, 0 }
 0x87e   :  { %v2476_v15 = vand.u32 31, %v2474_v11  ;;  %v2475_v19 = vshrl.u32 %v2474_v11, 5 }
 0x880   :  { %v2477_v49 = vsub.s32 32, %v2476_v15  ;;  %v2479_v50 = vshll.u32 %v5117_v25, %v2476_v15  ;;  %v2482_v20 = vshll.u32 %v5118_v27, %v2476_v15  ;;  %v2485_v23 = vshll.u32 %v5119_v30, %v2476_v15 }
 0x881   :  { %v2488_v60 = vshll.u32 %v5120_v33, %v2476_v15  ;;  %v2491_v12 = vshll.u32 %v5121_v36, %v2476_v15  ;;  %vm2494_vm7 = vcmp.lt.s32.totalorder %v2475_v19, 1  ;;  %vm2497_vm8 = vcmp.lt.s32.totalorder %v2475_v19, 4 }
 0x882   :  { %v2480_v18 = vshrl.u32 %v5118_v27, %v2477_v49  ;;  %v2483_v17 = vshrl.u32 %v5119_v30, %v2477_v49  ;;  %v2486_v1 = vshrl.u32 %v5120_v33, %v2477_v49  ;;  %v2489_v4 = vshrl.u32 %v5121_v36, %v2477_v49 }
 0x883   :  { %v2492_v63 = vshrl.u32 %v5122_v39, %v2477_v49  ;;  %v2478_v46 = vshrl.u32 %v5117_v25, %v2477_v49  ;;  %vm2496_vm9 = vcmp.lt.s32.totalorder %v2475_v19, 3  ;;  %vm2495_vm10 = vcmp.lt.s32.totalorder %v2475_v19, 2 }
 0x884   :  { %v2481_v3 = vor.u32 %v2480_v18, %v2479_v50  ;;  %v2484_v32 = vor.u32 %v2483_v17, %v2482_v20  ;;  %v2487_v6 = vor.u32 %v2486_v1, %v2485_v23  ;;  %v2490_v42 = vor.u32 %v2489_v4, %v2488_v60 }
 0x885   :  { %v2493_v9 = vor.u32 %v2492_v63, %v2491_v12  ;;  %v2567_v4 = vsub.f32 0.0, %v6034_v8 }
 0x886   :  { %v2499_v10 = vsel %vm2497_vm8, %v2487_v6, 2102212464  ;;  %v2502_v51 = vsel %vm2494_vm7, %v2481_v3, %v2484_v32  ;;  %v2506_v53 = vsel %vm2494_vm7, %v2484_v32, %v2487_v6  ;;  %v2503_v44 = vsel %vm2497_vm8, %v2490_v42, 920167782 }
 0x887   :  { %v2507_v13 = vsel %vm2497_vm8, %v2493_v9, 1326507024  ;;  %v2504_v22 = vsel %vm2496_vm9, %v2487_v6, %v2503_v44  ;;  %v2498_v34 = vsel %vm2494_vm7, %v2478_v46, %v2481_v3  ;;  %v2500_v21 = vsel %vm2496_vm9, %v2484_v32, %v2499_v10 }
 0x888   :  { %v2508_v24 = vsel %vm2496_vm9, %v2490_v42, %v2507_v13  ;;  %v2505_v52 = vsel %vm2495_vm10, %v2502_v51, %v2504_v22  ;;  %v2501_v35 = vsel %vm2495_vm10, %v2498_v34, %v2500_v21  ;;  %v2568_v3 = vmul.f32 1.442695, %v2567_v4 }
 0x889   :  { %v2509_v54 = vsel %vm2495_vm10, %v2506_v53, %v2508_v24  ;;  %v6058_v56 = vmul.u32.u64.low %v2510_v16, %v2505_v52  ;;  %v6059_v58 = vmul.u32.u64.high %v2510_v16, %v2505_v52, %v6058_v56  ;;  %v2517_v59 = vmul.u32 %v2510_v16, %v2501_v35 }
 0x88a   :  { %v6055_v40 = vmul.u32.u64.low %v2510_v16, %v2509_v54  ;;  %v6056_v5 = vmul.u32.u64.high %v2510_v16, %v2509_v54, %v6055_v40 }
 0x88b   :  { %v2520_v28 = vadd.s32 1, %v6059_v58 }
 0x88c   :  { %vm2519_vm11 = vc.u32 %v6056_v5, %v6058_v56  ;;  %v2518_v7 = vadd.s32 %v6058_v56, %v6056_v5 }
 0x88d   :  { %v2521_v31 = vsel %vm2519_vm11, %v2520_v28, %v6059_v58 }
 0x88e   :  { %v2522_v62 = vadd.s32 %v2521_v31, %v2517_v59 }
 0x890   :  { %v2523_v61 = vadd.s32 536870912, %v2522_v62 }
 0x892   :  { %v2524_v29 = vshrl.u32 %v2523_v61, 30 }
 0x894   :  { %v2525_v37 = vshll.u32 %v2524_v29, 30  ;;  %v2548_v12 = vsub.s32 4, %v2524_v29 }
 0x896   :  { %v2526_v41 = vsub.s32 %v2522_v62, %v2525_v37  ;;  %v2549_v32 = vsel %vm2464_vm13, %v2548_v12, %v2524_v29 }
 0x897   :  { %v2551_v6 = vsel %vm2463_vm14, 0, %v2549_v32 }
 0x898   :  { %v2528_v47 = vsub.s32 0, %v2526_v41  ;;  %v2555_v42 = vadd.s32 3, %v2551_v6 }
 0x89a   :  { %v4506_v55 = vmin.u32 %v2528_v47, %v2526_v41  ;;  %v2556_v9 = vand.u32 3, %v2555_v42 }
 0x89c   :  { %v2530_v43 = vclz %v4506_v55  ;;  %vm2561_vm15 = vcmp.eq.s32.totalorder %v2556_v9, 2  ;;  %vm2558_vm0 = vcmp.eq.s32.totalorder %v2556_v9, 0  ;;  %vm2557_vm1 = vcmp.lt.s32.totalorder %v2556_v9, 2 }
 0x89e   :  { %v4507_v57 = vadd.s32 4294967294, %v2530_v43 }
 0x8a0   :  { %vm4508_vm12 = vcmp.lt.s32.totalorder %v4507_v57, 0 }
 0x8a1   :  { %v2533_v45 = vsel %vm4508_vm12, 0, %v4507_v57 }
 0x8a2   :  { %v2534_v11 = vsub.s32 32, %v2533_v45  ;;  %v2538_v15 = vsub.s32 4294967266, %v2533_v45  ;;  %v2535_v26 = vshll.u32 %v2526_v41, %v2533_v45 }
 0x8a4   :  { %v2536_v49 = vshrl.u32 %v2518_v7, %v2534_v11  ;;  %v2539_v19 = vadd.s32 127, %v2538_v15 }
 0x8a6   :  { %v2537_v50 = vor.u32 %v2536_v49, %v2535_v26  ;;  %v2540_v20 = vshll.u32 %v2539_v19, 23 }
 0x8a8   :  { %v2541_v18 = vor.u32 4788187, %v2540_v20  ;;  %v2544_v23 = vcvt.s32.f32 %v2537_v50 }
 0x8aa   :  { %v2542_v17 = vand.u32 2147483647, %v2541_v18 }
 0x8ac   :  { %v2545_v1 = vmul.f32 %v2544_v23, %v2542_v17 }
 0x8ae   :  { %v2546_v60 = vxor.u32 2147483648, %v2545_v1 }
 0x8b0   :  { %v2547_v63 = vsel %vm2464_vm13, %v2546_v60, %v2545_v1 }
 0x8b1   :  { %v2550_v38 = vsel %vm2463_vm14, %v6038_v2, %v2547_v63 }
 0x8b2   :  { %4928 = vcosq.f32 %v2550_v38 }
 0x8b3   :  { %4930 = vsinq.f32 %v2550_v38 }
 0x8b4   :  { %4932 = vpow2.f32 %v2568_v3 }
 0x8bf   :  { %v4929_v10 = vpop.eup %4928 }
 0x8c0   :  { %v4931_v51 = vpop.eup %4930  ;;  %v2562_v53 = vxor.u32 2147483648, %v4929_v10 }
 0x8c1   :  { %v2559_v46 = vxor.u32 2147483648, %v4931_v51  ;;  %v4933_v13 = vpop.eup %4932 }
 0x8c2   :  { %v2563_v44 = vsel %vm2561_vm15, %v2562_v53, %v4931_v51  ;;  %v2570_v34 = vadd.f32 1.0, %v4933_v13 }
 0x8c3   :  { %v2560_v48 = vsel %vm2558_vm0, %v4929_v10, %v2559_v46 }
 0x8c4   :  { %v2564_v22 = vsel %vm2557_vm1, %v2560_v48, %v2563_v44 }
 0x8c5   :  { %v2565_v24 = vsel %vm2554_vm2, nan, %v2564_v22 }
 0x8c6   :  { %v2566_v16 = vmul.f32 %v2565_v24, %v2565_v24 }
 0x8c8   :  { %v2571_v21 = vmul.f32 %v2570_v34, %v2566_v16 }
 0x8ca   :  { %v6072_v52 = vsub.f32 %v2571_v21, %v6034_v8 }
 0x8cc   :  { %v6075_v54 = vmul.f32 0.037037037, %v6072_v52 }
 0x8ce   :  { %v6079_v40 = vadd.f32 %v6075_v54, %v6034_v8 }
 0x8d0   :  { %v6083_v5 = vadd.f32 %v5177_v14, %v6079_v40 }
 0x8d2   :  { %v2579_v2 = vand.u32 2139095040, %v6083_v5  ;;  %v2576_v28 = vand.u32 2147483647, %v6083_v5  ;;  %vm2578_vm10 = vcmp.lt.s32.totalorder %v6083_v5, 0  ;;  %vm2668_vm15 = vweird.f32 %v6083_v5 }
 0x8d4   :  { %v2580_v56 = vshrl.u32 %v2579_v2, 23  ;;  %v2583_v62 = vand.u32 8388607, %v2576_v28  ;;  %vm2577_vm11 = vcmp.le.f32.partialorder %v2576_v28, 0.7853982 }
 0x8d6   :  { %v4509_v58 = vadd.s32 4294967169, %v2580_v56  ;;  %v2584_v26 = vor.u32 8388608, %v2583_v62 }
 0x8d8   :  { %v2586_v35 = vadd.s32 1, %v4509_v58  ;;  %v2624_v3 = vshll.u32 %v2584_v26, 8  ;;  %v2681_v26 = vsub.f32 0.0, %v6079_v40 }
 0x8da   :  { %vm2587_vm3 = vcmp.gt.s32.totalorder %v2586_v35, 0 }
 0x8db   :  { %v2588_v59 = vsel %vm2587_vm3, %v2586_v35, 0 }
 0x8dc   :  { %v2590_v31 = vand.u32 31, %v2588_v59  ;;  %v2589_v29 = vshrl.u32 %v2588_v59, 5 }
 0x8de   :  { %v2591_v61 = vsub.s32 32, %v2590_v31  ;;  %v2593_v37 = vshll.u32 %v5117_v25, %v2590_v31  ;;  %v2596_v41 = vshll.u32 %v5118_v27, %v2590_v31  ;;  %v2599_v43 = vshll.u32 %v5119_v30, %v2590_v31 }
 0x8df   :  { %v2602_v45 = vshll.u32 %v5120_v33, %v2590_v31  ;;  %v2605_v11 = vshll.u32 %v5121_v36, %v2590_v31  ;;  %vm2608_vm4 = vcmp.lt.s32.totalorder %v2589_v29, 1  ;;  %vm2611_vm5 = vcmp.lt.s32.totalorder %v2589_v29, 4 }
 0x8e0   :  { %v2594_v47 = vshrl.u32 %v5118_v27, %v2591_v61  ;;  %v2597_v55 = vshrl.u32 %v5119_v30, %v2591_v61  ;;  %v2600_v57 = vshrl.u32 %v5120_v33, %v2591_v61  ;;  %v2603_v7 = vshrl.u32 %v5121_v36, %v2591_v61 }
 0x8e1   :  { %v2606_v15 = vshrl.u32 %v5122_v39, %v2591_v61  ;;  %v2592_v60 = vshrl.u32 %v5117_v25, %v2591_v61  ;;  %vm2610_vm6 = vcmp.lt.s32.totalorder %v2589_v29, 3  ;;  %vm2609_vm7 = vcmp.lt.s32.totalorder %v2589_v29, 2 }
 0x8e2   :  { %v2595_v49 = vor.u32 %v2594_v47, %v2593_v37  ;;  %v2598_v19 = vor.u32 %v2597_v55, %v2596_v41  ;;  %v2601_v50 = vor.u32 %v2600_v57, %v2599_v43  ;;  %v2604_v20 = vor.u32 %v2603_v7, %v2602_v45 }
 0x8e3   :  { %v2607_v18 = vor.u32 %v2606_v15, %v2605_v11 }
 0x8e4   :  { %v2613_v17 = vsel %vm2611_vm5, %v2601_v50, 2102212464  ;;  %v2616_v23 = vsel %vm2608_vm4, %v2595_v49, %v2598_v19  ;;  %v2620_v1 = vsel %vm2608_vm4, %v2598_v19, %v2601_v50  ;;  %v2617_v4 = vsel %vm2611_vm5, %v2604_v20, 920167782 }
 0x8e5   :  { %v2621_v12 = vsel %vm2611_vm5, %v2607_v18, 1326507024  ;;  %v2618_v63 = vsel %vm2610_vm6, %v2601_v50, %v2617_v4  ;;  %v2612_v32 = vsel %vm2608_vm4, %v2592_v60, %v2595_v49  ;;  %v2614_v6 = vsel %vm2610_vm6, %v2598_v19, %v2613_v17 }
 0x8e6   :  { %v2622_v38 = vsel %vm2610_vm6, %v2604_v20, %v2621_v12  ;;  %v2619_v42 = vsel %vm2609_vm7, %v2616_v23, %v2618_v63  ;;  %v2615_v44 = vsel %vm2609_vm7, %v2612_v32, %v2614_v6  ;;  %v2682_v20 = vmul.f32 1.442695, %v2681_v26 }
 0x8e7   :  { %v2623_v9 = vsel %vm2609_vm7, %v2620_v1, %v2622_v38  ;;  %v6103_v53 = vmul.u32.u64.low %v2624_v3, %v2619_v42  ;;  %v6104_v46 = vmul.u32.u64.high %v2624_v3, %v2619_v42, %v6103_v53  ;;  %v2631_v48 = vmul.u32 %v2624_v3, %v2615_v44 }
 0x8e8   :  { %v6100_v10 = vmul.u32.u64.low %v2624_v3, %v2623_v9  ;;  %v6101_v51 = vmul.u32.u64.high %v2624_v3, %v2623_v9, %v6100_v10 }
 0x8e9   :  { %v2634_v13 = vadd.s32 1, %v6104_v46 }
 0x8ea   :  { %vm2633_vm8 = vc.u32 %v6101_v51, %v6103_v53  ;;  %v2632_v62 = vadd.s32 %v6103_v53, %v6101_v51 }
 0x8eb   :  { %v2635_v22 = vsel %vm2633_vm8, %v2634_v13, %v6104_v46 }
 0x8ec   :  { %v2636_v24 = vadd.s32 %v2635_v22, %v2631_v48 }
 0x8ee   :  { %v2637_v16 = vadd.s32 536870912, %v2636_v24 }
 0x8f0   :  { %v2638_v34 = vshrl.u32 %v2637_v16, 30 }
 0x8f2   :  { %v2639_v21 = vshll.u32 %v2638_v34, 30  ;;  %v2662_v49 = vsub.s32 4, %v2638_v34 }
 0x8f4   :  { %v2640_v2 = vsub.s32 %v2636_v24, %v2639_v21  ;;  %v2663_v18 = vsel %vm2578_vm10, %v2662_v49, %v2638_v34 }
 0x8f5   :  { %v2665_v17 = vsel %vm2577_vm11, 0, %v2663_v18 }
 0x8f6   :  { %v2642_v56 = vsub.s32 0, %v2640_v2  ;;  %v2669_v23 = vadd.s32 3, %v2665_v17 }
 0x8f8   :  { %v4510_v58 = vmin.u32 %v2642_v56, %v2640_v2  ;;  %v2670_v1 = vand.u32 3, %v2669_v23 }
 0x8fa   :  { %v2644_v35 = vclz %v4510_v58  ;;  %vm2675_vm12 = vcmp.eq.s32.totalorder %v2670_v1, 2  ;;  %vm2672_vm13 = vcmp.eq.s32.totalorder %v2670_v1, 0  ;;  %vm2671_vm14 = vcmp.lt.s32.totalorder %v2670_v1, 2 }
 0x8fc   :  { %v4511_v59 = vadd.s32 4294967294, %v2644_v35 }
 0x8fe   :  { %vm4512_vm9 = vcmp.lt.s32.totalorder %v4511_v59, 0 }
 0x8ff   :  { %v2647_v31 = vsel %vm4512_vm9, 0, %v4511_v59 }
 0x900   :  { %v2648_v61 = vsub.s32 32, %v2647_v31  ;;  %v2652_v29 = vsub.s32 4294967266, %v2647_v31  ;;  %v2649_v37 = vshll.u32 %v2640_v2, %v2647_v31 }
 0x902   :  { %v2650_v41 = vshrl.u32 %v2632_v62, %v2648_v61  ;;  %v2653_v47 = vadd.s32 127, %v2652_v29 }
 0x904   :  { %v2651_v55 = vor.u32 %v2650_v41, %v2649_v37  ;;  %v2654_v43 = vshll.u32 %v2653_v47, 23 }
 0x906   :  { %v2655_v57 = vor.u32 4788187, %v2654_v43  ;;  %v2658_v7 = vcvt.s32.f32 %v2651_v55 }
 0x908   :  { %v2656_v45 = vand.u32 2147483647, %v2655_v57 }
 0x90a   :  { %v2659_v11 = vmul.f32 %v2658_v7, %v2656_v45 }
 0x90c   :  { %v2660_v15 = vxor.u32 2147483648, %v2659_v11 }
 0x90e   :  { %v2661_v19 = vsel %vm2578_vm10, %v2660_v15, %v2659_v11 }
 0x90f   :  { %v2664_v50 = vsel %vm2577_vm11, %v6083_v5, %v2661_v19 }
 0x910   :  { %4934 = vcosq.f32 %v2664_v50 }
 0x911   :  { %4936 = vsinq.f32 %v2664_v50 }
 0x912   :  { %4938 = vpow2.f32 %v2682_v20 }
 0x91d   :  { %v4935_v60 = vpop.eup %4934 }
 0x91e   :  { %v4937_v4 = vpop.eup %4936  ;;  %v2676_v12 = vxor.u32 2147483648, %v4935_v60 }
 0x91f   :  { %v2673_v63 = vxor.u32 2147483648, %v4937_v4  ;;  %v4939_v3 = vpop.eup %4938 }
 0x920   :  { %v2677_v38 = vsel %vm2675_vm12, %v2676_v12, %v4937_v4  ;;  %v2684_v9 = vadd.f32 1.0, %v4939_v3 }
 0x921   :  { %v2674_v28 = vsel %vm2672_vm13, %v4935_v60, %v2673_v63 }
 0x922   :  { %v2678_v32 = vsel %vm2671_vm14, %v2674_v28, %v2677_v38 }
 0x923   :  { %v2679_v6 = vsel %vm2668_vm15, nan, %v2678_v32 }
 0x924   :  { %v2680_v42 = vmul.f32 %v2679_v6, %v2679_v6 }
 0x926   :  { %v2685_v10 = vmul.f32 %v2684_v9, %v2680_v42 }
 0x928   :  { %v6117_v51 = vsub.f32 %v2685_v10, %v6079_v40 }
 0x92a   :  { %v2687_v53 = vmul.f32 0.11111111, %v6117_v51 }
 0x92c   :  { %v2688_v46 = vadd.f32 %v2687_v53, %v6034_v8 }
 0x92e   :  { %v6122_v44 = vsub.f32 %v2688_v46, %v6075_v54 }
 0x930   :  { %v6126_v13 = vadd.f32 %v5177_v14, %v6122_v44 }
 0x932   :  { %v2694_v5 = vand.u32 2139095040, %v6126_v13  ;;  %v2691_v16 = vand.u32 2147483647, %v6126_v13  ;;  %vm2693_vm7 = vcmp.lt.s32.totalorder %v6126_v13, 0  ;;  %vm2783_vm12 = vweird.f32 %v6126_v13 }
 0x934   :  { %v2695_v48 = vshrl.u32 %v2694_v5, 23  ;;  %v2698_v21 = vand.u32 8388607, %v2691_v16  ;;  %vm2692_vm8 = vcmp.le.f32.partialorder %v2691_v16, 0.7853982 }
 0x936   :  { %v4513_v22 = vadd.s32 4294967169, %v2695_v48  ;;  %v2699_v47 = vor.u32 8388608, %v2698_v21 }
 0x938   :  { %v2701_v24 = vadd.s32 1, %v4513_v22  ;;  %v2739_v17 = vshll.u32 %v2699_v47, 8  ;;  %v2796_v47 = vsub.f32 0.0, %v6122_v44 }
 0x93a   :  { %vm2702_vm0 = vcmp.gt.s32.totalorder %v2701_v24, 0 }
 0x93b   :  { %v2703_v40 = vsel %vm2702_vm0, %v2701_v24, 0 }
 0x93c   :  { %v2705_v34 = vand.u32 31, %v2703_v40  ;;  %v2704_v54 = vshrl.u32 %v2703_v40, 5 }
 0x93e   :  { %v2706_v2 = vsub.s32 32, %v2705_v34  ;;  %v2708_v56 = vshll.u32 %v5117_v25, %v2705_v34  ;;  %v2711_v58 = vshll.u32 %v5118_v27, %v2705_v34  ;;  %v2714_v31 = vshll.u32 %v5119_v30, %v2705_v34 }
 0x93f   :  { %v2717_v61 = vshll.u32 %v5120_v33, %v2705_v34  ;;  %v2720_v37 = vshll.u32 %v5121_v36, %v2705_v34  ;;  %vm2723_vm1 = vcmp.lt.s32.totalorder %v2704_v54, 1  ;;  %vm2726_vm2 = vcmp.lt.s32.totalorder %v2704_v54, 4 }
 0x940   :  { %v2709_v35 = vshrl.u32 %v5118_v27, %v2706_v2  ;;  %v2712_v59 = vshrl.u32 %v5119_v30, %v2706_v2  ;;  %v2715_v62 = vshrl.u32 %v5120_v33, %v2706_v2  ;;  %v2718_v29 = vshrl.u32 %v5121_v36, %v2706_v2 }
 0x941   :  { %v2721_v41 = vshrl.u32 %v5122_v39, %v2706_v2  ;;  %v2707_v49 = vshrl.u32 %v5117_v25, %v2706_v2  ;;  %vm2725_vm3 = vcmp.lt.s32.totalorder %v2704_v54, 3  ;;  %vm2724_vm4 = vcmp.lt.s32.totalorder %v2704_v54, 2 }
 0x942   :  { %v2710_v55 = vor.u32 %v2709_v35, %v2708_v56  ;;  %v2713_v43 = vor.u32 %v2712_v59, %v2711_v58  ;;  %v2716_v57 = vor.u32 %v2715_v62, %v2714_v31  ;;  %v2719_v45 = vor.u32 %v2718_v29, %v2717_v61 }
 0x943   :  { %v2722_v7 = vor.u32 %v2721_v41, %v2720_v37 }
 0x944   :  { %v2728_v11 = vsel %vm2726_vm2, %v2716_v57, 2102212464  ;;  %v2731_v15 = vsel %vm2723_vm1, %v2710_v55, %v2713_v43  ;;  %v2735_v26 = vsel %vm2723_vm1, %v2713_v43, %v2716_v57  ;;  %v2732_v19 = vsel %vm2726_vm2, %v2719_v45, 920167782 }
 0x945   :  { %v2736_v50 = vsel %vm2726_vm2, %v2722_v7, 1326507024  ;;  %v2733_v20 = vsel %vm2725_vm3, %v2716_v57, %v2732_v19  ;;  %v2727_v23 = vsel %vm2723_vm1, %v2707_v49, %v2710_v55  ;;  %v2729_v1 = vsel %vm2725_vm3, %v2713_v43, %v2728_v11 }
 0x946   :  { %v2737_v18 = vsel %vm2725_vm3, %v2719_v45, %v2736_v50  ;;  %v2734_v60 = vsel %vm2724_vm4, %v2731_v15, %v2733_v20  ;;  %v2730_v28 = vsel %vm2724_vm4, %v2727_v23, %v2729_v1  ;;  %v2797_v45 = vmul.f32 1.442695, %v2796_v47 }
 0x947   :  { %v2738_v4 = vsel %vm2724_vm4, %v2735_v26, %v2737_v18  ;;  %v6146_v38 = vmul.u32.u64.low %v2739_v17, %v2734_v60  ;;  %v6147_v3 = vmul.u32.u64.high %v2739_v17, %v2734_v60, %v6146_v38  ;;  %v2746_v6 = vmul.u32 %v2739_v17, %v2730_v28 }
 0x948   :  { %v6143_v12 = vmul.u32.u64.low %v2739_v17, %v2738_v4  ;;  %v6144_v63 = vmul.u32.u64.high %v2739_v17, %v2738_v4, %v6143_v12 }
 0x949   :  { %v2749_v32 = vadd.s32 1, %v6147_v3 }
 0x94a   :  { %vm2748_vm5 = vc.u32 %v6144_v63, %v6146_v38  ;;  %v2747_v21 = vadd.s32 %v6146_v38, %v6144_v63  ;;  %v2802_v38 = vsub.f32 %v6072_v52, %v6117_v51 }
 0x94b   :  { %v2750_v42 = vsel %vm2748_vm5, %v2749_v32, %v6147_v3 }
 0x94c   :  { %v2751_v9 = vadd.s32 %v2750_v42, %v2746_v6 }
 0x94e   :  { %v2752_v10 = vadd.s32 536870912, %v2751_v9 }
 0x950   :  { %v2753_v53 = vshrl.u32 %v2752_v10, 30 }
 0x952   :  { %v2754_v46 = vshll.u32 %v2753_v53, 30  ;;  %v2777_v55 = vsub.s32 4, %v2753_v53 }
 0x954   :  { %v2755_v5 = vsub.s32 %v2751_v9, %v2754_v46  ;;  %v2778_v7 = vsel %vm2693_vm7, %v2777_v55, %v2753_v53 }
 0x955   :  { %v2780_v11 = vsel %vm2692_vm8, 0, %v2778_v7 }
 0x956   :  { %v2757_v48 = vsub.s32 0, %v2755_v5  ;;  %v2784_v15 = vadd.s32 3, %v2780_v11 }
 0x958   :  { %v4514_v22 = vmin.u32 %v2757_v48, %v2755_v5  ;;  %v2785_v26 = vand.u32 3, %v2784_v15 }
 0x95a   :  { %v2759_v24 = vclz %v4514_v22  ;;  %vm2790_vm9 = vcmp.eq.s32.totalorder %v2785_v26, 2  ;;  %vm2787_vm10 = vcmp.eq.s32.totalorder %v2785_v26, 0  ;;  %vm2786_vm11 = vcmp.lt.s32.totalorder %v2785_v26, 2 }
 0x95c   :  { %v4515_v40 = vadd.s32 4294967294, %v2759_v24 }
 0x95e   :  { %vm4516_vm6 = vcmp.lt.s32.totalorder %v4515_v40, 0 }
 0x95f   :  { %v2762_v34 = vsel %vm4516_vm6, 0, %v4515_v40 }
 0x960   :  { %v2763_v2 = vsub.s32 32, %v2762_v34  ;;  %v2767_v54 = vsub.s32 4294967266, %v2762_v34  ;;  %v2764_v56 = vshll.u32 %v2755_v5, %v2762_v34 }
 0x962   :  { %v2765_v58 = vshrl.u32 %v2747_v21, %v2763_v2  ;;  %v2768_v35 = vadd.s32 127, %v2767_v54 }
 0x964   :  { %v2766_v59 = vor.u32 %v2765_v58, %v2764_v56  ;;  %v2769_v31 = vshll.u32 %v2768_v35, 23 }
 0x966   :  { %v2770_v62 = vor.u32 4788187, %v2769_v31  ;;  %v2773_v29 = vcvt.s32.f32 %v2766_v59 }
 0x968   :  { %v2771_v61 = vand.u32 2147483647, %v2770_v62 }
 0x96a   :  { %v2774_v37 = vmul.f32 %v2773_v29, %v2771_v61 }
 0x96c   :  { %v2775_v41 = vxor.u32 2147483648, %v2774_v37 }
 0x96e   :  { %v2776_v43 = vsel %vm2693_vm7, %v2775_v41, %v2774_v37 }
 0x96f   :  { %v2779_v57 = vsel %vm2692_vm8, %v6126_v13, %v2776_v43 }
 0x970   :  { %4940 = vcosq.f32 %v2779_v57 }
 0x971   :  { %4942 = vsinq.f32 %v2779_v57 }
 0x972   :  { %4944 = vpow2.f32 %v2797_v45 }
 0x97d   :  { %v4941_v49 = vpop.eup %4940 }
 0x97e   :  { %v4943_v19 = vpop.eup %4942  ;;  %v2791_v50 = vxor.u32 2147483648, %v4941_v49 }
 0x97f   :  { %v2788_v20 = vxor.u32 2147483648, %v4943_v19  ;;  %v4945_v17 = vpop.eup %4944 }
 0x980   :  { %v2792_v18 = vsel %vm2790_vm9, %v2791_v50, %v4943_v19  ;;  %v2799_v4 = vadd.f32 1.0, %v4945_v17 }
 0x981   :  { %v2789_v16 = vsel %vm2787_vm10, %v4941_v49, %v2788_v20 }
 0x982   :  { %v2793_v23 = vsel %vm2786_vm11, %v2789_v16, %v2792_v18 }
 0x983   :  { %v2794_v1 = vsel %vm2783_vm12, nan, %v2793_v23 }
 0x984   :  { %v2795_v60 = vmul.f32 %v2794_v1, %v2794_v1 }
 0x986   :  { %v2800_v12 = vmul.f32 %v2799_v4, %v2795_v60 }
 0x988   :  { %v6160_v63 = vsub.f32 %v2800_v12, %v6122_v44 }
 0x98a   :  { %v2803_v3 = vadd.f32 %v2802_v38, %v6160_v63 }
 0x98c   :  { %v2804_v28 = vmul.f32 0.11111111, %v2803_v3 }
 0x98e   :  { %v6166_v32 = vadd.f32 %v2804_v28, %v6034_v8 }
 0x990   :  { %v6170_v13 = vadd.f32 %v5177_v14, %v6166_v32 }
 0x992   :  { %v2810_v6 = vand.u32 2139095040, %v6170_v13  ;;  %v2807_v44 = vand.u32 2147483647, %v6170_v13  ;;  %vm2809_vm4 = vcmp.lt.s32.totalorder %v6170_v13, 0  ;;  %vm2899_vm9 = vweird.f32 %v6170_v13 }
 0x994   :  { %v2811_v42 = vshrl.u32 %v2810_v6, 23  ;;  %v2814_v5 = vand.u32 8388607, %v2807_v44  ;;  %vm2808_vm5 = vcmp.le.f32.partialorder %v2807_v44, 0.7853982  ;;  %v2918_v44 = vadd.f32 %v6160_v63, %v6117_v51 }
 0x996   :  { %v4517_v9 = vadd.s32 4294967169, %v2811_v42  ;;  %v2815_v31 = vor.u32 8388608, %v2814_v5 }
 0x998   :  { %v2817_v10 = vadd.s32 1, %v4517_v9  ;;  %v2855_v26 = vshll.u32 %v2815_v31, 8 }
 0x99a   :  { %vm2818_vm13 = vcmp.gt.s32.totalorder %v2817_v10, 0 }
 0x99b   :  { %v2819_v53 = vsel %vm2818_vm13, %v2817_v10, 0 }
 0x99c   :  { %v2821_v46 = vand.u32 31, %v2819_v53  ;;  %v2820_v22 = vshrl.u32 %v2819_v53, 5 }
 0x99e   :  { %v2822_v48 = vsub.s32 32, %v2821_v46  ;;  %v2824_v24 = vshll.u32 %v5117_v25, %v2821_v46  ;;  %v2827_v40 = vshll.u32 %v5118_v27, %v2821_v46  ;;  %v2830_v2 = vshll.u32 %v5119_v30, %v2821_v46 }
 0x99f   :  { %v2833_v56 = vshll.u32 %v5120_v33, %v2821_v46  ;;  %v2836_v35 = vshll.u32 %v5121_v36, %v2821_v46  ;;  %vm2839_vm14 = vcmp.lt.s32.totalorder %v2820_v22, 1  ;;  %vm2842_vm15 = vcmp.lt.s32.totalorder %v2820_v22, 4 }
 0x9a0   :  { %v2825_v34 = vshrl.u32 %v5118_v27, %v2822_v48  ;;  %v2828_v21 = vshrl.u32 %v5119_v30, %v2822_v48  ;;  %v2831_v54 = vshrl.u32 %v5120_v33, %v2822_v48  ;;  %v2834_v58 = vshrl.u32 %v5121_v36, %v2822_v48 }
 0x9a1   :  { %v2837_v59 = vshrl.u32 %v5122_v39, %v2822_v48  ;;  %v2823_v57 = vshrl.u32 %v5117_v25, %v2822_v48  ;;  %vm2841_vm0 = vcmp.lt.s32.totalorder %v2820_v22, 3  ;;  %vm2840_vm1 = vcmp.lt.s32.totalorder %v2820_v22, 2 }
 0x9a2   :  { %v2826_v62 = vor.u32 %v2825_v34, %v2824_v24  ;;  %v2829_v61 = vor.u32 %v2828_v21, %v2827_v40  ;;  %v2832_v29 = vor.u32 %v2831_v54, %v2830_v2  ;;  %v2835_v37 = vor.u32 %v2834_v58, %v2833_v56 }
 0x9a3   :  { %v2838_v41 = vor.u32 %v2837_v59, %v2836_v35 }
 0x9a4   :  { %v2844_v47 = vsel %vm2842_vm15, %v2832_v29, 2102212464  ;;  %v2847_v55 = vsel %vm2839_vm14, %v2826_v62, %v2829_v61  ;;  %v2851_v43 = vsel %vm2839_vm14, %v2829_v61, %v2832_v29  ;;  %v2848_v45 = vsel %vm2842_vm15, %v2835_v37, 920167782 }
 0x9a5   :  { %v2852_v7 = vsel %vm2842_vm15, %v2838_v41, 1326507024  ;;  %v2849_v11 = vsel %vm2841_vm0, %v2832_v29, %v2848_v45  ;;  %v2843_v49 = vsel %vm2839_vm14, %v2823_v57, %v2826_v62  ;;  %v2845_v19 = vsel %vm2841_vm0, %v2829_v61, %v2844_v47 }
 0x9a6   :  { %v2853_v15 = vsel %vm2841_vm0, %v2835_v37, %v2852_v7  ;;  %v2850_v50 = vsel %vm2840_vm1, %v2847_v55, %v2849_v11  ;;  %v2846_v1 = vsel %vm2840_vm1, %v2843_v49, %v2845_v19  ;;  %v2912_v62 = vsub.f32 0.0, %v6166_v32 }
 0x9a7   :  { %v2854_v20 = vsel %vm2840_vm1, %v2851_v43, %v2853_v15  ;;  %v6190_v16 = vmul.u32.u64.low %v2855_v26, %v2850_v50  ;;  %v6191_v23 = vmul.u32.u64.high %v2855_v26, %v2850_v50, %v6190_v16  ;;  %v2862_v4 = vmul.u32 %v2855_v26, %v2846_v1 }
 0x9a8   :  { %v6187_v18 = vmul.u32.u64.low %v2855_v26, %v2854_v20  ;;  %v6188_v17 = vmul.u32.u64.high %v2855_v26, %v2854_v20, %v6187_v18  ;;  %v2913_v41 = vmul.f32 1.442695, %v2912_v62 }
 0x9a9   :  { %v2865_v60 = vadd.s32 1, %v6191_v23 }
 0x9aa   :  { %vm2864_vm2 = vc.u32 %v6188_v17, %v6190_v16  ;;  %v2863_v48 = vadd.s32 %v6190_v16, %v6188_v17  ;;  %v2919_v16 = vmul.f32 3.0, %v2918_v44 }
 0x9ab   :  { %v2866_v12 = vsel %vm2864_vm2, %v2865_v60, %v6191_v23 }
 0x9ac   :  { %v2867_v38 = vadd.s32 %v2866_v12, %v2862_v4  ;;  %v2920_v60 = vadd.f32 %v2919_v16, %v6072_v52 }
 0x9ae   :  { %v2868_v3 = vadd.s32 536870912, %v2867_v38 }
 0x9b0   :  { %v2869_v28 = vshrl.u32 %v2868_v3, 30 }
 0x9b2   :  { %v2870_v6 = vshll.u32 %v2869_v28, 30  ;;  %v2893_v61 = vsub.s32 4, %v2869_v28 }
 0x9b4   :  { %v2871_v42 = vsub.s32 %v2867_v38, %v2870_v6  ;;  %v2894_v47 = vsel %vm2809_vm4, %v2893_v61, %v2869_v28 }
 0x9b5   :  { %v2896_v55 = vsel %vm2808_vm5, 0, %v2894_v47 }
 0x9b6   :  { %v2873_v9 = vsub.s32 0, %v2871_v42  ;;  %v2900_v43 = vadd.s32 3, %v2896_v55 }
 0x9b8   :  { %v4518_v10 = vmin.u32 %v2873_v9, %v2871_v42  ;;  %v2901_v57 = vand.u32 3, %v2900_v43 }
 0x9ba   :  { %v2875_v53 = vclz %v4518_v10  ;;  %vm2906_vm6 = vcmp.eq.s32.totalorder %v2901_v57, 2  ;;  %vm2903_vm7 = vcmp.eq.s32.totalorder %v2901_v57, 0  ;;  %vm2902_vm8 = vcmp.lt.s32.totalorder %v2901_v57, 2 }
 0x9bc   :  { %v4519_v46 = vadd.s32 4294967294, %v2875_v53 }
 0x9be   :  { %vm4520_vm3 = vcmp.lt.s32.totalorder %v4519_v46, 0 }
 0x9bf   :  { %v2878_v5 = vsel %vm4520_vm3, 0, %v4519_v46 }
 0x9c0   :  { %v2879_v22 = vsub.s32 32, %v2878_v5  ;;  %v2883_v24 = vsub.s32 4294967266, %v2878_v5  ;;  %v2880_v40 = vshll.u32 %v2871_v42, %v2878_v5 }
 0x9c2   :  { %v2881_v34 = vshrl.u32 %v2863_v48, %v2879_v22  ;;  %v2884_v21 = vadd.s32 127, %v2883_v24 }
 0x9c4   :  { %v2882_v2 = vor.u32 %v2881_v34, %v2880_v40  ;;  %v2885_v54 = vshll.u32 %v2884_v21, 23 }
 0x9c6   :  { %v2886_v56 = vor.u32 4788187, %v2885_v54  ;;  %v2889_v35 = vcvt.s32.f32 %v2882_v2 }
 0x9c8   :  { %v2887_v58 = vand.u32 2147483647, %v2886_v56 }
 0x9ca   :  { %v2890_v59 = vmul.f32 %v2889_v35, %v2887_v58 }
 0x9cc   :  { %v2891_v31 = vxor.u32 2147483648, %v2890_v59 }
 0x9ce   :  { %v2892_v29 = vsel %vm2809_vm4, %v2891_v31, %v2890_v59 }
 0x9cf   :  { %v2895_v37 = vsel %vm2808_vm5, %v6170_v13, %v2892_v29 }
 0x9d0   :  { %4946 = vcosq.f32 %v2895_v37 }
 0x9d1   :  { %4948 = vsinq.f32 %v2895_v37 }
 0x9d2   :  { %4950 = vpow2.f32 %v2913_v41 }
 0x9dd   :  { %v4947_v45 = vpop.eup %4946 }
 0x9de   :  { %v4949_v7 = vpop.eup %4948  ;;  %v2907_v11 = vxor.u32 2147483648, %v4947_v45 }
 0x9df   :  { %v2904_v15 = vxor.u32 2147483648, %v4949_v7  ;;  %v4951_v49 = vpop.eup %4950 }
 0x9e0   :  { %v2908_v26 = vsel %vm2906_vm6, %v2907_v11, %v4949_v7  ;;  %v2915_v17 = vadd.f32 1.0, %v4951_v49 }
 0x9e1   :  { %v2905_v19 = vsel %vm2903_vm7, %v4947_v45, %v2904_v15 }
 0x9e2   :  { %v2909_v50 = vsel %vm2902_vm8, %v2905_v19, %v2908_v26 }
 0x9e3   :  { %v2910_v20 = vsel %vm2899_vm9, nan, %v2909_v50 }
 0x9e4   :  { %v2911_v18 = vmul.f32 %v2910_v20, %v2910_v20 }
 0x9e6   :  { %v2916_v23 = vmul.f32 %v2915_v17, %v2911_v18 }
 0x9e8   :  { %v2917_v1 = vsub.f32 %v2916_v23, %v6166_v32 }
 0x9ea   :  { %v2921_v4 = vadd.f32 %v2920_v60, %v2917_v1 }
 0x9ec   :  { %v2922_v12 = vmul.f32 0.013888889, %v2921_v4 }
 0x9ee   :  { %v6208_v38 = vadd.f32 %v2922_v12, %v6034_v8 }
 0x9f0   :  { %v6212_v51 = vadd.f32 %v5177_v14, %v6208_v38 }
 0x9f2   :  { %v2928_v63 = vand.u32 2139095040, %v6212_v51  ;;  %v2925_v6 = vand.u32 2147483647, %v6212_v51  ;;  %vm2927_vm1 = vcmp.lt.s32.totalorder %v6212_v51, 0  ;;  %vm3017_vm6 = vweird.f32 %v6212_v51 }
 0x9f4   :  { %v2929_v13 = vshrl.u32 %v2928_v63, 23  ;;  %v2932_v52 = vand.u32 8388607, %v2925_v6  ;;  %vm2926_vm2 = vcmp.le.f32.partialorder %v2925_v6, 0.7853982 }
 0x9f6   :  { %v4521_v3 = vadd.s32 4294967169, %v2929_v13  ;;  %v2933_v2 = vor.u32 8388608, %v2932_v52 }
 0x9f8   :  { %v2935_v28 = vadd.s32 1, %v4521_v3  ;;  %v2973_v43 = vshll.u32 %v2933_v2, 8 }
 0x9fa   :  { %vm2936_vm10 = vcmp.gt.s32.totalorder %v2935_v28, 0 }
 0x9fb   :  { %v2937_v32 = vsel %vm2936_vm10, %v2935_v28, 0 }
 0x9fc   :  { %v2939_v42 = vand.u32 31, %v2937_v32  ;;  %v2938_v8 = vshrl.u32 %v2937_v32, 5 }
 0x9fe   :  { %v2940_v9 = vsub.s32 32, %v2939_v42  ;;  %v2942_v10 = vshll.u32 %v5117_v25, %v2939_v42  ;;  %v2945_v53 = vshll.u32 %v5118_v27, %v2939_v42  ;;  %v2948_v48 = vshll.u32 %v5119_v30, %v2939_v42 }
 0x9ff   :  { %v2951_v24 = vshll.u32 %v5120_v33, %v2939_v42  ;;  %v2954_v34 = vshll.u32 %v5121_v36, %v2939_v42  ;;  %vm2957_vm11 = vcmp.lt.s32.totalorder %v2938_v8, 1  ;;  %vm2960_vm12 = vcmp.lt.s32.totalorder %v2938_v8, 4 }
 0xa00   :  { %v2943_v46 = vshrl.u32 %v5118_v27, %v2940_v9  ;;  %v2946_v5 = vshrl.u32 %v5119_v30, %v2940_v9  ;;  %v2949_v22 = vshrl.u32 %v5120_v33, %v2940_v9  ;;  %v2952_v40 = vshrl.u32 %v5121_v36, %v2940_v9 }
 0xa01   :  { %v2955_v21 = vshrl.u32 %v5122_v39, %v2940_v9  ;;  %v2941_v29 = vshrl.u32 %v5117_v25, %v2940_v9  ;;  %vm2959_vm13 = vcmp.lt.s32.totalorder %v2938_v8, 3  ;;  %vm2958_vm14 = vcmp.lt.s32.totalorder %v2938_v8, 2 }
 0xa02   :  { %v2944_v54 = vor.u32 %v2943_v46, %v2942_v10  ;;  %v2947_v56 = vor.u32 %v2946_v5, %v2945_v53  ;;  %v2950_v58 = vor.u32 %v2949_v22, %v2948_v48  ;;  %v2953_v35 = vor.u32 %v2952_v40, %v2951_v24 }
 0xa03   :  { %v2956_v59 = vor.u32 %v2955_v21, %v2954_v34  ;;  %v3030_v40 = vsub.f32 0.0, %v6208_v38 }
 0xa04   :  { %v2962_v31 = vsel %vm2960_vm12, %v2950_v58, 2102212464  ;;  %v2965_v62 = vsel %vm2957_vm11, %v2944_v54, %v2947_v56  ;;  %v2969_v61 = vsel %vm2957_vm11, %v2947_v56, %v2950_v58  ;;  %v2966_v37 = vsel %vm2960_vm12, %v2953_v35, 920167782 }
 0xa05   :  { %v2970_v41 = vsel %vm2960_vm12, %v2956_v59, 1326507024  ;;  %v2967_v47 = vsel %vm2959_vm13, %v2950_v58, %v2966_v37  ;;  %v2961_v57 = vsel %vm2957_vm11, %v2941_v29, %v2944_v54  ;;  %v2963_v45 = vsel %vm2959_vm13, %v2947_v56, %v2962_v31 }
 0xa06   :  { %v2971_v55 = vsel %vm2959_vm13, %v2953_v35, %v2970_v41  ;;  %v2968_v7 = vsel %vm2958_vm14, %v2965_v62, %v2967_v47  ;;  %v2964_v19 = vsel %vm2958_vm14, %v2961_v57, %v2963_v45  ;;  %v3031_v54 = vmul.f32 1.442695, %v3030_v40 }
 0xa07   :  { %v2972_v11 = vsel %vm2958_vm14, %v2969_v61, %v2971_v55  ;;  %v6232_v44 = vmul.u32.u64.low %v2973_v43, %v2968_v7  ;;  %v6233_v49 = vmul.u32.u64.high %v2973_v43, %v2968_v7, %v6232_v44  ;;  %v2980_v20 = vmul.u32 %v2973_v43, %v2964_v19 }
 0xa08   :  { %v6229_v15 = vmul.u32.u64.low %v2973_v43, %v2972_v11  ;;  %v6230_v26 = vmul.u32.u64.high %v2973_v43, %v2972_v11, %v6229_v15 }
 0xa09   :  { %v2983_v50 = vadd.s32 1, %v6233_v49 }
 0xa0a   :  { %vm2982_vm15 = vc.u32 %v6230_v26, %v6232_v44  ;;  %v2981_v28 = vadd.s32 %v6232_v44, %v6230_v26 }
 0xa0b   :  { %v2984_v18 = vsel %vm2982_vm15, %v2983_v50, %v6233_v49 }
 0xa0c   :  { %v2985_v17 = vadd.s32 %v2984_v18, %v2980_v20 }
 0xa0e   :  { %v2986_v16 = vadd.s32 536870912, %v2985_v17 }
 0xa10   :  { %v2987_v23 = vshrl.u32 %v2986_v16, 30 }
 0xa12   :  { %v2988_v1 = vshll.u32 %v2987_v23, 30  ;;  %v3011_v34 = vsub.s32 4, %v2987_v23 }
 0xa14   :  { %v2989_v60 = vsub.s32 %v2985_v17, %v2988_v1  ;;  %v3012_v56 = vsel %vm2927_vm1, %v3011_v34, %v2987_v23 }
 0xa15   :  { %v3014_v58 = vsel %vm2926_vm2, 0, %v3012_v56 }
 0xa16   :  { %v2991_v4 = vsub.s32 0, %v2989_v60  ;;  %v3018_v35 = vadd.s32 3, %v3014_v58 }
 0xa18   :  { %v4522_v12 = vmin.u32 %v2991_v4, %v2989_v60  ;;  %v3019_v59 = vand.u32 3, %v3018_v35 }
 0xa1a   :  { %v2993_v63 = vclz %v4522_v12  ;;  %vm3024_vm3 = vcmp.eq.s32.totalorder %v3019_v59, 2  ;;  %vm3021_vm4 = vcmp.eq.s32.totalorder %v3019_v59, 0  ;;  %vm3020_vm5 = vcmp.lt.s32.totalorder %v3019_v59, 2 }
 0xa1c   :  { %v4523_v13 = vadd.s32 4294967294, %v2993_v63 }
 0xa1e   :  { %vm4524_vm0 = vcmp.lt.s32.totalorder %v4523_v13, 0 }
 0xa1f   :  { %v2996_v3 = vsel %vm4524_vm0, 0, %v4523_v13 }
 0xa20   :  { %v2997_v32 = vsub.s32 32, %v2996_v3  ;;  %v3001_v42 = vsub.s32 4294967266, %v2996_v3  ;;  %v2998_v52 = vshll.u32 %v2989_v60, %v2996_v3 }
 0xa22   :  { %v2999_v9 = vshrl.u32 %v2981_v28, %v2997_v32  ;;  %v3002_v8 = vadd.s32 127, %v3001_v42 }
 0xa24   :  { %v3000_v10 = vor.u32 %v2999_v9, %v2998_v52  ;;  %v3003_v53 = vshll.u32 %v3002_v8, 23 }
 0xa26   :  { %v3004_v46 = vor.u32 4788187, %v3003_v53  ;;  %v3007_v48 = vcvt.s32.f32 %v3000_v10 }
 0xa28   :  { %v3005_v5 = vand.u32 2147483647, %v3004_v46 }
 0xa2a   :  { %v3008_v22 = vmul.f32 %v3007_v48, %v3005_v5 }
 0xa2c   :  { %v3009_v24 = vxor.u32 2147483648, %v3008_v22 }
 0xa2e   :  { %v3010_v21 = vsel %vm2927_vm1, %v3009_v24, %v3008_v22 }
 0xa2f   :  { %v3013_v2 = vsel %vm2926_vm2, %v6212_v51, %v3010_v21 }
 0xa30   :  { %4952 = vcosq.f32 %v3013_v2 }
 0xa31   :  { %4954 = vsinq.f32 %v3013_v2 }
 0xa32   :  { %4956 = vpow2.f32 %v3031_v54 }
 0xa3d   :  { %v4953_v31 = vpop.eup %4952 }
 0xa3e   :  { %v4955_v62 = vpop.eup %4954  ;;  %v3025_v61 = vxor.u32 2147483648, %v4953_v31 }
 0xa3f   :  { %v3022_v29 = vxor.u32 2147483648, %v4955_v62  ;;  %v4957_v41 = vpop.eup %4956 }
 0xa40   :  { %v3026_v37 = vsel %vm3024_vm3, %v3025_v61, %v4955_v62  ;;  %v3033_v57 = vadd.f32 1.0, %v4957_v41 }
 0xa41   :  { %v3023_v6 = vsel %vm3021_vm4, %v4953_v31, %v3022_v29 }
 0xa42   :  { %v3027_v47 = vsel %vm3020_vm5, %v3023_v6, %v3026_v37 }
 0xa43   :  { %v3028_v55 = vsel %vm3017_vm6, nan, %v3027_v47 }
 0xa44   :  { %v3029_v43 = vmul.f32 %v3028_v55, %v3028_v55 }
 0xa46   :  { %v3034_v45 = vmul.f32 %v3033_v57, %v3029_v43 }
 0xa48   :  { %v6246_v7 = vsub.f32 %v3034_v45, %v6208_v38 }
 0xa4a   :  { %v6249_v11 = vmul.f32 0.037037037, %v6246_v7 }
 0xa4c   :  { %v6253_v15 = vadd.f32 %v6249_v11, %v6208_v38 }
 0xa4e   :  { %v6257_v26 = vadd.f32 %v5177_v14, %v6253_v15 }
 0xa50   :  { %v3042_v51 = vand.u32 2139095040, %v6257_v26  ;;  %v3039_v50 = vand.u32 2147483647, %v6257_v26  ;;  %vm3041_vm14 = vcmp.lt.s32.totalorder %v6257_v26, 0  ;;  %vm3131_vm3 = vweird.f32 %v6257_v26 }
 0xa52   :  { %v3043_v44 = vshrl.u32 %v3042_v51, 23  ;;  %v3046_v17 = vand.u32 8388607, %v3039_v50  ;;  %vm3040_vm15 = vcmp.le.f32.partialorder %v3039_v50, 0.7853982 }
 0xa54   :  { %v4525_v49 = vadd.s32 4294967169, %v3043_v44  ;;  %v3047_v52 = vor.u32 8388608, %v3046_v17 }
 0xa56   :  { %v3049_v19 = vadd.s32 1, %v4525_v49  ;;  %v3087_v54 = vshll.u32 %v3047_v52, 8  ;;  %v3144_v52 = vsub.f32 0.0, %v6253_v15 }
 0xa58   :  { %vm3050_vm7 = vcmp.gt.s32.totalorder %v3049_v19, 0 }
 0xa59   :  { %v3051_v20 = vsel %vm3050_vm7, %v3049_v19, 0 }
 0xa5a   :  { %v3053_v18 = vand.u32 31, %v3051_v20  ;;  %v3052_v23 = vshrl.u32 %v3051_v20, 5 }
 0xa5c   :  { %v3054_v16 = vsub.s32 32, %v3053_v18  ;;  %v3056_v1 = vshll.u32 %v5117_v25, %v3053_v18  ;;  %v3059_v60 = vshll.u32 %v5118_v27, %v3053_v18  ;;  %v3062_v63 = vshll.u32 %v5119_v30, %v3053_v18 }
 0xa5d   :  { %v3065_v3 = vshll.u32 %v5120_v33, %v3053_v18  ;;  %v3068_v32 = vshll.u32 %v5121_v36, %v3053_v18  ;;  %vm3071_vm8 = vcmp.lt.s32.totalorder %v3052_v23, 1  ;;  %vm3074_vm9 = vcmp.lt.s32.totalorder %v3052_v23, 4 }
 0xa5e   :  { %v3057_v4 = vshrl.u32 %v5118_v27, %v3054_v16  ;;  %v3060_v12 = vshrl.u32 %v5119_v30, %v3054_v16  ;;  %v3063_v13 = vshrl.u32 %v5120_v33, %v3054_v16  ;;  %v3066_v28 = vshrl.u32 %v5121_v36, %v3054_v16 }
 0xa5f   :  { %v3069_v42 = vshrl.u32 %v5122_v39, %v3054_v16  ;;  %v3055_v24 = vshrl.u32 %v5117_v25, %v3054_v16  ;;  %vm3073_vm10 = vcmp.lt.s32.totalorder %v3052_v23, 3  ;;  %vm3072_vm11 = vcmp.lt.s32.totalorder %v3052_v23, 2 }
 0xa60   :  { %v3058_v9 = vor.u32 %v3057_v4, %v3056_v1  ;;  %v3061_v8 = vor.u32 %v3060_v12, %v3059_v60  ;;  %v3064_v10 = vor.u32 %v3063_v13, %v3062_v63  ;;  %v3067_v53 = vor.u32 %v3066_v28, %v3065_v3 }
 0xa61   :  { %v3070_v46 = vor.u32 %v3069_v42, %v3068_v32 }
 0xa62   :  { %v3076_v5 = vsel %vm3074_vm9, %v3064_v10, 2102212464  ;;  %v3079_v48 = vsel %vm3071_vm8, %v3058_v9, %v3061_v8  ;;  %v3083_v22 = vsel %vm3071_vm8, %v3061_v8, %v3064_v10  ;;  %v3080_v40 = vsel %vm3074_vm9, %v3067_v53, 920167782 }
 0xa63   :  { %v3084_v34 = vsel %vm3074_vm9, %v3070_v46, 1326507024  ;;  %v3081_v21 = vsel %vm3073_vm10, %v3064_v10, %v3080_v40  ;;  %v3075_v56 = vsel %vm3071_vm8, %v3055_v24, %v3058_v9  ;;  %v3077_v58 = vsel %vm3073_vm10, %v3061_v8, %v3076_v5 }
 0xa64   :  { %v3085_v2 = vsel %vm3073_vm10, %v3067_v53, %v3084_v34  ;;  %v3082_v35 = vsel %vm3072_vm11, %v3079_v48, %v3081_v21  ;;  %v3078_v37 = vsel %vm3072_vm11, %v3075_v56, %v3077_v58  ;;  %v3145_v53 = vmul.f32 1.442695, %v3144_v52 }
 0xa65   :  { %v3086_v59 = vsel %vm3072_vm11, %v3083_v22, %v3085_v2  ;;  %v6277_v61 = vmul.u32.u64.low %v3087_v54, %v3082_v35  ;;  %v6278_v29 = vmul.u32.u64.high %v3087_v54, %v3082_v35, %v6277_v61  ;;  %v3094_v6 = vmul.u32 %v3087_v54, %v3078_v37 }
 0xa66   :  { %v6274_v31 = vmul.u32.u64.low %v3087_v54, %v3086_v59  ;;  %v6275_v62 = vmul.u32.u64.high %v3087_v54, %v3086_v59, %v6274_v31 }
 0xa67   :  { %v3097_v41 = vadd.s32 1, %v6278_v29 }
 0xa68   :  { %vm3096_vm12 = vc.u32 %v6275_v62, %v6277_v61  ;;  %v3095_v17 = vadd.s32 %v6277_v61, %v6275_v62 }
 0xa69   :  { %v3098_v47 = vsel %vm3096_vm12, %v3097_v41, %v6278_v29 }
 0xa6a   :  { %v3099_v55 = vadd.s32 %v3098_v47, %v3094_v6 }
 0xa6c   :  { %v3100_v43 = vadd.s32 536870912, %v3099_v55 }
 0xa6e   :  { %v3101_v57 = vshrl.u32 %v3100_v43, 30 }
 0xa70   :  { %v3102_v45 = vshll.u32 %v3101_v57, 30  ;;  %v3125_v9 = vsub.s32 4, %v3101_v57 }
 0xa72   :  { %v3103_v51 = vsub.s32 %v3099_v55, %v3102_v45  ;;  %v3126_v46 = vsel %vm3041_vm14, %v3125_v9, %v3101_v57 }
 0xa73   :  { %v3128_v5 = vsel %vm3040_vm15, 0, %v3126_v46 }
 0xa74   :  { %v3105_v44 = vsub.s32 0, %v3103_v51  ;;  %v3132_v48 = vadd.s32 3, %v3128_v5 }
 0xa76   :  { %v4526_v49 = vmin.u32 %v3105_v44, %v3103_v51  ;;  %v3133_v22 = vand.u32 3, %v3132_v48 }
 0xa78   :  { %v3107_v19 = vclz %v4526_v49  ;;  %vm3138_vm0 = vcmp.eq.s32.totalorder %v3133_v22, 2  ;;  %vm3135_vm1 = vcmp.eq.s32.totalorder %v3133_v22, 0  ;;  %vm3134_vm2 = vcmp.lt.s32.totalorder %v3133_v22, 2 }
 0xa7a   :  { %v4527_v20 = vadd.s32 4294967294, %v3107_v19 }
 0xa7c   :  { %vm4528_vm13 = vcmp.lt.s32.totalorder %v4527_v20, 0 }
 0xa7d   :  { %v3110_v18 = vsel %vm4528_vm13, 0, %v4527_v20 }
 0xa7e   :  { %v3111_v16 = vsub.s32 32, %v3110_v18  ;;  %v3115_v23 = vsub.s32 4294967266, %v3110_v18  ;;  %v3112_v1 = vshll.u32 %v3103_v51, %v3110_v18 }
 0xa80   :  { %v3113_v60 = vshrl.u32 %v3095_v17, %v3111_v16  ;;  %v3116_v4 = vadd.s32 127, %v3115_v23 }
 0xa82   :  { %v3114_v12 = vor.u32 %v3113_v60, %v3112_v1  ;;  %v3117_v63 = vshll.u32 %v3116_v4, 23 }
 0xa84   :  { %v3118_v13 = vor.u32 4788187, %v3117_v63  ;;  %v3121_v28 = vcvt.s32.f32 %v3114_v12 }
 0xa86   :  { %v3119_v3 = vand.u32 2147483647, %v3118_v13 }
 0xa88   :  { %v3122_v32 = vmul.f32 %v3121_v28, %v3119_v3 }
 0xa8a   :  { %v3123_v42 = vxor.u32 2147483648, %v3122_v32 }
 0xa8c   :  { %v3124_v8 = vsel %vm3041_vm14, %v3123_v42, %v3122_v32 }
 0xa8d   :  { %v3127_v10 = vsel %vm3040_vm15, %v6257_v26, %v3124_v8 }
 0xa8e   :  { %4958 = vcosq.f32 %v3127_v10 }
 0xa8f   :  { %4960 = vsinq.f32 %v3127_v10 }
 0xa90   :  { %4962 = vpow2.f32 %v3145_v53 }
 0xa9b   :  { %v4959_v24 = vpop.eup %4958 }
 0xa9c   :  { %v4961_v40 = vpop.eup %4960  ;;  %v3139_v34 = vxor.u32 2147483648, %v4959_v24 }
 0xa9d   :  { %v3136_v21 = vxor.u32 2147483648, %v4961_v40  ;;  %v4963_v54 = vpop.eup %4962 }
 0xa9e   :  { %v3140_v2 = vsel %vm3138_vm0, %v3139_v34, %v4961_v40  ;;  %v3147_v59 = vadd.f32 1.0, %v4963_v54 }
 0xa9f   :  { %v3137_v50 = vsel %vm3135_vm1, %v4959_v24, %v3136_v21 }
 0xaa0   :  { %v3141_v56 = vsel %vm3134_vm2, %v3137_v50, %v3140_v2 }
 0xaa1   :  { %v3142_v58 = vsel %vm3131_vm3, nan, %v3141_v56 }
 0xaa2   :  { %v3143_v35 = vmul.f32 %v3142_v58, %v3142_v58 }
 0xaa4   :  { %v3148_v31 = vmul.f32 %v3147_v59, %v3143_v35 }
 0xaa6   :  { %v6291_v62 = vsub.f32 %v3148_v31, %v6253_v15 }
 0xaa8   :  { %v3150_v61 = vmul.f32 0.11111111, %v6291_v62 }
 0xaaa   :  { %v3151_v29 = vadd.f32 %v3150_v61, %v6208_v38 }
 0xaac   :  { %v6296_v37 = vsub.f32 %v3151_v29, %v6249_v11 }
 0xaae   :  { %v6300_v41 = vadd.f32 %v5177_v14, %v6296_v37 }
 0xab0   :  { %v3157_v26 = vand.u32 2139095040, %v6300_v41  ;;  %v3154_v43 = vand.u32 2147483647, %v6300_v41  ;;  %vm3156_vm11 = vcmp.lt.s32.totalorder %v6300_v41, 0  ;;  %vm3246_vm0 = vweird.f32 %v6300_v41 }
 0xab2   :  { %v3158_v6 = vshrl.u32 %v3157_v26, 23  ;;  %v3161_v45 = vand.u32 8388607, %v3154_v43  ;;  %vm3155_vm12 = vcmp.le.f32.partialorder %v3154_v43, 0.7853982 }
 0xab4   :  { %v4529_v47 = vadd.s32 4294967169, %v3158_v6  ;;  %v3162_v4 = vor.u32 8388608, %v3161_v45 }
 0xab6   :  { %v3164_v55 = vadd.s32 1, %v4529_v47  ;;  %v3202_v5 = vshll.u32 %v3162_v4, 8  ;;  %v3259_v4 = vsub.f32 0.0, %v6296_v37 }
 0xab8   :  { %vm3165_vm4 = vcmp.gt.s32.totalorder %v3164_v55, 0 }
 0xab9   :  { %v3166_v15 = vsel %vm3165_vm4, %v3164_v55, 0 }
 0xaba   :  { %v3168_v57 = vand.u32 31, %v3166_v15  ;;  %v3167_v11 = vshrl.u32 %v3166_v15, 5 }
 0xabc   :  { %v3169_v51 = vsub.s32 32, %v3168_v57  ;;  %v3171_v44 = vshll.u32 %v5117_v25, %v3168_v57  ;;  %v3174_v49 = vshll.u32 %v5118_v27, %v3168_v57  ;;  %v3177_v18 = vshll.u32 %v5119_v30, %v3168_v57 }
 0xabd   :  { %v3180_v16 = vshll.u32 %v5120_v33, %v3168_v57  ;;  %v3183_v1 = vshll.u32 %v5121_v36, %v3168_v57  ;;  %vm3186_vm5 = vcmp.lt.s32.totalorder %v3167_v11, 1  ;;  %vm3189_vm6 = vcmp.lt.s32.totalorder %v3167_v11, 4 }
 0xabe   :  { %v3172_v19 = vshrl.u32 %v5118_v27, %v3169_v51  ;;  %v3175_v20 = vshrl.u32 %v5119_v30, %v3169_v51  ;;  %v3178_v17 = vshrl.u32 %v5120_v33, %v3169_v51  ;;  %v3181_v23 = vshrl.u32 %v5121_v36, %v3169_v51 }
 0xabf   :  { %v3184_v60 = vshrl.u32 %v5122_v39, %v3169_v51  ;;  %v3170_v9 = vshrl.u32 %v5117_v25, %v3169_v51  ;;  %vm3188_vm7 = vcmp.lt.s32.totalorder %v3167_v11, 3  ;;  %vm3187_vm8 = vcmp.lt.s32.totalorder %v3167_v11, 2 }
 0xac0   :  { %v3173_v12 = vor.u32 %v3172_v19, %v3171_v44  ;;  %v3176_v63 = vor.u32 %v3175_v20, %v3174_v49  ;;  %v3179_v13 = vor.u32 %v3178_v17, %v3177_v18  ;;  %v3182_v3 = vor.u32 %v3181_v23, %v3180_v16 }
 0xac1   :  { %v3185_v28 = vor.u32 %v3184_v60, %v3183_v1 }
 0xac2   :  { %v3191_v32 = vsel %vm3189_vm6, %v3179_v13, 2102212464  ;;  %v3194_v42 = vsel %vm3186_vm5, %v3173_v12, %v3176_v63  ;;  %v3198_v52 = vsel %vm3186_vm5, %v3176_v63, %v3179_v13  ;;  %v3195_v8 = vsel %vm3189_vm6, %v3182_v3, 920167782 }
 0xac3   :  { %v3199_v10 = vsel %vm3189_vm6, %v3185_v28, 1326507024  ;;  %v3196_v53 = vsel %vm3188_vm7, %v3179_v13, %v3195_v8  ;;  %v3190_v48 = vsel %vm3186_vm5, %v3170_v9, %v3173_v12  ;;  %v3192_v22 = vsel %vm3188_vm7, %v3176_v63, %v3191_v32 }
 0xac4   :  { %v3200_v46 = vsel %vm3188_vm7, %v3182_v3, %v3199_v10  ;;  %v3197_v24 = vsel %vm3187_vm8, %v3194_v42, %v3196_v53  ;;  %v3193_v50 = vsel %vm3187_vm8, %v3190_v48, %v3192_v22  ;;  %v3260_v3 = vmul.f32 1.442695, %v3259_v4 }
 0xac5   :  { %v3201_v40 = vsel %vm3187_vm8, %v3198_v52, %v3200_v46  ;;  %v6320_v2 = vmul.u32.u64.low %v3202_v5, %v3197_v24  ;;  %v6321_v54 = vmul.u32.u64.high %v3202_v5, %v3197_v24, %v6320_v2  ;;  %v3209_v58 = vmul.u32 %v3202_v5, %v3193_v50 }
 0xac6   :  { %v6317_v34 = vmul.u32.u64.low %v3202_v5, %v3201_v40  ;;  %v6318_v21 = vmul.u32.u64.high %v3202_v5, %v3201_v40, %v6317_v34 }
 0xac7   :  { %v3212_v56 = vadd.s32 1, %v6321_v54 }
 0xac8   :  { %vm3211_vm9 = vc.u32 %v6318_v21, %v6320_v2  ;;  %v3210_v45 = vadd.s32 %v6320_v2, %v6318_v21  ;;  %v3265_v2 = vsub.f32 %v6246_v7, %v6291_v62 }
 0xac9   :  { %v3213_v35 = vsel %vm3211_vm9, %v3212_v56, %v6321_v54 }
 0xaca   :  { %v3214_v59 = vadd.s32 %v3213_v35, %v3209_v58 }
 0xacc   :  { %v3215_v31 = vadd.s32 536870912, %v3214_v59 }
 0xace   :  { %v3216_v61 = vshrl.u32 %v3215_v31, 30 }
 0xad0   :  { %v3217_v29 = vshll.u32 %v3216_v61, 30  ;;  %v3240_v12 = vsub.s32 4, %v3216_v61 }
 0xad2   :  { %v3218_v26 = vsub.s32 %v3214_v59, %v3217_v29  ;;  %v3241_v28 = vsel %vm3156_vm11, %v3240_v12, %v3216_v61 }
 0xad3   :  { %v3243_v32 = vsel %vm3155_vm12, 0, %v3241_v28 }
 0xad4   :  { %v3220_v6 = vsub.s32 0, %v3218_v26  ;;  %v3247_v42 = vadd.s32 3, %v3243_v32 }
 0xad6   :  { %v4530_v47 = vmin.u32 %v3220_v6, %v3218_v26  ;;  %v3248_v52 = vand.u32 3, %v3247_v42 }
 0xad8   :  { %v3222_v55 = vclz %v4530_v47  ;;  %vm3253_vm13 = vcmp.eq.s32.totalorder %v3248_v52, 2  ;;  %vm3250_vm14 = vcmp.eq.s32.totalorder %v3248_v52, 0  ;;  %vm3249_vm15 = vcmp.lt.s32.totalorder %v3248_v52, 2 }
 0xada   :  { %v4531_v15 = vadd.s32 4294967294, %v3222_v55 }
 0xadc   :  { %vm4532_vm10 = vcmp.lt.s32.totalorder %v4531_v15, 0 }
 0xadd   :  { %v3225_v57 = vsel %vm4532_vm10, 0, %v4531_v15 }
 0xade   :  { %v3226_v51 = vsub.s32 32, %v3225_v57  ;;  %v3230_v11 = vsub.s32 4294967266, %v3225_v57  ;;  %v3227_v44 = vshll.u32 %v3218_v26, %v3225_v57 }
 0xae0   :  { %v3228_v49 = vshrl.u32 %v3210_v45, %v3226_v51  ;;  %v3231_v19 = vadd.s32 127, %v3230_v11 }
 0xae2   :  { %v3229_v20 = vor.u32 %v3228_v49, %v3227_v44  ;;  %v3232_v18 = vshll.u32 %v3231_v19, 23 }
 0xae4   :  { %v3233_v17 = vor.u32 4788187, %v3232_v18  ;;  %v3236_v23 = vcvt.s32.f32 %v3229_v20 }
 0xae6   :  { %v3234_v16 = vand.u32 2147483647, %v3233_v17 }
 0xae8   :  { %v3237_v1 = vmul.f32 %v3236_v23, %v3234_v16 }
 0xaea   :  { %v3238_v60 = vxor.u32 2147483648, %v3237_v1 }
 0xaec   :  { %v3239_v63 = vsel %vm3156_vm11, %v3238_v60, %v3237_v1 }
 0xaed   :  { %v3242_v13 = vsel %vm3155_vm12, %v6300_v41, %v3239_v63 }
 0xaee   :  { %4964 = vcosq.f32 %v3242_v13 }
 0xaef   :  { %4966 = vsinq.f32 %v3242_v13 }
 0xaf0   :  { %4968 = vpow2.f32 %v3260_v3 }
 0xafb   :  { %v4965_v9 = vpop.eup %4964 }
 0xafc   :  { %v4967_v8 = vpop.eup %4966  ;;  %v3254_v10 = vxor.u32 2147483648, %v4965_v9 }
 0xafd   :  { %v3251_v53 = vxor.u32 2147483648, %v4967_v8  ;;  %v4969_v5 = vpop.eup %4968 }
 0xafe   :  { %v3255_v46 = vsel %vm3253_vm13, %v3254_v10, %v4967_v8  ;;  %v3262_v40 = vadd.f32 1.0, %v4969_v5 }
 0xaff   :  { %v3252_v43 = vsel %vm3250_vm14, %v4965_v9, %v3251_v53 }
 0xb00   :  { %v3256_v48 = vsel %vm3249_vm15, %v3252_v43, %v3255_v46 }
 0xb01   :  { %v3257_v22 = vsel %vm3246_vm0, nan, %v3256_v48 }
 0xb02   :  { %v3258_v24 = vmul.f32 %v3257_v22, %v3257_v22 }
 0xb04   :  { %v3263_v34 = vmul.f32 %v3262_v40, %v3258_v24 }
 0xb06   :  { %v6334_v21 = vsub.f32 %v3263_v34, %v6296_v37 }
 0xb08   :  { %v3266_v54 = vadd.f32 %v3265_v2, %v6334_v21 }
 0xb0a   :  { %v3267_v50 = vmul.f32 0.11111111, %v3266_v54 }
 0xb0c   :  { %v6340_v56 = vadd.f32 %v3267_v50, %v6208_v38 }
 0xb0e   :  { %v6344_v41 = vadd.f32 %v5177_v14, %v6340_v56 }
 0xb10   :  { %v3273_v58 = vand.u32 2139095040, %v6344_v41  ;;  %v3270_v37 = vand.u32 2147483647, %v6344_v41  ;;  %vm3272_vm8 = vcmp.lt.s32.totalorder %v6344_v41, 0  ;;  %vm3362_vm13 = vweird.f32 %v6344_v41 }
 0xb12   :  { %v3274_v35 = vshrl.u32 %v3273_v58, 23  ;;  %v3277_v26 = vand.u32 8388607, %v3270_v37  ;;  %vm3271_vm9 = vcmp.le.f32.partialorder %v3270_v37, 0.7853982  ;;  %v3381_v37 = vadd.f32 %v6334_v21, %v6291_v62 }
 0xb14   :  { %v4533_v59 = vadd.s32 4294967169, %v3274_v35  ;;  %v3278_v18 = vor.u32 8388608, %v3277_v26 }
 0xb16   :  { %v3280_v31 = vadd.s32 1, %v4533_v59  ;;  %v3318_v52 = vshll.u32 %v3278_v18, 8 }
 0xb18   :  { %vm3281_vm1 = vcmp.gt.s32.totalorder %v3280_v31, 0 }
 0xb19   :  { %v3282_v61 = vsel %vm3281_vm1, %v3280_v31, 0 }
 0xb1a   :  { %v3284_v29 = vand.u32 31, %v3282_v61  ;;  %v3283_v47 = vshrl.u32 %v3282_v61, 5 }
 0xb1c   :  { %v3285_v6 = vsub.s32 32, %v3284_v29  ;;  %v3287_v55 = vshll.u32 %v5117_v25, %v3284_v29  ;;  %v3290_v15 = vshll.u32 %v5118_v27, %v3284_v29  ;;  %v3293_v51 = vshll.u32 %v5119_v30, %v3284_v29 }
 0xb1d   :  { %v3296_v44 = vshll.u32 %v5120_v33, %v3284_v29  ;;  %v3299_v19 = vshll.u32 %v5121_v36, %v3284_v29  ;;  %vm3302_vm2 = vcmp.lt.s32.totalorder %v3283_v47, 1  ;;  %vm3305_vm3 = vcmp.lt.s32.totalorder %v3283_v47, 4 }
 0xb1e   :  { %v3288_v57 = vshrl.u32 %v5118_v27, %v3285_v6  ;;  %v3291_v45 = vshrl.u32 %v5119_v30, %v3285_v6  ;;  %v3294_v11 = vshrl.u32 %v5120_v33, %v3285_v6  ;;  %v3297_v49 = vshrl.u32 %v5121_v36, %v3285_v6 }
 0xb1f   :  { %v3300_v20 = vshrl.u32 %v5122_v39, %v3285_v6  ;;  %v3286_v13 = vshrl.u32 %v5117_v25, %v3285_v6  ;;  %vm3304_vm4 = vcmp.lt.s32.totalorder %v3283_v47, 3  ;;  %vm3303_vm5 = vcmp.lt.s32.totalorder %v3283_v47, 2 }
 0xb20   :  { %v3289_v17 = vor.u32 %v3288_v57, %v3287_v55  ;;  %v3292_v16 = vor.u32 %v3291_v45, %v3290_v15  ;;  %v3295_v23 = vor.u32 %v3294_v11, %v3293_v51  ;;  %v3298_v1 = vor.u32 %v3297_v49, %v3296_v44 }
 0xb21   :  { %v3301_v60 = vor.u32 %v3300_v20, %v3299_v19 }
 0xb22   :  { %v3307_v4 = vsel %vm3305_vm3, %v3295_v23, 2102212464  ;;  %v3310_v12 = vsel %vm3302_vm2, %v3289_v17, %v3292_v16  ;;  %v3314_v63 = vsel %vm3302_vm2, %v3292_v16, %v3295_v23  ;;  %v3311_v3 = vsel %vm3305_vm3, %v3298_v1, 920167782 }
 0xb23   :  { %v3315_v28 = vsel %vm3305_vm3, %v3301_v60, 1326507024  ;;  %v3312_v32 = vsel %vm3304_vm4, %v3295_v23, %v3311_v3  ;;  %v3306_v9 = vsel %vm3302_vm2, %v3286_v13, %v3289_v17  ;;  %v3308_v8 = vsel %vm3304_vm4, %v3292_v16, %v3307_v4 }
 0xb24   :  { %v3316_v42 = vsel %vm3304_vm4, %v3298_v1, %v3315_v28  ;;  %v3313_v10 = vsel %vm3303_vm5, %v3310_v12, %v3312_v32  ;;  %v3309_v22 = vsel %vm3303_vm5, %v3306_v9, %v3308_v8  ;;  %v3375_v17 = vsub.f32 0.0, %v6340_v56 }
 0xb25   :  { %v3317_v53 = vsel %vm3303_vm5, %v3314_v63, %v3316_v42  ;;  %v6364_v43 = vmul.u32.u64.low %v3318_v52, %v3313_v10  ;;  %v6365_v48 = vmul.u32.u64.high %v3318_v52, %v3313_v10, %v6364_v43  ;;  %v3325_v40 = vmul.u32 %v3318_v52, %v3309_v22 }
 0xb26   :  { %v6361_v46 = vmul.u32.u64.low %v3318_v52, %v3317_v53  ;;  %v6362_v5 = vmul.u32.u64.high %v3318_v52, %v3317_v53, %v6361_v46  ;;  %v3376_v60 = vmul.f32 1.442695, %v3375_v17 }
 0xb27   :  { %v3328_v24 = vadd.s32 1, %v6365_v48 }
 0xb28   :  { %vm3327_vm6 = vc.u32 %v6362_v5, %v6364_v43  ;;  %v3326_v6 = vadd.s32 %v6364_v43, %v6362_v5  ;;  %v3382_v43 = vmul.f32 3.0, %v3381_v37 }
 0xb29   :  { %v3329_v34 = vsel %vm3327_vm6, %v3328_v24, %v6365_v48 }
 0xb2a   :  { %v3330_v2 = vadd.s32 %v3329_v34, %v3325_v40  ;;  %v3383_v24 = vadd.f32 %v3382_v43, %v6246_v7 }
 0xb2c   :  { %v3331_v54 = vadd.s32 536870912, %v3330_v2 }
 0xb2e   :  { %v3332_v50 = vshrl.u32 %v3331_v54, 30 }
 0xb30   :  { %v3333_v58 = vshll.u32 %v3332_v50, 30  ;;  %v3356_v16 = vsub.s32 4, %v3332_v50 }
 0xb32   :  { %v3334_v35 = vsub.s32 %v3330_v2, %v3333_v58  ;;  %v3357_v4 = vsel %vm3272_vm8, %v3356_v16, %v3332_v50 }
 0xb33   :  { %v3359_v12 = vsel %vm3271_vm9, 0, %v3357_v4 }
 0xb34   :  { %v3336_v59 = vsub.s32 0, %v3334_v35  ;;  %v3363_v63 = vadd.s32 3, %v3359_v12 }
 0xb36   :  { %v4534_v31 = vmin.u32 %v3336_v59, %v3334_v35  ;;  %v3364_v13 = vand.u32 3, %v3363_v63 }
 0xb38   :  { %v3338_v61 = vclz %v4534_v31  ;;  %vm3369_vm10 = vcmp.eq.s32.totalorder %v3364_v13, 2  ;;  %vm3366_vm11 = vcmp.eq.s32.totalorder %v3364_v13, 0  ;;  %vm3365_vm12 = vcmp.lt.s32.totalorder %v3364_v13, 2 }
 0xb3a   :  { %v4535_v29 = vadd.s32 4294967294, %v3338_v61 }
 0xb3c   :  { %vm4536_vm7 = vcmp.lt.s32.totalorder %v4535_v29, 0 }
 0xb3d   :  { %v3341_v26 = vsel %vm4536_vm7, 0, %v4535_v29 }
 0xb3e   :  { %v3342_v47 = vsub.s32 32, %v3341_v26  ;;  %v3346_v55 = vsub.s32 4294967266, %v3341_v26  ;;  %v3343_v15 = vshll.u32 %v3334_v35, %v3341_v26 }
 0xb40   :  { %v3344_v57 = vshrl.u32 %v3326_v6, %v3342_v47  ;;  %v3347_v45 = vadd.s32 127, %v3346_v55 }
 0xb42   :  { %v3345_v51 = vor.u32 %v3344_v57, %v3343_v15  ;;  %v3348_v11 = vshll.u32 %v3347_v45, 23 }
 0xb44   :  { %v3349_v44 = vor.u32 4788187, %v3348_v11  ;;  %v3352_v19 = vcvt.s32.f32 %v3345_v51 }
 0xb46   :  { %v3350_v49 = vand.u32 2147483647, %v3349_v44 }
 0xb48   :  { %v3353_v20 = vmul.f32 %v3352_v19, %v3350_v49 }
 0xb4a   :  { %v3354_v18 = vxor.u32 2147483648, %v3353_v20 }
 0xb4c   :  { %v3355_v23 = vsel %vm3272_vm8, %v3354_v18, %v3353_v20 }
 0xb4d   :  { %v3358_v1 = vsel %vm3271_vm9, %v6344_v41, %v3355_v23 }
 0xb4e   :  { %4970 = vcosq.f32 %v3358_v1 }
 0xb4f   :  { %4972 = vsinq.f32 %v3358_v1 }
 0xb50   :  { %4974 = vpow2.f32 %v3376_v60 }
 0xb5b   :  { %v4971_v3 = vpop.eup %4970 }
 0xb5c   :  { %v4973_v28 = vpop.eup %4972  ;;  %v3370_v32 = vxor.u32 2147483648, %v4971_v3 }
 0xb5d   :  { %v3367_v42 = vxor.u32 2147483648, %v4973_v28  ;;  %v4975_v9 = vpop.eup %4974 }
 0xb5e   :  { %v3371_v52 = vsel %vm3369_vm10, %v3370_v32, %v4973_v28  ;;  %v3378_v5 = vadd.f32 1.0, %v4975_v9 }
 0xb5f   :  { %v3368_v8 = vsel %vm3366_vm11, %v4971_v3, %v3367_v42 }
 0xb60   :  { %v3372_v10 = vsel %vm3365_vm12, %v3368_v8, %v3371_v52 }
 0xb61   :  { %v3373_v53 = vsel %vm3362_vm13, nan, %v3372_v10 }
 0xb62   :  { %v3374_v46 = vmul.f32 %v3373_v53, %v3373_v53 }
 0xb64   :  { %v3379_v48 = vmul.f32 %v3378_v5, %v3374_v46 }
 0xb66   :  { %v3380_v22 = vsub.f32 %v3379_v48, %v6340_v56 }
 0xb68   :  { %v3384_v40 = vadd.f32 %v3383_v24, %v3380_v22 }
 0xb6a   :  { %v3385_v34 = vmul.f32 0.013888889, %v3384_v40 }
 0xb6c   :  { %v6382_v2 = vadd.f32 %v3385_v34, %v6208_v38 }
 0xb6e   :  { %v6386_v62 = vadd.f32 %v5177_v14, %v6382_v2 }
 0xb70   :  { %v3391_v21 = vand.u32 2139095040, %v6386_v62  ;;  %v3388_v58 = vand.u32 2147483647, %v6386_v62  ;;  %vm3390_vm5 = vcmp.lt.s32.totalorder %v6386_v62, 0  ;;  %vm3480_vm10 = vweird.f32 %v6386_v62 }
 0xb72   :  { %v3392_v41 = vshrl.u32 %v3391_v21, 23  ;;  %v3395_v7 = vand.u32 8388607, %v3388_v58  ;;  %vm3389_vm6 = vcmp.le.f32.partialorder %v3388_v58, 0.7853982 }
 0xb74   :  { %v4537_v54 = vadd.s32 4294967169, %v3392_v41  ;;  %v3396_v51 = vor.u32 8388608, %v3395_v7 }
 0xb76   :  { %v3398_v50 = vadd.s32 1, %v4537_v54  ;;  %v3436_v63 = vshll.u32 %v3396_v51, 8 }
 0xb78   :  { %vm3399_vm14 = vcmp.gt.s32.totalorder %v3398_v50, 0 }
 0xb79   :  { %v3400_v56 = vsel %vm3399_vm14, %v3398_v50, 0 }
 0xb7a   :  { %v3402_v35 = vand.u32 31, %v3400_v56  ;;  %v3401_v38 = vshrl.u32 %v3400_v56, 5 }
 0xb7c   :  { %v3403_v59 = vsub.s32 32, %v3402_v35  ;;  %v3405_v31 = vshll.u32 %v5117_v25, %v3402_v35  ;;  %v3408_v61 = vshll.u32 %v5118_v27, %v3402_v35  ;;  %v3411_v6 = vshll.u32 %v5119_v30, %v3402_v35 }
 0xb7d   :  { %v3414_v55 = vshll.u32 %v5120_v33, %v3402_v35  ;;  %v3417_v57 = vshll.u32 %v5121_v36, %v3402_v35  ;;  %vm3420_vm15 = vcmp.lt.s32.totalorder %v3401_v38, 1  ;;  %vm3423_vm0 = vcmp.lt.s32.totalorder %v3401_v38, 4 }
 0xb7e   :  { %v3406_v29 = vshrl.u32 %v5118_v27, %v3403_v59  ;;  %v3409_v26 = vshrl.u32 %v5119_v30, %v3403_v59  ;;  %v3412_v47 = vshrl.u32 %v5120_v33, %v3403_v59  ;;  %v3415_v15 = vshrl.u32 %v5121_v36, %v3403_v59 }
 0xb7f   :  { %v3418_v45 = vshrl.u32 %v5122_v39, %v3403_v59  ;;  %v3404_v23 = vshrl.u32 %v5117_v25, %v3403_v59  ;;  %vm3422_vm1 = vcmp.lt.s32.totalorder %v3401_v38, 3  ;;  %vm3421_vm2 = vcmp.lt.s32.totalorder %v3401_v38, 2 }
 0xb80   :  { %v3407_v11 = vor.u32 %v3406_v29, %v3405_v31  ;;  %v3410_v44 = vor.u32 %v3409_v26, %v3408_v61  ;;  %v3413_v49 = vor.u32 %v3412_v47, %v3411_v6  ;;  %v3416_v19 = vor.u32 %v3415_v15, %v3414_v55 }
 0xb81   :  { %v3419_v20 = vor.u32 %v3418_v45, %v3417_v57  ;;  %v3493_v15 = vsub.f32 0.0, %v6382_v2 }
 0xb82   :  { %v3425_v18 = vsel %vm3423_vm0, %v3413_v49, 2102212464  ;;  %v3428_v17 = vsel %vm3420_vm15, %v3407_v11, %v3410_v44  ;;  %v3432_v16 = vsel %vm3420_vm15, %v3410_v44, %v3413_v49  ;;  %v3429_v1 = vsel %vm3423_vm0, %v3416_v19, 920167782 }
 0xb83   :  { %v3433_v60 = vsel %vm3423_vm0, %v3419_v20, 1326507024  ;;  %v3430_v4 = vsel %vm3422_vm1, %v3413_v49, %v3429_v1  ;;  %v3424_v13 = vsel %vm3420_vm15, %v3404_v23, %v3407_v11  ;;  %v3426_v3 = vsel %vm3422_vm1, %v3410_v44, %v3425_v18 }
 0xb84   :  { %v3434_v12 = vsel %vm3422_vm1, %v3416_v19, %v3433_v60  ;;  %v3431_v28 = vsel %vm3421_vm2, %v3428_v17, %v3430_v4  ;;  %v3427_v8 = vsel %vm3421_vm2, %v3424_v13, %v3426_v3  ;;  %v3494_v11 = vmul.f32 1.442695, %v3493_v15 }
 0xb85   :  { %v3435_v32 = vsel %vm3421_vm2, %v3432_v16, %v3434_v12  ;;  %v6406_v37 = vmul.u32.u64.low %v3436_v63, %v3431_v28  ;;  %v6407_v9 = vmul.u32.u64.high %v3436_v63, %v3431_v28, %v6406_v37  ;;  %v3443_v53 = vmul.u32 %v3436_v63, %v3427_v8 }
 0xb86   :  { %v6403_v42 = vmul.u32.u64.low %v3436_v63, %v3435_v32  ;;  %v6404_v52 = vmul.u32.u64.high %v3436_v63, %v3435_v32, %v6403_v42 }
 0xb87   :  { %v3446_v10 = vadd.s32 1, %v6407_v9 }
 0xb88   :  { %vm3445_vm3 = vc.u32 %v6404_v52, %v6406_v37  ;;  %v3444_v50 = vadd.s32 %v6406_v37, %v6404_v52 }
 0xb89   :  { %v3447_v46 = vsel %vm3445_vm3, %v3446_v10, %v6407_v9 }
 0xb8a   :  { %v3448_v5 = vadd.s32 %v3447_v46, %v3443_v53 }
 0xb8c   :  { %v3449_v43 = vadd.s32 536870912, %v3448_v5 }
 0xb8e   :  { %v3450_v48 = vshrl.u32 %v3449_v43, 30 }
 0xb90   :  { %v3451_v22 = vshll.u32 %v3450_v48, 30  ;;  %v3474_v57 = vsub.s32 4, %v3450_v48 }
 0xb92   :  { %v3452_v24 = vsub.s32 %v3448_v5, %v3451_v22  ;;  %v3475_v44 = vsel %vm3390_vm5, %v3474_v57, %v3450_v48 }
 0xb93   :  { %v3477_v49 = vsel %vm3389_vm6, 0, %v3475_v44 }
 0xb94   :  { %v3454_v40 = vsub.s32 0, %v3452_v24  ;;  %v3481_v19 = vadd.s32 3, %v3477_v49 }
 0xb96   :  { %v4538_v34 = vmin.u32 %v3454_v40, %v3452_v24  ;;  %v3482_v20 = vand.u32 3, %v3481_v19 }
 0xb98   :  { %v3456_v21 = vclz %v4538_v34  ;;  %vm3487_vm7 = vcmp.eq.s32.totalorder %v3482_v20, 2  ;;  %vm3484_vm8 = vcmp.eq.s32.totalorder %v3482_v20, 0  ;;  %vm3483_vm9 = vcmp.lt.s32.totalorder %v3482_v20, 2 }
 0xb9a   :  { %v4539_v41 = vadd.s32 4294967294, %v3456_v21 }
 0xb9c   :  { %vm4540_vm4 = vcmp.lt.s32.totalorder %v4539_v41, 0 }
 0xb9d   :  { %v3459_v54 = vsel %vm4540_vm4, 0, %v4539_v41 }
 0xb9e   :  { %v3460_v56 = vsub.s32 32, %v3459_v54  ;;  %v3464_v35 = vsub.s32 4294967266, %v3459_v54  ;;  %v3461_v7 = vshll.u32 %v3452_v24, %v3459_v54 }
 0xba0   :  { %v3462_v59 = vshrl.u32 %v3444_v50, %v3460_v56  ;;  %v3465_v38 = vadd.s32 127, %v3464_v35 }
 0xba2   :  { %v3463_v31 = vor.u32 %v3462_v59, %v3461_v7  ;;  %v3466_v61 = vshll.u32 %v3465_v38, 23 }
 0xba4   :  { %v3467_v29 = vor.u32 4788187, %v3466_v61  ;;  %v3470_v6 = vcvt.s32.f32 %v3463_v31 }
 0xba6   :  { %v3468_v26 = vand.u32 2147483647, %v3467_v29 }
 0xba8   :  { %v3471_v47 = vmul.f32 %v3470_v6, %v3468_v26 }
 0xbaa   :  { %v3472_v55 = vxor.u32 2147483648, %v3471_v47 }
 0xbac   :  { %v3473_v45 = vsel %vm3390_vm5, %v3472_v55, %v3471_v47 }
 0xbad   :  { %v3476_v51 = vsel %vm3389_vm6, %v6386_v62, %v3473_v45 }
 0xbae   :  { %4976 = vcosq.f32 %v3476_v51 }
 0xbaf   :  { %4978 = vsinq.f32 %v3476_v51 }
 0xbb0   :  { %4980 = vpow2.f32 %v3494_v11 }
 0xbbb   :  { %v4977_v18 = vpop.eup %4976 }
 0xbbc   :  { %v4979_v17 = vpop.eup %4978  ;;  %v3488_v16 = vxor.u32 2147483648, %v4977_v18 }
 0xbbd   :  { %v3485_v23 = vxor.u32 2147483648, %v4979_v17  ;;  %v4981_v60 = vpop.eup %4980 }
 0xbbe   :  { %v3489_v1 = vsel %vm3487_vm7, %v3488_v16, %v4979_v17  ;;  %v3496_v13 = vadd.f32 1.0, %v4981_v60 }
 0xbbf   :  { %v3486_v58 = vsel %vm3484_vm8, %v4977_v18, %v3485_v23 }
 0xbc0   :  { %v3490_v4 = vsel %vm3483_vm9, %v3486_v58, %v3489_v1 }
 0xbc1   :  { %v3491_v12 = vsel %vm3480_vm10, nan, %v3490_v4 }
 0xbc2   :  { %v3492_v63 = vmul.f32 %v3491_v12, %v3491_v12 }
 0xbc4   :  { %v3497_v3 = vmul.f32 %v3496_v13, %v3492_v63 }
 0xbc6   :  { %v6420_v28 = vsub.f32 %v3497_v3, %v6382_v2 }
 0xbc8   :  { %v6423_v32 = vmul.f32 0.037037037, %v6420_v28 }
 0xbca   :  { %v6427_v42 = vadd.f32 %v6423_v32, %v6382_v2 }
 0xbcc   :  { %v6431_v52 = vadd.f32 %v5177_v14, %v6427_v42 }
 0xbce   :  { %v3505_v62 = vand.u32 2139095040, %v6431_v52  ;;  %v3502_v10 = vand.u32 2147483647, %v6431_v52  ;;  %vm3504_vm2 = vcmp.lt.s32.totalorder %v6431_v52, 0  ;;  %vm3594_vm7 = vweird.f32 %v6431_v52 }
 0xbd0   :  { %v3506_v37 = vshrl.u32 %v3505_v62, 23  ;;  %v3509_v5 = vand.u32 8388607, %v3502_v10  ;;  %vm3503_vm3 = vcmp.le.f32.partialorder %v3502_v10, 0.7853982 }
 0xbd2   :  { %v4541_v9 = vadd.s32 4294967169, %v3506_v37  ;;  %v3510_v7 = vor.u32 8388608, %v3509_v5 }
 0xbd4   :  { %v3512_v8 = vadd.s32 1, %v4541_v9  ;;  %v3550_v11 = vshll.u32 %v3510_v7, 8  ;;  %v3607_v7 = vsub.f32 0.0, %v6427_v42 }
 0xbd6   :  { %vm3513_vm11 = vcmp.gt.s32.totalorder %v3512_v8, 0 }
 0xbd7   :  { %v3514_v53 = vsel %vm3513_vm11, %v3512_v8, 0 }
 0xbd8   :  { %v3516_v46 = vand.u32 31, %v3514_v53  ;;  %v3515_v48 = vshrl.u32 %v3514_v53, 5 }
 0xbda   :  { %v3517_v43 = vsub.s32 32, %v3516_v46  ;;  %v3519_v22 = vshll.u32 %v5117_v25, %v3516_v46  ;;  %v3522_v24 = vshll.u32 %v5118_v27, %v3516_v46  ;;  %v3525_v21 = vshll.u32 %v5119_v30, %v3516_v46 }
 0xbdb   :  { %v3528_v54 = vshll.u32 %v5120_v33, %v3516_v46  ;;  %v3531_v56 = vshll.u32 %v5121_v36, %v3516_v46  ;;  %vm3534_vm12 = vcmp.lt.s32.totalorder %v3515_v48, 1  ;;  %vm3537_vm13 = vcmp.lt.s32.totalorder %v3515_v48, 4 }
 0xbdc   :  { %v3520_v40 = vshrl.u32 %v5118_v27, %v3517_v43  ;;  %v3523_v34 = vshrl.u32 %v5119_v30, %v3517_v43  ;;  %v3526_v41 = vshrl.u32 %v5120_v33, %v3517_v43  ;;  %v3529_v50 = vshrl.u32 %v5121_v36, %v3517_v43 }
 0xbdd   :  { %v3532_v35 = vshrl.u32 %v5122_v39, %v3517_v43  ;;  %v3518_v55 = vshrl.u32 %v5117_v25, %v3517_v43  ;;  %vm3536_vm14 = vcmp.lt.s32.totalorder %v3515_v48, 3  ;;  %vm3535_vm15 = vcmp.lt.s32.totalorder %v3515_v48, 2 }
 0xbde   :  { %v3521_v59 = vor.u32 %v3520_v40, %v3519_v22  ;;  %v3524_v38 = vor.u32 %v3523_v34, %v3522_v24  ;;  %v3527_v31 = vor.u32 %v3526_v41, %v3525_v21  ;;  %v3530_v61 = vor.u32 %v3529_v50, %v3528_v54 }
 0xbdf   :  { %v3533_v29 = vor.u32 %v3532_v35, %v3531_v56 }
 0xbe0   :  { %v3539_v26 = vsel %vm3537_vm13, %v3527_v31, 2102212464  ;;  %v3542_v6 = vsel %vm3534_vm12, %v3521_v59, %v3524_v38  ;;  %v3546_v47 = vsel %vm3534_vm12, %v3524_v38, %v3527_v31  ;;  %v3543_v15 = vsel %vm3537_vm13, %v3530_v61, 920167782 }
 0xbe1   :  { %v3547_v57 = vsel %vm3537_vm13, %v3533_v29, 1326507024  ;;  %v3544_v45 = vsel %vm3536_vm14, %v3527_v31, %v3543_v15  ;;  %v3538_v44 = vsel %vm3534_vm12, %v3518_v55, %v3521_v59  ;;  %v3540_v49 = vsel %vm3536_vm14, %v3524_v38, %v3539_v26 }
 0xbe2   :  { %v3548_v51 = vsel %vm3536_vm14, %v3530_v61, %v3547_v57  ;;  %v3545_v19 = vsel %vm3535_vm15, %v3542_v6, %v3544_v45  ;;  %v3541_v1 = vsel %vm3535_vm15, %v3538_v44, %v3540_v49  ;;  %v3608_v61 = vmul.f32 1.442695, %v3607_v7 }
 0xbe3   :  { %v3549_v20 = vsel %vm3535_vm15, %v3546_v47, %v3548_v51  ;;  %v6451_v16 = vmul.u32.u64.low %v3550_v11, %v3545_v19  ;;  %v6452_v23 = vmul.u32.u64.high %v3550_v11, %v3545_v19, %v6451_v16  ;;  %v3557_v58 = vmul.u32 %v3550_v11, %v3541_v1 }
 0xbe4   :  { %v6448_v18 = vmul.u32.u64.low %v3550_v11, %v3549_v20  ;;  %v6449_v17 = vmul.u32.u64.high %v3550_v11, %v3549_v20, %v6448_v18 }
 0xbe5   :  { %v3560_v60 = vadd.s32 1, %v6452_v23 }
 0xbe6   :  { %vm3559_vm0 = vc.u32 %v6449_v17, %v6451_v16  ;;  %v3558_v5 = vadd.s32 %v6451_v16, %v6449_v17 }
 0xbe7   :  { %v3561_v4 = vsel %vm3559_vm0, %v3560_v60, %v6452_v23 }
 0xbe8   :  { %v3562_v12 = vadd.s32 %v3561_v4, %v3557_v58 }
 0xbea   :  { %v3563_v63 = vadd.s32 536870912, %v3562_v12 }
 0xbec   :  { %v3564_v13 = vshrl.u32 %v3563_v63, 30 }
 0xbee   :  { %v3565_v3 = vshll.u32 %v3564_v13, 30  ;;  %v3588_v59 = vsub.s32 4, %v3564_v13 }
 0xbf0   :  { %v3566_v62 = vsub.s32 %v3562_v12, %v3565_v3  ;;  %v3589_v29 = vsel %vm3504_vm2, %v3588_v59, %v3564_v13 }
 0xbf1   :  { %v3591_v26 = vsel %vm3503_vm3, 0, %v3589_v29 }
 0xbf2   :  { %v3568_v37 = vsub.s32 0, %v3566_v62  ;;  %v3595_v6 = vadd.s32 3, %v3591_v26 }
 0xbf4   :  { %v4542_v9 = vmin.u32 %v3568_v37, %v3566_v62  ;;  %v3596_v47 = vand.u32 3, %v3595_v6 }
 0xbf6   :  { %v3570_v8 = vclz %v4542_v9  ;;  %vm3601_vm4 = vcmp.eq.s32.totalorder %v3596_v47, 2  ;;  %vm3598_vm5 = vcmp.eq.s32.totalorder %v3596_v47, 0  ;;  %vm3597_vm6 = vcmp.lt.s32.totalorder %v3596_v47, 2 }
 0xbf8   :  { %v4543_v53 = vadd.s32 4294967294, %v3570_v8 }
 0xbfa   :  { %vm4544_vm1 = vcmp.lt.s32.totalorder %v4543_v53, 0 }
 0xbfb   :  { %v3573_v46 = vsel %vm4544_vm1, 0, %v4543_v53 }
 0xbfc   :  { %v3574_v43 = vsub.s32 32, %v3573_v46  ;;  %v3578_v48 = vsub.s32 4294967266, %v3573_v46  ;;  %v3575_v22 = vshll.u32 %v3566_v62, %v3573_v46 }
 0xbfe   :  { %v3576_v24 = vshrl.u32 %v3558_v5, %v3574_v43  ;;  %v3579_v40 = vadd.s32 127, %v3578_v48 }
 0xc00   :  { %v3577_v34 = vor.u32 %v3576_v24, %v3575_v22  ;;  %v3580_v21 = vshll.u32 %v3579_v40, 23 }
 0xc02   :  { %v3581_v41 = vor.u32 4788187, %v3580_v21  ;;  %v3584_v50 = vcvt.s32.f32 %v3577_v34 }
 0xc04   :  { %v3582_v54 = vand.u32 2147483647, %v3581_v41 }
 0xc06   :  { %v3585_v56 = vmul.f32 %v3584_v50, %v3582_v54 }
 0xc08   :  { %v3586_v35 = vxor.u32 2147483648, %v3585_v56 }
 0xc0a   :  { %v3587_v38 = vsel %vm3504_vm2, %v3586_v35, %v3585_v56 }
 0xc0b   :  { %v3590_v31 = vsel %vm3503_vm3, %v6431_v52, %v3587_v38 }
 0xc0c   :  { %4982 = vcosq.f32 %v3590_v31 }
 0xc0d   :  { %4984 = vsinq.f32 %v3590_v31 }
 0xc0e   :  { %4986 = vpow2.f32 %v3608_v61 }
 0xc19   :  { %v4983_v55 = vpop.eup %4982 }
 0xc1a   :  { %v4985_v15 = vpop.eup %4984  ;;  %v3602_v57 = vxor.u32 2147483648, %v4983_v55 }
 0xc1b   :  { %v3599_v45 = vxor.u32 2147483648, %v4985_v15  ;;  %v4987_v11 = vpop.eup %4986 }
 0xc1c   :  { %v3603_v51 = vsel %vm3601_vm4, %v3602_v57, %v4985_v15  ;;  %v3610_v20 = vadd.f32 1.0, %v4987_v11 }
 0xc1d   :  { %v3600_v10 = vsel %vm3598_vm5, %v4983_v55, %v3599_v45 }
 0xc1e   :  { %v3604_v44 = vsel %vm3597_vm6, %v3600_v10, %v3603_v51 }
 0xc1f   :  { %v3605_v49 = vsel %vm3594_vm7, nan, %v3604_v44 }
 0xc20   :  { %v3606_v19 = vmul.f32 %v3605_v49, %v3605_v49 }
 0xc22   :  { %v3611_v18 = vmul.f32 %v3610_v20, %v3606_v19 }
 0xc24   :  { %v6465_v17 = vsub.f32 %v3611_v18, %v6427_v42 }
 0xc26   :  { %v3613_v16 = vmul.f32 0.11111111, %v6465_v17 }
 0xc28   :  { %v3614_v23 = vadd.f32 %v3613_v16, %v6382_v2 }
 0xc2a   :  { %v6470_v1 = vsub.f32 %v3614_v23, %v6423_v32 }
 0xc2c   :  { %v6474_v60 = vadd.f32 %v5177_v14, %v6470_v1 }
 0xc2e   :  { %v3620_v52 = vand.u32 2139095040, %v6474_v60  ;;  %v3617_v63 = vand.u32 2147483647, %v6474_v60  ;;  %vm3619_vm15 = vcmp.lt.s32.totalorder %v6474_v60, 0  ;;  %vm3709_vm4 = vweird.f32 %v6474_v60 }
 0xc30   :  { %v3621_v58 = vshrl.u32 %v3620_v52, 23  ;;  %v3624_v3 = vand.u32 8388607, %v3617_v63  ;;  %vm3618_vm0 = vcmp.le.f32.partialorder %v3617_v63, 0.7853982 }
 0xc32   :  { %v4545_v4 = vadd.s32 4294967169, %v3621_v58  ;;  %v3625_v40 = vor.u32 8388608, %v3624_v3 }
 0xc34   :  { %v3627_v12 = vadd.s32 1, %v4545_v4  ;;  %v3665_v26 = vshll.u32 %v3625_v40, 8  ;;  %v3722_v40 = vsub.f32 0.0, %v6470_v1 }
 0xc36   :  { %vm3628_vm8 = vcmp.gt.s32.totalorder %v3627_v12, 0 }
 0xc37   :  { %v3629_v42 = vsel %vm3628_vm8, %v3627_v12, 0 }
 0xc38   :  { %v3631_v13 = vand.u32 31, %v3629_v42  ;;  %v3630_v32 = vshrl.u32 %v3629_v42, 5 }
 0xc3a   :  { %v3632_v62 = vsub.s32 32, %v3631_v13  ;;  %v3634_v37 = vshll.u32 %v5117_v25, %v3631_v13  ;;  %v3637_v9 = vshll.u32 %v5118_v27, %v3631_v13  ;;  %v3640_v46 = vshll.u32 %v5119_v30, %v3631_v13 }
 0xc3b   :  { %v3643_v43 = vshll.u32 %v5120_v33, %v3631_v13  ;;  %v3646_v22 = vshll.u32 %v5121_v36, %v3631_v13  ;;  %vm3649_vm9 = vcmp.lt.s32.totalorder %v3630_v32, 1  ;;  %vm3652_vm10 = vcmp.lt.s32.totalorder %v3630_v32, 4 }
 0xc3c   :  { %v3635_v8 = vshrl.u32 %v5118_v27, %v3632_v62  ;;  %v3638_v53 = vshrl.u32 %v5119_v30, %v3632_v62  ;;  %v3641_v5 = vshrl.u32 %v5120_v33, %v3632_v62  ;;  %v3644_v48 = vshrl.u32 %v5121_v36, %v3632_v62 }
 0xc3d   :  { %v3647_v24 = vshrl.u32 %v5122_v39, %v3632_v62  ;;  %v3633_v59 = vshrl.u32 %v5117_v25, %v3632_v62  ;;  %vm3651_vm11 = vcmp.lt.s32.totalorder %v3630_v32, 3  ;;  %vm3650_vm12 = vcmp.lt.s32.totalorder %v3630_v32, 2 }
 0xc3e   :  { %v3636_v34 = vor.u32 %v3635_v8, %v3634_v37  ;;  %v3639_v21 = vor.u32 %v3638_v53, %v3637_v9  ;;  %v3642_v41 = vor.u32 %v3641_v5, %v3640_v46  ;;  %v3645_v54 = vor.u32 %v3644_v48, %v3643_v43 }
 0xc3f   :  { %v3648_v50 = vor.u32 %v3647_v24, %v3646_v22 }
 0xc40   :  { %v3654_v56 = vsel %vm3652_vm10, %v3642_v41, 2102212464  ;;  %v3657_v35 = vsel %vm3649_vm9, %v3636_v34, %v3639_v21  ;;  %v3661_v7 = vsel %vm3649_vm9, %v3639_v21, %v3642_v41  ;;  %v3658_v38 = vsel %vm3652_vm10, %v3645_v54, 920167782 }
 0xc41   :  { %v3662_v31 = vsel %vm3652_vm10, %v3648_v50, 1326507024  ;;  %v3659_v61 = vsel %vm3651_vm11, %v3642_v41, %v3658_v38  ;;  %v3653_v6 = vsel %vm3649_vm9, %v3633_v59, %v3636_v34  ;;  %v3655_v47 = vsel %vm3651_vm11, %v3639_v21, %v3654_v56 }
 0xc42   :  { %v3663_v29 = vsel %vm3651_vm11, %v3645_v54, %v3662_v31  ;;  %v3660_v55 = vsel %vm3650_vm12, %v3657_v35, %v3659_v61  ;;  %v3656_v10 = vsel %vm3650_vm12, %v3653_v6, %v3655_v47  ;;  %v3723_v54 = vmul.f32 1.442695, %v3722_v40 }
 0xc43   :  { %v3664_v15 = vsel %vm3650_vm12, %v3661_v7, %v3663_v29  ;;  %v6494_v51 = vmul.u32.u64.low %v3665_v26, %v3660_v55  ;;  %v6495_v11 = vmul.u32.u64.high %v3665_v26, %v3660_v55, %v6494_v51  ;;  %v3672_v49 = vmul.u32 %v3665_v26, %v3656_v10 }
 0xc44   :  { %v6491_v57 = vmul.u32.u64.low %v3665_v26, %v3664_v15  ;;  %v6492_v45 = vmul.u32.u64.high %v3665_v26, %v3664_v15, %v6491_v57 }
 0xc45   :  { %v3675_v44 = vadd.s32 1, %v6495_v11 }
 0xc46   :  { %vm3674_vm13 = vc.u32 %v6492_v45, %v6494_v51  ;;  %v3673_v3 = vadd.s32 %v6494_v51, %v6492_v45  ;;  %v3728_v51 = vsub.f32 %v6420_v28, %v6465_v17 }
 0xc47   :  { %v3676_v19 = vsel %vm3674_vm13, %v3675_v44, %v6495_v11 }
 0xc48   :  { %v3677_v20 = vadd.s32 %v3676_v19, %v3672_v49 }
 0xc4a   :  { %v3678_v18 = vadd.s32 536870912, %v3677_v20 }
 0xc4c   :  { %v3679_v16 = vshrl.u32 %v3678_v18, 30 }
 0xc4e   :  { %v3680_v23 = vshll.u32 %v3679_v16, 30  ;;  %v3703_v34 = vsub.s32 4, %v3679_v16 }
 0xc50   :  { %v3681_v52 = vsub.s32 %v3677_v20, %v3680_v23  ;;  %v3704_v50 = vsel %vm3619_vm15, %v3703_v34, %v3679_v16 }
 0xc51   :  { %v3706_v56 = vsel %vm3618_vm0, 0, %v3704_v50 }
 0xc52   :  { %v3683_v58 = vsub.s32 0, %v3681_v52  ;;  %v3710_v35 = vadd.s32 3, %v3706_v56 }
 0xc54   :  { %v4546_v4 = vmin.u32 %v3683_v58, %v3681_v52  ;;  %v3711_v7 = vand.u32 3, %v3710_v35 }
 0xc56   :  { %v3685_v12 = vclz %v4546_v4  ;;  %vm3716_vm1 = vcmp.eq.s32.totalorder %v3711_v7, 2  ;;  %vm3713_vm2 = vcmp.eq.s32.totalorder %v3711_v7, 0  ;;  %vm3712_vm3 = vcmp.lt.s32.totalorder %v3711_v7, 2 }
 0xc58   :  { %v4547_v42 = vadd.s32 4294967294, %v3685_v12 }
 0xc5a   :  { %vm4548_vm14 = vcmp.lt.s32.totalorder %v4547_v42, 0 }
 0xc5b   :  { %v3688_v13 = vsel %vm4548_vm14, 0, %v4547_v42 }
 0xc5c   :  { %v3689_v62 = vsub.s32 32, %v3688_v13  ;;  %v3693_v32 = vsub.s32 4294967266, %v3688_v13  ;;  %v3690_v37 = vshll.u32 %v3681_v52, %v3688_v13 }
 0xc5e   :  { %v3691_v9 = vshrl.u32 %v3673_v3, %v3689_v62  ;;  %v3694_v8 = vadd.s32 127, %v3693_v32 }
 0xc60   :  { %v3692_v53 = vor.u32 %v3691_v9, %v3690_v37  ;;  %v3695_v46 = vshll.u32 %v3694_v8, 23 }
 0xc62   :  { %v3696_v5 = vor.u32 4788187, %v3695_v46  ;;  %v3699_v48 = vcvt.s32.f32 %v3692_v53 }
 0xc64   :  { %v3697_v43 = vand.u32 2147483647, %v3696_v5 }
 0xc66   :  { %v3700_v22 = vmul.f32 %v3699_v48, %v3697_v43 }
 0xc68   :  { %v3701_v24 = vxor.u32 2147483648, %v3700_v22 }
 0xc6a   :  { %v3702_v21 = vsel %vm3619_vm15, %v3701_v24, %v3700_v22 }
 0xc6b   :  { %v3705_v41 = vsel %vm3618_vm0, %v6474_v60, %v3702_v21 }
 0xc6c   :  { %4988 = vcosq.f32 %v3705_v41 }
 0xc6d   :  { %4990 = vsinq.f32 %v3705_v41 }
 0xc6e   :  { %4992 = vpow2.f32 %v3723_v54 }
 0xc79   :  { %v4989_v59 = vpop.eup %4988 }
 0xc7a   :  { %v4991_v38 = vpop.eup %4990  ;;  %v3717_v31 = vxor.u32 2147483648, %v4989_v59 }
 0xc7b   :  { %v3714_v61 = vxor.u32 2147483648, %v4991_v38  ;;  %v4993_v26 = vpop.eup %4992 }
 0xc7c   :  { %v3718_v29 = vsel %vm3716_vm1, %v3717_v31, %v4991_v38  ;;  %v3725_v15 = vadd.f32 1.0, %v4993_v26 }
 0xc7d   :  { %v3715_v63 = vsel %vm3713_vm2, %v4989_v59, %v3714_v61 }
 0xc7e   :  { %v3719_v6 = vsel %vm3712_vm3, %v3715_v63, %v3718_v29 }
 0xc7f   :  { %v3720_v47 = vsel %vm3709_vm4, nan, %v3719_v6 }
 0xc80   :  { %v3721_v55 = vmul.f32 %v3720_v47, %v3720_v47 }
 0xc82   :  { %v3726_v57 = vmul.f32 %v3725_v15, %v3721_v55 }
 0xc84   :  { %v6508_v45 = vsub.f32 %v3726_v57, %v6470_v1 }
 0xc86   :  { %v3729_v11 = vadd.f32 %v3728_v51, %v6508_v45 }
 0xc88   :  { %v3730_v10 = vmul.f32 0.11111111, %v3729_v11 }
 0xc8a   :  { %v6514_v44 = vadd.f32 %v3730_v10, %v6382_v2 }
 0xc8c   :  { %v6518_v60 = vadd.f32 %v5177_v14, %v6514_v44 }
 0xc8e   :  { %v3736_v49 = vand.u32 2139095040, %v6518_v60  ;;  %v3733_v1 = vand.u32 2147483647, %v6518_v60  ;;  %vm3735_vm12 = vcmp.lt.s32.totalorder %v6518_v60, 0  ;;  %vm3825_vm1 = vweird.f32 %v6518_v60 }
 0xc90   :  { %v3737_v19 = vshrl.u32 %v3736_v49, 23  ;;  %v3740_v52 = vand.u32 8388607, %v3733_v1  ;;  %vm3734_vm13 = vcmp.le.f32.partialorder %v3733_v1, 0.7853982  ;;  %v3844_v1 = vadd.f32 %v6508_v45, %v6465_v17 }
 0xc92   :  { %v4549_v20 = vadd.s32 4294967169, %v3737_v19  ;;  %v3741_v46 = vor.u32 8388608, %v3740_v52 }
 0xc94   :  { %v3743_v18 = vadd.s32 1, %v4549_v20  ;;  %v3781_v7 = vshll.u32 %v3741_v46, 8 }
 0xc96   :  { %vm3744_vm5 = vcmp.gt.s32.totalorder %v3743_v18, 0 }
 0xc97   :  { %v3745_v16 = vsel %vm3744_vm5, %v3743_v18, 0 }
 0xc98   :  { %v3747_v23 = vand.u32 31, %v3745_v16  ;;  %v3746_v4 = vshrl.u32 %v3745_v16, 5 }
 0xc9a   :  { %v3748_v58 = vsub.s32 32, %v3747_v23  ;;  %v3750_v12 = vshll.u32 %v5117_v25, %v3747_v23  ;;  %v3753_v42 = vshll.u32 %v5118_v27, %v3747_v23  ;;  %v3756_v62 = vshll.u32 %v5119_v30, %v3747_v23 }
 0xc9b   :  { %v3759_v37 = vshll.u32 %v5120_v33, %v3747_v23  ;;  %v3762_v8 = vshll.u32 %v5121_v36, %v3747_v23  ;;  %vm3765_vm6 = vcmp.lt.s32.totalorder %v3746_v4, 1  ;;  %vm3768_vm7 = vcmp.lt.s32.totalorder %v3746_v4, 4 }
 0xc9c   :  { %v3751_v13 = vshrl.u32 %v5118_v27, %v3748_v58  ;;  %v3754_v3 = vshrl.u32 %v5119_v30, %v3748_v58  ;;  %v3757_v32 = vshrl.u32 %v5120_v33, %v3748_v58  ;;  %v3760_v9 = vshrl.u32 %v5121_v36, %v3748_v58 }
 0xc9d   :  { %v3763_v53 = vshrl.u32 %v5122_v39, %v3748_v58  ;;  %v3749_v41 = vshrl.u32 %v5117_v25, %v3748_v58  ;;  %vm3767_vm8 = vcmp.lt.s32.totalorder %v3746_v4, 3  ;;  %vm3766_vm9 = vcmp.lt.s32.totalorder %v3746_v4, 2 }
 0xc9e   :  { %v3752_v5 = vor.u32 %v3751_v13, %v3750_v12  ;;  %v3755_v43 = vor.u32 %v3754_v3, %v3753_v42  ;;  %v3758_v48 = vor.u32 %v3757_v32, %v3756_v62  ;;  %v3761_v22 = vor.u32 %v3760_v9, %v3759_v37 }
 0xc9f   :  { %v3764_v24 = vor.u32 %v3763_v53, %v3762_v8 }
 0xca0   :  { %v3770_v40 = vsel %vm3768_vm7, %v3758_v48, 2102212464  ;;  %v3773_v34 = vsel %vm3765_vm6, %v3752_v5, %v3755_v43  ;;  %v3777_v21 = vsel %vm3765_vm6, %v3755_v43, %v3758_v48  ;;  %v3774_v54 = vsel %vm3768_vm7, %v3761_v22, 920167782 }
 0xca1   :  { %v3778_v50 = vsel %vm3768_vm7, %v3764_v24, 1326507024  ;;  %v3775_v56 = vsel %vm3767_vm8, %v3758_v48, %v3774_v54  ;;  %v3769_v59 = vsel %vm3765_vm6, %v3749_v41, %v3752_v5  ;;  %v3771_v38 = vsel %vm3767_vm8, %v3755_v43, %v3770_v40 }
 0xca2   :  { %v3779_v35 = vsel %vm3767_vm8, %v3761_v22, %v3778_v50  ;;  %v3776_v31 = vsel %vm3766_vm9, %v3773_v34, %v3775_v56  ;;  %v3772_v47 = vsel %vm3766_vm9, %v3769_v59, %v3771_v38  ;;  %v3838_v5 = vsub.f32 0.0, %v6514_v44 }
 0xca3   :  { %v3780_v61 = vsel %vm3766_vm9, %v3777_v21, %v3779_v35  ;;  %v6538_v63 = vmul.u32.u64.low %v3781_v7, %v3776_v31  ;;  %v6539_v6 = vmul.u32.u64.high %v3781_v7, %v3776_v31, %v6538_v63  ;;  %v3788_v15 = vmul.u32 %v3781_v7, %v3772_v47 }
 0xca4   :  { %v6535_v29 = vmul.u32.u64.low %v3781_v7, %v3780_v61  ;;  %v6536_v26 = vmul.u32.u64.high %v3781_v7, %v3780_v61, %v6535_v29  ;;  %v3839_v24 = vmul.f32 1.442695, %v3838_v5 }
 0xca5   :  { %v3791_v55 = vadd.s32 1, %v6539_v6 }
 0xca6   :  { %vm3790_vm10 = vc.u32 %v6536_v26, %v6538_v63  ;;  %v3789_v58 = vadd.s32 %v6538_v63, %v6536_v26  ;;  %v3845_v63 = vmul.f32 3.0, %v3844_v1 }
 0xca7   :  { %v3792_v57 = vsel %vm3790_vm10, %v3791_v55, %v6539_v6 }
 0xca8   :  { %v3793_v51 = vadd.s32 %v3792_v57, %v3788_v15  ;;  %v3846_v55 = vadd.f32 %v3845_v63, %v6420_v28 }
 0xcaa   :  { %v3794_v11 = vadd.s32 536870912, %v3793_v51 }
 0xcac   :  { %v3795_v10 = vshrl.u32 %v3794_v11, 30 }
 0xcae   :  { %v3796_v49 = vshll.u32 %v3795_v10, 30  ;;  %v3819_v43 = vsub.s32 4, %v3795_v10 }
 0xcb0   :  { %v3797_v19 = vsub.s32 %v3793_v51, %v3796_v49  ;;  %v3820_v40 = vsel %vm3735_vm12, %v3819_v43, %v3795_v10 }
 0xcb1   :  { %v3822_v34 = vsel %vm3734_vm13, 0, %v3820_v40 }
 0xcb2   :  { %v3799_v20 = vsub.s32 0, %v3797_v19  ;;  %v3826_v21 = vadd.s32 3, %v3822_v34 }
 0xcb4   :  { %v4550_v18 = vmin.u32 %v3799_v20, %v3797_v19  ;;  %v3827_v41 = vand.u32 3, %v3826_v21 }
 0xcb6   :  { %v3801_v16 = vclz %v4550_v18  ;;  %vm3832_vm14 = vcmp.eq.s32.totalorder %v3827_v41, 2  ;;  %vm3829_vm15 = vcmp.eq.s32.totalorder %v3827_v41, 0  ;;  %vm3828_vm0 = vcmp.lt.s32.totalorder %v3827_v41, 2 }
 0xcb8   :  { %v4551_v23 = vadd.s32 4294967294, %v3801_v16 }
 0xcba   :  { %vm4552_vm11 = vcmp.lt.s32.totalorder %v4551_v23, 0 }
 0xcbb   :  { %v3804_v52 = vsel %vm4552_vm11, 0, %v4551_v23 }
 0xcbc   :  { %v3805_v4 = vsub.s32 32, %v3804_v52  ;;  %v3809_v12 = vsub.s32 4294967266, %v3804_v52  ;;  %v3806_v42 = vshll.u32 %v3797_v19, %v3804_v52 }
 0xcbe   :  { %v3807_v13 = vshrl.u32 %v3789_v58, %v3805_v4  ;;  %v3810_v3 = vadd.s32 127, %v3809_v12 }
 0xcc0   :  { %v3808_v62 = vor.u32 %v3807_v13, %v3806_v42  ;;  %v3811_v32 = vshll.u32 %v3810_v3, 23 }
 0xcc2   :  { %v3812_v37 = vor.u32 4788187, %v3811_v32  ;;  %v3815_v8 = vcvt.s32.f32 %v3808_v62 }
 0xcc4   :  { %v3813_v9 = vand.u32 2147483647, %v3812_v37 }
 0xcc6   :  { %v3816_v53 = vmul.f32 %v3815_v8, %v3813_v9 }
 0xcc8   :  { %v3817_v46 = vxor.u32 2147483648, %v3816_v53 }
 0xcca   :  { %v3818_v48 = vsel %vm3735_vm12, %v3817_v46, %v3816_v53 }
 0xccb   :  { %v3821_v22 = vsel %vm3734_vm13, %v6518_v60, %v3818_v48 }
 0xccc   :  { %4994 = vcosq.f32 %v3821_v22 }
 0xccd   :  { %4996 = vsinq.f32 %v3821_v22 }
 0xcce   :  { %4998 = vpow2.f32 %v3839_v24 }
 0xcd9   :  { %v4995_v54 = vpop.eup %4994 }
 0xcda   :  { %v4997_v50 = vpop.eup %4996  ;;  %v3833_v56 = vxor.u32 2147483648, %v4995_v54 }
 0xcdb   :  { %v3830_v35 = vxor.u32 2147483648, %v4997_v50  ;;  %v4999_v59 = vpop.eup %4998 }
 0xcdc   :  { %v3834_v7 = vsel %vm3832_vm14, %v3833_v56, %v4997_v50  ;;  %v3841_v26 = vadd.f32 1.0, %v4999_v59 }
 0xcdd   :  { %v3831_v38 = vsel %vm3829_vm15, %v4995_v54, %v3830_v35 }
 0xcde   :  { %v3835_v31 = vsel %vm3828_vm0, %v3831_v38, %v3834_v7 }
 0xcdf   :  { %v3836_v61 = vsel %vm3825_vm1, nan, %v3835_v31 }
 0xce0   :  { %v3837_v29 = vmul.f32 %v3836_v61, %v3836_v61 }
 0xce2   :  { %v3842_v6 = vmul.f32 %v3841_v26, %v3837_v29 }
 0xce4   :  { %v3843_v47 = vsub.f32 %v3842_v6, %v6514_v44 }
 0xce6   :  { %v3847_v15 = vadd.f32 %v3846_v55, %v3843_v47 }
 0xce8   :  { %v3848_v57 = vmul.f32 0.013888889, %v3847_v15 }
 0xcea   :  { %v6556_v51 = vadd.f32 %v3848_v57, %v6382_v2 }
 0xcec   :  { %v6560_v17 = vadd.f32 %v5177_v14, %v6556_v51 }
 0xcee   :  { %v3854_v45 = vand.u32 2139095040, %v6560_v17  ;;  %v3851_v49 = vand.u32 2147483647, %v6560_v17  ;;  %vm3853_vm9 = vcmp.lt.s32.totalorder %v6560_v17, 0  ;;  %vm3943_vm14 = vweird.f32 %v6560_v17 }
 0xcf0   :  { %v3855_v60 = vshrl.u32 %v3854_v45, 23  ;;  %v3858_v28 = vand.u32 8388607, %v3851_v49  ;;  %vm3852_vm10 = vcmp.le.f32.partialorder %v3851_v49, 0.7853982 }
 0xcf2   :  { %v4553_v11 = vadd.s32 4294967169, %v3855_v60  ;;  %v3859_v62 = vor.u32 8388608, %v3858_v28 }
 0xcf4   :  { %v3861_v10 = vadd.s32 1, %v4553_v11  ;;  %v3899_v21 = vshll.u32 %v3859_v62, 8 }
 0xcf6   :  { %vm3862_vm2 = vcmp.gt.s32.totalorder %v3861_v10, 0 }
 0xcf7   :  { %v3863_v44 = vsel %vm3862_vm2, %v3861_v10, 0 }
 0xcf8   :  { %v3865_v19 = vand.u32 31, %v3863_v44  ;;  %v3864_v2 = vshrl.u32 %v3863_v44, 5 }
 0xcfa   :  { %v3866_v20 = vsub.s32 32, %v3865_v19  ;;  %v3868_v18 = vshll.u32 %v5117_v25, %v3865_v19  ;;  %v3871_v16 = vshll.u32 %v5118_v27, %v3865_v19  ;;  %v3874_v58 = vshll.u32 %v5119_v30, %v3865_v19 }
 0xcfb   :  { %v3877_v12 = vshll.u32 %v5120_v33, %v3865_v19  ;;  %v3880_v13 = vshll.u32 %v5121_v36, %v3865_v19  ;;  %vm3883_vm3 = vcmp.lt.s32.totalorder %v3864_v2, 1  ;;  %vm3886_vm4 = vcmp.lt.s32.totalorder %v3864_v2, 4 }
 0xcfc   :  { %v3869_v23 = vshrl.u32 %v5118_v27, %v3866_v20  ;;  %v3872_v52 = vshrl.u32 %v5119_v30, %v3866_v20  ;;  %v3875_v4 = vshrl.u32 %v5120_v33, %v3866_v20  ;;  %v3878_v42 = vshrl.u32 %v5121_v36, %v3866_v20 }
 0xcfd   :  { %v3881_v3 = vshrl.u32 %v5122_v39, %v3866_v20  ;;  %v3867_v48 = vshrl.u32 %v5117_v25, %v3866_v20  ;;  %vm3885_vm5 = vcmp.lt.s32.totalorder %v3864_v2, 3  ;;  %vm3884_vm6 = vcmp.lt.s32.totalorder %v3864_v2, 2 }
 0xcfe   :  { %v3870_v32 = vor.u32 %v3869_v23, %v3868_v18  ;;  %v3873_v37 = vor.u32 %v3872_v52, %v3871_v16  ;;  %v3876_v9 = vor.u32 %v3875_v4, %v3874_v58  ;;  %v3879_v8 = vor.u32 %v3878_v42, %v3877_v12 }
 0xcff   :  { %v3882_v53 = vor.u32 %v3881_v3, %v3880_v13  ;;  %v3956_v42 = vsub.f32 0.0, %v6556_v51 }
 0xd00   :  { %v3888_v46 = vsel %vm3886_vm4, %v3876_v9, 2102212464  ;;  %v3891_v5 = vsel %vm3883_vm3, %v3870_v32, %v3873_v37  ;;  %v3895_v43 = vsel %vm3883_vm3, %v3873_v37, %v3876_v9  ;;  %v3892_v22 = vsel %vm3886_vm4, %v3879_v8, 920167782 }
 0xd01   :  { %v3896_v24 = vsel %vm3886_vm4, %v3882_v53, 1326507024  ;;  %v3893_v40 = vsel %vm3885_vm5, %v3876_v9, %v3892_v22  ;;  %v3887_v41 = vsel %vm3883_vm3, %v3867_v48, %v3870_v32  ;;  %v3889_v54 = vsel %vm3885_vm5, %v3873_v37, %v3888_v46 }
 0xd02   :  { %v3897_v34 = vsel %vm3885_vm5, %v3879_v8, %v3896_v24  ;;  %v3894_v50 = vsel %vm3884_vm6, %v3891_v5, %v3893_v40  ;;  %v3890_v38 = vsel %vm3884_vm6, %v3887_v41, %v3889_v54  ;;  %v3957_v32 = vmul.f32 1.442695, %v3956_v42 }
 0xd03   :  { %v3898_v56 = vsel %vm3884_vm6, %v3895_v43, %v3897_v34  ;;  %v6580_v1 = vmul.u32.u64.low %v3899_v21, %v3894_v50  ;;  %v6581_v59 = vmul.u32.u64.high %v3899_v21, %v3894_v50, %v6580_v1  ;;  %v3906_v61 = vmul.u32 %v3899_v21, %v3890_v38 }
 0xd04   :  { %v6577_v35 = vmul.u32.u64.low %v3899_v21, %v3898_v56  ;;  %v6578_v7 = vmul.u32.u64.high %v3899_v21, %v3898_v56, %v6577_v35 }
 0xd05   :  { %v3909_v31 = vadd.s32 1, %v6581_v59 }
 0xd06   :  { %vm3908_vm7 = vc.u32 %v6578_v7, %v6580_v1  ;;  %v3907_v10 = vadd.s32 %v6580_v1, %v6578_v7 }
 0xd07   :  { %v3910_v29 = vsel %vm3908_vm7, %v3909_v31, %v6581_v59 }
 0xd08   :  { %v3911_v26 = vadd.s32 %v3910_v29, %v3906_v61 }
 0xd0a   :  { %v3912_v63 = vadd.s32 536870912, %v3911_v26 }
 0xd0c   :  { %v3913_v6 = vshrl.u32 %v3912_v63, 30 }
 0xd0e   :  { %v3914_v47 = vshll.u32 %v3913_v6, 30  ;;  %v3937_v13 = vsub.s32 4, %v3913_v6 }
 0xd10   :  { %v3915_v55 = vsub.s32 %v3911_v26, %v3914_v47  ;;  %v3938_v37 = vsel %vm3853_vm9, %v3937_v13, %v3913_v6 }
 0xd11   :  { %v3940_v9 = vsel %vm3852_vm10, 0, %v3938_v37 }
 0xd12   :  { %v3917_v15 = vsub.s32 0, %v3915_v55  ;;  %v3944_v8 = vadd.s32 3, %v3940_v9 }
 0xd14   :  { %v4554_v57 = vmin.u32 %v3917_v15, %v3915_v55  ;;  %v3945_v53 = vand.u32 3, %v3944_v8 }
 0xd16   :  { %v3919_v45 = vclz %v4554_v57  ;;  %vm3950_vm11 = vcmp.eq.s32.totalorder %v3945_v53, 2  ;;  %vm3947_vm12 = vcmp.eq.s32.totalorder %v3945_v53, 0  ;;  %vm3946_vm13 = vcmp.lt.s32.totalorder %v3945_v53, 2 }
 0xd18   :  { %v4555_v60 = vadd.s32 4294967294, %v3919_v45 }
 0xd1a   :  { %vm4556_vm8 = vcmp.lt.s32.totalorder %v4555_v60, 0 }
 0xd1b   :  { %v3922_v11 = vsel %vm4556_vm8, 0, %v4555_v60 }
 0xd1c   :  { %v3923_v44 = vsub.s32 32, %v3922_v11  ;;  %v3927_v19 = vsub.s32 4294967266, %v3922_v11  ;;  %v3924_v28 = vshll.u32 %v3915_v55, %v3922_v11 }
 0xd1e   :  { %v3925_v20 = vshrl.u32 %v3907_v10, %v3923_v44  ;;  %v3928_v2 = vadd.s32 127, %v3927_v19 }
 0xd20   :  { %v3926_v18 = vor.u32 %v3925_v20, %v3924_v28  ;;  %v3929_v16 = vshll.u32 %v3928_v2, 23 }
 0xd22   :  { %v3930_v23 = vor.u32 4788187, %v3929_v16  ;;  %v3933_v58 = vcvt.s32.f32 %v3926_v18 }
 0xd24   :  { %v3931_v52 = vand.u32 2147483647, %v3930_v23 }
 0xd26   :  { %v3934_v4 = vmul.f32 %v3933_v58, %v3931_v52 }
 0xd28   :  { %v3935_v12 = vxor.u32 2147483648, %v3934_v4 }
 0xd2a   :  { %v3936_v3 = vsel %vm3853_vm9, %v3935_v12, %v3934_v4 }
 0xd2b   :  { %v3939_v62 = vsel %vm3852_vm10, %v6560_v17, %v3936_v3 }
 0xd2c   :  { %5000 = vcosq.f32 %v3939_v62 }
 0xd2d   :  { %5002 = vsinq.f32 %v3939_v62 }
 0xd2e   :  { %5004 = vpow2.f32 %v3957_v32 }
 0xd39   :  { %v5001_v46 = vpop.eup %5000 }
 0xd3a   :  { %v5003_v5 = vpop.eup %5002  ;;  %v3951_v43 = vxor.u32 2147483648, %v5001_v46 }
 0xd3b   :  { %v3948_v48 = vxor.u32 2147483648, %v5003_v5  ;;  %v5005_v24 = vpop.eup %5004 }
 0xd3c   :  { %v3952_v22 = vsel %vm3950_vm11, %v3951_v43, %v5003_v5  ;;  %v3959_v41 = vadd.f32 1.0, %v5005_v24 }
 0xd3d   :  { %v3949_v49 = vsel %vm3947_vm12, %v5001_v46, %v3948_v48 }
 0xd3e   :  { %v3953_v40 = vsel %vm3946_vm13, %v3949_v49, %v3952_v22 }
 0xd3f   :  { %v3954_v34 = vsel %vm3943_vm14, nan, %v3953_v40 }
 0xd40   :  { %v3955_v21 = vmul.f32 %v3954_v34, %v3954_v34 }
 0xd42   :  { %v3960_v54 = vmul.f32 %v3959_v41, %v3955_v21 }
 0xd44   :  { %v6594_v50 = vsub.f32 %v3960_v54, %v6556_v51 }
 0xd46   :  { %v6597_v56 = vmul.f32 0.037037037, %v6594_v50 }
 0xd48   :  { %v6601_v35 = vadd.f32 %v6597_v56, %v6556_v51 }
 0xd4a   :  { %v6605_v7 = vadd.f32 %v5177_v14, %v6601_v35 }
 0xd4c   :  { %v3968_v17 = vand.u32 2139095040, %v6605_v7  ;;  %v3965_v31 = vand.u32 2147483647, %v6605_v7  ;;  %vm3967_vm6 = vcmp.lt.s32.totalorder %v6605_v7, 0  ;;  %vm4057_vm11 = vweird.f32 %v6605_v7 }
 0xd4e   :  { %v3969_v1 = vshrl.u32 %v3968_v17, 23  ;;  %v3972_v26 = vand.u32 8388607, %v3965_v31  ;;  %vm3966_vm7 = vcmp.le.f32.partialorder %v3965_v31, 0.7853982 }
 0xd50   :  { %v4557_v59 = vadd.s32 4294967169, %v3969_v1  ;;  %v3973_v28 = vor.u32 8388608, %v3972_v26 }
 0xd52   :  { %v3975_v38 = vadd.s32 1, %v4557_v59  ;;  %v4013_v32 = vshll.u32 %v3973_v28, 8  ;;  %v4070_v28 = vsub.f32 0.0, %v6601_v35 }
 0xd54   :  { %vm3976_vm15 = vcmp.gt.s32.totalorder %v3975_v38, 0 }
 0xd55   :  { %v3977_v61 = vsel %vm3976_vm15, %v3975_v38, 0 }
 0xd56   :  { %v3979_v29 = vand.u32 31, %v3977_v61  ;;  %v3978_v6 = vshrl.u32 %v3977_v61, 5 }
 0xd58   :  { %v3980_v63 = vsub.s32 32, %v3979_v29  ;;  %v3982_v47 = vshll.u32 %v5117_v25, %v3979_v29  ;;  %v3985_v55 = vshll.u32 %v5118_v27, %v3979_v29  ;;  %v3988_v45 = vshll.u32 %v5119_v30, %v3979_v29 }
 0xd59   :  { %v3991_v11 = vshll.u32 %v5120_v33, %v3979_v29  ;;  %v3994_v44 = vshll.u32 %v5121_v36, %v3979_v29  ;;  %vm3997_vm0 = vcmp.lt.s32.totalorder %v3978_v6, 1  ;;  %vm4000_vm1 = vcmp.lt.s32.totalorder %v3978_v6, 4 }
 0xd5a   :  { %v3983_v15 = vshrl.u32 %v5118_v27, %v3980_v63  ;;  %v3986_v57 = vshrl.u32 %v5119_v30, %v3980_v63  ;;  %v3989_v60 = vshrl.u32 %v5120_v33, %v3980_v63  ;;  %v3992_v10 = vshrl.u32 %v5121_v36, %v3980_v63 }
 0xd5b   :  { %v3995_v19 = vshrl.u32 %v5122_v39, %v3980_v63  ;;  %v3981_v12 = vshrl.u32 %v5117_v25, %v3980_v63  ;;  %vm3999_vm2 = vcmp.lt.s32.totalorder %v3978_v6, 3  ;;  %vm3998_vm3 = vcmp.lt.s32.totalorder %v3978_v6, 2 }
 0xd5c   :  { %v3984_v20 = vor.u32 %v3983_v15, %v3982_v47  ;;  %v3987_v2 = vor.u32 %v3986_v57, %v3985_v55  ;;  %v3990_v18 = vor.u32 %v3989_v60, %v3988_v45  ;;  %v3993_v16 = vor.u32 %v3992_v10, %v3991_v11 }
 0xd5d   :  { %v3996_v23 = vor.u32 %v3995_v19, %v3994_v44 }
 0xd5e   :  { %v4002_v52 = vsel %vm4000_vm1, %v3990_v18, 2102212464  ;;  %v4005_v58 = vsel %vm3997_vm0, %v3984_v20, %v3987_v2  ;;  %v4009_v4 = vsel %vm3997_vm0, %v3987_v2, %v3990_v18  ;;  %v4006_v42 = vsel %vm4000_vm1, %v3993_v16, 920167782 }
 0xd5f   :  { %v4010_v13 = vsel %vm4000_vm1, %v3996_v23, 1326507024  ;;  %v4007_v3 = vsel %vm3999_vm2, %v3990_v18, %v4006_v42  ;;  %v4001_v37 = vsel %vm3997_vm0, %v3981_v12, %v3984_v20  ;;  %v4003_v9 = vsel %vm3999_vm2, %v3987_v2, %v4002_v52 }
 0xd60   :  { %v4011_v62 = vsel %vm3999_vm2, %v3993_v16, %v4010_v13  ;;  %v4008_v8 = vsel %vm3998_vm3, %v4005_v58, %v4007_v3  ;;  %v4004_v22 = vsel %vm3998_vm3, %v4001_v37, %v4003_v9  ;;  %v4071_v16 = vmul.f32 1.442695, %v4070_v28 }
 0xd61   :  { %v4012_v53 = vsel %vm3998_vm3, %v4009_v4, %v4011_v62  ;;  %v6625_v43 = vmul.u32.u64.low %v4013_v32, %v4008_v8  ;;  %v6626_v48 = vmul.u32.u64.high %v4013_v32, %v4008_v8, %v6625_v43  ;;  %v4020_v49 = vmul.u32 %v4013_v32, %v4004_v22 }
 0xd62   :  { %v6622_v46 = vmul.u32.u64.low %v4013_v32, %v4012_v53  ;;  %v6623_v5 = vmul.u32.u64.high %v4013_v32, %v4012_v53, %v6622_v46 }
 0xd63   :  { %v4023_v24 = vadd.s32 1, %v6626_v48 }
 0xd64   :  { %vm4022_vm4 = vc.u32 %v6623_v5, %v6625_v43  ;;  %v4021_v26 = vadd.s32 %v6625_v43, %v6623_v5 }
 0xd65   :  { %v4024_v40 = vsel %vm4022_vm4, %v4023_v24, %v6626_v48 }
 0xd66   :  { %v4025_v34 = vadd.s32 %v4024_v40, %v4020_v49 }
 0xd68   :  { %v4026_v21 = vadd.s32 536870912, %v4025_v34 }
 0xd6a   :  { %v4027_v41 = vshrl.u32 %v4026_v21, 30 }
 0xd6c   :  { %v4028_v54 = vshll.u32 %v4027_v41, 30  ;;  %v4051_v20 = vsub.s32 4, %v4027_v41 }
 0xd6e   :  { %v4029_v17 = vsub.s32 %v4025_v34, %v4028_v54  ;;  %v4052_v23 = vsel %vm3967_vm6, %v4051_v20, %v4027_v41 }
 0xd6f   :  { %v4054_v52 = vsel %vm3966_vm7, 0, %v4052_v23 }
 0xd70   :  { %v4031_v1 = vsub.s32 0, %v4029_v17  ;;  %v4058_v58 = vadd.s32 3, %v4054_v52 }
 0xd72   :  { %v4558_v59 = vmin.u32 %v4031_v1, %v4029_v17  ;;  %v4059_v4 = vand.u32 3, %v4058_v58 }
 0xd74   :  { %v4033_v38 = vclz %v4558_v59  ;;  %vm4064_vm8 = vcmp.eq.s32.totalorder %v4059_v4, 2  ;;  %vm4061_vm9 = vcmp.eq.s32.totalorder %v4059_v4, 0  ;;  %vm4060_vm10 = vcmp.lt.s32.totalorder %v4059_v4, 2 }
 0xd76   :  { %v4559_v61 = vadd.s32 4294967294, %v4033_v38 }
 0xd78   :  { %vm4560_vm5 = vcmp.lt.s32.totalorder %v4559_v61, 0 }
 0xd79   :  { %v4036_v29 = vsel %vm4560_vm5, 0, %v4559_v61 }
 0xd7a   :  { %v4037_v63 = vsub.s32 32, %v4036_v29  ;;  %v4041_v6 = vsub.s32 4294967266, %v4036_v29  ;;  %v4038_v47 = vshll.u32 %v4029_v17, %v4036_v29 }
 0xd7c   :  { %v4039_v55 = vshrl.u32 %v4021_v26, %v4037_v63  ;;  %v4042_v15 = vadd.s32 127, %v4041_v6 }
 0xd7e   :  { %v4040_v57 = vor.u32 %v4039_v55, %v4038_v47  ;;  %v4043_v45 = vshll.u32 %v4042_v15, 23 }
 0xd80   :  { %v4044_v60 = vor.u32 4788187, %v4043_v45  ;;  %v4047_v10 = vcvt.s32.f32 %v4040_v57 }
 0xd82   :  { %v4045_v11 = vand.u32 2147483647, %v4044_v60 }
 0xd84   :  { %v4048_v44 = vmul.f32 %v4047_v10, %v4045_v11 }
 0xd86   :  { %v4049_v19 = vxor.u32 2147483648, %v4048_v44 }
 0xd88   :  { %v4050_v2 = vsel %vm3967_vm6, %v4049_v19, %v4048_v44 }
 0xd89   :  { %v4053_v18 = vsel %vm3966_vm7, %v6605_v7, %v4050_v2 }
 0xd8a   :  { %5006 = vcosq.f32 %v4053_v18 }
 0xd8b   :  { %5008 = vsinq.f32 %v4053_v18 }
 0xd8c   :  { %5010 = vpow2.f32 %v4071_v16 }
 0xd97   :  { %v5007_v12 = vpop.eup %5006 }
 0xd98   :  { %v5009_v42 = vpop.eup %5008  ;;  %v4065_v13 = vxor.u32 2147483648, %v5007_v12 }
 0xd99   :  { %v4062_v3 = vxor.u32 2147483648, %v5009_v42  ;;  %v5011_v32 = vpop.eup %5010 }
 0xd9a   :  { %v4066_v62 = vsel %vm4064_vm8, %v4065_v13, %v5009_v42  ;;  %v4073_v53 = vadd.f32 1.0, %v5011_v32 }
 0xd9b   :  { %v4063_v31 = vsel %vm4061_vm9, %v5007_v12, %v4062_v3 }
 0xd9c   :  { %v4067_v37 = vsel %vm4060_vm10, %v4063_v31, %v4066_v62 }
 0xd9d   :  { %v4068_v9 = vsel %vm4057_vm11, nan, %v4067_v37 }
 0xd9e   :  { %v4069_v8 = vmul.f32 %v4068_v9, %v4068_v9 }
 0xda0   :  { %v4074_v46 = vmul.f32 %v4073_v53, %v4069_v8 }
 0xda2   :  { %v6639_v5 = vsub.f32 %v4074_v46, %v6601_v35 }
 0xda4   :  { %v4076_v43 = vmul.f32 0.11111111, %v6639_v5 }
 0xda6   :  { %v4077_v48 = vadd.f32 %v4076_v43, %v6556_v51 }
 0xda8   :  { %v6644_v22 = vsub.f32 %v4077_v48, %v6597_v56 }
 0xdaa   :  { %v6648_v24 = vadd.f32 %v5177_v14, %v6644_v22 }
 0xdac   :  { %v4083_v7 = vand.u32 2139095040, %v6648_v24  ;;  %v4080_v21 = vand.u32 2147483647, %v6648_v24  ;;  %vm4082_vm3 = vcmp.lt.s32.totalorder %v6648_v24, 0  ;;  %vm4172_vm8 = vweird.f32 %v6648_v24 }
 0xdae   :  { %v4084_v49 = vshrl.u32 %v4083_v7, 23  ;;  %v4087_v54 = vand.u32 8388607, %v4080_v21  ;;  %vm6695_vm4 = vcmp.le.f32.partialorder %v4080_v21, 0.7853982  ;;  %v4313_v21 = vld [vmem:[#allocation7] sm:$0xff] }
 0xdb0   :  { %v4561_v40 = vadd.s32 4294967169, %v4084_v49  ;;  %v4088_v15 = vor.u32 8388608, %v4087_v54  ;;  %v4328_v49 = vld [vmem:[#allocation7 + $0x78] sm:$0xff] }
 0xdb1   :  { %4616 = vmatpush3.msra.mxu1 %v4328_v49 }
 0xdb2   :  { %v4090_v34 = vadd.s32 1, %v4561_v40  ;;  %v4128_v52 = vshll.u32 %v4088_v15, 8  ;;  %4617 = vmatprep.subr.mxu1 %v5115_v0  ;;  %v4321_v15 = vld [vmem:[#allocation7 + $0x40] sm:$0xff] }
 0xdb4   :  { %vm4091_vm12 = vcmp.gt.s32.totalorder %v4090_v34, 0 }
 0xdb5   :  { %v4092_v35 = vsel %vm4091_vm12, %v4090_v34, 0  ;;  %v4327_v34 = vld [vmem:[#allocation7 + $0x70] sm:$0xff] }
 0xdb6   :  { %v4094_v41 = vand.u32 31, %v4092_v35  ;;  %v4093_v56 = vshrl.u32 %v4092_v35, 5  ;;  %4618 = vmatpush3.msra.mxu1 %v4327_v34 }
 0xdb7   :  { %4619 = vmatprep.subr.mxu1 %v5115_v0 }
 0xdb8   :  { %v4095_v17 = vsub.s32 32, %v4094_v41  ;;  %v4097_v1 = vshll.u32 %v5117_v25, %v4094_v41  ;;  %v4100_v59 = vshll.u32 %v5118_v27, %v4094_v41  ;;  %v4103_v29 = vshll.u32 %v5119_v30, %v4094_v41 }
 0xdb9   :  { %v4106_v63 = vshll.u32 %v5120_v33, %v4094_v41  ;;  %v4109_v47 = vshll.u32 %v5121_v36, %v4094_v41  ;;  %vm4112_vm13 = vcmp.lt.s32.totalorder %v4093_v56, 1  ;;  %vm4115_vm14 = vcmp.lt.s32.totalorder %v4093_v56, 4  ;;  %v4326_v41 = vld [vmem:[#allocation7 + $0x68] sm:$0xff] }
 0xdba   :  { %v4098_v38 = vshrl.u32 %v5118_v27, %v4095_v17  ;;  %v4101_v61 = vshrl.u32 %v5119_v30, %v4095_v17  ;;  %v4104_v26 = vshrl.u32 %v5120_v33, %v4095_v17  ;;  %v4107_v6 = vshrl.u32 %v5121_v36, %v4095_v17  ;;  %4620 = vmatpush3.msra.mxu1 %v4326_v41 }
 0xdbb   :  { %v4110_v55 = vshrl.u32 %v5122_v39, %v4095_v17  ;;  %v4096_v20 = vshrl.u32 %v5117_v25, %v4095_v17  ;;  %vm4114_vm15 = vcmp.lt.s32.totalorder %v4093_v56, 3  ;;  %vm4113_vm0 = vcmp.lt.s32.totalorder %v4093_v56, 2  ;;  %v4325_v17 = vld [vmem:[#allocation7 + $0x60] sm:$0xff]  ;;  %4621 = vmatprep.subr.mxu1 %v5115_v0 }
 0xdbc   :  { %v4099_v57 = vor.u32 %v4098_v38, %v4097_v1  ;;  %v4102_v45 = vor.u32 %v4101_v61, %v4100_v59  ;;  %v4105_v60 = vor.u32 %v4104_v26, %v4103_v29  ;;  %v4108_v11 = vor.u32 %v4107_v6, %v4106_v63  ;;  %4622 = vmatpush3.msra.mxu1 %v4325_v17  ;;  %v4324_v1 = vld [vmem:[#allocation7 + $0x58] sm:$0xff]  ;;  %v4323_v59 = vld [vmem:[#allocation7 + $0x50] sm:$0xff]  ;;  %v4322_v63 = vld [vmem:[#allocation7 + $0x48] sm:$0xff] }
 0xdbd   :  { %v4111_v10 = vor.u32 %v4110_v55, %v4109_v47  ;;  %4623 = vmatprep.subr.mxu1 %v5115_v0 }
 0xdbe   :  { %v4117_v44 = vsel %vm4115_vm14, %v4105_v60, 2102212464  ;;  %v4120_v19 = vsel %vm4112_vm13, %v4099_v57, %v4102_v45  ;;  %v4124_v28 = vsel %vm4112_vm13, %v4102_v45, %v4105_v60  ;;  %v4121_v2 = vsel %vm4115_vm14, %v4108_v11, 920167782  ;;  %4624 = vmatpush3.msra.mxu1 %v4324_v1 }
 0xdbf   :  { %v4125_v18 = vsel %vm4115_vm14, %v4111_v10, 1326507024  ;;  %v4122_v16 = vsel %vm4114_vm15, %v4105_v60, %v4121_v2  ;;  %v4116_v58 = vsel %vm4112_vm13, %v4096_v20, %v4099_v57  ;;  %v4118_v4 = vsel %vm4114_vm15, %v4102_v45, %v4117_v44  ;;  %4625 = vmatprep.subr.mxu1 %v5115_v0  ;;  %v4320_v60 = vld [vmem:[#allocation7 + $0x38] sm:$0xff]  ;;  %v4319_v10 = vld [vmem:[#allocation7 + $0x30] sm:$0xff]  ;;  %v4317_v2 = vld [vmem:[#allocation7 + $0x20] sm:$0xff] }
 0xdc0   :  { %v4126_v23 = vsel %vm4114_vm15, %v4108_v11, %v4125_v18  ;;  %v4123_v12 = vsel %vm4113_vm0, %v4120_v19, %v4122_v16  ;;  %v4119_v31 = vsel %vm4113_vm0, %v4116_v58, %v4118_v4  ;;  %4626 = vmatpush3.msra.mxu1 %v4323_v59  ;;  %v4185_v16 = vsub.f32 0.0, %v6644_v22 }
 0xdc1   :  { %v4127_v42 = vsel %vm4113_vm0, %v4124_v28, %v4126_v23  ;;  %v6668_v62 = vmul.u32.u64.low %v4128_v52, %v4123_v12  ;;  %v6669_v32 = vmul.u32.u64.high %v4128_v52, %v4123_v12, %v6668_v62  ;;  %v4135_v9 = vmul.u32 %v4128_v52, %v4119_v31  ;;  %4627 = vmatprep.subr.mxu1 %v5115_v0  ;;  %v4318_v28 = vld [vmem:[#allocation7 + $0x28] sm:$0xff]  ;;  %v4316_v23 = vld [vmem:[#allocation7 + $0x18] sm:$0xff]  ;;  %v4315_v12 = vld [vmem:[#allocation7 + $0x10] sm:$0xff] }
 0xdc2   :  { %v6665_v13 = vmul.u32.u64.low %v4128_v52, %v4127_v42  ;;  %v6666_v3 = vmul.u32.u64.high %v4128_v52, %v4127_v42, %v6665_v13  ;;  %4628 = vmatpush3.msra.mxu1 %v4322_v63 }
 0xdc3   :  { %v4138_v37 = vadd.s32 1, %v6669_v32  ;;  %4629 = vmatprep.subr.mxu1 %v5115_v0  ;;  %v4186_v13 = vmul.f32 1.442695, %v4185_v16 }
 0xdc4   :  { %vm4137_vm1 = vc.u32 %v6666_v3, %v6668_v62  ;;  %v4136_v61 = vadd.s32 %v6668_v62, %v6666_v3  ;;  %4630 = vmatpush3.msra.mxu1 %v4321_v15  ;;  %v4314_v3 = vld [vmem:[#allocation7 + $0x8] sm:$0xff] }
 0xdc5   :  { %v4139_v8 = vsel %vm4137_vm1, %v4138_v37, %v6669_v32  ;;  %4631 = vmatprep.subr.mxu1 %v5115_v0 }
 0xdc6   :  { %v4140_v53 = vadd.s32 %v4139_v8, %v4135_v9  ;;  %4632 = vmatpush3.msra.mxu1 %v4320_v60 }
 0xdc7   :  { %4633 = vmatprep.subr.mxu1 %v5115_v0 }
 0xdc8   :  { %v4141_v46 = vadd.s32 536870912, %v4140_v53  ;;  %4634 = vmatpush3.msra.mxu1 %v4319_v10 }
 0xdc9   :  { %4635 = vmatprep.subr.mxu1 %v5115_v0 }
 0xdca   :  { %v6674_v43 = vshrl.u32 %v4141_v46, 30  ;;  %4636 = vmatpush3.msra.mxu1 %v4318_v28 }
 0xdcb   :  { %4637 = vmatprep.subr.mxu1 %v5115_v0 }
 0xdcc   :  { %v4143_v48 = vshll.u32 %v6674_v43, 30  ;;  %4638 = vmatpush3.msra.mxu1 %v4317_v2  ;;  %v4166_v52 = vsub.s32 4, %v6674_v43 }
 0xdcd   :  { %4639 = vmatprep.subr.mxu1 %v5115_v0 }
 0xdce   :  { %v4144_v7 = vsub.s32 %v4140_v53, %v4143_v48  ;;  %4640 = vmatpush3.msra.mxu1 %v4316_v23  ;;  %v4167_v62 = vsel %vm4082_vm3, %v4166_v52, %v6674_v43 }
 0xdcf   :  { %4641 = vmatprep.subr.mxu1 %v5115_v0  ;;  %v4169_v32 = vsel %vm6695_vm4, 0, %v4167_v62 }
 0xdd0   :  { %v4146_v40 = vsub.s32 0, %v4144_v7  ;;  %4642 = vmatpush3.msra.mxu1 %v4315_v12  ;;  %v4173_v31 = vadd.s32 3, %v4169_v32 }
 0xdd1   :  { %4643 = vmatprep.subr.mxu1 %v5115_v0 }
 0xdd2   :  { %v4562_v35 = vmin.u32 %v4146_v40, %v4144_v7  ;;  %4644 = vmatpush3.msra.mxu1 %v4314_v3  ;;  %v4174_v37 = vand.u32 3, %v4173_v31 }
 0xdd3   :  { %4645 = vmatprep.subr.mxu1 %v5115_v0 }
 0xdd4   :  { %v4148_v54 = vclz %v4562_v35  ;;  %4646 = vmatpush3.msra.mxu1 %v4313_v21  ;;  %vm4179_vm5 = vcmp.eq.s32.totalorder %v4174_v37, 2  ;;  %vm4176_vm6 = vcmp.eq.s32.totalorder %v4174_v37, 0  ;;  %vm4175_vm7 = vcmp.lt.s32.totalorder %v4174_v37, 2 }
 0xdd6   :  { %v4563_v56 = vadd.s32 4294967294, %v4148_v54  ;;  %v4191_v54 = vsub.f32 %v6594_v50, %v6639_v5 }
 0xdd8   :  { %vm4564_vm2 = vcmp.lt.s32.totalorder %v4563_v56, 0 }
 0xdd9   :  { %v4151_v38 = vsel %vm4564_vm2, 0, %v4563_v56 }
 0xdda   :  { %v4152_v29 = vsub.s32 32, %v4151_v38  ;;  %v4156_v26 = vsub.s32 4294967266, %v4151_v38  ;;  %v4153_v6 = vshll.u32 %v4144_v7, %v4151_v38 }
 0xddc   :  { %v4154_v47 = vshrl.u32 %v4136_v61, %v4152_v29  ;;  %v4157_v55 = vadd.s32 127, %v4156_v26 }
 0xdde   :  { %v4155_v57 = vor.u32 %v4154_v47, %v4153_v6  ;;  %v4158_v45 = vshll.u32 %v4157_v55, 23 }
 0xde0   :  { %v4159_v11 = vor.u32 4788187, %v4158_v45  ;;  %v4162_v19 = vcvt.s32.f32 %v4155_v57 }
 0xde2   :  { %v4160_v44 = vand.u32 2147483647, %v4159_v11 }
 0xde4   :  { %v4163_v20 = vmul.f32 %v4162_v19, %v4160_v44 }
 0xde6   :  { %v4164_v18 = vxor.u32 2147483648, %v4163_v20 }
 0xde8   :  { %v4165_v4 = vsel %vm4082_vm3, %v4164_v18, %v4163_v20 }
 0xde9   :  { %v4168_v42 = vsel %vm6695_vm4, %v6648_v24, %v4165_v4 }
 0xdea   :  { %5012 = vcosq.f32 %v4168_v42 }
 0xdeb   :  { %5014 = vsinq.f32 %v4168_v42 }
 0xdec   :  { %5016 = vpow2.f32 %v4186_v13 }
 0xdf7   :  { %v5013_v9 = vpop.eup %5012 }
 0xdf8   :  { %v5015_v8 = vpop.eup %5014  ;;  %v4180_v53 = vxor.u32 2147483648, %v5013_v9 }
 0xdf9   :  { %v4177_v46 = vxor.u32 2147483648, %v5015_v8  ;;  %v5017_v43 = vpop.eup %5016 }
 0xdfa   :  { %v4181_v48 = vsel %vm4179_vm5, %v4180_v53, %v5015_v8  ;;  %v4188_v34 = vadd.f32 1.0, %v5017_v43 }
 0xdfb   :  { %v4178_v7 = vsel %vm4176_vm6, %v5013_v9, %v4177_v46 }
 0xdfc   :  { %v4182_v0 = vsel %vm4175_vm7, %v4178_v7, %v4181_v48 }
 0xdfd   :  { %v4183_v49 = vsel %vm4172_vm8, nan, %v4182_v0 }
 0xdfe   :  { %v4184_v40 = vmul.f32 %v4183_v49, %v4183_v49 }
 0xe00   :  { %v4189_v35 = vmul.f32 %v4188_v34, %v4184_v40 }
 0xe02   :  { %v6710_v41 = vsub.f32 %v4189_v35, %v6644_v22 }
 0xe04   :  { %v4192_v17 = vadd.f32 %v4191_v54, %v6710_v41 }
 0xe06   :  { %v4193_v56 = vmul.f32 0.11111111, %v4192_v17 }
 0xe08   :  { %v6716_v1 = vadd.f32 %v4193_v56, %v6556_v51 }
 0xe0a   :  { %v6720_v24 = vadd.f32 %v5177_v14, %v6716_v1 }
 0xe0c   :  { %v4199_v59 = vand.u32 2139095040, %v6720_v24  ;;  %v4196_v22 = vand.u32 2147483647, %v6720_v24  ;;  %vm4198_vm0 = vcmp.lt.s32.totalorder %v6720_v24, 0  ;;  %vm4288_vm5 = vweird.f32 %v6720_v24 }
 0xe0e   :  { %v4200_v38 = vshrl.u32 %v4199_v59, 23  ;;  %v4203_v6 = vand.u32 8388607, %v4196_v22  ;;  %vm4197_vm1 = vcmp.le.f32.partialorder %v4196_v22, 0.7853982  ;;  %v4307_v22 = vadd.f32 %v6710_v41, %v6639_v5 }
 0xe0f   :  { %v4569_v5 = vld [vmem:[%s6768_s4] ss:$0 sm:$0xff] }
 0xe10   :  { %v4565_v61 = vadd.s32 4294967169, %v4200_v38  ;;  %v4204_v20 = vor.u32 8388608, %v4203_v6 }
 0xe12   :  { %v4206_v29 = vadd.s32 1, %v4565_v61 }
 0xe14   :  { %vm4207_vm9 = vcmp.gt.s32.totalorder %v4206_v29, 0 }
 0xe15   :  { %v4208_v26 = vsel %vm4207_vm9, %v4206_v29, 0 }
 0xe16   :  { %v4210_v63 = vand.u32 31, %v4208_v26  ;;  %v4209_v55 = vshrl.u32 %v4208_v26, 5 }
 0xe18   :  { %v4211_v47 = vsub.s32 32, %v4210_v63  ;;  %v4213_v15 = vshll.u32 %v5117_v25, %v4210_v63  ;;  %v4216_v14 = vshll.u32 %v5118_v27, %v4210_v63  ;;  %v4219_v60 = vshll.u32 %v5119_v30, %v4210_v63 }
 0xe19   :  { %v4222_v10 = vshll.u32 %v5120_v33, %v4210_v63  ;;  %v4225_v19 = vshll.u32 %v5121_v36, %v4210_v63  ;;  %vm4228_vm10 = vcmp.lt.s32.totalorder %v4209_v55, 1  ;;  %vm4231_vm11 = vcmp.lt.s32.totalorder %v4209_v55, 4 }
 0xe1a   :  { %v4214_v57 = vshrl.u32 %v5118_v27, %v4211_v47  ;;  %v4217_v45 = vshrl.u32 %v5119_v30, %v4211_v47  ;;  %v4220_v11 = vshrl.u32 %v5120_v33, %v4211_v47  ;;  %v4223_v44 = vshrl.u32 %v5121_v36, %v4211_v47 }
 0xe1b   :  { %v4226_v28 = vshrl.u32 %v5122_v39, %v4211_v47  ;;  %v4212_v4 = vshrl.u32 %v5117_v25, %v4211_v47  ;;  %vm4230_vm12 = vcmp.lt.s32.totalorder %v4209_v55, 3  ;;  %vm4229_vm13 = vcmp.lt.s32.totalorder %v4209_v55, 2 }
 0xe1c   :  { %v4215_v2 = vor.u32 %v4214_v57, %v4213_v15  ;;  %v4218_v18 = vor.u32 %v4217_v45, %v4216_v14  ;;  %v4221_v16 = vor.u32 %v4220_v11, %v4219_v60  ;;  %v4224_v23 = vor.u32 %v4223_v44, %v4222_v10 }
 0xe1d   :  { %v4227_v27 = vor.u32 %v4226_v28, %v4225_v19  ;;  %v4244_v39 = vshll.u32 %v4204_v20, 8  ;;  %v4301_v45 = vsub.f32 0.0, %v6716_v1 }
 0xe1e   :  { %v4233_v52 = vsel %vm4231_vm11, %v4221_v16, 2102212464  ;;  %v4236_v30 = vsel %vm4228_vm10, %v4215_v2, %v4218_v18  ;;  %v4240_v58 = vsel %vm4228_vm10, %v4218_v18, %v4221_v16  ;;  %v4237_v33 = vsel %vm4231_vm11, %v4224_v23, 920167782 }
 0xe1f   :  { %v4241_v12 = vsel %vm4231_vm11, %v4227_v27, 1326507024  ;;  %v4238_v36 = vsel %vm4230_vm12, %v4221_v16, %v4237_v33  ;;  %v4232_v13 = vsel %vm4228_vm10, %v4212_v4, %v4215_v2  ;;  %v4234_v3 = vsel %vm4230_vm12, %v4218_v18, %v4233_v52 }
 0xe20   :  { %v4242_v42 = vsel %vm4230_vm12, %v4224_v23, %v4241_v12  ;;  %v4239_v62 = vsel %vm4229_vm13, %v4236_v30, %v4238_v36  ;;  %v4235_v8 = vsel %vm4229_vm13, %v4232_v13, %v4234_v3  ;;  %v4302_v44 = vmul.f32 1.442695, %v4301_v45 }
 0xe21   :  { %v4243_v21 = vsel %vm4229_vm13, %v4240_v58, %v4242_v42  ;;  %v6740_v37 = vmul.u32.u64.low %v4244_v39, %v4239_v62  ;;  %v6741_v9 = vmul.u32.u64.high %v4244_v39, %v4239_v62, %v6740_v37  ;;  %v4251_v53 = vmul.u32 %v4244_v39, %v4235_v8 }
 0xe22   :  { %v6737_v32 = vmul.u32.u64.low %v4244_v39, %v4243_v21  ;;  %v6738_v31 = vmul.u32.u64.high %v4244_v39, %v4243_v21, %v6737_v32  ;;  %v4308_v42 = vmul.f32 3.0, %v4307_v22 }
 0xe23   :  { %v4254_v25 = vadd.s32 1, %v6741_v9 }
 0xe24   :  { %vm4253_vm14 = vc.u32 %v6738_v31, %v6740_v37  ;;  %v4252_v56 = vadd.s32 %v6740_v37, %v6738_v31  ;;  %v4309_v3 = vadd.f32 %v4308_v42, %v6594_v50 }
 0xe25   :  { %v4255_v46 = vsel %vm4253_vm14, %v4254_v25, %v6741_v9 }
 0xe26   :  { %v4256_v48 = vadd.s32 %v4255_v46, %v4251_v53 }
 0xe28   :  { %v4257_v43 = vadd.s32 536870912, %v4256_v48 }
 0xe2a   :  { %v4258_v7 = vshrl.u32 %v4257_v43, 30 }
 0xe2c   :  { %v4259_v0 = vshll.u32 %v4258_v7, 30  ;;  %v4282_v60 = vsub.s32 4, %v4258_v7 }
 0xe2e   :  { %v4260_v49 = vsub.s32 %v4256_v48, %v4259_v0  ;;  %v4283_v19 = vsel %vm4198_vm0, %v4282_v60, %v4258_v7 }
 0xe2f   :  { %v4285_v28 = vsel %vm4197_vm1, 0, %v4283_v19 }
 0xe30   :  { %v4262_v40 = vsub.s32 0, %v4260_v49  ;;  %v4289_v20 = vadd.s32 3, %v4285_v28 }
 0xe32   :  { %v4566_v34 = vmin.u32 %v4262_v40, %v4260_v49  ;;  %v4290_v2 = vand.u32 3, %v4289_v20 }
 0xe34   :  { %v4264_v35 = vclz %v4566_v34  ;;  %vm4295_vm2 = vcmp.eq.s32.totalorder %v4290_v2, 2  ;;  %vm4292_vm3 = vcmp.eq.s32.totalorder %v4290_v2, 0  ;;  %vm4291_vm4 = vcmp.lt.s32.totalorder %v4290_v2, 2 }
 0xe36   :  { %v4567_v54 = vadd.s32 4294967294, %v4264_v35 }
 0xe38   :  { %vm4568_vm15 = vcmp.lt.s32.totalorder %v4567_v54, 0 }
 0xe39   :  { %v4267_v17 = vsel %vm4568_vm15, 0, %v4567_v54 }
 0xe3a   :  { %v4268_v59 = vsub.s32 32, %v4267_v17  ;;  %v4272_v38 = vsub.s32 4294967266, %v4267_v17  ;;  %v4269_v61 = vshll.u32 %v4260_v49, %v4267_v17 }
 0xe3c   :  { %v4270_v29 = vshrl.u32 %v4252_v56, %v4268_v59  ;;  %v4273_v26 = vadd.s32 127, %v4272_v38 }
 0xe3e   :  { %v4271_v63 = vor.u32 %v4270_v29, %v4269_v61  ;;  %v4274_v6 = vshll.u32 %v4273_v26, 23 }
 0xe40   :  { %v4275_v47 = vor.u32 4788187, %v4274_v6  ;;  %v4278_v15 = vcvt.s32.f32 %v4271_v63 }
 0xe42   :  { %v4276_v55 = vand.u32 2147483647, %v4275_v47 }
 0xe44   :  { %v4279_v14 = vmul.f32 %v4278_v15, %v4276_v55 }
 0xe46   :  { %v4280_v57 = vxor.u32 2147483648, %v4279_v14 }
 0xe48   :  { %v4281_v11 = vsel %vm4198_vm0, %v4280_v57, %v4279_v14 }
 0xe49   :  { %v4284_v10 = vsel %vm4197_vm1, %v6720_v24, %v4281_v11 }
 0xe4a   :  { %5018 = vcosq.f32 %v4284_v10 }
 0xe4b   :  { %5020 = vsinq.f32 %v4284_v10 }
 0xe4c   :  { %5022 = vpow2.f32 %v4302_v44 }
 0xe57   :  { %v5019_v18 = vpop.eup %5018 }
 0xe58   :  { %v5021_v16 = vpop.eup %5020  ;;  %v4296_v23 = vxor.u32 2147483648, %v5019_v18 }
 0xe59   :  { %v4293_v27 = vxor.u32 2147483648, %v5021_v16  ;;  %v5023_v30 = vpop.eup %5022 }
 0xe5a   :  { %v4297_v52 = vsel %vm4295_vm2, %v4296_v23, %v5021_v16  ;;  %v4304_v36 = vadd.f32 1.0, %v5023_v30 }
 0xe5b   :  { %v4294_v58 = vsel %vm4292_vm3, %v5019_v18, %v4293_v27 }
 0xe5c   :  { %v4298_v4 = vsel %vm4291_vm4, %v4294_v58, %v4297_v52 }
 0xe5d   :  { %v4299_v33 = vsel %vm4288_vm5, nan, %v4298_v4 }
 0xe5e   :  { %v4300_v12 = vmul.f32 %v4299_v33, %v4299_v33 }
 0xe60   :  { %v4305_v39 = vmul.f32 %v4304_v36, %v4300_v12 }
 0xe62   :  { %v4306_v13 = vsub.f32 %v4305_v39, %v6716_v1 }
 0xe64   :  { %v4310_v62 = vadd.f32 %v4309_v3, %v4306_v13 }
 0xe66   :  { %v4311_v21 = vmul.f32 0.013888889, %v4310_v62 }
 0xe68   :  { %v4312_v32 = vadd.f32 %v4311_v21, %v6556_v51 }
 0xe6a   :  { %4648 = vmatmul.mubr.f32.vlgmr.msra.gmra.mxu1 %v4312_v32 }
 0xf2a   :  { %v4402_v41 = vpop.f32.mrf.mxu1 }
 0xf2b   :  { %v4403_v24 = vadd.f32 %v4569_v5, %v4402_v41 }
 0xf2c   :  { %v4649_v31 = vpop.f32.mrf.mxu1 }
 0xf2d   :  { %4406 = vst [vmem:[#allocation8] sm:$0xff] %v4403_v24 }
 0xf2e   :  { %5095 = shalt.err (!%p5092_p5)
}
 0xf2f   :  { %4416 = dma.vmem_to_hbm [thread:$0]  %s4414_s11, 128, %s6769_s5, [#allocation4]  }
 0xf30   :  { %5108 = dma.done.wait [#allocation4], 128  }
 0xf31   :  { %5109 = vsyncadd [#allocation4], 4294967168 }
 0xf32   :  { %4420 = vsyncpa [#allocation3], 1 }
 0xf33   :  { %4421 = vsyncpa [#allocation6], 1 }
 0xf34   :  { %4422 = vsyncpa [#allocation4], 1 }

</bundles_post_ra>
